<compile_context>
chip_gen: v6e
topology: v6e:2x2x1
jax: 0.10.0
libtpu: 0.0.40
codegen_flags: <defaults>
</compile_context>

<pallas_src>
import math
import functools

import jax
import jax.numpy as jnp
from jax.experimental import pallas as pl
from jax.experimental.pallas import tpu as pltpu

_CD = jnp.bfloat16          # MXU compute dtype (accumulation stays f32)
_APPROX_SOFTMAX_RECIP = True


def _torch_layer_norm(v, g, b, eps):
    """torch-style LayerNorm on rows of v (f32): unbiased std, eps added to std.
    Uses a per-row reciprocal with gamma folded in (no full [M, D] divide)."""
    d = v.shape[-1]
    mean = jnp.mean(v, axis=-1, keepdims=True)
    vc = v - mean
    var = jnp.sum(vc * vc, axis=-1, keepdims=True) * jnp.float32(1.0 / (d - 1))
    inv = 1.0 / (jnp.sqrt(var) + jnp.float32(eps))      # [M, 1] only
    return (g * inv) * vc + b


# ----------------------------- Pallas kernels ------------------------------

def _decoder_layer_kernel(
    x_ref, mem_ref, tmask_ref, smask_ref,
    ln0_g, ln0_b,
    sa_wq, sa_bq, sa_wk, sa_bk, sa_wv, sa_bv, sa_wo, sa_bo,
    ln1_g, ln1_b,
    ca_wq, ca_bq, ca_wk, ca_bk, ca_wv, ca_bv, ca_wo, ca_bo,
    ln2_g, ln2_b,
    w1_ref, b1_ref, w2_ref, b2_ref,
    fn_g, fn_b,
    o_ref,
    ctx_ref,
    *, n_heads, eps, tb, apply_final_norm,
):
    """One full decoder layer for a tile of `tb` batch elements (grid over B//tb)."""
    TB = tb
    _, L, D = x_ref.shape
    S = mem_ref.shape[1]
    dk = D // n_heads
    inv_sqrt_dk = jnp.float32(1.0 / math.sqrt(dk))

    def dense(v16, w_ref, b_ref):
        # bf16 MXU matmul (weights already bf16), f32 accumulation, f32 bias fused.
        return jnp.dot(v16, w_ref[...], preferred_element_type=jnp.float32) + b_ref[...]

    def mha(q16, kv16, bias, wq, bq, wk, bk, wv, bv, wo, bo):
        # q16: [TB*Lq, D] bf16 ; kv16: [TB*Sk, D] bf16
        # bias: [TBm, Lm, Sk] f32 additive mask (0 / -1e9), TBm in {1, TB}, Lm in {1, Lq}
        Lq = q16.shape[0] // TB
        Sk = kv16.shape[0] // TB
        # Projections over the whole batch tile (M = TB*Lq rows); cast to bf16 ONCE.
        q16h = (dense(q16, wq, bq) * inv_sqrt_dk).astype(_CD)   # 1/sqrt(dk) folded once
        k16h = dense(kv16, wk, bk).astype(_CD)
        v16h = dense(kv16, wv, bv).astype(_CD)
        for b in range(TB):                                     # static unroll
            bias_b = bias[b if bias.shape[0] == TB else 0]      # [Lm, Sk]
            qb = q16h[b * Lq:(b + 1) * Lq]
            kb = k16h[b * Sk:(b + 1) * Sk]
            vb = v16h[b * Sk:(b + 1) * Sk]
            for h in range(n_heads):                            # static unroll
                cs = slice(h * dk, (h + 1) * dk)
                s = jnp.einsum("ld,sd->ls", qb[:, cs], kb[:, cs],
                               preferred_element_type=jnp.float32)     # [Lq, Sk] f32
                s = s + bias_b                                   # hoisted mask bias
                s = s - jnp.max(s, axis=-1, keepdims=True)
                p = jnp.exp(s)
                denom = jnp.sum(p, axis=-1, keepdims=True)
                if _APPROX_SOFTMAX_RECIP:
                    p = p * pl.reciprocal(denom, approx=True)
                else:
                    p = p / denom
                # Write this head's context straight into the VMEM scratch slab
                # (no lane-axis concat, per-head temporaries die immediately).
                ctx_ref[b * Lq:(b + 1) * Lq, cs] = jnp.dot(
                    p.astype(_CD), vb[:, cs], preferred_element_type=jnp.float32)
        return dense(ctx_ref[...].astype(_CD), wo, bo)

    x = x_ref[...].reshape(TB * L, D)                 # f32 residual stream
    mem16 = mem_ref[...].reshape(TB * S, D)           # already bf16 (cast in wrapper)

    # Additive mask biases computed ONCE per kernel invocation (not per head).
    tbias = jnp.where(tmask_ref[...] == 0.0, jnp.float32(-1e9), jnp.float32(0.0))
    sbias = jnp.where(smask_ref[...] == 0.0, jnp.float32(-1e9), jnp.float32(0.0))

    # sublayer 0: masked self-attention (pre-norm, residual fused)
    y16 = _torch_layer_norm(x, ln0_g[...], ln0_b[...], eps).astype(_CD)
    x = x + mha(y16, y16, tbias, sa_wq, sa_bq, sa_wk, sa_bk, sa_wv, sa_bv, sa_wo, sa_bo)

    # sublayer 1: source (cross) attention against the encoder memory
    y16 = _torch_layer_norm(x, ln1_g[...], ln1_b[...], eps).astype(_CD)
    x = x + mha(y16, mem16, sbias, ca_wq, ca_bq, ca_wk, ca_bk, ca_wv, ca_bv, ca_wo, ca_bo)

    # sublayer 2: position-wise feed-forward
    # NOTE: for large d_ff, tile w1/w2 over d_ff (pltpu.emit_pipeline) to bound VMEM.
    y16 = _torch_layer_norm(x, ln2_g[...], ln2_b[...], eps).astype(_CD)
    hid = jnp.maximum(dense(y16, w1_ref, b1_ref), 0.0)
    x = x + dense(hid.astype(_CD), w2_ref, b2_ref)

    if apply_final_norm:                              # fused Decoder.norm (last layer)
        x = _torch_layer_norm(x, fn_g[...], fn_b[...], eps)

    o_ref[...] = x.reshape(TB, L, D)


def _final_norm_kernel(x_ref, g_ref, b_ref, o_ref, *, eps):
    # Only used for the degenerate 0-layer Decoder (otherwise fused into last layer).
    o_ref[0] = _torch_layer_norm(x_ref[0], g_ref[...], b_ref[...], eps)


# ------------------------------ kernel wrappers -----------------------------

def _const_spec(arr):
    """Grid-invariant full-array block (weights / params).  On VMEM-tight configs
    (v7x 64 MiB, v5e 16 MiB scoped default) add `pipeline_mode=pl.Buffered(1)` so
    these constants are not double-buffered."""
    nd = arr.ndim
    return pl.BlockSpec(arr.shape, lambda i, _nd=nd: (0,) * _nd)


def _mask_spec(mask, tb):
    """Masks kept at native (possibly size-1) shapes; broadcast happens in-kernel."""
    if mask.shape[0] == 1:
        return pl.BlockSpec((1,) + mask.shape[1:], lambda i: (0, 0, 0))
    return pl.BlockSpec((tb,) + mask.shape[1:], lambda i: (i, 0, 0))


def decoder_layer(x, memory16, tgt_mask, src_mask, lp, fn_g, fn_b, *,
                  n_heads, tb, apply_final_norm, eps=1e-6):
    B, L, D = x.shape
    S = memory16.shape[1]
    assert B % tb == 0

    sa, ca = lp["self_attn"], lp["src_attn"]
    weights = [
        lp["ln0_g"], lp["ln0_b"],
        sa["wq"], sa["bq"], sa["wk"], sa["bk"], sa["wv"], sa["bv"], sa["wo"], sa["bo"],
        lp["ln1_g"], lp["ln1_b"],
        ca["wq"], ca["bq"], ca["wk"], ca["bk"], ca["wv"], ca["bv"], ca["wo"], ca["bo"],
        lp["ln2_g"], lp["ln2_b"],
        lp["w1"], lp["b1"], lp["w2"], lp["b2"],
        fn_g, fn_b,
    ]

    kern = functools.partial(_decoder_layer_kernel, n_heads=n_heads, eps=eps,
                             tb=tb, apply_final_norm=apply_final_norm)

    in_specs = [
        pl.BlockSpec((tb, L, D), lambda i: (i, 0, 0)),   # x (batch tile)
        pl.BlockSpec((tb, S, D), lambda i: (i, 0, 0)),   # memory (bf16, batch tile)
        _mask_spec(tgt_mask, tb),
        _mask_spec(src_mask, tb),
    ] + [_const_spec(w) for w in weights]

    return pl.pallas_call(
        kern,
        out_shape=jax.ShapeDtypeStruct((B, L, D), jnp.float32),
        grid=(B // tb,),
        in_specs=in_specs,
        out_specs=pl.BlockSpec((tb, L, D), lambda i: (i, 0, 0)),
        scratch_shapes=[pltpu.VMEM((tb * L, D), jnp.float32)],   # attention ctx slab
        compiler_params=pltpu.CompilerParams(
            dimension_semantics=("parallel",),           # batch tiles shard across TCs
            vmem_limit_bytes=48 * 1024 * 1024,
        ),
    )(x, memory16, tgt_mask, src_mask, *weights)


def final_layer_norm(x, gamma, beta, eps=1e-6):
    B, L, D = x.shape
    kern = functools.partial(_final_norm_kernel, eps=eps)
    return pl.pallas_call(
        kern,
        out_shape=jax.ShapeDtypeStruct((B, L, D), jnp.float32),
        grid=(B,),
        in_specs=[pl.BlockSpec((1, L, D), lambda b: (b, 0, 0)),
                  pl.BlockSpec((1, D), lambda b: (0, 0)),
                  pl.BlockSpec((1, D), lambda b: (0, 0))],
        out_specs=pl.BlockSpec((1, L, D), lambda b: (b, 0, 0)),
        compiler_params=pltpu.CompilerParams(dimension_semantics=("parallel",)),
    )(x, gamma, beta)


# ------------------------------- model glue ---------------------------------

def _pick_block_b(B, L, target_rows=256):
    """Fold batch elements per grid step so projection/FFN matmuls have M≈target_rows
    rows, while keeping >= 2 parallel grid steps when possible (v7x has 2 TCs)."""
    tb = 1
    while (B % (tb * 2) == 0 and (tb * 2) * L <= target_rows and B // (tb * 2) >= 2):
        tb *= 2
    return tb


@functools.partial(jax.jit, static_argnames=("n_heads", "block_b"))
def decoder_forward(params, x, memory, src_mask, tgt_mask, n_heads, block_b=None):
    B, L, _ = x.shape
    tb = block_b if block_b is not None else _pick_block_b(B, L)

    mem16 = memory.astype(jnp.bfloat16)   # K/V matmuls are bf16 anyway; halves mem DMA
    src_m = src_mask.astype(jnp.float32)
    tgt_m = tgt_mask.astype(jnp.float32)

    layers = params["layers"]
    out = x.astype(jnp.float32)
    for li, lp in enumerate(layers):
        out = decoder_layer(out, mem16, tgt_m, src_m, lp,
                            params["norm_g"], params["norm_b"],
                            n_heads=n_heads, tb=tb,
                            apply_final_norm=(li == len(layers) - 1))
    if not layers:                        # degenerate Decoder with zero layers
        out = final_layer_norm(out, params["norm_g"], params["norm_b"])
    return out


# ------------------------------ param init ----------------------------------

def init_params(key, d_model, d_ff, n_layers):
    """f32 reference parameters matching the PyTorch module's structure."""
    keys = iter(jax.random.split(key, n_layers * 10 + 2))

    def dense_p(din, dout):
        w = 0.02 * jax.random.normal(next(keys), (din, dout), jnp.float32)
        b = jnp.zeros((1, dout), jnp.float32)
        return w, b

    def attn_p():
        p = {}
        for name in ("q", "k", "v", "o"):
            p["w" + name], p["b" + name] = dense_p(d_model, d_model)
        return p

    layers = []
    for _ in range(n_layers):
        lp = {"self_attn": attn_p(), "src_attn": attn_p()}
        lp["w1"], lp["b1"] = dense_p(d_model, d_ff)
        lp["w2"], lp["b2"] = dense_p(d_ff, d_model)
        for i in range(3):
            lp[f"ln{i}_g"] = jnp.ones((1, d_model), jnp.float32)
            lp[f"ln{i}_b"] = jnp.zeros((1, d_model), jnp.float32)
        layers.append(lp)

    return {"layers": layers,
            "norm_g": jnp.ones((1, d_model), jnp.float32),
            "norm_b": jnp.zeros((1, d_model), jnp.float32)}


def cast_matmul_weights_to_bf16(params):
    """Cast matmul weight matrices to bf16 ONCE (outside the kernels) — halves the
    dominant HBM->VMEM weight traffic.  Biases / LayerNorm params stay f32."""
    def attn(a):
        return {k: (v.astype(jnp.bfloat16) if k in ("wq", "wk", "wv", "wo") else v)
                for k, v in a.items()}
    layers = []
    for lp in params["layers"]:
        nl = dict(lp)
        nl["self_attn"] = attn(lp["self_attn"])
        nl["src_attn"] = attn(lp["src_attn"])
        nl["w1"] = lp["w1"].astype(jnp.bfloat16)
        nl["w2"] = lp["w2"].astype(jnp.bfloat16)
        layers.append(nl)
    out = dict(params)
    out["layers"] = layers
    return out


# --------------------------------- main --------------------------------------

if __name__ == "__main__":
    B, L, S = 4, 8, 16         # batch, target seq, source (memory) seq
    D, H, DFF = 32, 4, 64      # d_model, heads, feed-forward dim
    N_LAYERS = 2

    key = jax.random.PRNGKey(0)
    kx, kmem, kp = jax.random.split(key, 3)

    x = jax.random.normal(kx, (B, L, D), jnp.float32)
    memory = jax.random.normal(kmem, (B, S, D), jnp.float32)
    src_mask = jnp.ones((B, 1, S), jnp.float32)               # per-batch source mask
    tgt_mask = jnp.tril(jnp.ones((1, L, L), jnp.float32))     # subsequent (causal) mask

    params = cast_matmul_weights_to_bf16(init_params(kp, D, DFF, N_LAYERS))

    out = decoder_forward(params, x, memory, src_mask, tgt_mask, n_heads=H)
    out = jax.block_until_ready(out)

    assert out.shape == (B, L, D) and out.dtype == jnp.float32
    assert bool(jnp.isfinite(out).all())
    print("KERNEL_OK")
</pallas_src>

<mosaic_0001>
module attributes {stable_mosaic.version = 11 : i64} {
  func.func @_decoder_layer_kernel(%arg0: i32, %arg1: memref<2x8x32xf32, #tpu.memory_space<vmem>>, %arg2: memref<2x16x32xbf16, #tpu.memory_space<vmem>>, %arg3: memref<1x8x8xf32, #tpu.memory_space<vmem>>, %arg4: memref<2x1x16xf32, #tpu.memory_space<vmem>>, %arg5: memref<1x32xf32, #tpu.memory_space<vmem>>, %arg6: memref<1x32xf32, #tpu.memory_space<vmem>>, %arg7: memref<32x32xbf16, #tpu.memory_space<vmem>>, %arg8: memref<1x32xf32, #tpu.memory_space<vmem>>, %arg9: memref<32x32xbf16, #tpu.memory_space<vmem>>, %arg10: memref<1x32xf32, #tpu.memory_space<vmem>>, %arg11: memref<32x32xbf16, #tpu.memory_space<vmem>>, %arg12: memref<1x32xf32, #tpu.memory_space<vmem>>, %arg13: memref<32x32xbf16, #tpu.memory_space<vmem>>, %arg14: memref<1x32xf32, #tpu.memory_space<vmem>>, %arg15: memref<1x32xf32, #tpu.memory_space<vmem>>, %arg16: memref<1x32xf32, #tpu.memory_space<vmem>>, %arg17: memref<32x32xbf16, #tpu.memory_space<vmem>>, %arg18: memref<1x32xf32, #tpu.memory_space<vmem>>, %arg19: memref<32x32xbf16, #tpu.memory_space<vmem>>, %arg20: memref<1x32xf32, #tpu.memory_space<vmem>>, %arg21: memref<32x32xbf16, #tpu.memory_space<vmem>>, %arg22: memref<1x32xf32, #tpu.memory_space<vmem>>, %arg23: memref<32x32xbf16, #tpu.memory_space<vmem>>, %arg24: memref<1x32xf32, #tpu.memory_space<vmem>>, %arg25: memref<1x32xf32, #tpu.memory_space<vmem>>, %arg26: memref<1x32xf32, #tpu.memory_space<vmem>>, %arg27: memref<32x64xbf16, #tpu.memory_space<vmem>>, %arg28: memref<1x64xf32, #tpu.memory_space<vmem>>, %arg29: memref<64x32xbf16, #tpu.memory_space<vmem>>, %arg30: memref<1x32xf32, #tpu.memory_space<vmem>>, %arg31: memref<1x32xf32, #tpu.memory_space<vmem>>, %arg32: memref<1x32xf32, #tpu.memory_space<vmem>>, %arg33: memref<2x8x32xf32, #tpu.memory_space<vmem>>, %arg34: memref<16x32xf32, #tpu.memory_space<vmem>>) attributes {dimension_semantics = [#tpu.dimension_semantics<parallel>], iteration_bounds = array<i64: 2>, scalar_prefetch = 0 : i64, scratch_operands = 1 : i64, tpu.core_type = #tpu.core_type<tc>, window_params = [{transform_indices = @transform_0, window_bounds = array<i64: 2, 8, 32>}, {transform_indices = @transform_1, window_bounds = array<i64: 2, 16, 32>}, {pipeline_mode = #tpu.pipeline_mode<synchronous>, transform_indices = @transform_2, window_bounds = array<i64: 1, 8, 8>}, {transform_indices = @transform_3, window_bounds = array<i64: 2, 1, 16>}, {pipeline_mode = #tpu.pipeline_mode<synchronous>, transform_indices = @transform_4, window_bounds = array<i64: 1, 32>}, {pipeline_mode = #tpu.pipeline_mode<synchronous>, transform_indices = @transform_5, window_bounds = array<i64: 1, 32>}, {pipeline_mode = #tpu.pipeline_mode<synchronous>, transform_indices = @transform_6, window_bounds = array<i64: 32, 32>}, {pipeline_mode = #tpu.pipeline_mode<synchronous>, transform_indices = @transform_7, window_bounds = array<i64: 1, 32>}, {pipeline_mode = #tpu.pipeline_mode<synchronous>, transform_indices = @transform_8, window_bounds = array<i64: 32, 32>}, {pipeline_mode = #tpu.pipeline_mode<synchronous>, transform_indices = @transform_9, window_bounds = array<i64: 1, 32>}, {pipeline_mode = #tpu.pipeline_mode<synchronous>, transform_indices = @transform_10, window_bounds = array<i64: 32, 32>}, {pipeline_mode = #tpu.pipeline_mode<synchronous>, transform_indices = @transform_11, window_bounds = array<i64: 1, 32>}, {pipeline_mode = #tpu.pipeline_mode<synchronous>, transform_indices = @transform_12, window_bounds = array<i64: 32, 32>}, {pipeline_mode = #tpu.pipeline_mode<synchronous>, transform_indices = @transform_13, window_bounds = array<i64: 1, 32>}, {pipeline_mode = #tpu.pipeline_mode<synchronous>, transform_indices = @transform_14, window_bounds = array<i64: 1, 32>}, {pipeline_mode = #tpu.pipeline_mode<synchronous>, transform_indices = @transform_15, window_bounds = array<i64: 1, 32>}, {pipeline_mode = #tpu.pipeline_mode<synchronous>, transform_indices = @transform_16, window_bounds = array<i64: 32, 32>}, {pipeline_mode = #tpu.pipeline_mode<synchronous>, transform_indices = @transform_17, window_bounds = array<i64: 1, 32>}, {pipeline_mode = #tpu.pipeline_mode<synchronous>, transform_indices = @transform_18, window_bounds = array<i64: 32, 32>}, {pipeline_mode = #tpu.pipeline_mode<synchronous>, transform_indices = @transform_19, window_bounds = array<i64: 1, 32>}, {pipeline_mode = #tpu.pipeline_mode<synchronous>, transform_indices = @transform_20, window_bounds = array<i64: 32, 32>}, {pipeline_mode = #tpu.pipeline_mode<synchronous>, transform_indices = @transform_21, window_bounds = array<i64: 1, 32>}, {pipeline_mode = #tpu.pipeline_mode<synchronous>, transform_indices = @transform_22, window_bounds = array<i64: 32, 32>}, {pipeline_mode = #tpu.pipeline_mode<synchronous>, transform_indices = @transform_23, window_bounds = array<i64: 1, 32>}, {pipeline_mode = #tpu.pipeline_mode<synchronous>, transform_indices = @transform_24, window_bounds = array<i64: 1, 32>}, {pipeline_mode = #tpu.pipeline_mode<synchronous>, transform_indices = @transform_25, window_bounds = array<i64: 1, 32>}, {pipeline_mode = #tpu.pipeline_mode<synchronous>, transform_indices = @transform_26, window_bounds = array<i64: 32, 64>}, {pipeline_mode = #tpu.pipeline_mode<synchronous>, transform_indices = @transform_27, window_bounds = array<i64: 1, 64>}, {pipeline_mode = #tpu.pipeline_mode<synchronous>, transform_indices = @transform_28, window_bounds = array<i64: 64, 32>}, {pipeline_mode = #tpu.pipeline_mode<synchronous>, transform_indices = @transform_29, window_bounds = array<i64: 1, 32>}, {pipeline_mode = #tpu.pipeline_mode<synchronous>, transform_indices = @transform_30, window_bounds = array<i64: 1, 32>}, {pipeline_mode = #tpu.pipeline_mode<synchronous>, transform_indices = @transform_31, window_bounds = array<i64: 1, 32>}, {transform_indices = @transform_32, window_bounds = array<i64: 2, 8, 32>}]} {
    %c0 = arith.constant 0 : index
    %c0_0 = arith.constant 0 : index
    %c0_1 = arith.constant 0 : index
    %0 = vector.load %arg1[%c0, %c0_0, %c0_1] : memref<2x8x32xf32, #tpu.memory_space<vmem>>, vector<2x8x32xf32>
    %1 = vector.shape_cast %0 : vector<2x8x32xf32> to vector<16x32xf32>
    %c0_2 = arith.constant 0 : index
    %c0_3 = arith.constant 0 : index
    %c0_4 = arith.constant 0 : index
    %2 = vector.load %arg2[%c0_2, %c0_3, %c0_4] : memref<2x16x32xbf16, #tpu.memory_space<vmem>>, vector<2x16x32xbf16>
    %3 = vector.shape_cast %2 : vector<2x16x32xbf16> to vector<32x32xbf16>
    %c0_5 = arith.constant 0 : index
    %c0_6 = arith.constant 0 : index
    %c0_7 = arith.constant 0 : index
    %4 = vector.load %arg3[%c0_5, %c0_6, %c0_7] : memref<1x8x8xf32, #tpu.memory_space<vmem>>, vector<1x8x8xf32>
    %cst = arith.constant 0.000000e+00 : f32
    %5 = vector.broadcast %cst : f32 to vector<1x8x8xf32>
    %6 = arith.cmpf oeq, %4, %5 : vector<1x8x8xf32>
    %cst_8 = arith.constant -1.000000e+09 : f32
    %cst_9 = arith.constant 0.000000e+00 : f32
    %7 = vector.broadcast %cst_8 : f32 to vector<1x8x8xf32>
    %8 = vector.broadcast %cst_9 : f32 to vector<1x8x8xf32>
    %9 = arith.select %6, %7, %8 : vector<1x8x8xi1>, vector<1x8x8xf32>
    %c0_10 = arith.constant 0 : index
    %c0_11 = arith.constant 0 : index
    %c0_12 = arith.constant 0 : index
    %10 = vector.load %arg4[%c0_10, %c0_11, %c0_12] : memref<2x1x16xf32, #tpu.memory_space<vmem>>, vector<2x1x16xf32>
    %cst_13 = arith.constant 0.000000e+00 : f32
    %11 = vector.broadcast %cst_13 : f32 to vector<2x1x16xf32>
    %12 = arith.cmpf oeq, %10, %11 : vector<2x1x16xf32>
    %cst_14 = arith.constant -1.000000e+09 : f32
    %cst_15 = arith.constant 0.000000e+00 : f32
    %13 = vector.broadcast %cst_14 : f32 to vector<2x1x16xf32>
    %14 = vector.broadcast %cst_15 : f32 to vector<2x1x16xf32>
    %15 = arith.select %12, %13, %14 : vector<2x1x16xi1>, vector<2x1x16xf32>
    %c0_16 = arith.constant 0 : index
    %c0_17 = arith.constant 0 : index
    %16 = vector.load %arg5[%c0_16, %c0_17] : memref<1x32xf32, #tpu.memory_space<vmem>>, vector<1x32xf32>
    %c0_18 = arith.constant 0 : index
    %c0_19 = arith.constant 0 : index
    %17 = vector.load %arg6[%c0_18, %c0_19] : memref<1x32xf32, #tpu.memory_space<vmem>>, vector<1x32xf32>
    %cst_20 = arith.constant dense<0.000000e+00> : vector<16xf32>
    %18 = vector.multi_reduction <add>, %1, %cst_20 [1] : vector<16x32xf32> to vector<16xf32>
    %19 = vector.shape_cast %18 : vector<16xf32> to vector<16x1xf32>
    %cst_21 = arith.constant 3.200000e+01 : f32
    %20 = vector.broadcast %cst_21 : f32 to vector<16x1xf32>
    %21 = arith.divf %19, %20 : vector<16x1xf32>
    %22 = vector.broadcast %21 : vector<16x1xf32> to vector<16x32xf32>
    %23 = arith.subf %1, %22 : vector<16x32xf32>
    %24 = arith.mulf %23, %23 : vector<16x32xf32>
    %cst_22 = arith.constant dense<0.000000e+00> : vector<16xf32>
    %25 = vector.multi_reduction <add>, %24, %cst_22 [1] : vector<16x32xf32> to vector<16xf32>
    %26 = vector.shape_cast %25 : vector<16xf32> to vector<16x1xf32>
    %cst_23 = arith.constant 0.0322580636 : f32
    %27 = vector.broadcast %cst_23 : f32 to vector<16x1xf32>
    %28 = arith.mulf %26, %27 : vector<16x1xf32>
    %29 = math.sqrt %28 : vector<16x1xf32>
    %cst_24 = arith.constant 9.99999997E-7 : f32
    %30 = vector.broadcast %cst_24 : f32 to vector<16x1xf32>
    %31 = arith.addf %29, %30 : vector<16x1xf32>
    %cst_25 = arith.constant 1.000000e+00 : f32
    %32 = vector.broadcast %cst_25 : f32 to vector<16x1xf32>
    %33 = arith.divf %32, %31 : vector<16x1xf32>
    %34 = vector.broadcast %16 : vector<1x32xf32> to vector<16x32xf32>
    %35 = vector.broadcast %33 : vector<16x1xf32> to vector<16x32xf32>
    %36 = arith.mulf %34, %35 : vector<16x32xf32>
    %37 = arith.mulf %36, %23 : vector<16x32xf32>
    %38 = vector.broadcast %17 : vector<1x32xf32> to vector<16x32xf32>
    %39 = arith.addf %37, %38 : vector<16x32xf32>
    %40 = arith.truncf %39 : vector<16x32xf32> to vector<16x32xbf16>
    %c0_26 = arith.constant 0 : index
    %c0_27 = arith.constant 0 : index
    %41 = vector.load %arg7[%c0_26, %c0_27] : memref<32x32xbf16, #tpu.memory_space<vmem>>, vector<32x32xbf16>
    %cst_28 = arith.constant dense<0.000000e+00> : vector<16x32xf32>
    %42 = tpu.matmul %40, %41, %cst_28 {dimension_numbers = #tpu.dot_dimension_numbers<[1], [0], [0], [1], [0, 0, 1, 1], [], []>} : vector<16x32xbf16>, vector<32x32xbf16>, vector<16x32xf32> -> vector<16x32xf32>
    %c0_29 = arith.constant 0 : index
    %c0_30 = arith.constant 0 : index
    %43 = vector.load %arg8[%c0_29, %c0_30] : memref<1x32xf32, #tpu.memory_space<vmem>>, vector<1x32xf32>
    %44 = vector.broadcast %43 : vector<1x32xf32> to vector<16x32xf32>
    %45 = arith.addf %42, %44 : vector<16x32xf32>
    %cst_31 = arith.constant 0.353553385 : f32
    %46 = vector.broadcast %cst_31 : f32 to vector<16x32xf32>
    %47 = arith.mulf %45, %46 : vector<16x32xf32>
    %48 = arith.truncf %47 : vector<16x32xf32> to vector<16x32xbf16>
    %c0_32 = arith.constant 0 : index
    %c0_33 = arith.constant 0 : index
    %49 = vector.load %arg9[%c0_32, %c0_33] : memref<32x32xbf16, #tpu.memory_space<vmem>>, vector<32x32xbf16>
    %cst_34 = arith.constant dense<0.000000e+00> : vector<16x32xf32>
    %50 = tpu.matmul %40, %49, %cst_34 {dimension_numbers = #tpu.dot_dimension_numbers<[1], [0], [0], [1], [0, 0, 1, 1], [], []>} : vector<16x32xbf16>, vector<32x32xbf16>, vector<16x32xf32> -> vector<16x32xf32>
    %c0_35 = arith.constant 0 : index
    %c0_36 = arith.constant 0 : index
    %51 = vector.load %arg10[%c0_35, %c0_36] : memref<1x32xf32, #tpu.memory_space<vmem>>, vector<1x32xf32>
    %52 = vector.broadcast %51 : vector<1x32xf32> to vector<16x32xf32>
    %53 = arith.addf %50, %52 : vector<16x32xf32>
    %54 = arith.truncf %53 : vector<16x32xf32> to vector<16x32xbf16>
    %c0_37 = arith.constant 0 : index
    %c0_38 = arith.constant 0 : index
    %55 = vector.load %arg11[%c0_37, %c0_38] : memref<32x32xbf16, #tpu.memory_space<vmem>>, vector<32x32xbf16>
    %cst_39 = arith.constant dense<0.000000e+00> : vector<16x32xf32>
    %56 = tpu.matmul %40, %55, %cst_39 {dimension_numbers = #tpu.dot_dimension_numbers<[1], [0], [0], [1], [0, 0, 1, 1], [], []>} : vector<16x32xbf16>, vector<32x32xbf16>, vector<16x32xf32> -> vector<16x32xf32>
    %c0_40 = arith.constant 0 : index
    %c0_41 = arith.constant 0 : index
    %57 = vector.load %arg12[%c0_40, %c0_41] : memref<1x32xf32, #tpu.memory_space<vmem>>, vector<1x32xf32>
    %58 = vector.broadcast %57 : vector<1x32xf32> to vector<16x32xf32>
    %59 = arith.addf %56, %58 : vector<16x32xf32>
    %60 = arith.truncf %59 : vector<16x32xf32> to vector<16x32xbf16>
    %61 = vector.shape_cast %9 : vector<1x8x8xf32> to vector<8x8xf32>
    %62 = vector.extract_strided_slice %48 {offsets = [0, 0], sizes = [8, 32], strides = [1, 1]} : vector<16x32xbf16> to vector<8x32xbf16>
    %63 = vector.extract_strided_slice %54 {offsets = [0, 0], sizes = [8, 32], strides = [1, 1]} : vector<16x32xbf16> to vector<8x32xbf16>
    %64 = vector.extract_strided_slice %60 {offsets = [0, 0], sizes = [8, 32], strides = [1, 1]} : vector<16x32xbf16> to vector<8x32xbf16>
    %65 = vector.extract_strided_slice %62 {offsets = [0, 0], sizes = [8, 8], strides = [1, 1]} : vector<8x32xbf16> to vector<8x8xbf16>
    %66 = vector.extract_strided_slice %63 {offsets = [0, 0], sizes = [8, 8], strides = [1, 1]} : vector<8x32xbf16> to vector<8x8xbf16>
    "tpu.trace_start"() <{level = 10 : i32, message = "ld,sd->ls"}> : () -> ()
    %cst_42 = arith.constant dense<0.000000e+00> : vector<8x8xf32>
    %67 = tpu.matmul %65, %66, %cst_42 {dimension_numbers = #tpu.dot_dimension_numbers<[1], [1], [0], [0], [0, 0, 1, 0], [], []>} : vector<8x8xbf16>, vector<8x8xbf16>, vector<8x8xf32> -> vector<8x8xf32>
    "tpu.trace_stop"() : () -> ()
    %68 = arith.addf %67, %61 : vector<8x8xf32>
    %cst_43 = arith.constant dense<0xFF800000> : vector<8xf32>
    %69 = vector.multi_reduction <maximumf>, %68, %cst_43 [1] : vector<8x8xf32> to vector<8xf32>
    %70 = vector.shape_cast %69 : vector<8xf32> to vector<8x1xf32>
    %71 = vector.broadcast %70 : vector<8x1xf32> to vector<8x8xf32>
    %72 = arith.subf %68, %71 : vector<8x8xf32>
    %73 = math.exp %72 : vector<8x8xf32>
    %cst_44 = arith.constant dense<0.000000e+00> : vector<8xf32>
    %74 = vector.multi_reduction <add>, %73, %cst_44 [1] : vector<8x8xf32> to vector<8xf32>
    %75 = vector.shape_cast %74 : vector<8xf32> to vector<8x1xf32>
    %76 = tpu.reciprocal %75 {approx = true} : vector<8x1xf32> -> vector<8x1xf32>
    %77 = vector.broadcast %76 : vector<8x1xf32> to vector<8x8xf32>
    %78 = arith.mulf %73, %77 : vector<8x8xf32>
    %79 = arith.truncf %78 : vector<8x8xf32> to vector<8x8xbf16>
    %80 = vector.extract_strided_slice %64 {offsets = [0, 0], sizes = [8, 8], strides = [1, 1]} : vector<8x32xbf16> to vector<8x8xbf16>
    %cst_45 = arith.constant dense<0.000000e+00> : vector<8x8xf32>
    %81 = tpu.matmul %79, %80, %cst_45 {dimension_numbers = #tpu.dot_dimension_numbers<[1], [0], [0], [1], [0, 0, 1, 1], [], []>} : vector<8x8xbf16>, vector<8x8xbf16>, vector<8x8xf32> -> vector<8x8xf32>
    %c0_46 = arith.constant 0 : index
    %c0_47 = arith.constant 0 : index
    %82 = vector.load %arg34[%c0_46, %c0_47] : memref<16x32xf32, #tpu.memory_space<vmem>>, vector<8x8xf32>
    tpu.vector_store %arg34[%c0_46, %c0_47], %81 {strides = array<i32>} : memref<16x32xf32, #tpu.memory_space<vmem>>, vector<8x8xf32>,
    %83 = vector.extract_strided_slice %62 {offsets = [0, 8], sizes = [8, 8], strides = [1, 1]} : vector<8x32xbf16> to vector<8x8xbf16>
    %84 = vector.extract_strided_slice %63 {offsets = [0, 8], sizes = [8, 8], strides = [1, 1]} : vector<8x32xbf16> to vector<8x8xbf16>
    "tpu.trace_start"() <{level = 10 : i32, message = "ld,sd->ls"}> : () -> ()
    %cst_48 = arith.constant dense<0.000000e+00> : vector<8x8xf32>
    %85 = tpu.matmul %83, %84, %cst_48 {dimension_numbers = #tpu.dot_dimension_numbers<[1], [1], [0], [0], [0, 0, 1, 0], [], []>} : vector<8x8xbf16>, vector<8x8xbf16>, vector<8x8xf32> -> vector<8x8xf32>
    "tpu.trace_stop"() : () -> ()
    %86 = arith.addf %85, %61 : vector<8x8xf32>
    %cst_49 = arith.constant dense<0xFF800000> : vector<8xf32>
    %87 = vector.multi_reduction <maximumf>, %86, %cst_49 [1] : vector<8x8xf32> to vector<8xf32>
    %88 = vector.shape_cast %87 : vector<8xf32> to vector<8x1xf32>
    %89 = vector.broadcast %88 : vector<8x1xf32> to vector<8x8xf32>
    %90 = arith.subf %86, %89 : vector<8x8xf32>
    %91 = math.exp %90 : vector<8x8xf32>
    %cst_50 = arith.constant dense<0.000000e+00> : vector<8xf32>
    %92 = vector.multi_reduction <add>, %91, %cst_50 [1] : vector<8x8xf32> to vector<8xf32>
    %93 = vector.shape_cast %92 : vector<8xf32> to vector<8x1xf32>
    %94 = tpu.reciprocal %93 {approx = true} : vector<8x1xf32> -> vector<8x1xf32>
    %95 = vector.broadcast %94 : vector<8x1xf32> to vector<8x8xf32>
    %96 = arith.mulf %91, %95 : vector<8x8xf32>
    %97 = arith.truncf %96 : vector<8x8xf32> to vector<8x8xbf16>
    %98 = vector.extract_strided_slice %64 {offsets = [0, 8], sizes = [8, 8], strides = [1, 1]} : vector<8x32xbf16> to vector<8x8xbf16>
    %cst_51 = arith.constant dense<0.000000e+00> : vector<8x8xf32>
    %99 = tpu.matmul %97, %98, %cst_51 {dimension_numbers = #tpu.dot_dimension_numbers<[1], [0], [0], [1], [0, 0, 1, 1], [], []>} : vector<8x8xbf16>, vector<8x8xbf16>, vector<8x8xf32> -> vector<8x8xf32>
    %c0_52 = arith.constant 0 : index
    %c8 = arith.constant 8 : index
    %100 = vector.load %arg34[%c0_52, %c8] : memref<16x32xf32, #tpu.memory_space<vmem>>, vector<8x8xf32>
    tpu.vector_store %arg34[%c0_52, %c8], %99 {strides = array<i32>} : memref<16x32xf32, #tpu.memory_space<vmem>>, vector<8x8xf32>,
    %101 = vector.extract_strided_slice %62 {offsets = [0, 16], sizes = [8, 8], strides = [1, 1]} : vector<8x32xbf16> to vector<8x8xbf16>
    %102 = vector.extract_strided_slice %63 {offsets = [0, 16], sizes = [8, 8], strides = [1, 1]} : vector<8x32xbf16> to vector<8x8xbf16>
    "tpu.trace_start"() <{level = 10 : i32, message = "ld,sd->ls"}> : () -> ()
    %cst_53 = arith.constant dense<0.000000e+00> : vector<8x8xf32>
    %103 = tpu.matmul %101, %102, %cst_53 {dimension_numbers = #tpu.dot_dimension_numbers<[1], [1], [0], [0], [0, 0, 1, 0], [], []>} : vector<8x8xbf16>, vector<8x8xbf16>, vector<8x8xf32> -> vector<8x8xf32>
    "tpu.trace_stop"() : () -> ()
    %104 = arith.addf %103, %61 : vector<8x8xf32>
    %cst_54 = arith.constant dense<0xFF800000> : vector<8xf32>
    %105 = vector.multi_reduction <maximumf>, %104, %cst_54 [1] : vector<8x8xf32> to vector<8xf32>
    %106 = vector.shape_cast %105 : vector<8xf32> to vector<8x1xf32>
    %107 = vector.broadcast %106 : vector<8x1xf32> to vector<8x8xf32>
    %108 = arith.subf %104, %107 : vector<8x8xf32>
    %109 = math.exp %108 : vector<8x8xf32>
    %cst_55 = arith.constant dense<0.000000e+00> : vector<8xf32>
    %110 = vector.multi_reduction <add>, %109, %cst_55 [1] : vector<8x8xf32> to vector<8xf32>
    %111 = vector.shape_cast %110 : vector<8xf32> to vector<8x1xf32>
    %112 = tpu.reciprocal %111 {approx = true} : vector<8x1xf32> -> vector<8x1xf32>
    %113 = vector.broadcast %112 : vector<8x1xf32> to vector<8x8xf32>
    %114 = arith.mulf %109, %113 : vector<8x8xf32>
    %115 = arith.truncf %114 : vector<8x8xf32> to vector<8x8xbf16>
    %116 = vector.extract_strided_slice %64 {offsets = [0, 16], sizes = [8, 8], strides = [1, 1]} : vector<8x32xbf16> to vector<8x8xbf16>
    %cst_56 = arith.constant dense<0.000000e+00> : vector<8x8xf32>
    %117 = tpu.matmul %115, %116, %cst_56 {dimension_numbers = #tpu.dot_dimension_numbers<[1], [0], [0], [1], [0, 0, 1, 1], [], []>} : vector<8x8xbf16>, vector<8x8xbf16>, vector<8x8xf32> -> vector<8x8xf32>
    %c0_57 = arith.constant 0 : index
    %c16 = arith.constant 16 : index
    %118 = vector.load %arg34[%c0_57, %c16] : memref<16x32xf32, #tpu.memory_space<vmem>>, vector<8x8xf32>
    tpu.vector_store %arg34[%c0_57, %c16], %117 {strides = array<i32>} : memref<16x32xf32, #tpu.memory_space<vmem>>, vector<8x8xf32>,
    %119 = vector.extract_strided_slice %62 {offsets = [0, 24], sizes = [8, 8], strides = [1, 1]} : vector<8x32xbf16> to vector<8x8xbf16>
    %120 = vector.extract_strided_slice %63 {offsets = [0, 24], sizes = [8, 8], strides = [1, 1]} : vector<8x32xbf16> to vector<8x8xbf16>
    "tpu.trace_start"() <{level = 10 : i32, message = "ld,sd->ls"}> : () -> ()
    %cst_58 = arith.constant dense<0.000000e+00> : vector<8x8xf32>
    %121 = tpu.matmul %119, %120, %cst_58 {dimension_numbers = #tpu.dot_dimension_numbers<[1], [1], [0], [0], [0, 0, 1, 0], [], []>} : vector<8x8xbf16>, vector<8x8xbf16>, vector<8x8xf32> -> vector<8x8xf32>
    "tpu.trace_stop"() : () -> ()
    %122 = arith.addf %121, %61 : vector<8x8xf32>
    %cst_59 = arith.constant dense<0xFF800000> : vector<8xf32>
    %123 = vector.multi_reduction <maximumf>, %122, %cst_59 [1] : vector<8x8xf32> to vector<8xf32>
    %124 = vector.shape_cast %123 : vector<8xf32> to vector<8x1xf32>
    %125 = vector.broadcast %124 : vector<8x1xf32> to vector<8x8xf32>
    %126 = arith.subf %122, %125 : vector<8x8xf32>
    %127 = math.exp %126 : vector<8x8xf32>
    %cst_60 = arith.constant dense<0.000000e+00> : vector<8xf32>
    %128 = vector.multi_reduction <add>, %127, %cst_60 [1] : vector<8x8xf32> to vector<8xf32>
    %129 = vector.shape_cast %128 : vector<8xf32> to vector<8x1xf32>
    %130 = tpu.reciprocal %129 {approx = true} : vector<8x1xf32> -> vector<8x1xf32>
    %131 = vector.broadcast %130 : vector<8x1xf32> to vector<8x8xf32>
    %132 = arith.mulf %127, %131 : vector<8x8xf32>
    %133 = arith.truncf %132 : vector<8x8xf32> to vector<8x8xbf16>
    %134 = vector.extract_strided_slice %64 {offsets = [0, 24], sizes = [8, 8], strides = [1, 1]} : vector<8x32xbf16> to vector<8x8xbf16>
    %cst_61 = arith.constant dense<0.000000e+00> : vector<8x8xf32>
    %135 = tpu.matmul %133, %134, %cst_61 {dimension_numbers = #tpu.dot_dimension_numbers<[1], [0], [0], [1], [0, 0, 1, 1], [], []>} : vector<8x8xbf16>, vector<8x8xbf16>, vector<8x8xf32> -> vector<8x8xf32>
    %c0_62 = arith.constant 0 : index
    %c24 = arith.constant 24 : index
    %136 = vector.load %arg34[%c0_62, %c24] : memref<16x32xf32, #tpu.memory_space<vmem>>, vector<8x8xf32>
    tpu.vector_store %arg34[%c0_62, %c24], %135 {strides = array<i32>} : memref<16x32xf32, #tpu.memory_space<vmem>>, vector<8x8xf32>,
    %137 = vector.shape_cast %9 : vector<1x8x8xf32> to vector<8x8xf32>
    %138 = vector.extract_strided_slice %48 {offsets = [8, 0], sizes = [8, 32], strides = [1, 1]} : vector<16x32xbf16> to vector<8x32xbf16>
    %139 = vector.extract_strided_slice %54 {offsets = [8, 0], sizes = [8, 32], strides = [1, 1]} : vector<16x32xbf16> to vector<8x32xbf16>
    %140 = vector.extract_strided_slice %60 {offsets = [8, 0], sizes = [8, 32], strides = [1, 1]} : vector<16x32xbf16> to vector<8x32xbf16>
    %141 = vector.extract_strided_slice %138 {offsets = [0, 0], sizes = [8, 8], strides = [1, 1]} : vector<8x32xbf16> to vector<8x8xbf16>
    %142 = vector.extract_strided_slice %139 {offsets = [0, 0], sizes = [8, 8], strides = [1, 1]} : vector<8x32xbf16> to vector<8x8xbf16>
    "tpu.trace_start"() <{level = 10 : i32, message = "ld,sd->ls"}> : () -> ()
    %cst_63 = arith.constant dense<0.000000e+00> : vector<8x8xf32>
    %143 = tpu.matmul %141, %142, %cst_63 {dimension_numbers = #tpu.dot_dimension_numbers<[1], [1], [0], [0], [0, 0, 1, 0], [], []>} : vector<8x8xbf16>, vector<8x8xbf16>, vector<8x8xf32> -> vector<8x8xf32>
    "tpu.trace_stop"() : () -> ()
    %144 = arith.addf %143, %137 : vector<8x8xf32>
    %cst_64 = arith.constant dense<0xFF800000> : vector<8xf32>
    %145 = vector.multi_reduction <maximumf>, %144, %cst_64 [1] : vector<8x8xf32> to vector<8xf32>
    %146 = vector.shape_cast %145 : vector<8xf32> to vector<8x1xf32>
    %147 = vector.broadcast %146 : vector<8x1xf32> to vector<8x8xf32>
    %148 = arith.subf %144, %147 : vector<8x8xf32>
    %149 = math.exp %148 : vector<8x8xf32>
    %cst_65 = arith.constant dense<0.000000e+00> : vector<8xf32>
    %150 = vector.multi_reduction <add>, %149, %cst_65 [1] : vector<8x8xf32> to vector<8xf32>
    %151 = vector.shape_cast %150 : vector<8xf32> to vector<8x1xf32>
    %152 = tpu.reciprocal %151 {approx = true} : vector<8x1xf32> -> vector<8x1xf32>
    %153 = vector.broadcast %152 : vector<8x1xf32> to vector<8x8xf32>
    %154 = arith.mulf %149, %153 : vector<8x8xf32>
    %155 = arith.truncf %154 : vector<8x8xf32> to vector<8x8xbf16>
    %156 = vector.extract_strided_slice %140 {offsets = [0, 0], sizes = [8, 8], strides = [1, 1]} : vector<8x32xbf16> to vector<8x8xbf16>
    %cst_66 = arith.constant dense<0.000000e+00> : vector<8x8xf32>
    %157 = tpu.matmul %155, %156, %cst_66 {dimension_numbers = #tpu.dot_dimension_numbers<[1], [0], [0], [1], [0, 0, 1, 1], [], []>} : vector<8x8xbf16>, vector<8x8xbf16>, vector<8x8xf32> -> vector<8x8xf32>
    %c8_67 = arith.constant 8 : index
    %c0_68 = arith.constant 0 : index
    %158 = vector.load %arg34[%c8_67, %c0_68] : memref<16x32xf32, #tpu.memory_space<vmem>>, vector<8x8xf32>
    tpu.vector_store %arg34[%c8_67, %c0_68], %157 {strides = array<i32>} : memref<16x32xf32, #tpu.memory_space<vmem>>, vector<8x8xf32>,
    %159 = vector.extract_strided_slice %138 {offsets = [0, 8], sizes = [8, 8], strides = [1, 1]} : vector<8x32xbf16> to vector<8x8xbf16>
    %160 = vector.extract_strided_slice %139 {offsets = [0, 8], sizes = [8, 8], strides = [1, 1]} : vector<8x32xbf16> to vector<8x8xbf16>
    "tpu.trace_start"() <{level = 10 : i32, message = "ld,sd->ls"}> : () -> ()
    %cst_69 = arith.constant dense<0.000000e+00> : vector<8x8xf32>
    %161 = tpu.matmul %159, %160, %cst_69 {dimension_numbers = #tpu.dot_dimension_numbers<[1], [1], [0], [0], [0, 0, 1, 0], [], []>} : vector<8x8xbf16>, vector<8x8xbf16>, vector<8x8xf32> -> vector<8x8xf32>
    "tpu.trace_stop"() : () -> ()
    %162 = arith.addf %161, %137 : vector<8x8xf32>
    %cst_70 = arith.constant dense<0xFF800000> : vector<8xf32>
    %163 = vector.multi_reduction <maximumf>, %162, %cst_70 [1] : vector<8x8xf32> to vector<8xf32>
    %164 = vector.shape_cast %163 : vector<8xf32> to vector<8x1xf32>
    %165 = vector.broadcast %164 : vector<8x1xf32> to vector<8x8xf32>
    %166 = arith.subf %162, %165 : vector<8x8xf32>
    %167 = math.exp %166 : vector<8x8xf32>
    %cst_71 = arith.constant dense<0.000000e+00> : vector<8xf32>
    %168 = vector.multi_reduction <add>, %167, %cst_71 [1] : vector<8x8xf32> to vector<8xf32>
    %169 = vector.shape_cast %168 : vector<8xf32> to vector<8x1xf32>
    %170 = tpu.reciprocal %169 {approx = true} : vector<8x1xf32> -> vector<8x1xf32>
    %171 = vector.broadcast %170 : vector<8x1xf32> to vector<8x8xf32>
    %172 = arith.mulf %167, %171 : vector<8x8xf32>
    %173 = arith.truncf %172 : vector<8x8xf32> to vector<8x8xbf16>
    %174 = vector.extract_strided_slice %140 {offsets = [0, 8], sizes = [8, 8], strides = [1, 1]} : vector<8x32xbf16> to vector<8x8xbf16>
    %cst_72 = arith.constant dense<0.000000e+00> : vector<8x8xf32>
    %175 = tpu.matmul %173, %174, %cst_72 {dimension_numbers = #tpu.dot_dimension_numbers<[1], [0], [0], [1], [0, 0, 1, 1], [], []>} : vector<8x8xbf16>, vector<8x8xbf16>, vector<8x8xf32> -> vector<8x8xf32>
    %c8_73 = arith.constant 8 : index
    %c8_74 = arith.constant 8 : index
    %176 = vector.load %arg34[%c8_73, %c8_74] : memref<16x32xf32, #tpu.memory_space<vmem>>, vector<8x8xf32>
    tpu.vector_store %arg34[%c8_73, %c8_74], %175 {strides = array<i32>} : memref<16x32xf32, #tpu.memory_space<vmem>>, vector<8x8xf32>,
    %177 = vector.extract_strided_slice %138 {offsets = [0, 16], sizes = [8, 8], strides = [1, 1]} : vector<8x32xbf16> to vector<8x8xbf16>
    %178 = vector.extract_strided_slice %139 {offsets = [0, 16], sizes = [8, 8], strides = [1, 1]} : vector<8x32xbf16> to vector<8x8xbf16>
    "tpu.trace_start"() <{level = 10 : i32, message = "ld,sd->ls"}> : () -> ()
    %cst_75 = arith.constant dense<0.000000e+00> : vector<8x8xf32>
    %179 = tpu.matmul %177, %178, %cst_75 {dimension_numbers = #tpu.dot_dimension_numbers<[1], [1], [0], [0], [0, 0, 1, 0], [], []>} : vector<8x8xbf16>, vector<8x8xbf16>, vector<8x8xf32> -> vector<8x8xf32>
    "tpu.trace_stop"() : () -> ()
    %180 = arith.addf %179, %137 : vector<8x8xf32>
    %cst_76 = arith.constant dense<0xFF800000> : vector<8xf32>
    %181 = vector.multi_reduction <maximumf>, %180, %cst_76 [1] : vector<8x8xf32> to vector<8xf32>
    %182 = vector.shape_cast %181 : vector<8xf32> to vector<8x1xf32>
    %183 = vector.broadcast %182 : vector<8x1xf32> to vector<8x8xf32>
    %184 = arith.subf %180, %183 : vector<8x8xf32>
    %185 = math.exp %184 : vector<8x8xf32>
    %cst_77 = arith.constant dense<0.000000e+00> : vector<8xf32>
    %186 = vector.multi_reduction <add>, %185, %cst_77 [1] : vector<8x8xf32> to vector<8xf32>
    %187 = vector.shape_cast %186 : vector<8xf32> to vector<8x1xf32>
    %188 = tpu.reciprocal %187 {approx = true} : vector<8x1xf32> -> vector<8x1xf32>
    %189 = vector.broadcast %188 : vector<8x1xf32> to vector<8x8xf32>
    %190 = arith.mulf %185, %189 : vector<8x8xf32>
    %191 = arith.truncf %190 : vector<8x8xf32> to vector<8x8xbf16>
    %192 = vector.extract_strided_slice %140 {offsets = [0, 16], sizes = [8, 8], strides = [1, 1]} : vector<8x32xbf16> to vector<8x8xbf16>
    %cst_78 = arith.constant dense<0.000000e+00> : vector<8x8xf32>
    %193 = tpu.matmul %191, %192, %cst_78 {dimension_numbers = #tpu.dot_dimension_numbers<[1], [0], [0], [1], [0, 0, 1, 1], [], []>} : vector<8x8xbf16>, vector<8x8xbf16>, vector<8x8xf32> -> vector<8x8xf32>
    %c8_79 = arith.constant 8 : index
    %c16_80 = arith.constant 16 : index
    %194 = vector.load %arg34[%c8_79, %c16_80] : memref<16x32xf32, #tpu.memory_space<vmem>>, vector<8x8xf32>
    tpu.vector_store %arg34[%c8_79, %c16_80], %193 {strides = array<i32>} : memref<16x32xf32, #tpu.memory_space<vmem>>, vector<8x8xf32>,
    %195 = vector.extract_strided_slice %138 {offsets = [0, 24], sizes = [8, 8], strides = [1, 1]} : vector<8x32xbf16> to vector<8x8xbf16>
    %196 = vector.extract_strided_slice %139 {offsets = [0, 24], sizes = [8, 8], strides = [1, 1]} : vector<8x32xbf16> to vector<8x8xbf16>
    "tpu.trace_start"() <{level = 10 : i32, message = "ld,sd->ls"}> : () -> ()
    %cst_81 = arith.constant dense<0.000000e+00> : vector<8x8xf32>
    %197 = tpu.matmul %195, %196, %cst_81 {dimension_numbers = #tpu.dot_dimension_numbers<[1], [1], [0], [0], [0, 0, 1, 0], [], []>} : vector<8x8xbf16>, vector<8x8xbf16>, vector<8x8xf32> -> vector<8x8xf32>
    "tpu.trace_stop"() : () -> ()
    %198 = arith.addf %197, %137 : vector<8x8xf32>
    %cst_82 = arith.constant dense<0xFF800000> : vector<8xf32>
    %199 = vector.multi_reduction <maximumf>, %198, %cst_82 [1] : vector<8x8xf32> to vector<8xf32>
    %200 = vector.shape_cast %199 : vector<8xf32> to vector<8x1xf32>
    %201 = vector.broadcast %200 : vector<8x1xf32> to vector<8x8xf32>
    %202 = arith.subf %198, %201 : vector<8x8xf32>
    %203 = math.exp %202 : vector<8x8xf32>
    %cst_83 = arith.constant dense<0.000000e+00> : vector<8xf32>
    %204 = vector.multi_reduction <add>, %203, %cst_83 [1] : vector<8x8xf32> to vector<8xf32>
    %205 = vector.shape_cast %204 : vector<8xf32> to vector<8x1xf32>
    %206 = tpu.reciprocal %205 {approx = true} : vector<8x1xf32> -> vector<8x1xf32>
    %207 = vector.broadcast %206 : vector<8x1xf32> to vector<8x8xf32>
    %208 = arith.mulf %203, %207 : vector<8x8xf32>
    %209 = arith.truncf %208 : vector<8x8xf32> to vector<8x8xbf16>
    %210 = vector.extract_strided_slice %140 {offsets = [0, 24], sizes = [8, 8], strides = [1, 1]} : vector<8x32xbf16> to vector<8x8xbf16>
    %cst_84 = arith.constant dense<0.000000e+00> : vector<8x8xf32>
    %211 = tpu.matmul %209, %210, %cst_84 {dimension_numbers = #tpu.dot_dimension_numbers<[1], [0], [0], [1], [0, 0, 1, 1], [], []>} : vector<8x8xbf16>, vector<8x8xbf16>, vector<8x8xf32> -> vector<8x8xf32>
    %c8_85 = arith.constant 8 : index
    %c24_86 = arith.constant 24 : index
    %212 = vector.load %arg34[%c8_85, %c24_86] : memref<16x32xf32, #tpu.memory_space<vmem>>, vector<8x8xf32>
    tpu.vector_store %arg34[%c8_85, %c24_86], %211 {strides = array<i32>} : memref<16x32xf32, #tpu.memory_space<vmem>>, vector<8x8xf32>,
    %c0_87 = arith.constant 0 : index
    %c0_88 = arith.constant 0 : index
    %213 = vector.load %arg34[%c0_87, %c0_88] : memref<16x32xf32, #tpu.memory_space<vmem>>, vector<16x32xf32>
    %214 = arith.truncf %213 : vector<16x32xf32> to vector<16x32xbf16>
    %c0_89 = arith.constant 0 : index
    %c0_90 = arith.constant 0 : index
    %215 = vector.load %arg13[%c0_89, %c0_90] : memref<32x32xbf16, #tpu.memory_space<vmem>>, vector<32x32xbf16>
    %cst_91 = arith.constant dense<0.000000e+00> : vector<16x32xf32>
    %216 = tpu.matmul %214, %215, %cst_91 {dimension_numbers = #tpu.dot_dimension_numbers<[1], [0], [0], [1], [0, 0, 1, 1], [], []>} : vector<16x32xbf16>, vector<32x32xbf16>, vector<16x32xf32> -> vector<16x32xf32>
    %c0_92 = arith.constant 0 : index
    %c0_93 = arith.constant 0 : index
    %217 = vector.load %arg14[%c0_92, %c0_93] : memref<1x32xf32, #tpu.memory_space<vmem>>, vector<1x32xf32>
    %218 = vector.broadcast %217 : vector<1x32xf32> to vector<16x32xf32>
    %219 = arith.addf %216, %218 : vector<16x32xf32>
    %220 = arith.addf %1, %219 : vector<16x32xf32>
    %c0_94 = arith.constant 0 : index
    %c0_95 = arith.constant 0 : index
    %221 = vector.load %arg15[%c0_94, %c0_95] : memref<1x32xf32, #tpu.memory_space<vmem>>, vector<1x32xf32>
    %c0_96 = arith.constant 0 : index
    %c0_97 = arith.constant 0 : index
    %222 = vector.load %arg16[%c0_96, %c0_97] : memref<1x32xf32, #tpu.memory_space<vmem>>, vector<1x32xf32>
    %cst_98 = arith.constant dense<0.000000e+00> : vector<16xf32>
    %223 = vector.multi_reduction <add>, %220, %cst_98 [1] : vector<16x32xf32> to vector<16xf32>
    %224 = vector.shape_cast %223 : vector<16xf32> to vector<16x1xf32>
    %cst_99 = arith.constant 3.200000e+01 : f32
    %225 = vector.broadcast %cst_99 : f32 to vector<16x1xf32>
    %226 = arith.divf %224, %225 : vector<16x1xf32>
    %227 = vector.broadcast %226 : vector<16x1xf32> to vector<16x32xf32>
    %228 = arith.subf %220, %227 : vector<16x32xf32>
    %229 = arith.mulf %228, %228 : vector<16x32xf32>
    %cst_100 = arith.constant dense<0.000000e+00> : vector<16xf32>
    %230 = vector.multi_reduction <add>, %229, %cst_100 [1] : vector<16x32xf32> to vector<16xf32>
    %231 = vector.shape_cast %230 : vector<16xf32> to vector<16x1xf32>
    %cst_101 = arith.constant 0.0322580636 : f32
    %232 = vector.broadcast %cst_101 : f32 to vector<16x1xf32>
    %233 = arith.mulf %231, %232 : vector<16x1xf32>
    %234 = math.sqrt %233 : vector<16x1xf32>
    %cst_102 = arith.constant 9.99999997E-7 : f32
    %235 = vector.broadcast %cst_102 : f32 to vector<16x1xf32>
    %236 = arith.addf %234, %235 : vector<16x1xf32>
    %cst_103 = arith.constant 1.000000e+00 : f32
    %237 = vector.broadcast %cst_103 : f32 to vector<16x1xf32>
    %238 = arith.divf %237, %236 : vector<16x1xf32>
    %239 = vector.broadcast %221 : vector<1x32xf32> to vector<16x32xf32>
    %240 = vector.broadcast %238 : vector<16x1xf32> to vector<16x32xf32>
    %241 = arith.mulf %239, %240 : vector<16x32xf32>
    %242 = arith.mulf %241, %228 : vector<16x32xf32>
    %243 = vector.broadcast %222 : vector<1x32xf32> to vector<16x32xf32>
    %244 = arith.addf %242, %243 : vector<16x32xf32>
    %245 = arith.truncf %244 : vector<16x32xf32> to vector<16x32xbf16>
    %c0_104 = arith.constant 0 : index
    %c0_105 = arith.constant 0 : index
    %246 = vector.load %arg17[%c0_104, %c0_105] : memref<32x32xbf16, #tpu.memory_space<vmem>>, vector<32x32xbf16>
    %cst_106 = arith.constant dense<0.000000e+00> : vector<16x32xf32>
    %247 = tpu.matmul %245, %246, %cst_106 {dimension_numbers = #tpu.dot_dimension_numbers<[1], [0], [0], [1], [0, 0, 1, 1], [], []>} : vector<16x32xbf16>, vector<32x32xbf16>, vector<16x32xf32> -> vector<16x32xf32>
    %c0_107 = arith.constant 0 : index
    %c0_108 = arith.constant 0 : index
    %248 = vector.load %arg18[%c0_107, %c0_108] : memref<1x32xf32, #tpu.memory_space<vmem>>, vector<1x32xf32>
    %249 = vector.broadcast %248 : vector<1x32xf32> to vector<16x32xf32>
    %250 = arith.addf %247, %249 : vector<16x32xf32>
    %cst_109 = arith.constant 0.353553385 : f32
    %251 = vector.broadcast %cst_109 : f32 to vector<16x32xf32>
    %252 = arith.mulf %250, %251 : vector<16x32xf32>
    %253 = arith.truncf %252 : vector<16x32xf32> to vector<16x32xbf16>
    %c0_110 = arith.constant 0 : index
    %c0_111 = arith.constant 0 : index
    %254 = vector.load %arg19[%c0_110, %c0_111] : memref<32x32xbf16, #tpu.memory_space<vmem>>, vector<32x32xbf16>
    %cst_112 = arith.constant dense<0.000000e+00> : vector<32x32xf32>
    %255 = tpu.matmul %3, %254, %cst_112 {dimension_numbers = #tpu.dot_dimension_numbers<[1], [0], [0], [1], [0, 0, 1, 1], [], []>} : vector<32x32xbf16>, vector<32x32xbf16>, vector<32x32xf32> -> vector<32x32xf32>
    %c0_113 = arith.constant 0 : index
    %c0_114 = arith.constant 0 : index
    %256 = vector.load %arg20[%c0_113, %c0_114] : memref<1x32xf32, #tpu.memory_space<vmem>>, vector<1x32xf32>
    %257 = vector.broadcast %256 : vector<1x32xf32> to vector<32x32xf32>
    %258 = arith.addf %255, %257 : vector<32x32xf32>
    %259 = arith.truncf %258 : vector<32x32xf32> to vector<32x32xbf16>
    %c0_115 = arith.constant 0 : index
    %c0_116 = arith.constant 0 : index
    %260 = vector.load %arg21[%c0_115, %c0_116] : memref<32x32xbf16, #tpu.memory_space<vmem>>, vector<32x32xbf16>
    %cst_117 = arith.constant dense<0.000000e+00> : vector<32x32xf32>
    %261 = tpu.matmul %3, %260, %cst_117 {dimension_numbers = #tpu.dot_dimension_numbers<[1], [0], [0], [1], [0, 0, 1, 1], [], []>} : vector<32x32xbf16>, vector<32x32xbf16>, vector<32x32xf32> -> vector<32x32xf32>
    %c0_118 = arith.constant 0 : index
    %c0_119 = arith.constant 0 : index
    %262 = vector.load %arg22[%c0_118, %c0_119] : memref<1x32xf32, #tpu.memory_space<vmem>>, vector<1x32xf32>
    %263 = vector.broadcast %262 : vector<1x32xf32> to vector<32x32xf32>
    %264 = arith.addf %261, %263 : vector<32x32xf32>
    %265 = arith.truncf %264 : vector<32x32xf32> to vector<32x32xbf16>
    %266 = vector.extract_strided_slice %15 {offsets = [0, 0, 0], sizes = [1, 1, 16], strides = [1, 1, 1]} : vector<2x1x16xf32> to vector<1x1x16xf32>
    %267 = vector.shape_cast %266 : vector<1x1x16xf32> to vector<1x16xf32>
    %268 = vector.extract_strided_slice %253 {offsets = [0, 0], sizes = [8, 32], strides = [1, 1]} : vector<16x32xbf16> to vector<8x32xbf16>
    %269 = vector.extract_strided_slice %259 {offsets = [0, 0], sizes = [16, 32], strides = [1, 1]} : vector<32x32xbf16> to vector<16x32xbf16>
    %270 = vector.extract_strided_slice %265 {offsets = [0, 0], sizes = [16, 32], strides = [1, 1]} : vector<32x32xbf16> to vector<16x32xbf16>
    %271 = vector.extract_strided_slice %268 {offsets = [0, 0], sizes = [8, 8], strides = [1, 1]} : vector<8x32xbf16> to vector<8x8xbf16>
    %272 = vector.extract_strided_slice %269 {offsets = [0, 0], sizes = [16, 8], strides = [1, 1]} : vector<16x32xbf16> to vector<16x8xbf16>
    "tpu.trace_start"() <{level = 10 : i32, message = "ld,sd->ls"}> : () -> ()
    %cst_120 = arith.constant dense<0.000000e+00> : vector<8x16xf32>
    %273 = tpu.matmul %271, %272, %cst_120 {dimension_numbers = #tpu.dot_dimension_numbers<[1], [1], [0], [0], [0, 0, 1, 0], [], []>} : vector<8x8xbf16>, vector<16x8xbf16>, vector<8x16xf32> -> vector<8x16xf32>
    "tpu.trace_stop"() : () -> ()
    %274 = vector.broadcast %267 : vector<1x16xf32> to vector<8x16xf32>
    %275 = arith.addf %273, %274 : vector<8x16xf32>
    %cst_121 = arith.constant dense<0xFF800000> : vector<8xf32>
    %276 = vector.multi_reduction <maximumf>, %275, %cst_121 [1] : vector<8x16xf32> to vector<8xf32>
    %277 = vector.shape_cast %276 : vector<8xf32> to vector<8x1xf32>
    %278 = vector.broadcast %277 : vector<8x1xf32> to vector<8x16xf32>
    %279 = arith.subf %275, %278 : vector<8x16xf32>
    %280 = math.exp %279 : vector<8x16xf32>
    %cst_122 = arith.constant dense<0.000000e+00> : vector<8xf32>
    %281 = vector.multi_reduction <add>, %280, %cst_122 [1] : vector<8x16xf32> to vector<8xf32>
    %282 = vector.shape_cast %281 : vector<8xf32> to vector<8x1xf32>
    %283 = tpu.reciprocal %282 {approx = true} : vector<8x1xf32> -> vector<8x1xf32>
    %284 = vector.broadcast %283 : vector<8x1xf32> to vector<8x16xf32>
    %285 = arith.mulf %280, %284 : vector<8x16xf32>
    %286 = arith.truncf %285 : vector<8x16xf32> to vector<8x16xbf16>
    %287 = vector.extract_strided_slice %270 {offsets = [0, 0], sizes = [16, 8], strides = [1, 1]} : vector<16x32xbf16> to vector<16x8xbf16>
    %cst_123 = arith.constant dense<0.000000e+00> : vector<8x8xf32>
    %288 = tpu.matmul %286, %287, %cst_123 {dimension_numbers = #tpu.dot_dimension_numbers<[1], [0], [0], [1], [0, 0, 1, 1], [], []>} : vector<8x16xbf16>, vector<16x8xbf16>, vector<8x8xf32> -> vector<8x8xf32>
    %c0_124 = arith.constant 0 : index
    %c0_125 = arith.constant 0 : index
    %289 = vector.load %arg34[%c0_124, %c0_125] : memref<16x32xf32, #tpu.memory_space<vmem>>, vector<8x8xf32>
    tpu.vector_store %arg34[%c0_124, %c0_125], %288 {strides = array<i32>} : memref<16x32xf32, #tpu.memory_space<vmem>>, vector<8x8xf32>,
    %290 = vector.extract_strided_slice %268 {offsets = [0, 8], sizes = [8, 8], strides = [1, 1]} : vector<8x32xbf16> to vector<8x8xbf16>
    %291 = vector.extract_strided_slice %269 {offsets = [0, 8], sizes = [16, 8], strides = [1, 1]} : vector<16x32xbf16> to vector<16x8xbf16>
    "tpu.trace_start"() <{level = 10 : i32, message = "ld,sd->ls"}> : () -> ()
    %cst_126 = arith.constant dense<0.000000e+00> : vector<8x16xf32>
    %292 = tpu.matmul %290, %291, %cst_126 {dimension_numbers = #tpu.dot_dimension_numbers<[1], [1], [0], [0], [0, 0, 1, 0], [], []>} : vector<8x8xbf16>, vector<16x8xbf16>, vector<8x16xf32> -> vector<8x16xf32>
    "tpu.trace_stop"() : () -> ()
    %293 = vector.broadcast %267 : vector<1x16xf32> to vector<8x16xf32>
    %294 = arith.addf %292, %293 : vector<8x16xf32>
    %cst_127 = arith.constant dense<0xFF800000> : vector<8xf32>
    %295 = vector.multi_reduction <maximumf>, %294, %cst_127 [1] : vector<8x16xf32> to vector<8xf32>
    %296 = vector.shape_cast %295 : vector<8xf32> to vector<8x1xf32>
    %297 = vector.broadcast %296 : vector<8x1xf32> to vector<8x16xf32>
    %298 = arith.subf %294, %297 : vector<8x16xf32>
    %299 = math.exp %298 : vector<8x16xf32>
    %cst_128 = arith.constant dense<0.000000e+00> : vector<8xf32>
    %300 = vector.multi_reduction <add>, %299, %cst_128 [1] : vector<8x16xf32> to vector<8xf32>
    %301 = vector.shape_cast %300 : vector<8xf32> to vector<8x1xf32>
    %302 = tpu.reciprocal %301 {approx = true} : vector<8x1xf32> -> vector<8x1xf32>
    %303 = vector.broadcast %302 : vector<8x1xf32> to vector<8x16xf32>
    %304 = arith.mulf %299, %303 : vector<8x16xf32>
    %305 = arith.truncf %304 : vector<8x16xf32> to vector<8x16xbf16>
    %306 = vector.extract_strided_slice %270 {offsets = [0, 8], sizes = [16, 8], strides = [1, 1]} : vector<16x32xbf16> to vector<16x8xbf16>
    %cst_129 = arith.constant dense<0.000000e+00> : vector<8x8xf32>
    %307 = tpu.matmul %305, %306, %cst_129 {dimension_numbers = #tpu.dot_dimension_numbers<[1], [0], [0], [1], [0, 0, 1, 1], [], []>} : vector<8x16xbf16>, vector<16x8xbf16>, vector<8x8xf32> -> vector<8x8xf32>
    %c0_130 = arith.constant 0 : index
    %c8_131 = arith.constant 8 : index
    %308 = vector.load %arg34[%c0_130, %c8_131] : memref<16x32xf32, #tpu.memory_space<vmem>>, vector<8x8xf32>
    tpu.vector_store %arg34[%c0_130, %c8_131], %307 {strides = array<i32>} : memref<16x32xf32, #tpu.memory_space<vmem>>, vector<8x8xf32>,
    %309 = vector.extract_strided_slice %268 {offsets = [0, 16], sizes = [8, 8], strides = [1, 1]} : vector<8x32xbf16> to vector<8x8xbf16>
    %310 = vector.extract_strided_slice %269 {offsets = [0, 16], sizes = [16, 8], strides = [1, 1]} : vector<16x32xbf16> to vector<16x8xbf16>
    "tpu.trace_start"() <{level = 10 : i32, message = "ld,sd->ls"}> : () -> ()
    %cst_132 = arith.constant dense<0.000000e+00> : vector<8x16xf32>
    %311 = tpu.matmul %309, %310, %cst_132 {dimension_numbers = #tpu.dot_dimension_numbers<[1], [1], [0], [0], [0, 0, 1, 0], [], []>} : vector<8x8xbf16>, vector<16x8xbf16>, vector<8x16xf32> -> vector<8x16xf32>
    "tpu.trace_stop"() : () -> ()
    %312 = vector.broadcast %267 : vector<1x16xf32> to vector<8x16xf32>
    %313 = arith.addf %311, %312 : vector<8x16xf32>
    %cst_133 = arith.constant dense<0xFF800000> : vector<8xf32>
    %314 = vector.multi_reduction <maximumf>, %313, %cst_133 [1] : vector<8x16xf32> to vector<8xf32>
    %315 = vector.shape_cast %314 : vector<8xf32> to vector<8x1xf32>
    %316 = vector.broadcast %315 : vector<8x1xf32> to vector<8x16xf32>
    %317 = arith.subf %313, %316 : vector<8x16xf32>
    %318 = math.exp %317 : vector<8x16xf32>
    %cst_134 = arith.constant dense<0.000000e+00> : vector<8xf32>
    %319 = vector.multi_reduction <add>, %318, %cst_134 [1] : vector<8x16xf32> to vector<8xf32>
    %320 = vector.shape_cast %319 : vector<8xf32> to vector<8x1xf32>
    %321 = tpu.reciprocal %320 {approx = true} : vector<8x1xf32> -> vector<8x1xf32>
    %322 = vector.broadcast %321 : vector<8x1xf32> to vector<8x16xf32>
    %323 = arith.mulf %318, %322 : vector<8x16xf32>
    %324 = arith.truncf %323 : vector<8x16xf32> to vector<8x16xbf16>
    %325 = vector.extract_strided_slice %270 {offsets = [0, 16], sizes = [16, 8], strides = [1, 1]} : vector<16x32xbf16> to vector<16x8xbf16>
    %cst_135 = arith.constant dense<0.000000e+00> : vector<8x8xf32>
    %326 = tpu.matmul %324, %325, %cst_135 {dimension_numbers = #tpu.dot_dimension_numbers<[1], [0], [0], [1], [0, 0, 1, 1], [], []>} : vector<8x16xbf16>, vector<16x8xbf16>, vector<8x8xf32> -> vector<8x8xf32>
    %c0_136 = arith.constant 0 : index
    %c16_137 = arith.constant 16 : index
    %327 = vector.load %arg34[%c0_136, %c16_137] : memref<16x32xf32, #tpu.memory_space<vmem>>, vector<8x8xf32>
    tpu.vector_store %arg34[%c0_136, %c16_137], %326 {strides = array<i32>} : memref<16x32xf32, #tpu.memory_space<vmem>>, vector<8x8xf32>,
    %328 = vector.extract_strided_slice %268 {offsets = [0, 24], sizes = [8, 8], strides = [1, 1]} : vector<8x32xbf16> to vector<8x8xbf16>
    %329 = vector.extract_strided_slice %269 {offsets = [0, 24], sizes = [16, 8], strides = [1, 1]} : vector<16x32xbf16> to vector<16x8xbf16>
    "tpu.trace_start"() <{level = 10 : i32, message = "ld,sd->ls"}> : () -> ()
    %cst_138 = arith.constant dense<0.000000e+00> : vector<8x16xf32>
    %330 = tpu.matmul %328, %329, %cst_138 {dimension_numbers = #tpu.dot_dimension_numbers<[1], [1], [0], [0], [0, 0, 1, 0], [], []>} : vector<8x8xbf16>, vector<16x8xbf16>, vector<8x16xf32> -> vector<8x16xf32>
    "tpu.trace_stop"() : () -> ()
    %331 = vector.broadcast %267 : vector<1x16xf32> to vector<8x16xf32>
    %332 = arith.addf %330, %331 : vector<8x16xf32>
    %cst_139 = arith.constant dense<0xFF800000> : vector<8xf32>
    %333 = vector.multi_reduction <maximumf>, %332, %cst_139 [1] : vector<8x16xf32> to vector<8xf32>
    %334 = vector.shape_cast %333 : vector<8xf32> to vector<8x1xf32>
    %335 = vector.broadcast %334 : vector<8x1xf32> to vector<8x16xf32>
    %336 = arith.subf %332, %335 : vector<8x16xf32>
    %337 = math.exp %336 : vector<8x16xf32>
    %cst_140 = arith.constant dense<0.000000e+00> : vector<8xf32>
    %338 = vector.multi_reduction <add>, %337, %cst_140 [1] : vector<8x16xf32> to vector<8xf32>
    %339 = vector.shape_cast %338 : vector<8xf32> to vector<8x1xf32>
    %340 = tpu.reciprocal %339 {approx = true} : vector<8x1xf32> -> vector<8x1xf32>
    %341 = vector.broadcast %340 : vector<8x1xf32> to vector<8x16xf32>
    %342 = arith.mulf %337, %341 : vector<8x16xf32>
    %343 = arith.truncf %342 : vector<8x16xf32> to vector<8x16xbf16>
    %344 = vector.extract_strided_slice %270 {offsets = [0, 24], sizes = [16, 8], strides = [1, 1]} : vector<16x32xbf16> to vector<16x8xbf16>
    %cst_141 = arith.constant dense<0.000000e+00> : vector<8x8xf32>
    %345 = tpu.matmul %343, %344, %cst_141 {dimension_numbers = #tpu.dot_dimension_numbers<[1], [0], [0], [1], [0, 0, 1, 1], [], []>} : vector<8x16xbf16>, vector<16x8xbf16>, vector<8x8xf32> -> vector<8x8xf32>
    %c0_142 = arith.constant 0 : index
    %c24_143 = arith.constant 24 : index
    %346 = vector.load %arg34[%c0_142, %c24_143] : memref<16x32xf32, #tpu.memory_space<vmem>>, vector<8x8xf32>
    tpu.vector_store %arg34[%c0_142, %c24_143], %345 {strides = array<i32>} : memref<16x32xf32, #tpu.memory_space<vmem>>, vector<8x8xf32>,
    %347 = vector.extract_strided_slice %15 {offsets = [1, 0, 0], sizes = [1, 1, 16], strides = [1, 1, 1]} : vector<2x1x16xf32> to vector<1x1x16xf32>
    %348 = vector.shape_cast %347 : vector<1x1x16xf32> to vector<1x16xf32>
    %349 = vector.extract_strided_slice %253 {offsets = [8, 0], sizes = [8, 32], strides = [1, 1]} : vector<16x32xbf16> to vector<8x32xbf16>
    %350 = vector.extract_strided_slice %259 {offsets = [16, 0], sizes = [16, 32], strides = [1, 1]} : vector<32x32xbf16> to vector<16x32xbf16>
    %351 = vector.extract_strided_slice %265 {offsets = [16, 0], sizes = [16, 32], strides = [1, 1]} : vector<32x32xbf16> to vector<16x32xbf16>
    %352 = vector.extract_strided_slice %349 {offsets = [0, 0], sizes = [8, 8], strides = [1, 1]} : vector<8x32xbf16> to vector<8x8xbf16>
    %353 = vector.extract_strided_slice %350 {offsets = [0, 0], sizes = [16, 8], strides = [1, 1]} : vector<16x32xbf16> to vector<16x8xbf16>
    "tpu.trace_start"() <{level = 10 : i32, message = "ld,sd->ls"}> : () -> ()
    %cst_144 = arith.constant dense<0.000000e+00> : vector<8x16xf32>
    %354 = tpu.matmul %352, %353, %cst_144 {dimension_numbers = #tpu.dot_dimension_numbers<[1], [1], [0], [0], [0, 0, 1, 0], [], []>} : vector<8x8xbf16>, vector<16x8xbf16>, vector<8x16xf32> -> vector<8x16xf32>
    "tpu.trace_stop"() : () -> ()
    %355 = vector.broadcast %348 : vector<1x16xf32> to vector<8x16xf32>
    %356 = arith.addf %354, %355 : vector<8x16xf32>
    %cst_145 = arith.constant dense<0xFF800000> : vector<8xf32>
    %357 = vector.multi_reduction <maximumf>, %356, %cst_145 [1] : vector<8x16xf32> to vector<8xf32>
    %358 = vector.shape_cast %357 : vector<8xf32> to vector<8x1xf32>
    %359 = vector.broadcast %358 : vector<8x1xf32> to vector<8x16xf32>
    %360 = arith.subf %356, %359 : vector<8x16xf32>
    %361 = math.exp %360 : vector<8x16xf32>
    %cst_146 = arith.constant dense<0.000000e+00> : vector<8xf32>
    %362 = vector.multi_reduction <add>, %361, %cst_146 [1] : vector<8x16xf32> to vector<8xf32>
    %363 = vector.shape_cast %362 : vector<8xf32> to vector<8x1xf32>
    %364 = tpu.reciprocal %363 {approx = true} : vector<8x1xf32> -> vector<8x1xf32>
    %365 = vector.broadcast %364 : vector<8x1xf32> to vector<8x16xf32>
    %366 = arith.mulf %361, %365 : vector<8x16xf32>
    %367 = arith.truncf %366 : vector<8x16xf32> to vector<8x16xbf16>
    %368 = vector.extract_strided_slice %351 {offsets = [0, 0], sizes = [16, 8], strides = [1, 1]} : vector<16x32xbf16> to vector<16x8xbf16>
    %cst_147 = arith.constant dense<0.000000e+00> : vector<8x8xf32>
    %369 = tpu.matmul %367, %368, %cst_147 {dimension_numbers = #tpu.dot_dimension_numbers<[1], [0], [0], [1], [0, 0, 1, 1], [], []>} : vector<8x16xbf16>, vector<16x8xbf16>, vector<8x8xf32> -> vector<8x8xf32>
    %c8_148 = arith.constant 8 : index
    %c0_149 = arith.constant 0 : index
    %370 = vector.load %arg34[%c8_148, %c0_149] : memref<16x32xf32, #tpu.memory_space<vmem>>, vector<8x8xf32>
    tpu.vector_store %arg34[%c8_148, %c0_149], %369 {strides = array<i32>} : memref<16x32xf32, #tpu.memory_space<vmem>>, vector<8x8xf32>,
    %371 = vector.extract_strided_slice %349 {offsets = [0, 8], sizes = [8, 8], strides = [1, 1]} : vector<8x32xbf16> to vector<8x8xbf16>
    %372 = vector.extract_strided_slice %350 {offsets = [0, 8], sizes = [16, 8], strides = [1, 1]} : vector<16x32xbf16> to vector<16x8xbf16>
    "tpu.trace_start"() <{level = 10 : i32, message = "ld,sd->ls"}> : () -> ()
    %cst_150 = arith.constant dense<0.000000e+00> : vector<8x16xf32>
    %373 = tpu.matmul %371, %372, %cst_150 {dimension_numbers = #tpu.dot_dimension_numbers<[1], [1], [0], [0], [0, 0, 1, 0], [], []>} : vector<8x8xbf16>, vector<16x8xbf16>, vector<8x16xf32> -> vector<8x16xf32>
    "tpu.trace_stop"() : () -> ()
    %374 = vector.broadcast %348 : vector<1x16xf32> to vector<8x16xf32>
    %375 = arith.addf %373, %374 : vector<8x16xf32>
    %cst_151 = arith.constant dense<0xFF800000> : vector<8xf32>
    %376 = vector.multi_reduction <maximumf>, %375, %cst_151 [1] : vector<8x16xf32> to vector<8xf32>
    %377 = vector.shape_cast %376 : vector<8xf32> to vector<8x1xf32>
    %378 = vector.broadcast %377 : vector<8x1xf32> to vector<8x16xf32>
    %379 = arith.subf %375, %378 : vector<8x16xf32>
    %380 = math.exp %379 : vector<8x16xf32>
    %cst_152 = arith.constant dense<0.000000e+00> : vector<8xf32>
    %381 = vector.multi_reduction <add>, %380, %cst_152 [1] : vector<8x16xf32> to vector<8xf32>
    %382 = vector.shape_cast %381 : vector<8xf32> to vector<8x1xf32>
    %383 = tpu.reciprocal %382 {approx = true} : vector<8x1xf32> -> vector<8x1xf32>
    %384 = vector.broadcast %383 : vector<8x1xf32> to vector<8x16xf32>
    %385 = arith.mulf %380, %384 : vector<8x16xf32>
    %386 = arith.truncf %385 : vector<8x16xf32> to vector<8x16xbf16>
    %387 = vector.extract_strided_slice %351 {offsets = [0, 8], sizes = [16, 8], strides = [1, 1]} : vector<16x32xbf16> to vector<16x8xbf16>
    %cst_153 = arith.constant dense<0.000000e+00> : vector<8x8xf32>
    %388 = tpu.matmul %386, %387, %cst_153 {dimension_numbers = #tpu.dot_dimension_numbers<[1], [0], [0], [1], [0, 0, 1, 1], [], []>} : vector<8x16xbf16>, vector<16x8xbf16>, vector<8x8xf32> -> vector<8x8xf32>
    %c8_154 = arith.constant 8 : index
    %c8_155 = arith.constant 8 : index
    %389 = vector.load %arg34[%c8_154, %c8_155] : memref<16x32xf32, #tpu.memory_space<vmem>>, vector<8x8xf32>
    tpu.vector_store %arg34[%c8_154, %c8_155], %388 {strides = array<i32>} : memref<16x32xf32, #tpu.memory_space<vmem>>, vector<8x8xf32>,
    %390 = vector.extract_strided_slice %349 {offsets = [0, 16], sizes = [8, 8], strides = [1, 1]} : vector<8x32xbf16> to vector<8x8xbf16>
    %391 = vector.extract_strided_slice %350 {offsets = [0, 16], sizes = [16, 8], strides = [1, 1]} : vector<16x32xbf16> to vector<16x8xbf16>
    "tpu.trace_start"() <{level = 10 : i32, message = "ld,sd->ls"}> : () -> ()
    %cst_156 = arith.constant dense<0.000000e+00> : vector<8x16xf32>
    %392 = tpu.matmul %390, %391, %cst_156 {dimension_numbers = #tpu.dot_dimension_numbers<[1], [1], [0], [0], [0, 0, 1, 0], [], []>} : vector<8x8xbf16>, vector<16x8xbf16>, vector<8x16xf32> -> vector<8x16xf32>
    "tpu.trace_stop"() : () -> ()
    %393 = vector.broadcast %348 : vector<1x16xf32> to vector<8x16xf32>
    %394 = arith.addf %392, %393 : vector<8x16xf32>
    %cst_157 = arith.constant dense<0xFF800000> : vector<8xf32>
    %395 = vector.multi_reduction <maximumf>, %394, %cst_157 [1] : vector<8x16xf32> to vector<8xf32>
    %396 = vector.shape_cast %395 : vector<8xf32> to vector<8x1xf32>
    %397 = vector.broadcast %396 : vector<8x1xf32> to vector<8x16xf32>
    %398 = arith.subf %394, %397 : vector<8x16xf32>
    %399 = math.exp %398 : vector<8x16xf32>
    %cst_158 = arith.constant dense<0.000000e+00> : vector<8xf32>
    %400 = vector.multi_reduction <add>, %399, %cst_158 [1] : vector<8x16xf32> to vector<8xf32>
    %401 = vector.shape_cast %400 : vector<8xf32> to vector<8x1xf32>
    %402 = tpu.reciprocal %401 {approx = true} : vector<8x1xf32> -> vector<8x1xf32>
    %403 = vector.broadcast %402 : vector<8x1xf32> to vector<8x16xf32>
    %404 = arith.mulf %399, %403 : vector<8x16xf32>
    %405 = arith.truncf %404 : vector<8x16xf32> to vector<8x16xbf16>
    %406 = vector.extract_strided_slice %351 {offsets = [0, 16], sizes = [16, 8], strides = [1, 1]} : vector<16x32xbf16> to vector<16x8xbf16>
    %cst_159 = arith.constant dense<0.000000e+00> : vector<8x8xf32>
    %407 = tpu.matmul %405, %406, %cst_159 {dimension_numbers = #tpu.dot_dimension_numbers<[1], [0], [0], [1], [0, 0, 1, 1], [], []>} : vector<8x16xbf16>, vector<16x8xbf16>, vector<8x8xf32> -> vector<8x8xf32>
    %c8_160 = arith.constant 8 : index
    %c16_161 = arith.constant 16 : index
    %408 = vector.load %arg34[%c8_160, %c16_161] : memref<16x32xf32, #tpu.memory_space<vmem>>, vector<8x8xf32>
    tpu.vector_store %arg34[%c8_160, %c16_161], %407 {strides = array<i32>} : memref<16x32xf32, #tpu.memory_space<vmem>>, vector<8x8xf32>,
    %409 = vector.extract_strided_slice %349 {offsets = [0, 24], sizes = [8, 8], strides = [1, 1]} : vector<8x32xbf16> to vector<8x8xbf16>
    %410 = vector.extract_strided_slice %350 {offsets = [0, 24], sizes = [16, 8], strides = [1, 1]} : vector<16x32xbf16> to vector<16x8xbf16>
    "tpu.trace_start"() <{level = 10 : i32, message = "ld,sd->ls"}> : () -> ()
    %cst_162 = arith.constant dense<0.000000e+00> : vector<8x16xf32>
    %411 = tpu.matmul %409, %410, %cst_162 {dimension_numbers = #tpu.dot_dimension_numbers<[1], [1], [0], [0], [0, 0, 1, 0], [], []>} : vector<8x8xbf16>, vector<16x8xbf16>, vector<8x16xf32> -> vector<8x16xf32>
    "tpu.trace_stop"() : () -> ()
    %412 = vector.broadcast %348 : vector<1x16xf32> to vector<8x16xf32>
    %413 = arith.addf %411, %412 : vector<8x16xf32>
    %cst_163 = arith.constant dense<0xFF800000> : vector<8xf32>
    %414 = vector.multi_reduction <maximumf>, %413, %cst_163 [1] : vector<8x16xf32> to vector<8xf32>
    %415 = vector.shape_cast %414 : vector<8xf32> to vector<8x1xf32>
    %416 = vector.broadcast %415 : vector<8x1xf32> to vector<8x16xf32>
    %417 = arith.subf %413, %416 : vector<8x16xf32>
    %418 = math.exp %417 : vector<8x16xf32>
    %cst_164 = arith.constant dense<0.000000e+00> : vector<8xf32>
    %419 = vector.multi_reduction <add>, %418, %cst_164 [1] : vector<8x16xf32> to vector<8xf32>
    %420 = vector.shape_cast %419 : vector<8xf32> to vector<8x1xf32>
    %421 = tpu.reciprocal %420 {approx = true} : vector<8x1xf32> -> vector<8x1xf32>
    %422 = vector.broadcast %421 : vector<8x1xf32> to vector<8x16xf32>
    %423 = arith.mulf %418, %422 : vector<8x16xf32>
    %424 = arith.truncf %423 : vector<8x16xf32> to vector<8x16xbf16>
    %425 = vector.extract_strided_slice %351 {offsets = [0, 24], sizes = [16, 8], strides = [1, 1]} : vector<16x32xbf16> to vector<16x8xbf16>
    %cst_165 = arith.constant dense<0.000000e+00> : vector<8x8xf32>
    %426 = tpu.matmul %424, %425, %cst_165 {dimension_numbers = #tpu.dot_dimension_numbers<[1], [0], [0], [1], [0, 0, 1, 1], [], []>} : vector<8x16xbf16>, vector<16x8xbf16>, vector<8x8xf32> -> vector<8x8xf32>
    %c8_166 = arith.constant 8 : index
    %c24_167 = arith.constant 24 : index
    %427 = vector.load %arg34[%c8_166, %c24_167] : memref<16x32xf32, #tpu.memory_space<vmem>>, vector<8x8xf32>
    tpu.vector_store %arg34[%c8_166, %c24_167], %426 {strides = array<i32>} : memref<16x32xf32, #tpu.memory_space<vmem>>, vector<8x8xf32>,
    %c0_168 = arith.constant 0 : index
    %c0_169 = arith.constant 0 : index
    %428 = vector.load %arg34[%c0_168, %c0_169] : memref<16x32xf32, #tpu.memory_space<vmem>>, vector<16x32xf32>
    %429 = arith.truncf %428 : vector<16x32xf32> to vector<16x32xbf16>
    %c0_170 = arith.constant 0 : index
    %c0_171 = arith.constant 0 : index
    %430 = vector.load %arg23[%c0_170, %c0_171] : memref<32x32xbf16, #tpu.memory_space<vmem>>, vector<32x32xbf16>
    %cst_172 = arith.constant dense<0.000000e+00> : vector<16x32xf32>
    %431 = tpu.matmul %429, %430, %cst_172 {dimension_numbers = #tpu.dot_dimension_numbers<[1], [0], [0], [1], [0, 0, 1, 1], [], []>} : vector<16x32xbf16>, vector<32x32xbf16>, vector<16x32xf32> -> vector<16x32xf32>
    %c0_173 = arith.constant 0 : index
    %c0_174 = arith.constant 0 : index
    %432 = vector.load %arg24[%c0_173, %c0_174] : memref<1x32xf32, #tpu.memory_space<vmem>>, vector<1x32xf32>
    %433 = vector.broadcast %432 : vector<1x32xf32> to vector<16x32xf32>
    %434 = arith.addf %431, %433 : vector<16x32xf32>
    %435 = arith.addf %220, %434 : vector<16x32xf32>
    %c0_175 = arith.constant 0 : index
    %c0_176 = arith.constant 0 : index
    %436 = vector.load %arg25[%c0_175, %c0_176] : memref<1x32xf32, #tpu.memory_space<vmem>>, vector<1x32xf32>
    %c0_177 = arith.constant 0 : index
    %c0_178 = arith.constant 0 : index
    %437 = vector.load %arg26[%c0_177, %c0_178] : memref<1x32xf32, #tpu.memory_space<vmem>>, vector<1x32xf32>
    %cst_179 = arith.constant dense<0.000000e+00> : vector<16xf32>
    %438 = vector.multi_reduction <add>, %435, %cst_179 [1] : vector<16x32xf32> to vector<16xf32>
    %439 = vector.shape_cast %438 : vector<16xf32> to vector<16x1xf32>
    %cst_180 = arith.constant 3.200000e+01 : f32
    %440 = vector.broadcast %cst_180 : f32 to vector<16x1xf32>
    %441 = arith.divf %439, %440 : vector<16x1xf32>
    %442 = vector.broadcast %441 : vector<16x1xf32> to vector<16x32xf32>
    %443 = arith.subf %435, %442 : vector<16x32xf32>
    %444 = arith.mulf %443, %443 : vector<16x32xf32>
    %cst_181 = arith.constant dense<0.000000e+00> : vector<16xf32>
    %445 = vector.multi_reduction <add>, %444, %cst_181 [1] : vector<16x32xf32> to vector<16xf32>
    %446 = vector.shape_cast %445 : vector<16xf32> to vector<16x1xf32>
    %cst_182 = arith.constant 0.0322580636 : f32
    %447 = vector.broadcast %cst_182 : f32 to vector<16x1xf32>
    %448 = arith.mulf %446, %447 : vector<16x1xf32>
    %449 = math.sqrt %448 : vector<16x1xf32>
    %cst_183 = arith.constant 9.99999997E-7 : f32
    %450 = vector.broadcast %cst_183 : f32 to vector<16x1xf32>
    %451 = arith.addf %449, %450 : vector<16x1xf32>
    %cst_184 = arith.constant 1.000000e+00 : f32
    %452 = vector.broadcast %cst_184 : f32 to vector<16x1xf32>
    %453 = arith.divf %452, %451 : vector<16x1xf32>
    %454 = vector.broadcast %436 : vector<1x32xf32> to vector<16x32xf32>
    %455 = vector.broadcast %453 : vector<16x1xf32> to vector<16x32xf32>
    %456 = arith.mulf %454, %455 : vector<16x32xf32>
    %457 = arith.mulf %456, %443 : vector<16x32xf32>
    %458 = vector.broadcast %437 : vector<1x32xf32> to vector<16x32xf32>
    %459 = arith.addf %457, %458 : vector<16x32xf32>
    %460 = arith.truncf %459 : vector<16x32xf32> to vector<16x32xbf16>
    %c0_185 = arith.constant 0 : index
    %c0_186 = arith.constant 0 : index
    %461 = vector.load %arg27[%c0_185, %c0_186] : memref<32x64xbf16, #tpu.memory_space<vmem>>, vector<32x64xbf16>
    %cst_187 = arith.constant dense<0.000000e+00> : vector<16x64xf32>
    %462 = tpu.matmul %460, %461, %cst_187 {dimension_numbers = #tpu.dot_dimension_numbers<[1], [0], [0], [1], [0, 0, 1, 1], [], []>} : vector<16x32xbf16>, vector<32x64xbf16>, vector<16x64xf32> -> vector<16x64xf32>
    %c0_188 = arith.constant 0 : index
    %c0_189 = arith.constant 0 : index
    %463 = vector.load %arg28[%c0_188, %c0_189] : memref<1x64xf32, #tpu.memory_space<vmem>>, vector<1x64xf32>
    %464 = vector.broadcast %463 : vector<1x64xf32> to vector<16x64xf32>
    %465 = arith.addf %462, %464 : vector<16x64xf32>
    %cst_190 = arith.constant 0.000000e+00 : f32
    %466 = vector.broadcast %cst_190 : f32 to vector<16x64xf32>
    %467 = arith.maximumf %465, %466 : vector<16x64xf32>
    %468 = arith.truncf %467 : vector<16x64xf32> to vector<16x64xbf16>
    %c0_191 = arith.constant 0 : index
    %c0_192 = arith.constant 0 : index
    %469 = vector.load %arg29[%c0_191, %c0_192] : memref<64x32xbf16, #tpu.memory_space<vmem>>, vector<64x32xbf16>
    %cst_193 = arith.constant dense<0.000000e+00> : vector<16x32xf32>
    %470 = tpu.matmul %468, %469, %cst_193 {dimension_numbers = #tpu.dot_dimension_numbers<[1], [0], [0], [1], [0, 0, 1, 1], [], []>} : vector<16x64xbf16>, vector<64x32xbf16>, vector<16x32xf32> -> vector<16x32xf32>
    %c0_194 = arith.constant 0 : index
    %c0_195 = arith.constant 0 : index
    %471 = vector.load %arg30[%c0_194, %c0_195] : memref<1x32xf32, #tpu.memory_space<vmem>>, vector<1x32xf32>
    %472 = vector.broadcast %471 : vector<1x32xf32> to vector<16x32xf32>
    %473 = arith.addf %470, %472 : vector<16x32xf32>
    %474 = arith.addf %435, %473 : vector<16x32xf32>
    %475 = vector.shape_cast %474 : vector<16x32xf32> to vector<2x8x32xf32>
    %c0_196 = arith.constant 0 : index
    %c0_197 = arith.constant 0 : index
    %c0_198 = arith.constant 0 : index
    %476 = vector.load %arg33[%c0_196, %c0_197, %c0_198] : memref<2x8x32xf32, #tpu.memory_space<vmem>>, vector<2x8x32xf32>
    tpu.vector_store %arg33[%c0_196, %c0_197, %c0_198], %475 {strides = array<i32>} : memref<2x8x32xf32, #tpu.memory_space<vmem>>, vector<2x8x32xf32>,
    return
  }
  func.func @transform_0(%arg0: i32) -> (i32, i32, i32) {
    %c0_i32 = arith.constant 0 : i32
    %c0_i32_0 = arith.constant 0 : i32
    %c0_i32_1 = arith.constant 0 : i32
    return %arg0, %c0_i32, %c0_i32_0 : i32, i32, i32
  }
  func.func @transform_1(%arg0: i32) -> (i32, i32, i32) {
    %c0_i32 = arith.constant 0 : i32
    %c0_i32_0 = arith.constant 0 : i32
    %c0_i32_1 = arith.constant 0 : i32
    return %arg0, %c0_i32, %c0_i32_0 : i32, i32, i32
  }
  func.func @transform_2(%arg0: i32) -> (i32, i32, i32) {
    %c0_i32 = arith.constant 0 : i32
    %c0_i32_0 = arith.constant 0 : i32
    %c0_i32_1 = arith.constant 0 : i32
    %c0_i32_2 = arith.constant 0 : i32
    return %c0_i32, %c0_i32_0, %c0_i32_1 : i32, i32, i32
  }
  func.func @transform_3(%arg0: i32) -> (i32, i32, i32) {
    %c0_i32 = arith.constant 0 : i32
    %c0_i32_0 = arith.constant 0 : i32
    %c0_i32_1 = arith.constant 0 : i32
    return %arg0, %c0_i32, %c0_i32_0 : i32, i32, i32
  }
  func.func @transform_4(%arg0: i32) -> (i32, i32) {
    %c0_i32 = arith.constant 0 : i32
    %c0_i32_0 = arith.constant 0 : i32
    %c0_i32_1 = arith.constant 0 : i32
    return %c0_i32, %c0_i32_0 : i32, i32
  }
  func.func @transform_5(%arg0: i32) -> (i32, i32) {
    %c0_i32 = arith.constant 0 : i32
    %c0_i32_0 = arith.constant 0 : i32
    %c0_i32_1 = arith.constant 0 : i32
    return %c0_i32, %c0_i32_0 : i32, i32
  }
  func.func @transform_6(%arg0: i32) -> (i32, i32) {
    %c0_i32 = arith.constant 0 : i32
    %c0_i32_0 = arith.constant 0 : i32
    %c0_i32_1 = arith.constant 0 : i32
    return %c0_i32, %c0_i32_0 : i32, i32
  }
  func.func @transform_7(%arg0: i32) -> (i32, i32) {
    %c0_i32 = arith.constant 0 : i32
    %c0_i32_0 = arith.constant 0 : i32
    %c0_i32_1 = arith.constant 0 : i32
    return %c0_i32, %c0_i32_0 : i32, i32
  }
  func.func @transform_8(%arg0: i32) -> (i32, i32) {
    %c0_i32 = arith.constant 0 : i32
    %c0_i32_0 = arith.constant 0 : i32
    %c0_i32_1 = arith.constant 0 : i32
    return %c0_i32, %c0_i32_0 : i32, i32
  }
  func.func @transform_9(%arg0: i32) -> (i32, i32) {
    %c0_i32 = arith.constant 0 : i32
    %c0_i32_0 = arith.constant 0 : i32
    %c0_i32_1 = arith.constant 0 : i32
    return %c0_i32, %c0_i32_0 : i32, i32
  }
  func.func @transform_10(%arg0: i32) -> (i32, i32) {
    %c0_i32 = arith.constant 0 : i32
    %c0_i32_0 = arith.constant 0 : i32
    %c0_i32_1 = arith.constant 0 : i32
    return %c0_i32, %c0_i32_0 : i32, i32
  }
  func.func @transform_11(%arg0: i32) -> (i32, i32) {
    %c0_i32 = arith.constant 0 : i32
    %c0_i32_0 = arith.constant 0 : i32
    %c0_i32_1 = arith.constant 0 : i32
    return %c0_i32, %c0_i32_0 : i32, i32
  }
  func.func @transform_12(%arg0: i32) -> (i32, i32) {
    %c0_i32 = arith.constant 0 : i32
    %c0_i32_0 = arith.constant 0 : i32
    %c0_i32_1 = arith.constant 0 : i32
    return %c0_i32, %c0_i32_0 : i32, i32
  }
  func.func @transform_13(%arg0: i32) -> (i32, i32) {
    %c0_i32 = arith.constant 0 : i32
    %c0_i32_0 = arith.constant 0 : i32
    %c0_i32_1 = arith.constant 0 : i32
    return %c0_i32, %c0_i32_0 : i32, i32
  }
  func.func @transform_14(%arg0: i32) -> (i32, i32) {
    %c0_i32 = arith.constant 0 : i32
    %c0_i32_0 = arith.constant 0 : i32
    %c0_i32_1 = arith.constant 0 : i32
    return %c0_i32, %c0_i32_0 : i32, i32
  }
  func.func @transform_15(%arg0: i32) -> (i32, i32) {
    %c0_i32 = arith.constant 0 : i32
    %c0_i32_0 = arith.constant 0 : i32
    %c0_i32_1 = arith.constant 0 : i32
    return %c0_i32, %c0_i32_0 : i32, i32
  }
  func.func @transform_16(%arg0: i32) -> (i32, i32) {
    %c0_i32 = arith.constant 0 : i32
    %c0_i32_0 = arith.constant 0 : i32
    %c0_i32_1 = arith.constant 0 : i32
    return %c0_i32, %c0_i32_0 : i32, i32
  }
  func.func @transform_17(%arg0: i32) -> (i32, i32) {
    %c0_i32 = arith.constant 0 : i32
    %c0_i32_0 = arith.constant 0 : i32
    %c0_i32_1 = arith.constant 0 : i32
    return %c0_i32, %c0_i32_0 : i32, i32
  }
  func.func @transform_18(%arg0: i32) -> (i32, i32) {
    %c0_i32 = arith.constant 0 : i32
    %c0_i32_0 = arith.constant 0 : i32
    %c0_i32_1 = arith.constant 0 : i32
    return %c0_i32, %c0_i32_0 : i32, i32
  }
  func.func @transform_19(%arg0: i32) -> (i32, i32) {
    %c0_i32 = arith.constant 0 : i32
    %c0_i32_0 = arith.constant 0 : i32
    %c0_i32_1 = arith.constant 0 : i32
    return %c0_i32, %c0_i32_0 : i32, i32
  }
  func.func @transform_20(%arg0: i32) -> (i32, i32) {
    %c0_i32 = arith.constant 0 : i32
    %c0_i32_0 = arith.constant 0 : i32
    %c0_i32_1 = arith.constant 0 : i32
    return %c0_i32, %c0_i32_0 : i32, i32
  }
  func.func @transform_21(%arg0: i32) -> (i32, i32) {
    %c0_i32 = arith.constant 0 : i32
    %c0_i32_0 = arith.constant 0 : i32
    %c0_i32_1 = arith.constant 0 : i32
    return %c0_i32, %c0_i32_0 : i32, i32
  }
  func.func @transform_22(%arg0: i32) -> (i32, i32) {
    %c0_i32 = arith.constant 0 : i32
    %c0_i32_0 = arith.constant 0 : i32
    %c0_i32_1 = arith.constant 0 : i32
    return %c0_i32, %c0_i32_0 : i32, i32
  }
  func.func @transform_23(%arg0: i32) -> (i32, i32) {
    %c0_i32 = arith.constant 0 : i32
    %c0_i32_0 = arith.constant 0 : i32
    %c0_i32_1 = arith.constant 0 : i32
    return %c0_i32, %c0_i32_0 : i32, i32
  }
  func.func @transform_24(%arg0: i32) -> (i32, i32) {
    %c0_i32 = arith.constant 0 : i32
    %c0_i32_0 = arith.constant 0 : i32
    %c0_i32_1 = arith.constant 0 : i32
    return %c0_i32, %c0_i32_0 : i32, i32
  }
  func.func @transform_25(%arg0: i32) -> (i32, i32) {
    %c0_i32 = arith.constant 0 : i32
    %c0_i32_0 = arith.constant 0 : i32
    %c0_i32_1 = arith.constant 0 : i32
    return %c0_i32, %c0_i32_0 : i32, i32
  }
  func.func @transform_26(%arg0: i32) -> (i32, i32) {
    %c0_i32 = arith.constant 0 : i32
    %c0_i32_0 = arith.constant 0 : i32
    %c0_i32_1 = arith.constant 0 : i32
    return %c0_i32, %c0_i32_0 : i32, i32
  }
  func.func @transform_27(%arg0: i32) -> (i32, i32) {
    %c0_i32 = arith.constant 0 : i32
    %c0_i32_0 = arith.constant 0 : i32
    %c0_i32_1 = arith.constant 0 : i32
    return %c0_i32, %c0_i32_0 : i32, i32
  }
  func.func @transform_28(%arg0: i32) -> (i32, i32) {
    %c0_i32 = arith.constant 0 : i32
    %c0_i32_0 = arith.constant 0 : i32
    %c0_i32_1 = arith.constant 0 : i32
    return %c0_i32, %c0_i32_0 : i32, i32
  }
  func.func @transform_29(%arg0: i32) -> (i32, i32) {
    %c0_i32 = arith.constant 0 : i32
    %c0_i32_0 = arith.constant 0 : i32
    %c0_i32_1 = arith.constant 0 : i32
    return %c0_i32, %c0_i32_0 : i32, i32
  }
  func.func @transform_30(%arg0: i32) -> (i32, i32) {
    %c0_i32 = arith.constant 0 : i32
    %c0_i32_0 = arith.constant 0 : i32
    %c0_i32_1 = arith.constant 0 : i32
    return %c0_i32, %c0_i32_0 : i32, i32
  }
  func.func @transform_31(%arg0: i32) -> (i32, i32) {
    %c0_i32 = arith.constant 0 : i32
    %c0_i32_0 = arith.constant 0 : i32
    %c0_i32_1 = arith.constant 0 : i32
    return %c0_i32, %c0_i32_0 : i32, i32
  }
  func.func @transform_32(%arg0: i32) -> (i32, i32, i32) {
    %c0_i32 = arith.constant 0 : i32
    %c0_i32_0 = arith.constant 0 : i32
    %c0_i32_1 = arith.constant 0 : i32
    return %arg0, %c0_i32, %c0_i32_0 : i32, i32, i32
  }
}

module attributes {stable_mosaic.version = 11 : i64} {
  func.func @_decoder_layer_kernel(%arg0: i32, %arg1: memref<2x8x32xf32, #tpu.memory_space<vmem>>, %arg2: memref<2x16x32xbf16, #tpu.memory_space<vmem>>, %arg3: memref<1x8x8xf32, #tpu.memory_space<vmem>>, %arg4: memref<2x1x16xf32, #tpu.memory_space<vmem>>, %arg5: memref<1x32xf32, #tpu.memory_space<vmem>>, %arg6: memref<1x32xf32, #tpu.memory_space<vmem>>, %arg7: memref<32x32xbf16, #tpu.memory_space<vmem>>, %arg8: memref<1x32xf32, #tpu.memory_space<vmem>>, %arg9: memref<32x32xbf16, #tpu.memory_space<vmem>>, %arg10: memref<1x32xf32, #tpu.memory_space<vmem>>, %arg11: memref<32x32xbf16, #tpu.memory_space<vmem>>, %arg12: memref<1x32xf32, #tpu.memory_space<vmem>>, %arg13: memref<32x32xbf16, #tpu.memory_space<vmem>>, %arg14: memref<1x32xf32, #tpu.memory_space<vmem>>, %arg15: memref<1x32xf32, #tpu.memory_space<vmem>>, %arg16: memref<1x32xf32, #tpu.memory_space<vmem>>, %arg17: memref<32x32xbf16, #tpu.memory_space<vmem>>, %arg18: memref<1x32xf32, #tpu.memory_space<vmem>>, %arg19: memref<32x32xbf16, #tpu.memory_space<vmem>>, %arg20: memref<1x32xf32, #tpu.memory_space<vmem>>, %arg21: memref<32x32xbf16, #tpu.memory_space<vmem>>, %arg22: memref<1x32xf32, #tpu.memory_space<vmem>>, %arg23: memref<32x32xbf16, #tpu.memory_space<vmem>>, %arg24: memref<1x32xf32, #tpu.memory_space<vmem>>, %arg25: memref<1x32xf32, #tpu.memory_space<vmem>>, %arg26: memref<1x32xf32, #tpu.memory_space<vmem>>, %arg27: memref<32x64xbf16, #tpu.memory_space<vmem>>, %arg28: memref<1x64xf32, #tpu.memory_space<vmem>>, %arg29: memref<64x32xbf16, #tpu.memory_space<vmem>>, %arg30: memref<1x32xf32, #tpu.memory_space<vmem>>, %arg31: memref<1x32xf32, #tpu.memory_space<vmem>>, %arg32: memref<1x32xf32, #tpu.memory_space<vmem>>, %arg33: memref<2x8x32xf32, #tpu.memory_space<vmem>>, %arg34: memref<16x32xf32, #tpu.memory_space<vmem>>) attributes {dimension_semantics = [#tpu.dimension_semantics<parallel>], iteration_bounds = array<i64: 2>, scalar_prefetch = 0 : i64, scratch_operands = 1 : i64, tpu.core_type = #tpu.core_type<tc>, window_params = [{transform_indices = @transform_0, window_bounds = array<i64: 2, 8, 32>}, {transform_indices = @transform_1, window_bounds = array<i64: 2, 16, 32>}, {pipeline_mode = #tpu.pipeline_mode<synchronous>, transform_indices = @transform_2, window_bounds = array<i64: 1, 8, 8>}, {transform_indices = @transform_3, window_bounds = array<i64: 2, 1, 16>}, {pipeline_mode = #tpu.pipeline_mode<synchronous>, transform_indices = @transform_4, window_bounds = array<i64: 1, 32>}, {pipeline_mode = #tpu.pipeline_mode<synchronous>, transform_indices = @transform_5, window_bounds = array<i64: 1, 32>}, {pipeline_mode = #tpu.pipeline_mode<synchronous>, transform_indices = @transform_6, window_bounds = array<i64: 32, 32>}, {pipeline_mode = #tpu.pipeline_mode<synchronous>, transform_indices = @transform_7, window_bounds = array<i64: 1, 32>}, {pipeline_mode = #tpu.pipeline_mode<synchronous>, transform_indices = @transform_8, window_bounds = array<i64: 32, 32>}, {pipeline_mode = #tpu.pipeline_mode<synchronous>, transform_indices = @transform_9, window_bounds = array<i64: 1, 32>}, {pipeline_mode = #tpu.pipeline_mode<synchronous>, transform_indices = @transform_10, window_bounds = array<i64: 32, 32>}, {pipeline_mode = #tpu.pipeline_mode<synchronous>, transform_indices = @transform_11, window_bounds = array<i64: 1, 32>}, {pipeline_mode = #tpu.pipeline_mode<synchronous>, transform_indices = @transform_12, window_bounds = array<i64: 32, 32>}, {pipeline_mode = #tpu.pipeline_mode<synchronous>, transform_indices = @transform_13, window_bounds = array<i64: 1, 32>}, {pipeline_mode = #tpu.pipeline_mode<synchronous>, transform_indices = @transform_14, window_bounds = array<i64: 1, 32>}, {pipeline_mode = #tpu.pipeline_mode<synchronous>, transform_indices = @transform_15, window_bounds = array<i64: 1, 32>}, {pipeline_mode = #tpu.pipeline_mode<synchronous>, transform_indices = @transform_16, window_bounds = array<i64: 32, 32>}, {pipeline_mode = #tpu.pipeline_mode<synchronous>, transform_indices = @transform_17, window_bounds = array<i64: 1, 32>}, {pipeline_mode = #tpu.pipeline_mode<synchronous>, transform_indices = @transform_18, window_bounds = array<i64: 32, 32>}, {pipeline_mode = #tpu.pipeline_mode<synchronous>, transform_indices = @transform_19, window_bounds = array<i64: 1, 32>}, {pipeline_mode = #tpu.pipeline_mode<synchronous>, transform_indices = @transform_20, window_bounds = array<i64: 32, 32>}, {pipeline_mode = #tpu.pipeline_mode<synchronous>, transform_indices = @transform_21, window_bounds = array<i64: 1, 32>}, {pipeline_mode = #tpu.pipeline_mode<synchronous>, transform_indices = @transform_22, window_bounds = array<i64: 32, 32>}, {pipeline_mode = #tpu.pipeline_mode<synchronous>, transform_indices = @transform_23, window_bounds = array<i64: 1, 32>}, {pipeline_mode = #tpu.pipeline_mode<synchronous>, transform_indices = @transform_24, window_bounds = array<i64: 1, 32>}, {pipeline_mode = #tpu.pipeline_mode<synchronous>, transform_indices = @transform_25, window_bounds = array<i64: 1, 32>}, {pipeline_mode = #tpu.pipeline_mode<synchronous>, transform_indices = @transform_26, window_bounds = array<i64: 32, 64>}, {pipeline_mode = #tpu.pipeline_mode<synchronous>, transform_indices = @transform_27, window_bounds = array<i64: 1, 64>}, {pipeline_mode = #tpu.pipeline_mode<synchronous>, transform_indices = @transform_28, window_bounds = array<i64: 64, 32>}, {pipeline_mode = #tpu.pipeline_mode<synchronous>, transform_indices = @transform_29, window_bounds = array<i64: 1, 32>}, {pipeline_mode = #tpu.pipeline_mode<synchronous>, transform_indices = @transform_30, window_bounds = array<i64: 1, 32>}, {pipeline_mode = #tpu.pipeline_mode<synchronous>, transform_indices = @transform_31, window_bounds = array<i64: 1, 32>}, {transform_indices = @transform_32, window_bounds = array<i64: 2, 8, 32>}]} {
    %c0 = arith.constant 0 : index
    %c0_0 = arith.constant 0 : index
    %c0_1 = arith.constant 0 : index
    %0 = vector.load %arg1[%c0, %c0_0, %c0_1] : memref<2x8x32xf32, #tpu.memory_space<vmem>>, vector<2x8x32xf32>
    %1 = vector.shape_cast %0 : vector<2x8x32xf32> to vector<16x32xf32>
    %c0_2 = arith.constant 0 : index
    %c0_3 = arith.constant 0 : index
    %c0_4 = arith.constant 0 : index
    %2 = vector.load %arg2[%c0_2, %c0_3, %c0_4] : memref<2x16x32xbf16, #tpu.memory_space<vmem>>, vector<2x16x32xbf16>
    %3 = vector.shape_cast %2 : vector<2x16x32xbf16> to vector<32x32xbf16>
    %c0_5 = arith.constant 0 : index
    %c0_6 = arith.constant 0 : index
    %c0_7 = arith.constant 0 : index
    %4 = vector.load %arg3[%c0_5, %c0_6, %c0_7] : memref<1x8x8xf32, #tpu.memory_space<vmem>>, vector<1x8x8xf32>
    %cst = arith.constant 0.000000e+00 : f32
    %5 = vector.broadcast %cst : f32 to vector<1x8x8xf32>
    %6 = arith.cmpf oeq, %4, %5 : vector<1x8x8xf32>
    %cst_8 = arith.constant -1.000000e+09 : f32
    %cst_9 = arith.constant 0.000000e+00 : f32
    %7 = vector.broadcast %cst_8 : f32 to vector<1x8x8xf32>
    %8 = vector.broadcast %cst_9 : f32 to vector<1x8x8xf32>
    %9 = arith.select %6, %7, %8 : vector<1x8x8xi1>, vector<1x8x8xf32>
    %c0_10 = arith.constant 0 : index
    %c0_11 = arith.constant 0 : index
    %c0_12 = arith.constant 0 : index
    %10 = vector.load %arg4[%c0_10, %c0_11, %c0_12] : memref<2x1x16xf32, #tpu.memory_space<vmem>>, vector<2x1x16xf32>
    %cst_13 = arith.constant 0.000000e+00 : f32
    %11 = vector.broadcast %cst_13 : f32 to vector<2x1x16xf32>
    %12 = arith.cmpf oeq, %10, %11 : vector<2x1x16xf32>
    %cst_14 = arith.constant -1.000000e+09 : f32
    %cst_15 = arith.constant 0.000000e+00 : f32
    %13 = vector.broadcast %cst_14 : f32 to vector<2x1x16xf32>
    %14 = vector.broadcast %cst_15 : f32 to vector<2x1x16xf32>
    %15 = arith.select %12, %13, %14 : vector<2x1x16xi1>, vector<2x1x16xf32>
    %c0_16 = arith.constant 0 : index
    %c0_17 = arith.constant 0 : index
    %16 = vector.load %arg5[%c0_16, %c0_17] : memref<1x32xf32, #tpu.memory_space<vmem>>, vector<1x32xf32>
    %c0_18 = arith.constant 0 : index
    %c0_19 = arith.constant 0 : index
    %17 = vector.load %arg6[%c0_18, %c0_19] : memref<1x32xf32, #tpu.memory_space<vmem>>, vector<1x32xf32>
    %cst_20 = arith.constant dense<0.000000e+00> : vector<16xf32>
    %18 = vector.multi_reduction <add>, %1, %cst_20 [1] : vector<16x32xf32> to vector<16xf32>
    %19 = vector.shape_cast %18 : vector<16xf32> to vector<16x1xf32>
    %cst_21 = arith.constant 3.200000e+01 : f32
    %20 = vector.broadcast %cst_21 : f32 to vector<16x1xf32>
    %21 = arith.divf %19, %20 : vector<16x1xf32>
    %22 = vector.broadcast %21 : vector<16x1xf32> to vector<16x32xf32>
    %23 = arith.subf %1, %22 : vector<16x32xf32>
    %24 = arith.mulf %23, %23 : vector<16x32xf32>
    %cst_22 = arith.constant dense<0.000000e+00> : vector<16xf32>
    %25 = vector.multi_reduction <add>, %24, %cst_22 [1] : vector<16x32xf32> to vector<16xf32>
    %26 = vector.shape_cast %25 : vector<16xf32> to vector<16x1xf32>
    %cst_23 = arith.constant 0.0322580636 : f32
    %27 = vector.broadcast %cst_23 : f32 to vector<16x1xf32>
    %28 = arith.mulf %26, %27 : vector<16x1xf32>
    %29 = math.sqrt %28 : vector<16x1xf32>
    %cst_24 = arith.constant 9.99999997E-7 : f32
    %30 = vector.broadcast %cst_24 : f32 to vector<16x1xf32>
    %31 = arith.addf %29, %30 : vector<16x1xf32>
    %cst_25 = arith.constant 1.000000e+00 : f32
    %32 = vector.broadcast %cst_25 : f32 to vector<16x1xf32>
    %33 = arith.divf %32, %31 : vector<16x1xf32>
    %34 = vector.broadcast %16 : vector<1x32xf32> to vector<16x32xf32>
    %35 = vector.broadcast %33 : vector<16x1xf32> to vector<16x32xf32>
    %36 = arith.mulf %34, %35 : vector<16x32xf32>
    %37 = arith.mulf %36, %23 : vector<16x32xf32>
    %38 = vector.broadcast %17 : vector<1x32xf32> to vector<16x32xf32>
    %39 = arith.addf %37, %38 : vector<16x32xf32>
    %40 = arith.truncf %39 : vector<16x32xf32> to vector<16x32xbf16>
    %c0_26 = arith.constant 0 : index
    %c0_27 = arith.constant 0 : index
    %41 = vector.load %arg7[%c0_26, %c0_27] : memref<32x32xbf16, #tpu.memory_space<vmem>>, vector<32x32xbf16>
    %cst_28 = arith.constant dense<0.000000e+00> : vector<16x32xf32>
    %42 = tpu.matmul %40, %41, %cst_28 {dimension_numbers = #tpu.dot_dimension_numbers<[1], [0], [0], [1], [0, 0, 1, 1], [], []>} : vector<16x32xbf16>, vector<32x32xbf16>, vector<16x32xf32> -> vector<16x32xf32>
    %c0_29 = arith.constant 0 : index
    %c0_30 = arith.constant 0 : index
    %43 = vector.load %arg8[%c0_29, %c0_30] : memref<1x32xf32, #tpu.memory_space<vmem>>, vector<1x32xf32>
    %44 = vector.broadcast %43 : vector<1x32xf32> to vector<16x32xf32>
    %45 = arith.addf %42, %44 : vector<16x32xf32>
    %cst_31 = arith.constant 0.353553385 : f32
    %46 = vector.broadcast %cst_31 : f32 to vector<16x32xf32>
    %47 = arith.mulf %45, %46 : vector<16x32xf32>
    %48 = arith.truncf %47 : vector<16x32xf32> to vector<16x32xbf16>
    %c0_32 = arith.constant 0 : index
    %c0_33 = arith.constant 0 : index
    %49 = vector.load %arg9[%c0_32, %c0_33] : memref<32x32xbf16, #tpu.memory_space<vmem>>, vector<32x32xbf16>
    %cst_34 = arith.constant dense<0.000000e+00> : vector<16x32xf32>
    %50 = tpu.matmul %40, %49, %cst_34 {dimension_numbers = #tpu.dot_dimension_numbers<[1], [0], [0], [1], [0, 0, 1, 1], [], []>} : vector<16x32xbf16>, vector<32x32xbf16>, vector<16x32xf32> -> vector<16x32xf32>
    %c0_35 = arith.constant 0 : index
    %c0_36 = arith.constant 0 : index
    %51 = vector.load %arg10[%c0_35, %c0_36] : memref<1x32xf32, #tpu.memory_space<vmem>>, vector<1x32xf32>
    %52 = vector.broadcast %51 : vector<1x32xf32> to vector<16x32xf32>
    %53 = arith.addf %50, %52 : vector<16x32xf32>
    %54 = arith.truncf %53 : vector<16x32xf32> to vector<16x32xbf16>
    %c0_37 = arith.constant 0 : index
    %c0_38 = arith.constant 0 : index
    %55 = vector.load %arg11[%c0_37, %c0_38] : memref<32x32xbf16, #tpu.memory_space<vmem>>, vector<32x32xbf16>
    %cst_39 = arith.constant dense<0.000000e+00> : vector<16x32xf32>
    %56 = tpu.matmul %40, %55, %cst_39 {dimension_numbers = #tpu.dot_dimension_numbers<[1], [0], [0], [1], [0, 0, 1, 1], [], []>} : vector<16x32xbf16>, vector<32x32xbf16>, vector<16x32xf32> -> vector<16x32xf32>
    %c0_40 = arith.constant 0 : index
    %c0_41 = arith.constant 0 : index
    %57 = vector.load %arg12[%c0_40, %c0_41] : memref<1x32xf32, #tpu.memory_space<vmem>>, vector<1x32xf32>
    %58 = vector.broadcast %57 : vector<1x32xf32> to vector<16x32xf32>
    %59 = arith.addf %56, %58 : vector<16x32xf32>
    %60 = arith.truncf %59 : vector<16x32xf32> to vector<16x32xbf16>
    %61 = vector.shape_cast %9 : vector<1x8x8xf32> to vector<8x8xf32>
    %62 = vector.extract_strided_slice %48 {offsets = [0, 0], sizes = [8, 32], strides = [1, 1]} : vector<16x32xbf16> to vector<8x32xbf16>
    %63 = vector.extract_strided_slice %54 {offsets = [0, 0], sizes = [8, 32], strides = [1, 1]} : vector<16x32xbf16> to vector<8x32xbf16>
    %64 = vector.extract_strided_slice %60 {offsets = [0, 0], sizes = [8, 32], strides = [1, 1]} : vector<16x32xbf16> to vector<8x32xbf16>
    %65 = vector.extract_strided_slice %62 {offsets = [0, 0], sizes = [8, 8], strides = [1, 1]} : vector<8x32xbf16> to vector<8x8xbf16>
    %66 = vector.extract_strided_slice %63 {offsets = [0, 0], sizes = [8, 8], strides = [1, 1]} : vector<8x32xbf16> to vector<8x8xbf16>
    "tpu.trace_start"() <{level = 10 : i32, message = "ld,sd->ls"}> : () -> ()
    %cst_42 = arith.constant dense<0.000000e+00> : vector<8x8xf32>
    %67 = tpu.matmul %65, %66, %cst_42 {dimension_numbers = #tpu.dot_dimension_numbers<[1], [1], [0], [0], [0, 0, 1, 0], [], []>} : vector<8x8xbf16>, vector<8x8xbf16>, vector<8x8xf32> -> vector<8x8xf32>
    "tpu.trace_stop"() : () -> ()
    %68 = arith.addf %67, %61 : vector<8x8xf32>
    %cst_43 = arith.constant dense<0xFF800000> : vector<8xf32>
    %69 = vector.multi_reduction <maximumf>, %68, %cst_43 [1] : vector<8x8xf32> to vector<8xf32>
    %70 = vector.shape_cast %69 : vector<8xf32> to vector<8x1xf32>
    %71 = vector.broadcast %70 : vector<8x1xf32> to vector<8x8xf32>
    %72 = arith.subf %68, %71 : vector<8x8xf32>
    %73 = math.exp %72 : vector<8x8xf32>
    %cst_44 = arith.constant dense<0.000000e+00> : vector<8xf32>
    %74 = vector.multi_reduction <add>, %73, %cst_44 [1] : vector<8x8xf32> to vector<8xf32>
    %75 = vector.shape_cast %74 : vector<8xf32> to vector<8x1xf32>
    %76 = tpu.reciprocal %75 {approx = true} : vector<8x1xf32> -> vector<8x1xf32>
    %77 = vector.broadcast %76 : vector<8x1xf32> to vector<8x8xf32>
    %78 = arith.mulf %73, %77 : vector<8x8xf32>
    %79 = arith.truncf %78 : vector<8x8xf32> to vector<8x8xbf16>
    %80 = vector.extract_strided_slice %64 {offsets = [0, 0], sizes = [8, 8], strides = [1, 1]} : vector<8x32xbf16> to vector<8x8xbf16>
    %cst_45 = arith.constant dense<0.000000e+00> : vector<8x8xf32>
    %81 = tpu.matmul %79, %80, %cst_45 {dimension_numbers = #tpu.dot_dimension_numbers<[1], [0], [0], [1], [0, 0, 1, 1], [], []>} : vector<8x8xbf16>, vector<8x8xbf16>, vector<8x8xf32> -> vector<8x8xf32>
    %c0_46 = arith.constant 0 : index
    %c0_47 = arith.constant 0 : index
    %82 = vector.load %arg34[%c0_46, %c0_47] : memref<16x32xf32, #tpu.memory_space<vmem>>, vector<8x8xf32>
    tpu.vector_store %arg34[%c0_46, %c0_47], %81 {strides = array<i32>} : memref<16x32xf32, #tpu.memory_space<vmem>>, vector<8x8xf32>,
    %83 = vector.extract_strided_slice %62 {offsets = [0, 8], sizes = [8, 8], strides = [1, 1]} : vector<8x32xbf16> to vector<8x8xbf16>
    %84 = vector.extract_strided_slice %63 {offsets = [0, 8], sizes = [8, 8], strides = [1, 1]} : vector<8x32xbf16> to vector<8x8xbf16>
    "tpu.trace_start"() <{level = 10 : i32, message = "ld,sd->ls"}> : () -> ()
    %cst_48 = arith.constant dense<0.000000e+00> : vector<8x8xf32>
    %85 = tpu.matmul %83, %84, %cst_48 {dimension_numbers = #tpu.dot_dimension_numbers<[1], [1], [0], [0], [0, 0, 1, 0], [], []>} : vector<8x8xbf16>, vector<8x8xbf16>, vector<8x8xf32> -> vector<8x8xf32>
    "tpu.trace_stop"() : () -> ()
    %86 = arith.addf %85, %61 : vector<8x8xf32>
    %cst_49 = arith.constant dense<0xFF800000> : vector<8xf32>
    %87 = vector.multi_reduction <maximumf>, %86, %cst_49 [1] : vector<8x8xf32> to vector<8xf32>
    %88 = vector.shape_cast %87 : vector<8xf32> to vector<8x1xf32>
    %89 = vector.broadcast %88 : vector<8x1xf32> to vector<8x8xf32>
    %90 = arith.subf %86, %89 : vector<8x8xf32>
    %91 = math.exp %90 : vector<8x8xf32>
    %cst_50 = arith.constant dense<0.000000e+00> : vector<8xf32>
    %92 = vector.multi_reduction <add>, %91, %cst_50 [1] : vector<8x8xf32> to vector<8xf32>
    %93 = vector.shape_cast %92 : vector<8xf32> to vector<8x1xf32>
    %94 = tpu.reciprocal %93 {approx = true} : vector<8x1xf32> -> vector<8x1xf32>
    %95 = vector.broadcast %94 : vector<8x1xf32> to vector<8x8xf32>
    %96 = arith.mulf %91, %95 : vector<8x8xf32>
    %97 = arith.truncf %96 : vector<8x8xf32> to vector<8x8xbf16>
    %98 = vector.extract_strided_slice %64 {offsets = [0, 8], sizes = [8, 8], strides = [1, 1]} : vector<8x32xbf16> to vector<8x8xbf16>
    %cst_51 = arith.constant dense<0.000000e+00> : vector<8x8xf32>
    %99 = tpu.matmul %97, %98, %cst_51 {dimension_numbers = #tpu.dot_dimension_numbers<[1], [0], [0], [1], [0, 0, 1, 1], [], []>} : vector<8x8xbf16>, vector<8x8xbf16>, vector<8x8xf32> -> vector<8x8xf32>
    %c0_52 = arith.constant 0 : index
    %c8 = arith.constant 8 : index
    %100 = vector.load %arg34[%c0_52, %c8] : memref<16x32xf32, #tpu.memory_space<vmem>>, vector<8x8xf32>
    tpu.vector_store %arg34[%c0_52, %c8], %99 {strides = array<i32>} : memref<16x32xf32, #tpu.memory_space<vmem>>, vector<8x8xf32>,
    %101 = vector.extract_strided_slice %62 {offsets = [0, 16], sizes = [8, 8], strides = [1, 1]} : vector<8x32xbf16> to vector<8x8xbf16>
    %102 = vector.extract_strided_slice %63 {offsets = [0, 16], sizes = [8, 8], strides = [1, 1]} : vector<8x32xbf16> to vector<8x8xbf16>
    "tpu.trace_start"() <{level = 10 : i32, message = "ld,sd->ls"}> : () -> ()
    %cst_53 = arith.constant dense<0.000000e+00> : vector<8x8xf32>
    %103 = tpu.matmul %101, %102, %cst_53 {dimension_numbers = #tpu.dot_dimension_numbers<[1], [1], [0], [0], [0, 0, 1, 0], [], []>} : vector<8x8xbf16>, vector<8x8xbf16>, vector<8x8xf32> -> vector<8x8xf32>
    "tpu.trace_stop"() : () -> ()
    %104 = arith.addf %103, %61 : vector<8x8xf32>
    %cst_54 = arith.constant dense<0xFF800000> : vector<8xf32>
    %105 = vector.multi_reduction <maximumf>, %104, %cst_54 [1] : vector<8x8xf32> to vector<8xf32>
    %106 = vector.shape_cast %105 : vector<8xf32> to vector<8x1xf32>
    %107 = vector.broadcast %106 : vector<8x1xf32> to vector<8x8xf32>
    %108 = arith.subf %104, %107 : vector<8x8xf32>
    %109 = math.exp %108 : vector<8x8xf32>
    %cst_55 = arith.constant dense<0.000000e+00> : vector<8xf32>
    %110 = vector.multi_reduction <add>, %109, %cst_55 [1] : vector<8x8xf32> to vector<8xf32>
    %111 = vector.shape_cast %110 : vector<8xf32> to vector<8x1xf32>
    %112 = tpu.reciprocal %111 {approx = true} : vector<8x1xf32> -> vector<8x1xf32>
    %113 = vector.broadcast %112 : vector<8x1xf32> to vector<8x8xf32>
    %114 = arith.mulf %109, %113 : vector<8x8xf32>
    %115 = arith.truncf %114 : vector<8x8xf32> to vector<8x8xbf16>
    %116 = vector.extract_strided_slice %64 {offsets = [0, 16], sizes = [8, 8], strides = [1, 1]} : vector<8x32xbf16> to vector<8x8xbf16>
    %cst_56 = arith.constant dense<0.000000e+00> : vector<8x8xf32>
    %117 = tpu.matmul %115, %116, %cst_56 {dimension_numbers = #tpu.dot_dimension_numbers<[1], [0], [0], [1], [0, 0, 1, 1], [], []>} : vector<8x8xbf16>, vector<8x8xbf16>, vector<8x8xf32> -> vector<8x8xf32>
    %c0_57 = arith.constant 0 : index
    %c16 = arith.constant 16 : index
    %118 = vector.load %arg34[%c0_57, %c16] : memref<16x32xf32, #tpu.memory_space<vmem>>, vector<8x8xf32>
    tpu.vector_store %arg34[%c0_57, %c16], %117 {strides = array<i32>} : memref<16x32xf32, #tpu.memory_space<vmem>>, vector<8x8xf32>,
    %119 = vector.extract_strided_slice %62 {offsets = [0, 24], sizes = [8, 8], strides = [1, 1]} : vector<8x32xbf16> to vector<8x8xbf16>
    %120 = vector.extract_strided_slice %63 {offsets = [0, 24], sizes = [8, 8], strides = [1, 1]} : vector<8x32xbf16> to vector<8x8xbf16>
    "tpu.trace_start"() <{level = 10 : i32, message = "ld,sd->ls"}> : () -> ()
    %cst_58 = arith.constant dense<0.000000e+00> : vector<8x8xf32>
    %121 = tpu.matmul %119, %120, %cst_58 {dimension_numbers = #tpu.dot_dimension_numbers<[1], [1], [0], [0], [0, 0, 1, 0], [], []>} : vector<8x8xbf16>, vector<8x8xbf16>, vector<8x8xf32> -> vector<8x8xf32>
    "tpu.trace_stop"() : () -> ()
    %122 = arith.addf %121, %61 : vector<8x8xf32>
    %cst_59 = arith.constant dense<0xFF800000> : vector<8xf32>
    %123 = vector.multi_reduction <maximumf>, %122, %cst_59 [1] : vector<8x8xf32> to vector<8xf32>
    %124 = vector.shape_cast %123 : vector<8xf32> to vector<8x1xf32>
    %125 = vector.broadcast %124 : vector<8x1xf32> to vector<8x8xf32>
    %126 = arith.subf %122, %125 : vector<8x8xf32>
    %127 = math.exp %126 : vector<8x8xf32>
    %cst_60 = arith.constant dense<0.000000e+00> : vector<8xf32>
    %128 = vector.multi_reduction <add>, %127, %cst_60 [1] : vector<8x8xf32> to vector<8xf32>
    %129 = vector.shape_cast %128 : vector<8xf32> to vector<8x1xf32>
    %130 = tpu.reciprocal %129 {approx = true} : vector<8x1xf32> -> vector<8x1xf32>
    %131 = vector.broadcast %130 : vector<8x1xf32> to vector<8x8xf32>
    %132 = arith.mulf %127, %131 : vector<8x8xf32>
    %133 = arith.truncf %132 : vector<8x8xf32> to vector<8x8xbf16>
    %134 = vector.extract_strided_slice %64 {offsets = [0, 24], sizes = [8, 8], strides = [1, 1]} : vector<8x32xbf16> to vector<8x8xbf16>
    %cst_61 = arith.constant dense<0.000000e+00> : vector<8x8xf32>
    %135 = tpu.matmul %133, %134, %cst_61 {dimension_numbers = #tpu.dot_dimension_numbers<[1], [0], [0], [1], [0, 0, 1, 1], [], []>} : vector<8x8xbf16>, vector<8x8xbf16>, vector<8x8xf32> -> vector<8x8xf32>
    %c0_62 = arith.constant 0 : index
    %c24 = arith.constant 24 : index
    %136 = vector.load %arg34[%c0_62, %c24] : memref<16x32xf32, #tpu.memory_space<vmem>>, vector<8x8xf32>
    tpu.vector_store %arg34[%c0_62, %c24], %135 {strides = array<i32>} : memref<16x32xf32, #tpu.memory_space<vmem>>, vector<8x8xf32>,
    %137 = vector.shape_cast %9 : vector<1x8x8xf32> to vector<8x8xf32>
    %138 = vector.extract_strided_slice %48 {offsets = [8, 0], sizes = [8, 32], strides = [1, 1]} : vector<16x32xbf16> to vector<8x32xbf16>
    %139 = vector.extract_strided_slice %54 {offsets = [8, 0], sizes = [8, 32], strides = [1, 1]} : vector<16x32xbf16> to vector<8x32xbf16>
    %140 = vector.extract_strided_slice %60 {offsets = [8, 0], sizes = [8, 32], strides = [1, 1]} : vector<16x32xbf16> to vector<8x32xbf16>
    %141 = vector.extract_strided_slice %138 {offsets = [0, 0], sizes = [8, 8], strides = [1, 1]} : vector<8x32xbf16> to vector<8x8xbf16>
    %142 = vector.extract_strided_slice %139 {offsets = [0, 0], sizes = [8, 8], strides = [1, 1]} : vector<8x32xbf16> to vector<8x8xbf16>
    "tpu.trace_start"() <{level = 10 : i32, message = "ld,sd->ls"}> : () -> ()
    %cst_63 = arith.constant dense<0.000000e+00> : vector<8x8xf32>
    %143 = tpu.matmul %141, %142, %cst_63 {dimension_numbers = #tpu.dot_dimension_numbers<[1], [1], [0], [0], [0, 0, 1, 0], [], []>} : vector<8x8xbf16>, vector<8x8xbf16>, vector<8x8xf32> -> vector<8x8xf32>
    "tpu.trace_stop"() : () -> ()
    %144 = arith.addf %143, %137 : vector<8x8xf32>
    %cst_64 = arith.constant dense<0xFF800000> : vector<8xf32>
    %145 = vector.multi_reduction <maximumf>, %144, %cst_64 [1] : vector<8x8xf32> to vector<8xf32>
    %146 = vector.shape_cast %145 : vector<8xf32> to vector<8x1xf32>
    %147 = vector.broadcast %146 : vector<8x1xf32> to vector<8x8xf32>
    %148 = arith.subf %144, %147 : vector<8x8xf32>
    %149 = math.exp %148 : vector<8x8xf32>
    %cst_65 = arith.constant dense<0.000000e+00> : vector<8xf32>
    %150 = vector.multi_reduction <add>, %149, %cst_65 [1] : vector<8x8xf32> to vector<8xf32>
    %151 = vector.shape_cast %150 : vector<8xf32> to vector<8x1xf32>
    %152 = tpu.reciprocal %151 {approx = true} : vector<8x1xf32> -> vector<8x1xf32>
    %153 = vector.broadcast %152 : vector<8x1xf32> to vector<8x8xf32>
    %154 = arith.mulf %149, %153 : vector<8x8xf32>
    %155 = arith.truncf %154 : vector<8x8xf32> to vector<8x8xbf16>
    %156 = vector.extract_strided_slice %140 {offsets = [0, 0], sizes = [8, 8], strides = [1, 1]} : vector<8x32xbf16> to vector<8x8xbf16>
    %cst_66 = arith.constant dense<0.000000e+00> : vector<8x8xf32>
    %157 = tpu.matmul %155, %156, %cst_66 {dimension_numbers = #tpu.dot_dimension_numbers<[1], [0], [0], [1], [0, 0, 1, 1], [], []>} : vector<8x8xbf16>, vector<8x8xbf16>, vector<8x8xf32> -> vector<8x8xf32>
    %c8_67 = arith.constant 8 : index
    %c0_68 = arith.constant 0 : index
    %158 = vector.load %arg34[%c8_67, %c0_68] : memref<16x32xf32, #tpu.memory_space<vmem>>, vector<8x8xf32>
    tpu.vector_store %arg34[%c8_67, %c0_68], %157 {strides = array<i32>} : memref<16x32xf32, #tpu.memory_space<vmem>>, vector<8x8xf32>,
    %159 = vector.extract_strided_slice %138 {offsets = [0, 8], sizes = [8, 8], strides = [1, 1]} : vector<8x32xbf16> to vector<8x8xbf16>
    %160 = vector.extract_strided_slice %139 {offsets = [0, 8], sizes = [8, 8], strides = [1, 1]} : vector<8x32xbf16> to vector<8x8xbf16>
    "tpu.trace_start"() <{level = 10 : i32, message = "ld,sd->ls"}> : () -> ()
    %cst_69 = arith.constant dense<0.000000e+00> : vector<8x8xf32>
    %161 = tpu.matmul %159, %160, %cst_69 {dimension_numbers = #tpu.dot_dimension_numbers<[1], [1], [0], [0], [0, 0, 1, 0], [], []>} : vector<8x8xbf16>, vector<8x8xbf16>, vector<8x8xf32> -> vector<8x8xf32>
    "tpu.trace_stop"() : () -> ()
    %162 = arith.addf %161, %137 : vector<8x8xf32>
    %cst_70 = arith.constant dense<0xFF800000> : vector<8xf32>
    %163 = vector.multi_reduction <maximumf>, %162, %cst_70 [1] : vector<8x8xf32> to vector<8xf32>
    %164 = vector.shape_cast %163 : vector<8xf32> to vector<8x1xf32>
    %165 = vector.broadcast %164 : vector<8x1xf32> to vector<8x8xf32>
    %166 = arith.subf %162, %165 : vector<8x8xf32>
    %167 = math.exp %166 : vector<8x8xf32>
    %cst_71 = arith.constant dense<0.000000e+00> : vector<8xf32>
    %168 = vector.multi_reduction <add>, %167, %cst_71 [1] : vector<8x8xf32> to vector<8xf32>
    %169 = vector.shape_cast %168 : vector<8xf32> to vector<8x1xf32>
    %170 = tpu.reciprocal %169 {approx = true} : vector<8x1xf32> -> vector<8x1xf32>
    %171 = vector.broadcast %170 : vector<8x1xf32> to vector<8x8xf32>
    %172 = arith.mulf %167, %171 : vector<8x8xf32>
    %173 = arith.truncf %172 : vector<8x8xf32> to vector<8x8xbf16>
    %174 = vector.extract_strided_slice %140 {offsets = [0, 8], sizes = [8, 8], strides = [1, 1]} : vector<8x32xbf16> to vector<8x8xbf16>
    %cst_72 = arith.constant dense<0.000000e+00> : vector<8x8xf32>
    %175 = tpu.matmul %173, %174, %cst_72 {dimension_numbers = #tpu.dot_dimension_numbers<[1], [0], [0], [1], [0, 0, 1, 1], [], []>} : vector<8x8xbf16>, vector<8x8xbf16>, vector<8x8xf32> -> vector<8x8xf32>
    %c8_73 = arith.constant 8 : index
    %c8_74 = arith.constant 8 : index
    %176 = vector.load %arg34[%c8_73, %c8_74] : memref<16x32xf32, #tpu.memory_space<vmem>>, vector<8x8xf32>
    tpu.vector_store %arg34[%c8_73, %c8_74], %175 {strides = array<i32>} : memref<16x32xf32, #tpu.memory_space<vmem>>, vector<8x8xf32>,
    %177 = vector.extract_strided_slice %138 {offsets = [0, 16], sizes = [8, 8], strides = [1, 1]} : vector<8x32xbf16> to vector<8x8xbf16>
    %178 = vector.extract_strided_slice %139 {offsets = [0, 16], sizes = [8, 8], strides = [1, 1]} : vector<8x32xbf16> to vector<8x8xbf16>
    "tpu.trace_start"() <{level = 10 : i32, message = "ld,sd->ls"}> : () -> ()
    %cst_75 = arith.constant dense<0.000000e+00> : vector<8x8xf32>
    %179 = tpu.matmul %177, %178, %cst_75 {dimension_numbers = #tpu.dot_dimension_numbers<[1], [1], [0], [0], [0, 0, 1, 0], [], []>} : vector<8x8xbf16>, vector<8x8xbf16>, vector<8x8xf32> -> vector<8x8xf32>
    "tpu.trace_stop"() : () -> ()
    %180 = arith.addf %179, %137 : vector<8x8xf32>
    %cst_76 = arith.constant dense<0xFF800000> : vector<8xf32>
    %181 = vector.multi_reduction <maximumf>, %180, %cst_76 [1] : vector<8x8xf32> to vector<8xf32>
    %182 = vector.shape_cast %181 : vector<8xf32> to vector<8x1xf32>
    %183 = vector.broadcast %182 : vector<8x1xf32> to vector<8x8xf32>
    %184 = arith.subf %180, %183 : vector<8x8xf32>
    %185 = math.exp %184 : vector<8x8xf32>
    %cst_77 = arith.constant dense<0.000000e+00> : vector<8xf32>
    %186 = vector.multi_reduction <add>, %185, %cst_77 [1] : vector<8x8xf32> to vector<8xf32>
    %187 = vector.shape_cast %186 : vector<8xf32> to vector<8x1xf32>
    %188 = tpu.reciprocal %187 {approx = true} : vector<8x1xf32> -> vector<8x1xf32>
    %189 = vector.broadcast %188 : vector<8x1xf32> to vector<8x8xf32>
    %190 = arith.mulf %185, %189 : vector<8x8xf32>
    %191 = arith.truncf %190 : vector<8x8xf32> to vector<8x8xbf16>
    %192 = vector.extract_strided_slice %140 {offsets = [0, 16], sizes = [8, 8], strides = [1, 1]} : vector<8x32xbf16> to vector<8x8xbf16>
    %cst_78 = arith.constant dense<0.000000e+00> : vector<8x8xf32>
    %193 = tpu.matmul %191, %192, %cst_78 {dimension_numbers = #tpu.dot_dimension_numbers<[1], [0], [0], [1], [0, 0, 1, 1], [], []>} : vector<8x8xbf16>, vector<8x8xbf16>, vector<8x8xf32> -> vector<8x8xf32>
    %c8_79 = arith.constant 8 : index
    %c16_80 = arith.constant 16 : index
    %194 = vector.load %arg34[%c8_79, %c16_80] : memref<16x32xf32, #tpu.memory_space<vmem>>, vector<8x8xf32>
    tpu.vector_store %arg34[%c8_79, %c16_80], %193 {strides = array<i32>} : memref<16x32xf32, #tpu.memory_space<vmem>>, vector<8x8xf32>,
    %195 = vector.extract_strided_slice %138 {offsets = [0, 24], sizes = [8, 8], strides = [1, 1]} : vector<8x32xbf16> to vector<8x8xbf16>
    %196 = vector.extract_strided_slice %139 {offsets = [0, 24], sizes = [8, 8], strides = [1, 1]} : vector<8x32xbf16> to vector<8x8xbf16>
    "tpu.trace_start"() <{level = 10 : i32, message = "ld,sd->ls"}> : () -> ()
    %cst_81 = arith.constant dense<0.000000e+00> : vector<8x8xf32>
    %197 = tpu.matmul %195, %196, %cst_81 {dimension_numbers = #tpu.dot_dimension_numbers<[1], [1], [0], [0], [0, 0, 1, 0], [], []>} : vector<8x8xbf16>, vector<8x8xbf16>, vector<8x8xf32> -> vector<8x8xf32>
    "tpu.trace_stop"() : () -> ()
    %198 = arith.addf %197, %137 : vector<8x8xf32>
    %cst_82 = arith.constant dense<0xFF800000> : vector<8xf32>
    %199 = vector.multi_reduction <maximumf>, %198, %cst_82 [1] : vector<8x8xf32> to vector<8xf32>
    %200 = vector.shape_cast %199 : vector<8xf32> to vector<8x1xf32>
    %201 = vector.broadcast %200 : vector<8x1xf32> to vector<8x8xf32>
    %202 = arith.subf %198, %201 : vector<8x8xf32>
    %203 = math.exp %202 : vector<8x8xf32>
    %cst_83 = arith.constant dense<0.000000e+00> : vector<8xf32>
    %204 = vector.multi_reduction <add>, %203, %cst_83 [1] : vector<8x8xf32> to vector<8xf32>
    %205 = vector.shape_cast %204 : vector<8xf32> to vector<8x1xf32>
    %206 = tpu.reciprocal %205 {approx = true} : vector<8x1xf32> -> vector<8x1xf32>
    %207 = vector.broadcast %206 : vector<8x1xf32> to vector<8x8xf32>
    %208 = arith.mulf %203, %207 : vector<8x8xf32>
    %209 = arith.truncf %208 : vector<8x8xf32> to vector<8x8xbf16>
    %210 = vector.extract_strided_slice %140 {offsets = [0, 24], sizes = [8, 8], strides = [1, 1]} : vector<8x32xbf16> to vector<8x8xbf16>
    %cst_84 = arith.constant dense<0.000000e+00> : vector<8x8xf32>
    %211 = tpu.matmul %209, %210, %cst_84 {dimension_numbers = #tpu.dot_dimension_numbers<[1], [0], [0], [1], [0, 0, 1, 1], [], []>} : vector<8x8xbf16>, vector<8x8xbf16>, vector<8x8xf32> -> vector<8x8xf32>
    %c8_85 = arith.constant 8 : index
    %c24_86 = arith.constant 24 : index
    %212 = vector.load %arg34[%c8_85, %c24_86] : memref<16x32xf32, #tpu.memory_space<vmem>>, vector<8x8xf32>
    tpu.vector_store %arg34[%c8_85, %c24_86], %211 {strides = array<i32>} : memref<16x32xf32, #tpu.memory_space<vmem>>, vector<8x8xf32>,
    %c0_87 = arith.constant 0 : index
    %c0_88 = arith.constant 0 : index
    %213 = vector.load %arg34[%c0_87, %c0_88] : memref<16x32xf32, #tpu.memory_space<vmem>>, vector<16x32xf32>
    %214 = arith.truncf %213 : vector<16x32xf32> to vector<16x32xbf16>
    %c0_89 = arith.constant 0 : index
    %c0_90 = arith.constant 0 : index
    %215 = vector.load %arg13[%c0_89, %c0_90] : memref<32x32xbf16, #tpu.memory_space<vmem>>, vector<32x32xbf16>
    %cst_91 = arith.constant dense<0.000000e+00> : vector<16x32xf32>
    %216 = tpu.matmul %214, %215, %cst_91 {dimension_numbers = #tpu.dot_dimension_numbers<[1], [0], [0], [1], [0, 0, 1, 1], [], []>} : vector<16x32xbf16>, vector<32x32xbf16>, vector<16x32xf32> -> vector<16x32xf32>
    %c0_92 = arith.constant 0 : index
    %c0_93 = arith.constant 0 : index
    %217 = vector.load %arg14[%c0_92, %c0_93] : memref<1x32xf32, #tpu.memory_space<vmem>>, vector<1x32xf32>
    %218 = vector.broadcast %217 : vector<1x32xf32> to vector<16x32xf32>
    %219 = arith.addf %216, %218 : vector<16x32xf32>
    %220 = arith.addf %1, %219 : vector<16x32xf32>
    %c0_94 = arith.constant 0 : index
    %c0_95 = arith.constant 0 : index
    %221 = vector.load %arg15[%c0_94, %c0_95] : memref<1x32xf32, #tpu.memory_space<vmem>>, vector<1x32xf32>
    %c0_96 = arith.constant 0 : index
    %c0_97 = arith.constant 0 : index
    %222 = vector.load %arg16[%c0_96, %c0_97] : memref<1x32xf32, #tpu.memory_space<vmem>>, vector<1x32xf32>
    %cst_98 = arith.constant dense<0.000000e+00> : vector<16xf32>
    %223 = vector.multi_reduction <add>, %220, %cst_98 [1] : vector<16x32xf32> to vector<16xf32>
    %224 = vector.shape_cast %223 : vector<16xf32> to vector<16x1xf32>
    %cst_99 = arith.constant 3.200000e+01 : f32
    %225 = vector.broadcast %cst_99 : f32 to vector<16x1xf32>
    %226 = arith.divf %224, %225 : vector<16x1xf32>
    %227 = vector.broadcast %226 : vector<16x1xf32> to vector<16x32xf32>
    %228 = arith.subf %220, %227 : vector<16x32xf32>
    %229 = arith.mulf %228, %228 : vector<16x32xf32>
    %cst_100 = arith.constant dense<0.000000e+00> : vector<16xf32>
    %230 = vector.multi_reduction <add>, %229, %cst_100 [1] : vector<16x32xf32> to vector<16xf32>
    %231 = vector.shape_cast %230 : vector<16xf32> to vector<16x1xf32>
    %cst_101 = arith.constant 0.0322580636 : f32
    %232 = vector.broadcast %cst_101 : f32 to vector<16x1xf32>
    %233 = arith.mulf %231, %232 : vector<16x1xf32>
    %234 = math.sqrt %233 : vector<16x1xf32>
    %cst_102 = arith.constant 9.99999997E-7 : f32
    %235 = vector.broadcast %cst_102 : f32 to vector<16x1xf32>
    %236 = arith.addf %234, %235 : vector<16x1xf32>
    %cst_103 = arith.constant 1.000000e+00 : f32
    %237 = vector.broadcast %cst_103 : f32 to vector<16x1xf32>
    %238 = arith.divf %237, %236 : vector<16x1xf32>
    %239 = vector.broadcast %221 : vector<1x32xf32> to vector<16x32xf32>
    %240 = vector.broadcast %238 : vector<16x1xf32> to vector<16x32xf32>
    %241 = arith.mulf %239, %240 : vector<16x32xf32>
    %242 = arith.mulf %241, %228 : vector<16x32xf32>
    %243 = vector.broadcast %222 : vector<1x32xf32> to vector<16x32xf32>
    %244 = arith.addf %242, %243 : vector<16x32xf32>
    %245 = arith.truncf %244 : vector<16x32xf32> to vector<16x32xbf16>
    %c0_104 = arith.constant 0 : index
    %c0_105 = arith.constant 0 : index
    %246 = vector.load %arg17[%c0_104, %c0_105] : memref<32x32xbf16, #tpu.memory_space<vmem>>, vector<32x32xbf16>
    %cst_106 = arith.constant dense<0.000000e+00> : vector<16x32xf32>
    %247 = tpu.matmul %245, %246, %cst_106 {dimension_numbers = #tpu.dot_dimension_numbers<[1], [0], [0], [1], [0, 0, 1, 1], [], []>} : vector<16x32xbf16>, vector<32x32xbf16>, vector<16x32xf32> -> vector<16x32xf32>
    %c0_107 = arith.constant 0 : index
    %c0_108 = arith.constant 0 : index
    %248 = vector.load %arg18[%c0_107, %c0_108] : memref<1x32xf32, #tpu.memory_space<vmem>>, vector<1x32xf32>
    %249 = vector.broadcast %248 : vector<1x32xf32> to vector<16x32xf32>
    %250 = arith.addf %247, %249 : vector<16x32xf32>
    %cst_109 = arith.constant 0.353553385 : f32
    %251 = vector.broadcast %cst_109 : f32 to vector<16x32xf32>
    %252 = arith.mulf %250, %251 : vector<16x32xf32>
    %253 = arith.truncf %252 : vector<16x32xf32> to vector<16x32xbf16>
    %c0_110 = arith.constant 0 : index
    %c0_111 = arith.constant 0 : index
    %254 = vector.load %arg19[%c0_110, %c0_111] : memref<32x32xbf16, #tpu.memory_space<vmem>>, vector<32x32xbf16>
    %cst_112 = arith.constant dense<0.000000e+00> : vector<32x32xf32>
    %255 = tpu.matmul %3, %254, %cst_112 {dimension_numbers = #tpu.dot_dimension_numbers<[1], [0], [0], [1], [0, 0, 1, 1], [], []>} : vector<32x32xbf16>, vector<32x32xbf16>, vector<32x32xf32> -> vector<32x32xf32>
    %c0_113 = arith.constant 0 : index
    %c0_114 = arith.constant 0 : index
    %256 = vector.load %arg20[%c0_113, %c0_114] : memref<1x32xf32, #tpu.memory_space<vmem>>, vector<1x32xf32>
    %257 = vector.broadcast %256 : vector<1x32xf32> to vector<32x32xf32>
    %258 = arith.addf %255, %257 : vector<32x32xf32>
    %259 = arith.truncf %258 : vector<32x32xf32> to vector<32x32xbf16>
    %c0_115 = arith.constant 0 : index
    %c0_116 = arith.constant 0 : index
    %260 = vector.load %arg21[%c0_115, %c0_116] : memref<32x32xbf16, #tpu.memory_space<vmem>>, vector<32x32xbf16>
    %cst_117 = arith.constant dense<0.000000e+00> : vector<32x32xf32>
    %261 = tpu.matmul %3, %260, %cst_117 {dimension_numbers = #tpu.dot_dimension_numbers<[1], [0], [0], [1], [0, 0, 1, 1], [], []>} : vector<32x32xbf16>, vector<32x32xbf16>, vector<32x32xf32> -> vector<32x32xf32>
    %c0_118 = arith.constant 0 : index
    %c0_119 = arith.constant 0 : index
    %262 = vector.load %arg22[%c0_118, %c0_119] : memref<1x32xf32, #tpu.memory_space<vmem>>, vector<1x32xf32>
    %263 = vector.broadcast %262 : vector<1x32xf32> to vector<32x32xf32>
    %264 = arith.addf %261, %263 : vector<32x32xf32>
    %265 = arith.truncf %264 : vector<32x32xf32> to vector<32x32xbf16>
    %266 = vector.extract_strided_slice %15 {offsets = [0, 0, 0], sizes = [1, 1, 16], strides = [1, 1, 1]} : vector<2x1x16xf32> to vector<1x1x16xf32>
    %267 = vector.shape_cast %266 : vector<1x1x16xf32> to vector<1x16xf32>
    %268 = vector.extract_strided_slice %253 {offsets = [0, 0], sizes = [8, 32], strides = [1, 1]} : vector<16x32xbf16> to vector<8x32xbf16>
    %269 = vector.extract_strided_slice %259 {offsets = [0, 0], sizes = [16, 32], strides = [1, 1]} : vector<32x32xbf16> to vector<16x32xbf16>
    %270 = vector.extract_strided_slice %265 {offsets = [0, 0], sizes = [16, 32], strides = [1, 1]} : vector<32x32xbf16> to vector<16x32xbf16>
    %271 = vector.extract_strided_slice %268 {offsets = [0, 0], sizes = [8, 8], strides = [1, 1]} : vector<8x32xbf16> to vector<8x8xbf16>
    %272 = vector.extract_strided_slice %269 {offsets = [0, 0], sizes = [16, 8], strides = [1, 1]} : vector<16x32xbf16> to vector<16x8xbf16>
    "tpu.trace_start"() <{level = 10 : i32, message = "ld,sd->ls"}> : () -> ()
    %cst_120 = arith.constant dense<0.000000e+00> : vector<8x16xf32>
    %273 = tpu.matmul %271, %272, %cst_120 {dimension_numbers = #tpu.dot_dimension_numbers<[1], [1], [0], [0], [0, 0, 1, 0], [], []>} : vector<8x8xbf16>, vector<16x8xbf16>, vector<8x16xf32> -> vector<8x16xf32>
    "tpu.trace_stop"() : () -> ()
    %274 = vector.broadcast %267 : vector<1x16xf32> to vector<8x16xf32>
    %275 = arith.addf %273, %274 : vector<8x16xf32>
    %cst_121 = arith.constant dense<0xFF800000> : vector<8xf32>
    %276 = vector.multi_reduction <maximumf>, %275, %cst_121 [1] : vector<8x16xf32> to vector<8xf32>
    %277 = vector.shape_cast %276 : vector<8xf32> to vector<8x1xf32>
    %278 = vector.broadcast %277 : vector<8x1xf32> to vector<8x16xf32>
    %279 = arith.subf %275, %278 : vector<8x16xf32>
    %280 = math.exp %279 : vector<8x16xf32>
    %cst_122 = arith.constant dense<0.000000e+00> : vector<8xf32>
    %281 = vector.multi_reduction <add>, %280, %cst_122 [1] : vector<8x16xf32> to vector<8xf32>
    %282 = vector.shape_cast %281 : vector<8xf32> to vector<8x1xf32>
    %283 = tpu.reciprocal %282 {approx = true} : vector<8x1xf32> -> vector<8x1xf32>
    %284 = vector.broadcast %283 : vector<8x1xf32> to vector<8x16xf32>
    %285 = arith.mulf %280, %284 : vector<8x16xf32>
    %286 = arith.truncf %285 : vector<8x16xf32> to vector<8x16xbf16>
    %287 = vector.extract_strided_slice %270 {offsets = [0, 0], sizes = [16, 8], strides = [1, 1]} : vector<16x32xbf16> to vector<16x8xbf16>
    %cst_123 = arith.constant dense<0.000000e+00> : vector<8x8xf32>
    %288 = tpu.matmul %286, %287, %cst_123 {dimension_numbers = #tpu.dot_dimension_numbers<[1], [0], [0], [1], [0, 0, 1, 1], [], []>} : vector<8x16xbf16>, vector<16x8xbf16>, vector<8x8xf32> -> vector<8x8xf32>
    %c0_124 = arith.constant 0 : index
    %c0_125 = arith.constant 0 : index
    %289 = vector.load %arg34[%c0_124, %c0_125] : memref<16x32xf32, #tpu.memory_space<vmem>>, vector<8x8xf32>
    tpu.vector_store %arg34[%c0_124, %c0_125], %288 {strides = array<i32>} : memref<16x32xf32, #tpu.memory_space<vmem>>, vector<8x8xf32>,
    %290 = vector.extract_strided_slice %268 {offsets = [0, 8], sizes = [8, 8], strides = [1, 1]} : vector<8x32xbf16> to vector<8x8xbf16>
    %291 = vector.extract_strided_slice %269 {offsets = [0, 8], sizes = [16, 8], strides = [1, 1]} : vector<16x32xbf16> to vector<16x8xbf16>
    "tpu.trace_start"() <{level = 10 : i32, message = "ld,sd->ls"}> : () -> ()
    %cst_126 = arith.constant dense<0.000000e+00> : vector<8x16xf32>
    %292 = tpu.matmul %290, %291, %cst_126 {dimension_numbers = #tpu.dot_dimension_numbers<[1], [1], [0], [0], [0, 0, 1, 0], [], []>} : vector<8x8xbf16>, vector<16x8xbf16>, vector<8x16xf32> -> vector<8x16xf32>
    "tpu.trace_stop"() : () -> ()
    %293 = vector.broadcast %267 : vector<1x16xf32> to vector<8x16xf32>
    %294 = arith.addf %292, %293 : vector<8x16xf32>
    %cst_127 = arith.constant dense<0xFF800000> : vector<8xf32>
    %295 = vector.multi_reduction <maximumf>, %294, %cst_127 [1] : vector<8x16xf32> to vector<8xf32>
    %296 = vector.shape_cast %295 : vector<8xf32> to vector<8x1xf32>
    %297 = vector.broadcast %296 : vector<8x1xf32> to vector<8x16xf32>
    %298 = arith.subf %294, %297 : vector<8x16xf32>
    %299 = math.exp %298 : vector<8x16xf32>
    %cst_128 = arith.constant dense<0.000000e+00> : vector<8xf32>
    %300 = vector.multi_reduction <add>, %299, %cst_128 [1] : vector<8x16xf32> to vector<8xf32>
    %301 = vector.shape_cast %300 : vector<8xf32> to vector<8x1xf32>
    %302 = tpu.reciprocal %301 {approx = true} : vector<8x1xf32> -> vector<8x1xf32>
    %303 = vector.broadcast %302 : vector<8x1xf32> to vector<8x16xf32>
    %304 = arith.mulf %299, %303 : vector<8x16xf32>
    %305 = arith.truncf %304 : vector<8x16xf32> to vector<8x16xbf16>
    %306 = vector.extract_strided_slice %270 {offsets = [0, 8], sizes = [16, 8], strides = [1, 1]} : vector<16x32xbf16> to vector<16x8xbf16>
    %cst_129 = arith.constant dense<0.000000e+00> : vector<8x8xf32>
    %307 = tpu.matmul %305, %306, %cst_129 {dimension_numbers = #tpu.dot_dimension_numbers<[1], [0], [0], [1], [0, 0, 1, 1], [], []>} : vector<8x16xbf16>, vector<16x8xbf16>, vector<8x8xf32> -> vector<8x8xf32>
    %c0_130 = arith.constant 0 : index
    %c8_131 = arith.constant 8 : index
    %308 = vector.load %arg34[%c0_130, %c8_131] : memref<16x32xf32, #tpu.memory_space<vmem>>, vector<8x8xf32>
    tpu.vector_store %arg34[%c0_130, %c8_131], %307 {strides = array<i32>} : memref<16x32xf32, #tpu.memory_space<vmem>>, vector<8x8xf32>,
    %309 = vector.extract_strided_slice %268 {offsets = [0, 16], sizes = [8, 8], strides = [1, 1]} : vector<8x32xbf16> to vector<8x8xbf16>
    %310 = vector.extract_strided_slice %269 {offsets = [0, 16], sizes = [16, 8], strides = [1, 1]} : vector<16x32xbf16> to vector<16x8xbf16>
    "tpu.trace_start"() <{level = 10 : i32, message = "ld,sd->ls"}> : () -> ()
    %cst_132 = arith.constant dense<0.000000e+00> : vector<8x16xf32>
    %311 = tpu.matmul %309, %310, %cst_132 {dimension_numbers = #tpu.dot_dimension_numbers<[1], [1], [0], [0], [0, 0, 1, 0], [], []>} : vector<8x8xbf16>, vector<16x8xbf16>, vector<8x16xf32> -> vector<8x16xf32>
    "tpu.trace_stop"() : () -> ()
    %312 = vector.broadcast %267 : vector<1x16xf32> to vector<8x16xf32>
    %313 = arith.addf %311, %312 : vector<8x16xf32>
    %cst_133 = arith.constant dense<0xFF800000> : vector<8xf32>
    %314 = vector.multi_reduction <maximumf>, %313, %cst_133 [1] : vector<8x16xf32> to vector<8xf32>
    %315 = vector.shape_cast %314 : vector<8xf32> to vector<8x1xf32>
    %316 = vector.broadcast %315 : vector<8x1xf32> to vector<8x16xf32>
    %317 = arith.subf %313, %316 : vector<8x16xf32>
    %318 = math.exp %317 : vector<8x16xf32>
    %cst_134 = arith.constant dense<0.000000e+00> : vector<8xf32>
    %319 = vector.multi_reduction <add>, %318, %cst_134 [1] : vector<8x16xf32> to vector<8xf32>
    %320 = vector.shape_cast %319 : vector<8xf32> to vector<8x1xf32>
    %321 = tpu.reciprocal %320 {approx = true} : vector<8x1xf32> -> vector<8x1xf32>
    %322 = vector.broadcast %321 : vector<8x1xf32> to vector<8x16xf32>
    %323 = arith.mulf %318, %322 : vector<8x16xf32>
    %324 = arith.truncf %323 : vector<8x16xf32> to vector<8x16xbf16>
    %325 = vector.extract_strided_slice %270 {offsets = [0, 16], sizes = [16, 8], strides = [1, 1]} : vector<16x32xbf16> to vector<16x8xbf16>
    %cst_135 = arith.constant dense<0.000000e+00> : vector<8x8xf32>
    %326 = tpu.matmul %324, %325, %cst_135 {dimension_numbers = #tpu.dot_dimension_numbers<[1], [0], [0], [1], [0, 0, 1, 1], [], []>} : vector<8x16xbf16>, vector<16x8xbf16>, vector<8x8xf32> -> vector<8x8xf32>
    %c0_136 = arith.constant 0 : index
    %c16_137 = arith.constant 16 : index
    %327 = vector.load %arg34[%c0_136, %c16_137] : memref<16x32xf32, #tpu.memory_space<vmem>>, vector<8x8xf32>
    tpu.vector_store %arg34[%c0_136, %c16_137], %326 {strides = array<i32>} : memref<16x32xf32, #tpu.memory_space<vmem>>, vector<8x8xf32>,
    %328 = vector.extract_strided_slice %268 {offsets = [0, 24], sizes = [8, 8], strides = [1, 1]} : vector<8x32xbf16> to vector<8x8xbf16>
    %329 = vector.extract_strided_slice %269 {offsets = [0, 24], sizes = [16, 8], strides = [1, 1]} : vector<16x32xbf16> to vector<16x8xbf16>
    "tpu.trace_start"() <{level = 10 : i32, message = "ld,sd->ls"}> : () -> ()
    %cst_138 = arith.constant dense<0.000000e+00> : vector<8x16xf32>
    %330 = tpu.matmul %328, %329, %cst_138 {dimension_numbers = #tpu.dot_dimension_numbers<[1], [1], [0], [0], [0, 0, 1, 0], [], []>} : vector<8x8xbf16>, vector<16x8xbf16>, vector<8x16xf32> -> vector<8x16xf32>
    "tpu.trace_stop"() : () -> ()
    %331 = vector.broadcast %267 : vector<1x16xf32> to vector<8x16xf32>
    %332 = arith.addf %330, %331 : vector<8x16xf32>
    %cst_139 = arith.constant dense<0xFF800000> : vector<8xf32>
    %333 = vector.multi_reduction <maximumf>, %332, %cst_139 [1] : vector<8x16xf32> to vector<8xf32>
    %334 = vector.shape_cast %333 : vector<8xf32> to vector<8x1xf32>
    %335 = vector.broadcast %334 : vector<8x1xf32> to vector<8x16xf32>
    %336 = arith.subf %332, %335 : vector<8x16xf32>
    %337 = math.exp %336 : vector<8x16xf32>
    %cst_140 = arith.constant dense<0.000000e+00> : vector<8xf32>
    %338 = vector.multi_reduction <add>, %337, %cst_140 [1] : vector<8x16xf32> to vector<8xf32>
    %339 = vector.shape_cast %338 : vector<8xf32> to vector<8x1xf32>
    %340 = tpu.reciprocal %339 {approx = true} : vector<8x1xf32> -> vector<8x1xf32>
    %341 = vector.broadcast %340 : vector<8x1xf32> to vector<8x16xf32>
    %342 = arith.mulf %337, %341 : vector<8x16xf32>
    %343 = arith.truncf %342 : vector<8x16xf32> to vector<8x16xbf16>
    %344 = vector.extract_strided_slice %270 {offsets = [0, 24], sizes = [16, 8], strides = [1, 1]} : vector<16x32xbf16> to vector<16x8xbf16>
    %cst_141 = arith.constant dense<0.000000e+00> : vector<8x8xf32>
    %345 = tpu.matmul %343, %344, %cst_141 {dimension_numbers = #tpu.dot_dimension_numbers<[1], [0], [0], [1], [0, 0, 1, 1], [], []>} : vector<8x16xbf16>, vector<16x8xbf16>, vector<8x8xf32> -> vector<8x8xf32>
    %c0_142 = arith.constant 0 : index
    %c24_143 = arith.constant 24 : index
    %346 = vector.load %arg34[%c0_142, %c24_143] : memref<16x32xf32, #tpu.memory_space<vmem>>, vector<8x8xf32>
    tpu.vector_store %arg34[%c0_142, %c24_143], %345 {strides = array<i32>} : memref<16x32xf32, #tpu.memory_space<vmem>>, vector<8x8xf32>,
    %347 = vector.extract_strided_slice %15 {offsets = [1, 0, 0], sizes = [1, 1, 16], strides = [1, 1, 1]} : vector<2x1x16xf32> to vector<1x1x16xf32>
    %348 = vector.shape_cast %347 : vector<1x1x16xf32> to vector<1x16xf32>
    %349 = vector.extract_strided_slice %253 {offsets = [8, 0], sizes = [8, 32], strides = [1, 1]} : vector<16x32xbf16> to vector<8x32xbf16>
    %350 = vector.extract_strided_slice %259 {offsets = [16, 0], sizes = [16, 32], strides = [1, 1]} : vector<32x32xbf16> to vector<16x32xbf16>
    %351 = vector.extract_strided_slice %265 {offsets = [16, 0], sizes = [16, 32], strides = [1, 1]} : vector<32x32xbf16> to vector<16x32xbf16>
    %352 = vector.extract_strided_slice %349 {offsets = [0, 0], sizes = [8, 8], strides = [1, 1]} : vector<8x32xbf16> to vector<8x8xbf16>
    %353 = vector.extract_strided_slice %350 {offsets = [0, 0], sizes = [16, 8], strides = [1, 1]} : vector<16x32xbf16> to vector<16x8xbf16>
    "tpu.trace_start"() <{level = 10 : i32, message = "ld,sd->ls"}> : () -> ()
    %cst_144 = arith.constant dense<0.000000e+00> : vector<8x16xf32>
    %354 = tpu.matmul %352, %353, %cst_144 {dimension_numbers = #tpu.dot_dimension_numbers<[1], [1], [0], [0], [0, 0, 1, 0], [], []>} : vector<8x8xbf16>, vector<16x8xbf16>, vector<8x16xf32> -> vector<8x16xf32>
    "tpu.trace_stop"() : () -> ()
    %355 = vector.broadcast %348 : vector<1x16xf32> to vector<8x16xf32>
    %356 = arith.addf %354, %355 : vector<8x16xf32>
    %cst_145 = arith.constant dense<0xFF800000> : vector<8xf32>
    %357 = vector.multi_reduction <maximumf>, %356, %cst_145 [1] : vector<8x16xf32> to vector<8xf32>
    %358 = vector.shape_cast %357 : vector<8xf32> to vector<8x1xf32>
    %359 = vector.broadcast %358 : vector<8x1xf32> to vector<8x16xf32>
    %360 = arith.subf %356, %359 : vector<8x16xf32>
    %361 = math.exp %360 : vector<8x16xf32>
    %cst_146 = arith.constant dense<0.000000e+00> : vector<8xf32>
    %362 = vector.multi_reduction <add>, %361, %cst_146 [1] : vector<8x16xf32> to vector<8xf32>
    %363 = vector.shape_cast %362 : vector<8xf32> to vector<8x1xf32>
    %364 = tpu.reciprocal %363 {approx = true} : vector<8x1xf32> -> vector<8x1xf32>
    %365 = vector.broadcast %364 : vector<8x1xf32> to vector<8x16xf32>
    %366 = arith.mulf %361, %365 : vector<8x16xf32>
    %367 = arith.truncf %366 : vector<8x16xf32> to vector<8x16xbf16>
    %368 = vector.extract_strided_slice %351 {offsets = [0, 0], sizes = [16, 8], strides = [1, 1]} : vector<16x32xbf16> to vector<16x8xbf16>
    %cst_147 = arith.constant dense<0.000000e+00> : vector<8x8xf32>
    %369 = tpu.matmul %367, %368, %cst_147 {dimension_numbers = #tpu.dot_dimension_numbers<[1], [0], [0], [1], [0, 0, 1, 1], [], []>} : vector<8x16xbf16>, vector<16x8xbf16>, vector<8x8xf32> -> vector<8x8xf32>
    %c8_148 = arith.constant 8 : index
    %c0_149 = arith.constant 0 : index
    %370 = vector.load %arg34[%c8_148, %c0_149] : memref<16x32xf32, #tpu.memory_space<vmem>>, vector<8x8xf32>
    tpu.vector_store %arg34[%c8_148, %c0_149], %369 {strides = array<i32>} : memref<16x32xf32, #tpu.memory_space<vmem>>, vector<8x8xf32>,
    %371 = vector.extract_strided_slice %349 {offsets = [0, 8], sizes = [8, 8], strides = [1, 1]} : vector<8x32xbf16> to vector<8x8xbf16>
    %372 = vector.extract_strided_slice %350 {offsets = [0, 8], sizes = [16, 8], strides = [1, 1]} : vector<16x32xbf16> to vector<16x8xbf16>
    "tpu.trace_start"() <{level = 10 : i32, message = "ld,sd->ls"}> : () -> ()
    %cst_150 = arith.constant dense<0.000000e+00> : vector<8x16xf32>
    %373 = tpu.matmul %371, %372, %cst_150 {dimension_numbers = #tpu.dot_dimension_numbers<[1], [1], [0], [0], [0, 0, 1, 0], [], []>} : vector<8x8xbf16>, vector<16x8xbf16>, vector<8x16xf32> -> vector<8x16xf32>
    "tpu.trace_stop"() : () -> ()
    %374 = vector.broadcast %348 : vector<1x16xf32> to vector<8x16xf32>
    %375 = arith.addf %373, %374 : vector<8x16xf32>
    %cst_151 = arith.constant dense<0xFF800000> : vector<8xf32>
    %376 = vector.multi_reduction <maximumf>, %375, %cst_151 [1] : vector<8x16xf32> to vector<8xf32>
    %377 = vector.shape_cast %376 : vector<8xf32> to vector<8x1xf32>
    %378 = vector.broadcast %377 : vector<8x1xf32> to vector<8x16xf32>
    %379 = arith.subf %375, %378 : vector<8x16xf32>
    %380 = math.exp %379 : vector<8x16xf32>
    %cst_152 = arith.constant dense<0.000000e+00> : vector<8xf32>
    %381 = vector.multi_reduction <add>, %380, %cst_152 [1] : vector<8x16xf32> to vector<8xf32>
    %382 = vector.shape_cast %381 : vector<8xf32> to vector<8x1xf32>
    %383 = tpu.reciprocal %382 {approx = true} : vector<8x1xf32> -> vector<8x1xf32>
    %384 = vector.broadcast %383 : vector<8x1xf32> to vector<8x16xf32>
    %385 = arith.mulf %380, %384 : vector<8x16xf32>
    %386 = arith.truncf %385 : vector<8x16xf32> to vector<8x16xbf16>
    %387 = vector.extract_strided_slice %351 {offsets = [0, 8], sizes = [16, 8], strides = [1, 1]} : vector<16x32xbf16> to vector<16x8xbf16>
    %cst_153 = arith.constant dense<0.000000e+00> : vector<8x8xf32>
    %388 = tpu.matmul %386, %387, %cst_153 {dimension_numbers = #tpu.dot_dimension_numbers<[1], [0], [0], [1], [0, 0, 1, 1], [], []>} : vector<8x16xbf16>, vector<16x8xbf16>, vector<8x8xf32> -> vector<8x8xf32>
    %c8_154 = arith.constant 8 : index
    %c8_155 = arith.constant 8 : index
    %389 = vector.load %arg34[%c8_154, %c8_155] : memref<16x32xf32, #tpu.memory_space<vmem>>, vector<8x8xf32>
    tpu.vector_store %arg34[%c8_154, %c8_155], %388 {strides = array<i32>} : memref<16x32xf32, #tpu.memory_space<vmem>>, vector<8x8xf32>,
    %390 = vector.extract_strided_slice %349 {offsets = [0, 16], sizes = [8, 8], strides = [1, 1]} : vector<8x32xbf16> to vector<8x8xbf16>
    %391 = vector.extract_strided_slice %350 {offsets = [0, 16], sizes = [16, 8], strides = [1, 1]} : vector<16x32xbf16> to vector<16x8xbf16>
    "tpu.trace_start"() <{level = 10 : i32, message = "ld,sd->ls"}> : () -> ()
    %cst_156 = arith.constant dense<0.000000e+00> : vector<8x16xf32>
    %392 = tpu.matmul %390, %391, %cst_156 {dimension_numbers = #tpu.dot_dimension_numbers<[1], [1], [0], [0], [0, 0, 1, 0], [], []>} : vector<8x8xbf16>, vector<16x8xbf16>, vector<8x16xf32> -> vector<8x16xf32>
    "tpu.trace_stop"() : () -> ()
    %393 = vector.broadcast %348 : vector<1x16xf32> to vector<8x16xf32>
    %394 = arith.addf %392, %393 : vector<8x16xf32>
    %cst_157 = arith.constant dense<0xFF800000> : vector<8xf32>
    %395 = vector.multi_reduction <maximumf>, %394, %cst_157 [1] : vector<8x16xf32> to vector<8xf32>
    %396 = vector.shape_cast %395 : vector<8xf32> to vector<8x1xf32>
    %397 = vector.broadcast %396 : vector<8x1xf32> to vector<8x16xf32>
    %398 = arith.subf %394, %397 : vector<8x16xf32>
    %399 = math.exp %398 : vector<8x16xf32>
    %cst_158 = arith.constant dense<0.000000e+00> : vector<8xf32>
    %400 = vector.multi_reduction <add>, %399, %cst_158 [1] : vector<8x16xf32> to vector<8xf32>
    %401 = vector.shape_cast %400 : vector<8xf32> to vector<8x1xf32>
    %402 = tpu.reciprocal %401 {approx = true} : vector<8x1xf32> -> vector<8x1xf32>
    %403 = vector.broadcast %402 : vector<8x1xf32> to vector<8x16xf32>
    %404 = arith.mulf %399, %403 : vector<8x16xf32>
    %405 = arith.truncf %404 : vector<8x16xf32> to vector<8x16xbf16>
    %406 = vector.extract_strided_slice %351 {offsets = [0, 16], sizes = [16, 8], strides = [1, 1]} : vector<16x32xbf16> to vector<16x8xbf16>
    %cst_159 = arith.constant dense<0.000000e+00> : vector<8x8xf32>
    %407 = tpu.matmul %405, %406, %cst_159 {dimension_numbers = #tpu.dot_dimension_numbers<[1], [0], [0], [1], [0, 0, 1, 1], [], []>} : vector<8x16xbf16>, vector<16x8xbf16>, vector<8x8xf32> -> vector<8x8xf32>
    %c8_160 = arith.constant 8 : index
    %c16_161 = arith.constant 16 : index
    %408 = vector.load %arg34[%c8_160, %c16_161] : memref<16x32xf32, #tpu.memory_space<vmem>>, vector<8x8xf32>
    tpu.vector_store %arg34[%c8_160, %c16_161], %407 {strides = array<i32>} : memref<16x32xf32, #tpu.memory_space<vmem>>, vector<8x8xf32>,
    %409 = vector.extract_strided_slice %349 {offsets = [0, 24], sizes = [8, 8], strides = [1, 1]} : vector<8x32xbf16> to vector<8x8xbf16>
    %410 = vector.extract_strided_slice %350 {offsets = [0, 24], sizes = [16, 8], strides = [1, 1]} : vector<16x32xbf16> to vector<16x8xbf16>
    "tpu.trace_start"() <{level = 10 : i32, message = "ld,sd->ls"}> : () -> ()
    %cst_162 = arith.constant dense<0.000000e+00> : vector<8x16xf32>
    %411 = tpu.matmul %409, %410, %cst_162 {dimension_numbers = #tpu.dot_dimension_numbers<[1], [1], [0], [0], [0, 0, 1, 0], [], []>} : vector<8x8xbf16>, vector<16x8xbf16>, vector<8x16xf32> -> vector<8x16xf32>
    "tpu.trace_stop"() : () -> ()
    %412 = vector.broadcast %348 : vector<1x16xf32> to vector<8x16xf32>
    %413 = arith.addf %411, %412 : vector<8x16xf32>
    %cst_163 = arith.constant dense<0xFF800000> : vector<8xf32>
    %414 = vector.multi_reduction <maximumf>, %413, %cst_163 [1] : vector<8x16xf32> to vector<8xf32>
    %415 = vector.shape_cast %414 : vector<8xf32> to vector<8x1xf32>
    %416 = vector.broadcast %415 : vector<8x1xf32> to vector<8x16xf32>
    %417 = arith.subf %413, %416 : vector<8x16xf32>
    %418 = math.exp %417 : vector<8x16xf32>
    %cst_164 = arith.constant dense<0.000000e+00> : vector<8xf32>
    %419 = vector.multi_reduction <add>, %418, %cst_164 [1] : vector<8x16xf32> to vector<8xf32>
    %420 = vector.shape_cast %419 : vector<8xf32> to vector<8x1xf32>
    %421 = tpu.reciprocal %420 {approx = true} : vector<8x1xf32> -> vector<8x1xf32>
    %422 = vector.broadcast %421 : vector<8x1xf32> to vector<8x16xf32>
    %423 = arith.mulf %418, %422 : vector<8x16xf32>
    %424 = arith.truncf %423 : vector<8x16xf32> to vector<8x16xbf16>
    %425 = vector.extract_strided_slice %351 {offsets = [0, 24], sizes = [16, 8], strides = [1, 1]} : vector<16x32xbf16> to vector<16x8xbf16>
    %cst_165 = arith.constant dense<0.000000e+00> : vector<8x8xf32>
    %426 = tpu.matmul %424, %425, %cst_165 {dimension_numbers = #tpu.dot_dimension_numbers<[1], [0], [0], [1], [0, 0, 1, 1], [], []>} : vector<8x16xbf16>, vector<16x8xbf16>, vector<8x8xf32> -> vector<8x8xf32>
    %c8_166 = arith.constant 8 : index
    %c24_167 = arith.constant 24 : index
    %427 = vector.load %arg34[%c8_166, %c24_167] : memref<16x32xf32, #tpu.memory_space<vmem>>, vector<8x8xf32>
    tpu.vector_store %arg34[%c8_166, %c24_167], %426 {strides = array<i32>} : memref<16x32xf32, #tpu.memory_space<vmem>>, vector<8x8xf32>,
    %c0_168 = arith.constant 0 : index
    %c0_169 = arith.constant 0 : index
    %428 = vector.load %arg34[%c0_168, %c0_169] : memref<16x32xf32, #tpu.memory_space<vmem>>, vector<16x32xf32>
    %429 = arith.truncf %428 : vector<16x32xf32> to vector<16x32xbf16>
    %c0_170 = arith.constant 0 : index
    %c0_171 = arith.constant 0 : index
    %430 = vector.load %arg23[%c0_170, %c0_171] : memref<32x32xbf16, #tpu.memory_space<vmem>>, vector<32x32xbf16>
    %cst_172 = arith.constant dense<0.000000e+00> : vector<16x32xf32>
    %431 = tpu.matmul %429, %430, %cst_172 {dimension_numbers = #tpu.dot_dimension_numbers<[1], [0], [0], [1], [0, 0, 1, 1], [], []>} : vector<16x32xbf16>, vector<32x32xbf16>, vector<16x32xf32> -> vector<16x32xf32>
    %c0_173 = arith.constant 0 : index
    %c0_174 = arith.constant 0 : index
    %432 = vector.load %arg24[%c0_173, %c0_174] : memref<1x32xf32, #tpu.memory_space<vmem>>, vector<1x32xf32>
    %433 = vector.broadcast %432 : vector<1x32xf32> to vector<16x32xf32>
    %434 = arith.addf %431, %433 : vector<16x32xf32>
    %435 = arith.addf %220, %434 : vector<16x32xf32>
    %c0_175 = arith.constant 0 : index
    %c0_176 = arith.constant 0 : index
    %436 = vector.load %arg25[%c0_175, %c0_176] : memref<1x32xf32, #tpu.memory_space<vmem>>, vector<1x32xf32>
    %c0_177 = arith.constant 0 : index
    %c0_178 = arith.constant 0 : index
    %437 = vector.load %arg26[%c0_177, %c0_178] : memref<1x32xf32, #tpu.memory_space<vmem>>, vector<1x32xf32>
    %cst_179 = arith.constant dense<0.000000e+00> : vector<16xf32>
    %438 = vector.multi_reduction <add>, %435, %cst_179 [1] : vector<16x32xf32> to vector<16xf32>
    %439 = vector.shape_cast %438 : vector<16xf32> to vector<16x1xf32>
    %cst_180 = arith.constant 3.200000e+01 : f32
    %440 = vector.broadcast %cst_180 : f32 to vector<16x1xf32>
    %441 = arith.divf %439, %440 : vector<16x1xf32>
    %442 = vector.broadcast %441 : vector<16x1xf32> to vector<16x32xf32>
    %443 = arith.subf %435, %442 : vector<16x32xf32>
    %444 = arith.mulf %443, %443 : vector<16x32xf32>
    %cst_181 = arith.constant dense<0.000000e+00> : vector<16xf32>
    %445 = vector.multi_reduction <add>, %444, %cst_181 [1] : vector<16x32xf32> to vector<16xf32>
    %446 = vector.shape_cast %445 : vector<16xf32> to vector<16x1xf32>
    %cst_182 = arith.constant 0.0322580636 : f32
    %447 = vector.broadcast %cst_182 : f32 to vector<16x1xf32>
    %448 = arith.mulf %446, %447 : vector<16x1xf32>
    %449 = math.sqrt %448 : vector<16x1xf32>
    %cst_183 = arith.constant 9.99999997E-7 : f32
    %450 = vector.broadcast %cst_183 : f32 to vector<16x1xf32>
    %451 = arith.addf %449, %450 : vector<16x1xf32>
    %cst_184 = arith.constant 1.000000e+00 : f32
    %452 = vector.broadcast %cst_184 : f32 to vector<16x1xf32>
    %453 = arith.divf %452, %451 : vector<16x1xf32>
    %454 = vector.broadcast %436 : vector<1x32xf32> to vector<16x32xf32>
    %455 = vector.broadcast %453 : vector<16x1xf32> to vector<16x32xf32>
    %456 = arith.mulf %454, %455 : vector<16x32xf32>
    %457 = arith.mulf %456, %443 : vector<16x32xf32>
    %458 = vector.broadcast %437 : vector<1x32xf32> to vector<16x32xf32>
    %459 = arith.addf %457, %458 : vector<16x32xf32>
    %460 = arith.truncf %459 : vector<16x32xf32> to vector<16x32xbf16>
    %c0_185 = arith.constant 0 : index
    %c0_186 = arith.constant 0 : index
    %461 = vector.load %arg27[%c0_185, %c0_186] : memref<32x64xbf16, #tpu.memory_space<vmem>>, vector<32x64xbf16>
    %cst_187 = arith.constant dense<0.000000e+00> : vector<16x64xf32>
    %462 = tpu.matmul %460, %461, %cst_187 {dimension_numbers = #tpu.dot_dimension_numbers<[1], [0], [0], [1], [0, 0, 1, 1], [], []>} : vector<16x32xbf16>, vector<32x64xbf16>, vector<16x64xf32> -> vector<16x64xf32>
    %c0_188 = arith.constant 0 : index
    %c0_189 = arith.constant 0 : index
    %463 = vector.load %arg28[%c0_188, %c0_189] : memref<1x64xf32, #tpu.memory_space<vmem>>, vector<1x64xf32>
    %464 = vector.broadcast %463 : vector<1x64xf32> to vector<16x64xf32>
    %465 = arith.addf %462, %464 : vector<16x64xf32>
    %cst_190 = arith.constant 0.000000e+00 : f32
    %466 = vector.broadcast %cst_190 : f32 to vector<16x64xf32>
    %467 = arith.maximumf %465, %466 : vector<16x64xf32>
    %468 = arith.truncf %467 : vector<16x64xf32> to vector<16x64xbf16>
    %c0_191 = arith.constant 0 : index
    %c0_192 = arith.constant 0 : index
    %469 = vector.load %arg29[%c0_191, %c0_192] : memref<64x32xbf16, #tpu.memory_space<vmem>>, vector<64x32xbf16>
    %cst_193 = arith.constant dense<0.000000e+00> : vector<16x32xf32>
    %470 = tpu.matmul %468, %469, %cst_193 {dimension_numbers = #tpu.dot_dimension_numbers<[1], [0], [0], [1], [0, 0, 1, 1], [], []>} : vector<16x64xbf16>, vector<64x32xbf16>, vector<16x32xf32> -> vector<16x32xf32>
    %c0_194 = arith.constant 0 : index
    %c0_195 = arith.constant 0 : index
    %471 = vector.load %arg30[%c0_194, %c0_195] : memref<1x32xf32, #tpu.memory_space<vmem>>, vector<1x32xf32>
    %472 = vector.broadcast %471 : vector<1x32xf32> to vector<16x32xf32>
    %473 = arith.addf %470, %472 : vector<16x32xf32>
    %474 = arith.addf %435, %473 : vector<16x32xf32>
    %c0_196 = arith.constant 0 : index
    %c0_197 = arith.constant 0 : index
    %475 = vector.load %arg31[%c0_196, %c0_197] : memref<1x32xf32, #tpu.memory_space<vmem>>, vector<1x32xf32>
    %c0_198 = arith.constant 0 : index
    %c0_199 = arith.constant 0 : index
    %476 = vector.load %arg32[%c0_198, %c0_199] : memref<1x32xf32, #tpu.memory_space<vmem>>, vector<1x32xf32>
    %cst_200 = arith.constant dense<0.000000e+00> : vector<16xf32>
    %477 = vector.multi_reduction <add>, %474, %cst_200 [1] : vector<16x32xf32> to vector<16xf32>
    %478 = vector.shape_cast %477 : vector<16xf32> to vector<16x1xf32>
    %cst_201 = arith.constant 3.200000e+01 : f32
    %479 = vector.broadcast %cst_201 : f32 to vector<16x1xf32>
    %480 = arith.divf %478, %479 : vector<16x1xf32>
    %481 = vector.broadcast %480 : vector<16x1xf32> to vector<16x32xf32>
    %482 = arith.subf %474, %481 : vector<16x32xf32>
    %483 = arith.mulf %482, %482 : vector<16x32xf32>
    %cst_202 = arith.constant dense<0.000000e+00> : vector<16xf32>
    %484 = vector.multi_reduction <add>, %483, %cst_202 [1] : vector<16x32xf32> to vector<16xf32>
    %485 = vector.shape_cast %484 : vector<16xf32> to vector<16x1xf32>
    %cst_203 = arith.constant 0.0322580636 : f32
    %486 = vector.broadcast %cst_203 : f32 to vector<16x1xf32>
    %487 = arith.mulf %485, %486 : vector<16x1xf32>
    %488 = math.sqrt %487 : vector<16x1xf32>
    %cst_204 = arith.constant 9.99999997E-7 : f32
    %489 = vector.broadcast %cst_204 : f32 to vector<16x1xf32>
    %490 = arith.addf %488, %489 : vector<16x1xf32>
    %cst_205 = arith.constant 1.000000e+00 : f32
    %491 = vector.broadcast %cst_205 : f32 to vector<16x1xf32>
    %492 = arith.divf %491, %490 : vector<16x1xf32>
    %493 = vector.broadcast %475 : vector<1x32xf32> to vector<16x32xf32>
    %494 = vector.broadcast %492 : vector<16x1xf32> to vector<16x32xf32>
    %495 = arith.mulf %493, %494 : vector<16x32xf32>
    %496 = arith.mulf %495, %482 : vector<16x32xf32>
    %497 = vector.broadcast %476 : vector<1x32xf32> to vector<16x32xf32>
    %498 = arith.addf %496, %497 : vector<16x32xf32>
    %499 = vector.shape_cast %498 : vector<16x32xf32> to vector<2x8x32xf32>
    %c0_206 = arith.constant 0 : index
    %c0_207 = arith.constant 0 : index
    %c0_208 = arith.constant 0 : index
    %500 = vector.load %arg33[%c0_206, %c0_207, %c0_208] : memref<2x8x32xf32, #tpu.memory_space<vmem>>, vector<2x8x32xf32>
    tpu.vector_store %arg33[%c0_206, %c0_207, %c0_208], %499 {strides = array<i32>} : memref<2x8x32xf32, #tpu.memory_space<vmem>>, vector<2x8x32xf32>,
    return
  }
  func.func @transform_0(%arg0: i32) -> (i32, i32, i32) {
    %c0_i32 = arith.constant 0 : i32
    %c0_i32_0 = arith.constant 0 : i32
    %c0_i32_1 = arith.constant 0 : i32
    return %arg0, %c0_i32, %c0_i32_0 : i32, i32, i32
  }
  func.func @transform_1(%arg0: i32) -> (i32, i32, i32) {
    %c0_i32 = arith.constant 0 : i32
    %c0_i32_0 = arith.constant 0 : i32
    %c0_i32_1 = arith.constant 0 : i32
    return %arg0, %c0_i32, %c0_i32_0 : i32, i32, i32
  }
  func.func @transform_2(%arg0: i32) -> (i32, i32, i32) {
    %c0_i32 = arith.constant 0 : i32
    %c0_i32_0 = arith.constant 0 : i32
    %c0_i32_1 = arith.constant 0 : i32
    %c0_i32_2 = arith.constant 0 : i32
    return %c0_i32, %c0_i32_0, %c0_i32_1 : i32, i32, i32
  }
  func.func @transform_3(%arg0: i32) -> (i32, i32, i32) {
    %c0_i32 = arith.constant 0 : i32
    %c0_i32_0 = arith.constant 0 : i32
    %c0_i32_1 = arith.constant 0 : i32
    return %arg0, %c0_i32, %c0_i32_0 : i32, i32, i32
  }
  func.func @transform_4(%arg0: i32) -> (i32, i32) {
    %c0_i32 = arith.constant 0 : i32
    %c0_i32_0 = arith.constant 0 : i32
    %c0_i32_1 = arith.constant 0 : i32
    return %c0_i32, %c0_i32_0 : i32, i32
  }
  func.func @transform_5(%arg0: i32) -> (i32, i32) {
    %c0_i32 = arith.constant 0 : i32
    %c0_i32_0 = arith.constant 0 : i32
    %c0_i32_1 = arith.constant 0 : i32
    return %c0_i32, %c0_i32_0 : i32, i32
  }
  func.func @transform_6(%arg0: i32) -> (i32, i32) {
    %c0_i32 = arith.constant 0 : i32
    %c0_i32_0 = arith.constant 0 : i32
    %c0_i32_1 = arith.constant 0 : i32
    return %c0_i32, %c0_i32_0 : i32, i32
  }
  func.func @transform_7(%arg0: i32) -> (i32, i32) {
    %c0_i32 = arith.constant 0 : i32
    %c0_i32_0 = arith.constant 0 : i32
    %c0_i32_1 = arith.constant 0 : i32
    return %c0_i32, %c0_i32_0 : i32, i32
  }
  func.func @transform_8(%arg0: i32) -> (i32, i32) {
    %c0_i32 = arith.constant 0 : i32
    %c0_i32_0 = arith.constant 0 : i32
    %c0_i32_1 = arith.constant 0 : i32
    return %c0_i32, %c0_i32_0 : i32, i32
  }
  func.func @transform_9(%arg0: i32) -> (i32, i32) {
    %c0_i32 = arith.constant 0 : i32
    %c0_i32_0 = arith.constant 0 : i32
    %c0_i32_1 = arith.constant 0 : i32
    return %c0_i32, %c0_i32_0 : i32, i32
  }
  func.func @transform_10(%arg0: i32) -> (i32, i32) {
    %c0_i32 = arith.constant 0 : i32
    %c0_i32_0 = arith.constant 0 : i32
    %c0_i32_1 = arith.constant 0 : i32
    return %c0_i32, %c0_i32_0 : i32, i32
  }
  func.func @transform_11(%arg0: i32) -> (i32, i32) {
    %c0_i32 = arith.constant 0 : i32
    %c0_i32_0 = arith.constant 0 : i32
    %c0_i32_1 = arith.constant 0 : i32
    return %c0_i32, %c0_i32_0 : i32, i32
  }
  func.func @transform_12(%arg0: i32) -> (i32, i32) {
    %c0_i32 = arith.constant 0 : i32
    %c0_i32_0 = arith.constant 0 : i32
    %c0_i32_1 = arith.constant 0 : i32
    return %c0_i32, %c0_i32_0 : i32, i32
  }
  func.func @transform_13(%arg0: i32) -> (i32, i32) {
    %c0_i32 = arith.constant 0 : i32
    %c0_i32_0 = arith.constant 0 : i32
    %c0_i32_1 = arith.constant 0 : i32
    return %c0_i32, %c0_i32_0 : i32, i32
  }
  func.func @transform_14(%arg0: i32) -> (i32, i32) {
    %c0_i32 = arith.constant 0 : i32
    %c0_i32_0 = arith.constant 0 : i32
    %c0_i32_1 = arith.constant 0 : i32
    return %c0_i32, %c0_i32_0 : i32, i32
  }
  func.func @transform_15(%arg0: i32) -> (i32, i32) {
    %c0_i32 = arith.constant 0 : i32
    %c0_i32_0 = arith.constant 0 : i32
    %c0_i32_1 = arith.constant 0 : i32
    return %c0_i32, %c0_i32_0 : i32, i32
  }
  func.func @transform_16(%arg0: i32) -> (i32, i32) {
    %c0_i32 = arith.constant 0 : i32
    %c0_i32_0 = arith.constant 0 : i32
    %c0_i32_1 = arith.constant 0 : i32
    return %c0_i32, %c0_i32_0 : i32, i32
  }
  func.func @transform_17(%arg0: i32) -> (i32, i32) {
    %c0_i32 = arith.constant 0 : i32
    %c0_i32_0 = arith.constant 0 : i32
    %c0_i32_1 = arith.constant 0 : i32
    return %c0_i32, %c0_i32_0 : i32, i32
  }
  func.func @transform_18(%arg0: i32) -> (i32, i32) {
    %c0_i32 = arith.constant 0 : i32
    %c0_i32_0 = arith.constant 0 : i32
    %c0_i32_1 = arith.constant 0 : i32
    return %c0_i32, %c0_i32_0 : i32, i32
  }
  func.func @transform_19(%arg0: i32) -> (i32, i32) {
    %c0_i32 = arith.constant 0 : i32
    %c0_i32_0 = arith.constant 0 : i32
    %c0_i32_1 = arith.constant 0 : i32
    return %c0_i32, %c0_i32_0 : i32, i32
  }
  func.func @transform_20(%arg0: i32) -> (i32, i32) {
    %c0_i32 = arith.constant 0 : i32
    %c0_i32_0 = arith.constant 0 : i32
    %c0_i32_1 = arith.constant 0 : i32
    return %c0_i32, %c0_i32_0 : i32, i32
  }
  func.func @transform_21(%arg0: i32) -> (i32, i32) {
    %c0_i32 = arith.constant 0 : i32
    %c0_i32_0 = arith.constant 0 : i32
    %c0_i32_1 = arith.constant 0 : i32
    return %c0_i32, %c0_i32_0 : i32, i32
  }
  func.func @transform_22(%arg0: i32) -> (i32, i32) {
    %c0_i32 = arith.constant 0 : i32
    %c0_i32_0 = arith.constant 0 : i32
    %c0_i32_1 = arith.constant 0 : i32
    return %c0_i32, %c0_i32_0 : i32, i32
  }
  func.func @transform_23(%arg0: i32) -> (i32, i32) {
    %c0_i32 = arith.constant 0 : i32
    %c0_i32_0 = arith.constant 0 : i32
    %c0_i32_1 = arith.constant 0 : i32
    return %c0_i32, %c0_i32_0 : i32, i32
  }
  func.func @transform_24(%arg0: i32) -> (i32, i32) {
    %c0_i32 = arith.constant 0 : i32
    %c0_i32_0 = arith.constant 0 : i32
    %c0_i32_1 = arith.constant 0 : i32
    return %c0_i32, %c0_i32_0 : i32, i32
  }
  func.func @transform_25(%arg0: i32) -> (i32, i32) {
    %c0_i32 = arith.constant 0 : i32
    %c0_i32_0 = arith.constant 0 : i32
    %c0_i32_1 = arith.constant 0 : i32
    return %c0_i32, %c0_i32_0 : i32, i32
  }
  func.func @transform_26(%arg0: i32) -> (i32, i32) {
    %c0_i32 = arith.constant 0 : i32
    %c0_i32_0 = arith.constant 0 : i32
    %c0_i32_1 = arith.constant 0 : i32
    return %c0_i32, %c0_i32_0 : i32, i32
  }
  func.func @transform_27(%arg0: i32) -> (i32, i32) {
    %c0_i32 = arith.constant 0 : i32
    %c0_i32_0 = arith.constant 0 : i32
    %c0_i32_1 = arith.constant 0 : i32
    return %c0_i32, %c0_i32_0 : i32, i32
  }
  func.func @transform_28(%arg0: i32) -> (i32, i32) {
    %c0_i32 = arith.constant 0 : i32
    %c0_i32_0 = arith.constant 0 : i32
    %c0_i32_1 = arith.constant 0 : i32
    return %c0_i32, %c0_i32_0 : i32, i32
  }
  func.func @transform_29(%arg0: i32) -> (i32, i32) {
    %c0_i32 = arith.constant 0 : i32
    %c0_i32_0 = arith.constant 0 : i32
    %c0_i32_1 = arith.constant 0 : i32
    return %c0_i32, %c0_i32_0 : i32, i32
  }
  func.func @transform_30(%arg0: i32) -> (i32, i32) {
    %c0_i32 = arith.constant 0 : i32
    %c0_i32_0 = arith.constant 0 : i32
    %c0_i32_1 = arith.constant 0 : i32
    return %c0_i32, %c0_i32_0 : i32, i32
  }
  func.func @transform_31(%arg0: i32) -> (i32, i32) {
    %c0_i32 = arith.constant 0 : i32
    %c0_i32_0 = arith.constant 0 : i32
    %c0_i32_1 = arith.constant 0 : i32
    return %c0_i32, %c0_i32_0 : i32, i32
  }
  func.func @transform_32(%arg0: i32) -> (i32, i32, i32) {
    %c0_i32 = arith.constant 0 : i32
    %c0_i32_0 = arith.constant 0 : i32
    %c0_i32_1 = arith.constant 0 : i32
    return %arg0, %c0_i32, %c0_i32_0 : i32, i32, i32
  }
}

</mosaic_0001>

<bundles_post_ra>
// kernel: decoder_forward.2
= control target key start
LH: loop header
LB: loop body
LE: loop exit
PB: predicated region body
PF: predicated region fallthrough
CT: control target
= control target key end

     0   :  { %s5537_s6 = smov 1   ;;  %s5538_s10 = smov 2   ;;  %s6401_s0 = inlined_call_operand.smem [shape: u32[33], index: -1, kind: input, shape index: {}] }
   0x1   :  { %s5601_s5 = sld [smem:[%s6401_s0]]   ;;  %s5539_s14 = smov 3  }
   0x2   :  { %s5606_s9 = sld [smem:[%s6401_s0 + %s5537_s6]]   ;;  %s5540_s18 = smov 4  }
   0x3   :  { %s5611_s13 = sld [smem:[%s6401_s0 + %s5538_s10]]   ;;  %s5541_s22 = smov 5  }
   0x4   :  { %s5616_s17 = sld [smem:[%s6401_s0 + %s5539_s14]]   ;;  %s5542_s26 = smov 6  }
   0x5   :  { %s5621_s21 = sld [smem:[%s6401_s0 + %s5540_s18]]   ;;  %s5543_s30 = smov 7  }
   0x6   :  { %s5626_s25 = sld [smem:[%s6401_s0 + %s5541_s22]]   ;;  %s5544_s4 = smov 8  }
   0x7   :  { %6423 = sst [smem:[#allocation37_spill]] %s5601_s5  ;;  %s5545_s10 = smov 9  }
   0x8   :  { %6424 = sst [smem:[#allocation38_spill]] %s5606_s9  ;;  %s5546_s15 = smov 10  }
   0x9   :  { %6425 = sst [smem:[#allocation39_spill]] %s5611_s13  ;;  %s5547_s20 = smov 11  }
   0xa   :  { %6426 = sst [smem:[#allocation40_spill]] %s5616_s17  ;;  %s5549_s1 = smov 13  }
   0xb   :  { %s5631_s29 = sld [smem:[%s6401_s0 + %s5542_s26]]   ;;  %s5548_s26 = smov 12  }
   0xc   :  { %s5636_s3 = sld [smem:[%s6401_s0 + %s5543_s30]]   ;;  %s5550_s7 = smov 14  }
   0xd   :  { %s5641_s8 = sld [smem:[%s6401_s0 + %s5544_s4]]   ;;  %s5552_s22 = smov 16  }
   0xe   :  { %s5646_s14 = sld [smem:[%s6401_s0 + %s5545_s10]]   ;;  %s5553_s28 = smov 17  }
   0xf   :  { %s5651_s19 = sld [smem:[%s6401_s0 + %s5546_s15]]   ;;  %s5551_s15 = smov 15  }
  0x10   :  { %s5656_s24 = sld [smem:[%s6401_s0 + %s5547_s20]]  }
  0x11   :  { %6427 = sst [smem:[#allocation41_spill]] %s5631_s29 }
  0x12   :  { %s5661_s30 = sld [smem:[%s6401_s0 + %s5548_s26]]  }
  0x13   :  { %6428 = sst [smem:[#allocation42_spill]] %s5641_s8 }
  0x14   :  { %s5666_s6 = sld [smem:[%s6401_s0 + %s5549_s1]]  }
  0x15   :  { %6429 = sst [smem:[#allocation43_spill]] %s5651_s19 }
  0x16   :  { %s5671_s12 = sld [smem:[%s6401_s0 + %s5550_s7]]   ;;  %s5554_s7 = smov 18  }
  0x17   :  { %s5676_s20 = sld [smem:[%s6401_s0 + %s5551_s15]]   ;;  %s5555_s15 = smov 19  }
  0x18   :  { %6430 = sst [smem:[#allocation44_spill]] %s5661_s30 }
  0x19   :  { %s5681_s27 = sld [smem:[%s6401_s0 + %s5552_s22]]   ;;  %s5556_s22 = smov 20  }
  0x1a   :  { %6431 = sst [smem:[#allocation45_spill]] %s5666_s6 }
  0x1b   :  { %s5686_s4 = sld [smem:[%s6401_s0 + %s5553_s28]]   ;;  %s5557_s28 = smov 21  }
  0x1c   :  { %s5691_s17 = sld [smem:[%s6401_s0 + %s5554_s7]]   ;;  %s5558_s7 = smov 22  }
  0x1d   :  { %s5696_s30 = sld [smem:[%s6401_s0 + %s5555_s15]]   ;;  %s5559_s15 = smov 23  }
  0x1e   :  { %s5716_s13 = sld [smem:[%s6401_s0 + %s5559_s15]]   ;;  %s5563_s15 = smov 27  }
  0x1f   :  { %6432 = sst [smem:[#allocation46_spill]] %s5681_s27 }
  0x20   :  { %s5701_s27 = sld [smem:[%s6401_s0 + %s5556_s22]]   ;;  %s5560_s22 = smov 24  }
  0x21   :  { %6433 = sst [smem:[#allocation47_spill]] %s5686_s4 }
  0x22   :  { %6434 = sst [smem:[#allocation48_spill]] %s5691_s17 }
  0x23   :  { %s5706_s4 = sld [smem:[%s6401_s0 + %s5557_s28]]   ;;  %s5561_s28 = smov 25  }
  0x24   :  { %s5711_s17 = sld [smem:[%s6401_s0 + %s5558_s7]]   ;;  %s5562_s7 = smov 26  }
  0x25   :  { %s5731_s19 = sld [smem:[%s6401_s0 + %s5562_s7]]   ;;  %s5566_s7 = smov 32  }
  0x26   :  { %6435 = sst [smem:[#allocation49_spill]] %s5701_s27 }
  0x27   :  { %s5721_s27 = sld [smem:[%s6401_s0 + %s5560_s22]]   ;;  %s5564_s22 = smov 28  }
  0x28   :  { %s5736_s8 = sld [smem:[%s6401_s0 + %s5563_s15]]  }
  0x29   :  { %6436 = sst [smem:[#allocation50_spill]] %s5706_s4 }
  0x2a   :  { %s5726_s4 = sld [smem:[%s6401_s0 + %s5561_s28]]   ;;  %s5565_s28 = smov 29  }
  0x2b   :  { %s5741_s29 = sld [smem:[%s6401_s0 + %s5564_s22]]  }
  0x2c   :  { %s5746_s9 = sld [smem:[%s6401_s0 + %s5565_s28]]  }
  0x2d   :  { %s5751_s5 = sld [smem:[%s6401_s0 + %s5566_s7]]  }
  0x2e   :  { %70 = vsyncpa [#allocation4], 0 }
  0x2f   :  { %71 = vsyncpa [#allocation6], 0 }
  0x30   :  { %72 = vsyncpa [#allocation9], 0 }
  0x31   :  { %73 = vsyncpa [#allocation12], 0 }
  0x32   :  { %74 = vsyncpa [#allocation15], 0 }
  0x33   :  { %75 = vsyncpa [#allocation18], 0 }
  0x34   :  { %76 = vsyncpa [#allocation21], 0 }
  0x35   :  { %77 = vsyncpa [#allocation24], 0 }
  0x36   :  { %78 = vsyncpa [#allocation27], 0  ;;  %s5753_s15 = smov 0  }
  0x37 LB: > { %s5567_s0 = smov [#allocation5]   ;;  %s6409_s18 = sadd.s32 4294967295, %s5535_s15   ;;  %s5535_s15 = sphi %s5753_s15, %s84_s15  }
  0x38   : > { %s829_s16 = sshll.u32 %s5567_s0, 4  ;;  %p4252_p0 = scmp.ge.s32.totalorder %s5535_s15, 1  ;;  %s830_s16 = int_to_ptr.vmem [resolvable:$true] %s829_s16 }
  0x39   : > { %p802_p1 = scmp.lt.s32.totalorder %s5535_s15, 3  ;;  %p5763_p2 = scmp.eq.s32.totalorder %s6409_s18, 0 }
  0x3a   : > { %s5568_s26 = smov [#allocation8]   ;;  %s5569_s1 = smov [#allocation11]  }
  0x3b   : > { %s6437_s22 = scalar_select %p5763_p2, 1, 0 }
  0x3c   : > { %p5767_p3 = pnand %p4252_p0, %p802_p1  ;;  %s857_s28 = sshll.u32 %s5568_s26, 4  ;;  %s5773_s28 = int_to_ptr.vmem [resolvable:$true] %s857_s28 }
  0x3d   : > { %s885_s2 = sshll.u32 %s5569_s1, 4  ;;  %s5570_s10 = smov [#allocation14]   ;;  %s5781_s2 = int_to_ptr.vmem [resolvable:$true] %s885_s2 }
  0x3e   : > { %s6438_s23 = scalar_select %p5767_p3, 1, 0 }
  0x3f   : > { %p4820_p4 = pneg %p5767_p3  ;;  %s907_s11 = sshll.u32 %s5570_s10, 4  ;;  %s5783_s11 = int_to_ptr.vmem [resolvable:$true] %s907_s11 }
  0x40   : > { %s5088_s26 = scalar_lea.vmem %s830_s16, 16  ;;  %s5095_s1 = scalar_lea.vmem %s830_s16, 32 }
  0x41   : > { %p5777_p5 = pnand %p5763_p2, %p4820_p4  ;;  %p5089_p7 = scmp.ne.s32.totalorder %s830_s16, %s5088_s26 }
  0x42   : > { %p5096_p10 = scmp.lt.s32.totalorder %s830_s16, %s830_s16  ;;  %p5097_p11 = scmp.lt.s32.totalorder %s5095_s1, %s5088_s26 }
  0x43   : > { %p5787_p6 = pneg %p5777_p5 }
  0x44   : > { %p5098_p12 = por %p5097_p11, %p5096_p10 }
  0x45   : > { %p5091_p8 = pnand %p5089_p7, %p5787_p6 }
  0x47   : > { %p5092_p9 = pneg %p5091_p8 }
  0x49   : > { %p5099_p13 = pnand %p5098_p12, %p5092_p9 }
  0x4b   : > { %5102 = shalt.err (!%p5099_p13)
}
  0x4c   : > { %4826 = dma.hbm_to_vmem [thread:$0]  (!%p5777_p5), %s5626_s25, 16, %s830_s16, [#allocation6]  }
  0x4d   : > { %s5114_s10 = scalar_lea.vmem %s5773_s28, 16  ;;  %s5121_s18 = scalar_lea.vmem %s5773_s28, 32 }
  0x4e   : > { %p5115_p0 = scmp.ne.s32.totalorder %s5773_s28, %s5114_s10  ;;  %p5122_p7 = scmp.lt.s32.totalorder %s5773_s28, %s5773_s28 }
  0x4f   : > { %p5123_p8 = scmp.lt.s32.totalorder %s5121_s18, %s5114_s10 }
  0x50   : > { %p5117_p1 = pnand %p5115_p0, %p5787_p6 }
  0x51   : > { %p5124_p9 = por %p5123_p8, %p5122_p7 }
  0x52   : > { %p5118_p4 = pneg %p5117_p1 }
  0x54   : > { %p5125_p10 = pnand %p5124_p9, %p5118_p4 }
  0x56   : > { %5128 = shalt.err (!%p5125_p10)
}
  0x57   : > { %4832 = dma.hbm_to_vmem [thread:$0]  (!%p5777_p5), %s5646_s14, 16, %s5773_s28, [#allocation9]  }
  0x58   : > { %s5140_s16 = scalar_lea.vmem %s5781_s2, 16  ;;  %s5147_s26 = scalar_lea.vmem %s5781_s2, 32 }
  0x59   : > { %p5141_p11 = scmp.ne.s32.totalorder %s5781_s2, %s5140_s16  ;;  %p5148_p0 = scmp.lt.s32.totalorder %s5781_s2, %s5781_s2 }
  0x5a   : > { %p5149_p1 = scmp.lt.s32.totalorder %s5147_s26, %s5140_s16 }
  0x5b   : > { %p5143_p12 = pnand %p5141_p11, %p5787_p6 }
  0x5c   : > { %p5150_p4 = por %p5149_p1, %p5148_p0 }
  0x5d   : > { %p5144_p13 = pneg %p5143_p12 }
  0x5f   : > { %p5151_p7 = pnand %p5150_p4, %p5144_p13 }
  0x61   : > { %5154 = shalt.err (!%p5151_p7)
}
  0x62   : > { %s6441_s6 = sld [smem:[#allocation45_spill]]  ;;  %s5166_s18 = scalar_lea.vmem %s5783_s11, 16 }
  0x63   : > { %p5167_p8 = scmp.ne.s32.totalorder %s5783_s11, %s5166_s18  ;;  %s5173_s28 = scalar_lea.vmem %s5783_s11, 32 }
  0x64   : > { %p5174_p11 = scmp.lt.s32.totalorder %s5783_s11, %s5783_s11  ;;  %p5175_p12 = scmp.lt.s32.totalorder %s5173_s28, %s5166_s18 }
  0x65   : > { %p5169_p9 = pnand %p5167_p8, %p5787_p6 }
  0x66   : > { %p5176_p13 = por %p5175_p12, %p5174_p11 }
  0x67   : > { %p5170_p10 = pneg %p5169_p9 }
  0x68   : > { %4838 = dma.hbm_to_vmem [thread:$0]  (!%p5777_p5), %s6441_s6, 16, %s5781_s2, [#allocation12]  }
  0x69   : > { %p5177_p0 = pnand %p5176_p13, %p5170_p10 }
  0x6b   : > { %5180 = shalt.err (!%p5177_p0)
}
  0x6c   : > { %4844 = dma.hbm_to_vmem [thread:$0]  (!%p5777_p5), %s5676_s20, 16, %s5783_s11, [#allocation15]  }
  0x6d   : > { %s5571_s1 = smov [#allocation17]  }
  0x6e   : > { %s943_s2 = sshll.u32 %s5571_s1, 4  ;;  %s944_s2 = int_to_ptr.vmem [resolvable:$true] %s943_s2 }
  0x6f   : > { %s5192_s10 = scalar_lea.vmem %s944_s2, 256  ;;  %p5200_p8 = scmp.lt.s32.totalorder %s944_s2, %s944_s2 }
  0x70   : > { %p5193_p1 = scmp.ne.s32.totalorder %s944_s2, %s5192_s10  ;;  %p5201_p9 = scmp.lt.s32.totalorder %s5192_s10, %s5192_s10 }
  0x72   : > { %p5195_p4 = pnand %p5193_p1, %p5787_p6  ;;  %p5202_p2 = por %p5201_p9, %p5200_p8 }
  0x74   : > { %p5196_p7 = pneg %p5195_p4 }
  0x76   : > { %p5203_p11 = pnand %p5202_p2, %p5196_p7 }
  0x78   : > { %5206 = shalt.err (!%p5203_p11)
}
  0x79   : > { %s5572_s16 = smov 64   ;;  %s5573_s26 = smov 4  }
  0x7a   : > { %4850 = dma.hbm_to_vmem [thread:$0]  (!%p5777_p5), %s5711_s17, 256, %s944_s2, [#allocation18], %s5572_s16, %s5572_s16, %s5573_s26  }
  0x7b   : > { %s5574_s11 = smov [#allocation20]   ;;  %s5575_s28 = smov [#allocation23]  }
  0x7c   : > { %s968_s18 = sshll.u32 %s5574_s11, 4  ;;  %s989_s1 = sshll.u32 %s5575_s28, 4  ;;  %s969_s18 = int_to_ptr.vmem [resolvable:$true] %s968_s18  ;;  %s990_s1 = int_to_ptr.vmem [resolvable:$true] %s989_s1 }
  0x7d   : > { %s5218_s10 = scalar_lea.vmem %s969_s18, 16  ;;  %s5225_s6 = scalar_lea.vmem %s969_s18, 32 }
  0x7e   : > { %p5219_p10 = scmp.ne.s32.totalorder %s969_s18, %s5218_s10  ;;  %p5226_p13 = scmp.lt.s32.totalorder %s969_s18, %s969_s18 }
  0x7f   : > { %p5227_p0 = scmp.lt.s32.totalorder %s5225_s6, %s5218_s10 }
  0x80   : > { %p5221_p2 = pnand %p5219_p10, %p5787_p6 }
  0x81   : > { %p5228_p1 = por %p5227_p0, %p5226_p13 }
  0x82   : > { %p5222_p12 = pneg %p5221_p2 }
  0x84   : > { %p5229_p4 = pnand %p5228_p1, %p5222_p12 }
  0x86   : > { %5232 = shalt.err (!%p5229_p4)
}
  0x87   : > { %4856 = dma.hbm_to_vmem [thread:$0]  (!%p5777_p5), %s5721_s27, 16, %s969_s18, [#allocation21]  }
  0x88   : > { %s5244_s2 = scalar_lea.vmem %s990_s1, 256  ;;  %p5252_p11 = scmp.lt.s32.totalorder %s990_s1, %s990_s1 }
  0x89   : > { %p5245_p7 = scmp.ne.s32.totalorder %s990_s1, %s5244_s2  ;;  %p5253_p3 = scmp.lt.s32.totalorder %s5244_s2, %s5244_s2 }
  0x8b   : > { %p5247_p8 = pnand %p5245_p7, %p5787_p6  ;;  %p5254_p10 = por %p5253_p3, %p5252_p11 }
  0x8d   : > { %p5248_p9 = pneg %p5247_p8 }
  0x8f   : > { %p5255_p2 = pnand %p5254_p10, %p5248_p9 }
  0x91   : > { %5258 = shalt.err (!%p5255_p2)
}
  0x92   : > { %4862 = dma.hbm_to_vmem [thread:$0]  (!%p5777_p5), %s5731_s19, 256, %s990_s1, [#allocation24], %s5572_s16, %s5572_s16, %s5573_s26  }
  0x93   : > { %s5576_s6 = smov [#allocation3]   ;;  %s5577_s18 = smov [#allocation7]  }
  0x94   : > { %s818_s11 = sshll.u32 %s5576_s6, 4  ;;  %s843_s28 = sshll.u32 %s5577_s18, 4  ;;  %s819_s11 = int_to_ptr.vmem [resolvable:$true] %s818_s11  ;;  %s844_s28 = int_to_ptr.vmem [resolvable:$true] %s843_s28 }
  0x95   : > { %s5270_s10 = scalar_lea.vmem %s819_s11, 16  ;;  %s5277_s2 = scalar_lea.vmem %s819_s11, 32 }
  0x96   : > { %p5271_p12 = scmp.ne.s32.totalorder %s819_s11, %s5270_s10  ;;  %p5278_p0 = scmp.lt.s32.totalorder %s819_s11, %s819_s11 }
  0x97   : > { %p5279_p1 = scmp.lt.s32.totalorder %s5277_s2, %s5270_s10 }
  0x98   : > { %p5273_p3 = pnand %p5271_p12, %p5787_p6 }
  0x99   : > { %p5280_p4 = por %p5279_p1, %p5278_p0 }
  0x9a   : > { %p5274_p13 = pneg %p5273_p3 }
  0x9c   : > { %p5281_p7 = pnand %p5280_p4, %p5274_p13 }
  0x9e   : > { %5284 = shalt.err (!%p5281_p7)
}
  0x9f   : > { %4823 = dma.hbm_to_vmem [thread:$0]  (!%p5777_p5), %s5621_s21, 16, %s819_s11, [#allocation4]  }
  0xa0   : > { %s5296_s16 = scalar_lea.vmem %s844_s28, 16  ;;  %s5303_s26 = scalar_lea.vmem %s844_s28, 32 }
  0xa1   : > { %p5297_p8 = scmp.ne.s32.totalorder %s844_s28, %s5296_s16  ;;  %p5304_p10 = scmp.lt.s32.totalorder %s844_s28, %s844_s28 }
  0xa2   : > { %p5305_p2 = scmp.lt.s32.totalorder %s5303_s26, %s5296_s16 }
  0xa3   : > { %p5299_p9 = pnand %p5297_p8, %p5787_p6 }
  0xa4   : > { %p5306_p12 = por %p5305_p2, %p5304_p10 }
  0xa5   : > { %p5300_p11 = pneg %p5299_p9 }
  0xa7   : > { %p5307_p3 = pnand %p5306_p12, %p5300_p11 }
  0xa9   : > { %5310 = shalt.err (!%p5307_p3)
}
  0xaa   : > { %4829 = dma.hbm_to_vmem [thread:$0]  (!%p5777_p5), %s5636_s3, 16, %s844_s28, [#allocation6]  }
  0xab   : > { %s5578_s1 = smov [#allocation10]   ;;  %s5579_s18 = smov [#allocation13]  }
  0xac   : > { %s871_s6 = sshll.u32 %s5578_s1, 4  ;;  %s896_s11 = sshll.u32 %s5579_s18, 4  ;;  %s872_s6 = int_to_ptr.vmem [resolvable:$true] %s871_s6  ;;  %s897_s11 = int_to_ptr.vmem [resolvable:$true] %s896_s11 }
  0xad   : > { %s5322_s10 = scalar_lea.vmem %s872_s6, 16  ;;  %s5329_s2 = scalar_lea.vmem %s872_s6, 32 }
  0xae   : > { %p5323_p13 = scmp.ne.s32.totalorder %s872_s6, %s5322_s10  ;;  %p5330_p4 = scmp.lt.s32.totalorder %s872_s6, %s872_s6 }
  0xaf   : > { %p5331_p7 = scmp.lt.s32.totalorder %s5329_s2, %s5322_s10 }
  0xb0   : > { %p5325_p0 = pnand %p5323_p13, %p5787_p6 }
  0xb1   : > { %p5332_p8 = por %p5331_p7, %p5330_p4 }
  0xb2   : > { %p5326_p1 = pneg %p5325_p0 }
  0xb4   : > { %p5333_p9 = pnand %p5332_p8, %p5326_p1 }
  0xb6   : > { %5336 = shalt.err (!%p5333_p9)
}
  0xb7   : > { %4835 = dma.hbm_to_vmem [thread:$0]  (!%p5777_p5), %s5656_s24, 16, %s872_s6, [#allocation9]  }
  0xb8   : > { %s5348_s28 = scalar_lea.vmem %s897_s11, 16  ;;  %s5355_s16 = scalar_lea.vmem %s897_s11, 32 }
  0xb9   : > { %p5349_p11 = scmp.ne.s32.totalorder %s897_s11, %s5348_s28  ;;  %p5356_p12 = scmp.lt.s32.totalorder %s897_s11, %s897_s11 }
  0xba   : > { %p5357_p3 = scmp.lt.s32.totalorder %s5355_s16, %s5348_s28 }
  0xbb   : > { %p5351_p10 = pnand %p5349_p11, %p5787_p6 }
  0xbc   : > { %p5358_p13 = por %p5357_p3, %p5356_p12 }
  0xbd   : > { %p5352_p2 = pneg %p5351_p10 }
  0xbf   : > { %p5359_p0 = pnand %p5358_p13, %p5352_p2 }
  0xc1   : > { %5362 = shalt.err (!%p5359_p0)
}
  0xc2   : > { %4841 = dma.hbm_to_vmem [thread:$0]  (!%p5777_p5), %s5671_s12, 16, %s897_s11, [#allocation12]  }
  0xc3   : > { %s5580_s26 = smov [#allocation16]   ;;  %s5581_s18 = smov [#allocation19]  }
  0xc4   : > { %s927_s1 = sshll.u32 %s5580_s26, 4  ;;  %s957_s6 = sshll.u32 %s5581_s18, 4  ;;  %s928_s1 = int_to_ptr.vmem [resolvable:$true] %s927_s1  ;;  %s958_s6 = int_to_ptr.vmem [resolvable:$true] %s957_s6 }
  0xc5   : > { %s5374_s10 = scalar_lea.vmem %s928_s1, 16  ;;  %s5381_s2 = scalar_lea.vmem %s928_s1, 32 }
  0xc6   : > { %p5375_p1 = scmp.ne.s32.totalorder %s928_s1, %s5374_s10  ;;  %p5382_p8 = scmp.lt.s32.totalorder %s928_s1, %s928_s1 }
  0xc7   : > { %p5383_p9 = scmp.lt.s32.totalorder %s5381_s2, %s5374_s10 }
  0xc8   : > { %p5377_p4 = pnand %p5375_p1, %p5787_p6 }
  0xc9   : > { %p5384_p11 = por %p5383_p9, %p5382_p8 }
  0xca   : > { %p5378_p7 = pneg %p5377_p4 }
  0xcc   : > { %p5385_p10 = pnand %p5384_p11, %p5378_p7 }
  0xce   : > { %5388 = shalt.err (!%p5385_p10)
}
  0xcf   : > { %4847 = dma.hbm_to_vmem [thread:$0]  (!%p5777_p5), %s5696_s30, 16, %s928_s1, [#allocation15]  }
  0xd0   : > { %s5400_s11 = scalar_lea.vmem %s958_s6, 16  ;;  %s5407_s28 = scalar_lea.vmem %s958_s6, 32 }
  0xd1   : > { %p5401_p2 = scmp.ne.s32.totalorder %s958_s6, %s5400_s11  ;;  %p5408_p13 = scmp.lt.s32.totalorder %s958_s6, %s958_s6 }
  0xd2   : > { %p5409_p0 = scmp.lt.s32.totalorder %s5407_s28, %s5400_s11 }
  0xd3   : > { %p5403_p12 = pnand %p5401_p2, %p5787_p6 }
  0xd4   : > { %p5410_p1 = por %p5409_p0, %p5408_p13 }
  0xd5   : > { %p5404_p3 = pneg %p5403_p12 }
  0xd7   : > { %p5411_p4 = pnand %p5410_p1, %p5404_p3 }
  0xd9   : > { %5414 = shalt.err (!%p5411_p4)
}
  0xda   : > { %4853 = dma.hbm_to_vmem [thread:$0]  (!%p5777_p5), %s5716_s13, 16, %s958_s6, [#allocation18]  }
  0xdb   : > { %s5582_s16 = smov [#allocation22]   ;;  %s5583_s18 = smov [#allocation25]  }
  0xdc   : > { %s979_s26 = sshll.u32 %s5582_s16, 4  ;;  %s1003_s1 = sshll.u32 %s5583_s18, 4  ;;  %s980_s26 = int_to_ptr.vmem [resolvable:$true] %s979_s26  ;;  %s1004_s1 = int_to_ptr.vmem [resolvable:$true] %s1003_s1 }
  0xdd   : > { %s5426_s10 = scalar_lea.vmem %s980_s26, 16  ;;  %s5433_s2 = scalar_lea.vmem %s980_s26, 32 }
  0xde   : > { %p5427_p7 = scmp.ne.s32.totalorder %s980_s26, %s5426_s10  ;;  %p5434_p11 = scmp.lt.s32.totalorder %s980_s26, %s980_s26 }
  0xdf   : > { %p5435_p10 = scmp.lt.s32.totalorder %s5433_s2, %s5426_s10 }
  0xe0   : > { %p5429_p8 = pnand %p5427_p7, %p5787_p6 }
  0xe1   : > { %p5436_p2 = por %p5435_p10, %p5434_p11 }
  0xe2   : > { %p5430_p9 = pneg %p5429_p8 }
  0xe4   : > { %p5437_p12 = pnand %p5436_p2, %p5430_p9 }
  0xe6   : > { %5440 = shalt.err (!%p5437_p12)
}
  0xe7   : > { %4859 = dma.hbm_to_vmem [thread:$0]  (!%p5777_p5), %s5726_s4, 16, %s980_s26, [#allocation21]  }
  0xe8   : > { %s5452_s6 = scalar_lea.vmem %s1004_s1, 16  ;;  %s5459_s11 = scalar_lea.vmem %s1004_s1, 32 }
  0xe9   : > { %p5453_p3 = scmp.ne.s32.totalorder %s1004_s1, %s5452_s6  ;;  %p5460_p1 = scmp.lt.s32.totalorder %s1004_s1, %s1004_s1 }
  0xea   : > { %p5461_p4 = scmp.lt.s32.totalorder %s5459_s11, %s5452_s6 }
  0xeb   : > { %p5455_p13 = pnand %p5453_p3, %p5787_p6 }
  0xec   : > { %p5462_p7 = por %p5461_p4, %p5460_p1 }
  0xed   : > { %p5456_p0 = pneg %p5455_p13 }
  0xef   : > { %p5463_p8 = pnand %p5462_p7, %p5456_p0 }
  0xf1   : > { %5466 = shalt.err (!%p5463_p8)
}
  0xf2   : > { %4865 = dma.hbm_to_vmem [thread:$0]  (!%p5777_p5), %s5736_s8, 16, %s1004_s1, [#allocation24]  }
  0xf3   : > { %s5584_s28 = smov [#allocation26]  }
  0xf4   : > { %s1017_s16 = sshll.u32 %s5584_s28, 4  ;;  %s1018_s16 = int_to_ptr.vmem [resolvable:$true] %s1017_s16 }
  0xf5   : > { %s5478_s26 = scalar_lea.vmem %s1018_s16, 16  ;;  %s5485_s18 = scalar_lea.vmem %s1018_s16, 32 }
  0xf6   : > { %p5479_p9 = scmp.ne.s32.totalorder %s1018_s16, %s5478_s26  ;;  %p5486_p2 = scmp.lt.s32.totalorder %s1018_s16, %s1018_s16 }
  0xf7   : > { %p5487_p12 = scmp.lt.s32.totalorder %s5485_s18, %s5478_s26 }
  0xf8   : > { %p5481_p11 = pnand %p5479_p9, %p5787_p6 }
  0xf9   : > { %p5488_p3 = por %p5487_p12, %p5486_p2 }
  0xfa   : > { %p5482_p10 = pneg %p5481_p11 }
  0xfc   : > { %p5489_p13 = pnand %p5488_p3, %p5482_p10 }
  0xfe   : > { %5492 = shalt.err (!%p5489_p13)
}
  0xff   : > { %4868 = dma.hbm_to_vmem [thread:$0]  (!%p5777_p5), %s5746_s9, 16, %s1018_s16, [#allocation27]  }
 0x100   : > { %p6442_p0 = scmp.ne.s32.totalorder %s6438_s23, 0 }
 0x101   : > { %p6443_p1 = scmp.ne.s32.totalorder (!%p6442_p0), %s6437_s22, 0 }
 0x102   : > { %1063 = sbr.rel (%p6442_p0) target bundleno = 4569 (0x11d9), region = 148 }
 0x107   : > { %5498 = dma.done.wait (%p6443_p1), [#allocation4], 16  }
 0x108   : > { %5500 = vsyncadd (%p6443_p1), [#allocation4], 4294967280 }
 0x109   : > { %5502 = dma.done.wait (%p6443_p1), [#allocation6], 32  }
 0x10a   : > { %5504 = vsyncadd (%p6443_p1), [#allocation6], 4294967264 }
 0x10b   : > { %5506 = dma.done.wait (%p6443_p1), [#allocation9], 32  }
 0x10c   : > { %5508 = vsyncadd (%p6443_p1), [#allocation9], 4294967264 }
 0x10d   : > { %5510 = dma.done.wait (%p6443_p1), [#allocation12], 32  }
 0x10e   : > { %5512 = vsyncadd (%p6443_p1), [#allocation12], 4294967264 }
 0x10f   : > { %5514 = dma.done.wait (%p6443_p1), [#allocation15], 32  }
 0x110   : > { %5516 = vsyncadd (%p6443_p1), [#allocation15], 4294967264 }
 0x111   : > { %5518 = dma.done.wait (%p6443_p1), [#allocation18], 272  }
 0x112   : > { %5520 = vsyncadd (%p6443_p1), [#allocation18], 4294967024 }
 0x113   : > { %5522 = dma.done.wait (%p6443_p1), [#allocation21], 32  }
 0x114   : > { %5524 = vsyncadd (%p6443_p1), [#allocation21], 4294967264 }
 0x115   : > { %5526 = dma.done.wait (%p6443_p1), [#allocation24], 272  }
 0x116   : > { %5528 = vsyncadd (%p6443_p1), [#allocation24], 4294967024 }
 0x117   : > { %5530 = dma.done.wait (%p6443_p1), [#allocation27], 16  }
 0x118   : > { %5532 = vsyncadd (%p6443_p1), [#allocation27], 4294967280  ;;  %s6444_s23 = sadd.s32 4294967295, %s5535_s15   ;;  %s6445_s7 = sld [smem:[#allocation37_spill]]  ;;  %vm1257_vm0 = vcmask 261120   ;;  %v5585_v16 = vmov 0.0  }
 0x119   : > { %s6446_s0 = sld [smem:[#allocation38_spill]]  ;;  %s4287_s1 = sshll.u32 %s6444_s23, 1  ;;  %4480 = vmatprep.subr.bf16.mxu0 %v5585_v16  ;;  %4488 = vmatprep.subr.bf16.mxu1 %v5585_v16  ;;  %vm5586_vm1 = vmmov 0   ;;  %v4295_v35 = vld [vmem:[#allocation3] ss:$0 sm:$0xff]  ;;  %vm1518_vm6 = vcmask 64512  }
 0x11a   : > { %p1216_p5 = scmp.lt.s32.totalorder %s4287_s1, 3  ;;  %s6447_s22 = sld [smem:[#allocation41_spill]]  ;;  %4484 = vmatprep.mubr.msk.bf16.mxu0 %vm5586_vm1, %v5585_v16  ;;  %4492 = vmatprep.mubr.msk.bf16.mxu1 %vm5586_vm1, %v5585_v16  ;;  %v4296_v41 = vld [vmem:[#allocation5] ss:$0 sm:$0xff]  ;;  %v4297_v48 = vld [vmem:[#allocation7] ss:$0 sm:$0xff] }
 0x11b   : > { %s6448_s6 = sld [smem:[#allocation42_spill]]  ;;  %v4301_v51 = vld [vmem:[#allocation8] ss:$0 sm:$0xff]  ;;  %s5587_s16 = smov 120   ;;  %vm1580_vm7 = vcmask 1043456   ;;  %vm1742_vm9 = vcmask 130112  }
 0x11c   : > { %s6464_s1 = smov (!%p1216_p5, %s4287_s1), 3  ;;  %s6449_s28 = sld [smem:[#allocation43_spill]]  ;;  %vm1858_vm10 = vcmask 195712   ;;  %vm1974_vm11 = vcmask 261312  }
 0x11d   : > { %s5938_s10 = sshll.u32 %s6464_s1, 3  ;;  %s6419_s26 = smov 104  }
 0x11e   : > { %s1219_s2 = scalar_lea.vmem %s6445_s7, %s5938_s10  ;;  %s6421_s18 = smov 112  }
 0x11f   : > { %v5942_v0 = vld [vmem:[%s1219_s2] sm:$0xff]  ;;  %v5946_v2 = vld [vmem:[%s1219_s2 + $0x8] sm:$0xff]  ;;  %s5952_s11 = scalar_lea.vmem %s6446_s0, %s5938_s10  ;;  %s6450_s23 = sld [smem:[#allocation39_spill]] }
 0x120   : > { %v1258_v1 = vsel %vm1257_vm0, %v5942_v0, 0.0  ;;  %v1261_v3 = vsel %vm1257_vm0, %v5946_v2, 0.0  ;;  %v4965_v14 = vld [vmem:[%s6447_s22 + $0x8] sm:$0xff]   ;;  %v4967_v17 = vld [vmem:[%s6447_s22] sm:$0xff]   ;;  %s6417_s7 = smov 8   ;;  %s6415_s0 = smov 16  }
 0x121   : > { %1259 = vadd.xlane.f32.xlu0 %v1258_v1  ;;  %v4966_v15 = vld [vmem:[%s6448_s6 + $0x8] sm:$0xff]   ;;  %4481 = vmatpush3.bf16.msra.mxu0 %v4965_v14  ;;  %v4968_v18 = vld [vmem:[%s6448_s6] sm:$0xff]   ;;  %s6451_s2 = sld [smem:[#allocation44_spill]] }
 0x122   : > { %4489 = vmatpush3.bf16.msra.mxu1 %v4966_v15  ;;  %4482 = vmatprep.subr.bf16.mxu0 %v5585_v16  ;;  %v4969_v45 = vld [vmem:[%s6449_s28 + $0x8] sm:$0xff]   ;;  %v4970_v47 = vld [vmem:[%s6449_s28] sm:$0xff]  }
 0x123   : > { %4490 = vmatprep.subr.bf16.mxu1 %v5585_v16 }
 0x125   : > { %1262 = vadd.xlane.f32.xlu0 %v1261_v3  ;;  %4483 = vmatpush3.bf16.msra.mxu0 %v4967_v17 }
 0x126   : > { %4491 = vmatpush3.bf16.msra.mxu1 %v4968_v18  ;;  %4496 = vmatprep.subr.bf16.mxu0 %v5585_v16 }
 0x127   : > { %4504 = vmatprep.subr.bf16.mxu1 %v5585_v16 }
 0x1aa   : > { %v1260_v4 = vpop.xlane.xlu0 %1259 }
 0x1ab   : > { %v1265_v5 = vmul.f32 0.03125, %v1260_v4 }
 0x1ad   : > { %v1267_v6 = vsub.f32 %v5942_v0, %v1265_v5 }
 0x1ae   : > { %v1263_v7 = vpop.xlane.xlu0 %1262 }
 0x1af   : > { %v1266_v8 = vmul.f32 0.03125, %v1263_v7  ;;  %v1269_v9 = vmul.f32 %v1267_v6, %v1267_v6 }
 0x1b1   : > { %v1268_v10 = vsub.f32 %v5946_v2, %v1266_v8  ;;  %v1271_v11 = vsel %vm1257_vm0, %v1269_v9, 0.0 }
 0x1b2   : > { %1272 = vadd.xlane.f32.xlu1 %v1271_v11 }
 0x1b3   : > { %v1270_v12 = vmul.f32 %v1268_v10, %v1268_v10 }
 0x1b5   : > { %v1274_v13 = vsel %vm1257_vm0, %v1270_v12, 0.0 }
 0x1b6   : > { %1275 = vadd.xlane.f32.xlu1 %v1274_v13 }
 0x23b   : > { %v1273_v19 = vpop.xlane.xlu1 %1272 }
 0x23c   : > { %v1277_v20 = vmul.f32 0.032258064, %v1273_v19 }
 0x23e   : > { %4989 = vrsqrt.f32 %v1277_v20  ;;  %vm1281_vm2 = vcmp.eq.f32.partialorder %v1277_v20, inf  ;;  %v1284_v25 = vand.u32 2147483648, %v1277_v20  ;;  %vm1283_vm3 = vcmp.eq.f32.partialorder %v1277_v20, 0.0 }
 0x23f   : > { %v1276_v21 = vpop.xlane.xlu1 %1275 }
 0x240   : > { %v1278_v22 = vmul.f32 0.032258064, %v1276_v21 }
 0x242   : > { %4991 = vrsqrt.f32 %v1278_v22  ;;  %vm1288_vm4 = vcmp.eq.f32.partialorder %v1278_v22, inf  ;;  %v1291_v31 = vand.u32 2147483648, %v1278_v22  ;;  %vm1290_vm5 = vcmp.eq.f32.partialorder %v1278_v22, 0.0 }
 0x24b   : > { %v4990_v23 = vpop.eup %4989 }
 0x24c   : > { %v1280_v24 = vmul.f32 %v4990_v23, %v1277_v20 }
 0x24e   : > { %v1282_v26 = vsel %vm1281_vm2, %v1277_v20, %v1280_v24 }
 0x24f   : > { %v4992_v27 = vpop.eup %4991  ;;  %v1285_v28 = vsel %vm1283_vm3, %v1284_v25, %v1282_v26  ;;  %vm2848_vm3 = vcmask 130048  }
 0x250   : > { %v1293_v29 = vadd.f32 1e-06, %v1285_v28  ;;  %v1287_v30 = vmul.f32 %v4992_v27, %v1278_v22 }
 0x252   : > { %4993 = vrcp.f32 %v1293_v29  ;;  %v1289_v32 = vsel %vm1288_vm4, %v1278_v22, %v1287_v30 }
 0x253   : > { %v1292_v33 = vsel %vm1290_vm5, %v1291_v31, %v1289_v32 }
 0x254   : > { %v1294_v34 = vadd.f32 1e-06, %v1292_v33 }
 0x256   : > { %4995 = vrcp.f32 %v1294_v34 }
 0x25f   : > { %v4994_v36 = vpop.eup %4993 }
 0x260   : > { %v1305_v37 = vmul.f32 %v4994_v36, %v4295_v35  ;;  %v1246_v36 = vld [vmem:[%s6450_s23] sm:$0xff]  ;;  %s6413_s23 = smov 24  }
 0x261   : > { %vm1247_vm8 = vcmp.eq.f32.partialorder %v1246_v36, 0.0 }
 0x262   : > { %v1307_v40 = vmul.f32 %v1305_v37, %v1267_v6  ;;  %v4305_v6 = vld [vmem:[#allocation10] ss:$0 sm:$0xff]  ;;  %v1248_v37 = vsel %vm1247_vm8, -1e+09, %v5585_v16  ;;  %vm3939_vm8 = vcmask 523264  }
 0x263   : > { %v4996_v38 = vpop.eup %4995 }
 0x264   : > { %v1306_v39 = vmul.f32 %v4996_v38, %v4295_v35  ;;  %v1315_v43 = vadd.f32 %v4296_v41, %v1307_v40 }
 0x266   : > { %v1308_v42 = vmul.f32 %v1306_v39, %v1268_v10 }
 0x268   : > { %v1316_v44 = vadd.f32 %v4296_v41, %v1308_v42 }
 0x26a   : > { %v1317_v46 = vpack.c.bf16 %v1316_v44, %v1315_v43 }
 0x26c   : > { %4485 = vmatmul.mubr.msk.bf16.vlgmr.msra.gmra.mxu0 %vm1257_vm0, %v1317_v46  ;;  %4493 = vmatmul.mubr.msk.bf16.vlgmr.msra.gmra.mxu1 %vm1257_vm0, %v1317_v46 }
 0x26d   : > { %4497 = vmatpush3.bf16.msra.mxu0 %v4969_v45  ;;  %4500 = vmatprep.mubr.msk.bf16.mxu0 %vm5586_vm1, %v5585_v16 }
 0x26e   : > { %4498 = vmatprep.subr.bf16.mxu0 %v5585_v16  ;;  %4506 = vmatprep.mubr.msk.bf16.mxu1 %vm5586_vm1, %v5585_v16 }
 0x271   : > { %4499 = vmatpush3.bf16.msra.mxu0 %v4970_v47 }
 0x272   : > { %4510 = vmatprep.subr.bf16.mxu0 %v5585_v16 }
 0x274   : > { %4501 = vmatmul.mubr.msk.bf16.vlgmr.msra.gmra.mxu0 %vm1257_vm0, %v1317_v46 }
 0x275   : > { %4512 = vmatprep.mubr.msk.bf16.mxu0 %vm5586_vm1, %v5585_v16 }
 0x32c   : > { %v1378_v49 = vpop.f32.mrf.mxu0  ;;  %v1445_v50 = vpop.f32.mrf.mxu1 }
 0x32d   : > { %v1379_v54 = vadd.f32 %v4297_v48, %v1378_v49  ;;  %v1446_v57 = vadd.f32 %v4301_v51, %v1445_v50 }
 0x32e   : > { %v4486_v52 = vpop.f32.mrf.mxu0  ;;  %v4494_v53 = vpop.f32.mrf.mxu1 }
 0x32f   : > { %v1385_v62 = vmul.f32 0.35355338, %v1379_v54 }
 0x330   : > { %v1381_v55 = vpop.f32.mrf.mxu0  ;;  %v1448_v56 = vpop.f32.mrf.mxu1 }
 0x331   : > { %v1382_v58 = vadd.f32 %v4297_v48, %v1381_v55  ;;  %v1449_v59 = vadd.f32 %v4301_v51, %v1448_v56 }
 0x332   : > { %v4487_v60 = vpop.f32.mrf.mxu0  ;;  %v4495_v61 = vpop.f32.mrf.mxu1 }
 0x333   : > { %v1386_v63 = vmul.f32 0.35355338, %v1382_v58  ;;  %v1452_v1 = vpack.c.bf16 %v1449_v59, %v1446_v57 }
 0x334   : > { %v1510_v3 = vpop.f32.mrf.mxu0 }
 0x335   : > { %v1387_v4 = vpack.c.bf16 %v1386_v63, %v1385_v62  ;;  %1629 = vrot.lane.b32.xlu0 %v1452_v1, %s5587_s16  ;;  %v1523_v5 = vsel %vm1518_vm6, %v1452_v1, 0  ;;  %v1511_v9 = vadd.f32 %v4305_v6, %v1510_v3  ;;  %v1977_v13 = vrot.slane %v1452_v1, 4 }
 0x336   : > { %v4502_v7 = vpop.f32.mrf.mxu0  ;;  %4505 = vmatpush3.bf16.xpose.msra.mxu1 %v1523_v5 }
 0x337   : > { %1626 = vrot.lane.b32.xlu1 %v1387_v4, %s5587_s16  ;;  %4516 = vmatprep.subr.bf16.mxu1 %v5585_v16  ;;  %v1976_v15 = vrot.slane %v1387_v4, 4  ;;  %v1982_v26 = vsel %vm1518_vm6, %v1977_v13, 0 }
 0x338   : > { %v1513_v8 = vpop.f32.mrf.mxu0 }
 0x339   : > { %v1514_v10 = vadd.f32 %v4305_v6, %v1513_v8  ;;  %1862 = vrot.lane.b32.xlu0 %v1452_v1, %s6419_s26 }
 0x33a   : > { %v4503_v11 = vpop.f32.mrf.mxu0 }
 0x33b   : > { %v5990_v12 = vpack.c.bf16 %v1514_v10, %v1511_v9  ;;  %1746 = vrot.lane.b32.xlu1 %v1452_v1, %s6421_s18 }
 0x33d   : > { %2086 = vrot.lane.b32.xlu0 %v1977_v13, %s5587_s16  ;;  %4507 = vmatmul.mubr.msk.bf16.vlgmr.msra.gmra.mxu1 %vm1518_vm6, %v1387_v4  ;;  %v1582_v14 = vsel %vm1580_vm7, %v5990_v12, 0 }
 0x33e   : > { %4511 = vmatpush3.bf16.msra.mxu0 %v1582_v14  ;;  %4518 = vmatprep.mubr.msk.bf16.mxu1 %vm5586_vm1, %v5585_v16 }
 0x33f   : > { %1744 = vrot.lane.b32.xlu1 %v1387_v4, %s6421_s18  ;;  %4522 = vmatprep.subr.bf16.mxu0 %v5585_v16 }
 0x341   : > { %2201 = vrot.lane.b32.xlu0 %v1977_v13, %s6421_s18 }
 0x343   : > { %1860 = vrot.lane.b32.xlu1 %v1387_v4, %s6419_s26 }
 0x345   : > { %2316 = vrot.lane.b32.xlu0 %v1977_v13, %s6419_s26 }
 0x347   : > { %2084 = vrot.lane.b32.xlu1 %v1976_v15, %s5587_s16 }
 0x34b   : > { %2199 = vrot.lane.b32.xlu1 %v1976_v15, %s6421_s18 }
 0x34f   : > { %2314 = vrot.lane.b32.xlu1 %v1976_v15, %s6419_s26 }
 0x3a7   : > { %v1630_v17 = vpop.permute.xlu0 %1629 }
 0x3a8   : > { %v1635_v18 = vsel %vm1518_vm6, %v1630_v17, 0 }
 0x3a9   : > { %v1627_v19 = vpop.permute.xlu1 %1626  ;;  %4517 = vmatpush3.bf16.xpose.msra.mxu1 %v1635_v18 }
 0x3aa   : > { %4528 = vmatprep.subr.bf16.mxu1 %v5585_v16 }
 0x3ab   : > { %v1863_v22 = vpop.permute.xlu0 %1862 }
 0x3ac   : > { %v1868_v24 = vsel %vm1518_vm6, %v1863_v22, 0 }
 0x3ad   : > { %v1747_v20 = vpop.permute.xlu1 %1746 }
 0x3ae   : > { %v1752_v21 = vsel %vm1518_vm6, %v1747_v20, 0 }
 0x3af   : > { %v2087_v27 = vpop.permute.xlu0 %2086 }
 0x3b0   : > { %4519 = vmatmul.mubr.msk.bf16.vlgmr.msra.gmra.mxu1 %vm1518_vm6, %v1627_v19  ;;  %v2092_v28 = vsel %vm1518_vm6, %v2087_v27, 0 }
 0x3b1   : > { %4529 = vmatpush3.bf16.xpose.msra.mxu1 %v1752_v21  ;;  %4530 = vmatprep.mubr.msk.bf16.mxu1 %vm5586_vm1, %v5585_v16  ;;  %v1745_v23 = vpop.permute.xlu1 %1744 }
 0x3b2   : > { %4540 = vmatprep.subr.bf16.mxu1 %v5585_v16 }
 0x3b3   : > { %v2202_v29 = vpop.permute.xlu0 %2201 }
 0x3b4   : > { %v2207_v31 = vsel %vm1518_vm6, %v2202_v29, 0 }
 0x3b5   : > { %v1861_v25 = vpop.permute.xlu1 %1860 }
 0x3b7   : > { %v2317_v32 = vpop.permute.xlu0 %2316 }
 0x3b8   : > { %4531 = vmatmul.mubr.msk.bf16.vlgmr.msra.gmra.mxu1 %vm1518_vm6, %v1745_v23  ;;  %v2322_v34 = vsel %vm1518_vm6, %v2317_v32, 0 }
 0x3b9   : > { %4541 = vmatpush3.bf16.xpose.msra.mxu1 %v1868_v24  ;;  %4542 = vmatprep.mubr.msk.bf16.mxu1 %vm5586_vm1, %v5585_v16  ;;  %v2085_v30 = vpop.permute.xlu1 %2084 }
 0x3ba   : > { %4552 = vmatprep.subr.bf16.mxu1 %v5585_v16 }
 0x3bd   : > { %v2200_v33 = vpop.permute.xlu1 %2199 }
 0x3c0   : > { %4543 = vmatmul.mubr.msk.bf16.vlgmr.msra.gmra.mxu1 %vm1518_vm6, %v1861_v25 }
 0x3c1   : > { %4553 = vmatpush3.bf16.xpose.msra.mxu1 %v1982_v26  ;;  %4554 = vmatprep.mubr.msk.bf16.mxu1 %vm5586_vm1, %v5585_v16  ;;  %v2315_v35 = vpop.permute.xlu1 %2314 }
 0x3c2   : > { %4564 = vmatprep.subr.bf16.mxu1 %v5585_v16 }
 0x3c8   : > { %4555 = vmatmul.mubr.msk.bf16.vlgmr.msra.gmra.mxu1 %vm1518_vm6, %v1976_v15 }
 0x3c9   : > { %4565 = vmatpush3.bf16.xpose.msra.mxu1 %v2092_v28  ;;  %4566 = vmatprep.mubr.msk.bf16.mxu1 %vm5586_vm1, %v5585_v16 }
 0x3ca   : > { %4576 = vmatprep.subr.bf16.mxu1 %v5585_v16 }
 0x3d0   : > { %4567 = vmatmul.mubr.msk.bf16.vlgmr.msra.gmra.mxu1 %vm1518_vm6, %v2085_v30 }
 0x3d1   : > { %4577 = vmatpush3.bf16.xpose.msra.mxu1 %v2207_v31  ;;  %4578 = vmatprep.mubr.msk.bf16.mxu1 %vm5586_vm1, %v5585_v16 }
 0x3d2   : > { %4588 = vmatprep.subr.bf16.mxu1 %v5585_v16 }
 0x3d8   : > { %4579 = vmatmul.mubr.msk.bf16.vlgmr.msra.gmra.mxu1 %vm1518_vm6, %v2200_v33 }
 0x3d9   : > { %4589 = vmatpush3.bf16.xpose.msra.mxu1 %v2322_v34  ;;  %4590 = vmatprep.mubr.msk.bf16.mxu1 %vm5586_vm1, %v5585_v16 }
 0x3da   : > { %4600 = vmatprep.subr.bf16.mxu1 %v5585_v16 }
 0x3e0   : > { %4591 = vmatmul.mubr.msk.bf16.vlgmr.msra.gmra.mxu1 %vm1518_vm6, %v2315_v35 }
 0x3e1   : > { %4604 = vmatprep.mubr.msk.bf16.mxu1 %vm5586_vm1, %v5585_v16 }
 0x3fd   : > { %v1559_v38 = vpop.f32.mrf.mxu1 }
 0x3fe   : > { %v1560_v39 = vadd.f32 %v1559_v38, %v1248_v37 }
 0x3ff   : > { %v4508_v40 = vpop.f32.mrf.mxu1 }
 0x400   : > { %v1565_v41 = vsel %vm1518_vm6, %v1560_v39, -inf }
 0x401   : > { %1566 = vmax.xlane.f32.xlu0 %v1565_v41  ;;  %v1562_v42 = vpop.f32.mrf.mxu1 }
 0x403   : > { %v4509_v43 = vpop.f32.mrf.mxu1 }
 0x470   : > { %v1671_v44 = vpop.f32.mrf.mxu1 }
 0x471   : > { %v1672_v45 = vadd.f32 %v1671_v44, %v1248_v37 }
 0x472   : > { %v4520_v46 = vpop.f32.mrf.mxu1 }
 0x473   : > { %v1677_v47 = vsel %vm1518_vm6, %v1672_v45, -inf }
 0x474   : > { %1678 = vmax.xlane.f32.xlu1 %v1677_v47  ;;  %v1674_v48 = vpop.f32.mrf.mxu1 }
 0x476   : > { %v4521_v49 = vpop.f32.mrf.mxu1 }
 0x478   : > { %v1788_v50 = vpop.f32.mrf.mxu1 }
 0x479   : > { %v1789_v51 = vadd.f32 %v1788_v50, %v1248_v37 }
 0x47a   : > { %v4532_v52 = vpop.f32.mrf.mxu1 }
 0x47b   : > { %v1794_v53 = vsel %vm1518_vm6, %v1789_v51, -inf }
 0x47c   : > { %1795 = vmax.xlane.f32.xlu0 %v1794_v53  ;;  %v1791_v54 = vpop.f32.mrf.mxu1 }
 0x47d   : > { %v6077_v54 = vrot.slane %v5990_v12, 4 }
 0x47e   : > { %v4533_v55 = vpop.f32.mrf.mxu1 }
 0x480   : > { %v1904_v56 = vpop.f32.mrf.mxu1 }
 0x481   : > { %v1905_v57 = vadd.f32 %v1904_v56, %v1248_v37 }
 0x482   : > { %v4544_v58 = vpop.f32.mrf.mxu1 }
 0x483   : > { %v1910_v59 = vsel %vm1518_vm6, %v1905_v57, -inf }
 0x484   : > { %1911 = vmax.xlane.f32.xlu0 %v1910_v59  ;;  %v1907_v60 = vpop.f32.mrf.mxu1 }
 0x486   : > { %v4545_v61 = vpop.f32.mrf.mxu1 }
 0x488   : > { %v2018_v62 = vpop.f32.mrf.mxu1 }
 0x489   : > { %v2019_v63 = vadd.f32 %v2018_v62, %v1248_v37 }
 0x48a   : > { %v1567_v1 = vpop.xlane.xlu0 %1566  ;;  %v4556_v3 = vpop.f32.mrf.mxu1 }
 0x48b   : > { %v1568_v4 = vsub.f32 %v1560_v39, %v1567_v1  ;;  %v2024_v5 = vsel %vm1518_vm6, %v2019_v63, -inf }
 0x48c   : > { %2025 = vmax.xlane.f32.xlu0 %v2024_v5  ;;  %v2021_v6 = vpop.f32.mrf.mxu1 }
 0x48d   : > { %v1569_v7 = vmul.f32 1.442695, %v1568_v4 }
 0x48e   : > { %v4557_v8 = vpop.f32.mrf.mxu1 }
 0x48f   : > { %4997 = vpow2.f32 %v1569_v7 }
 0x490   : > { %v2128_v9 = vpop.f32.mrf.mxu1 }
 0x491   : > { %v6049_v10 = vadd.f32 %v2128_v9, %v1248_v37 }
 0x492   : > { %v4568_v11 = vpop.f32.mrf.mxu1 }
 0x493   : > { %v2134_v13 = vsel %vm1518_vm6, %v6049_v10, -inf }
 0x494   : > { %2135 = vmax.xlane.f32.xlu1 %v2134_v13  ;;  %v2131_v14 = vpop.f32.mrf.mxu1 }
 0x496   : > { %v4569_v15 = vpop.f32.mrf.mxu1 }
 0x498   : > { %v2243_v17 = vpop.f32.mrf.mxu1 }
 0x499   : > { %v6053_v18 = vadd.f32 %v2243_v17, %v1248_v37 }
 0x49a   : > { %v4580_v19 = vpop.f32.mrf.mxu1 }
 0x49b   : > { %v2249_v20 = vsel %vm1518_vm6, %v6053_v18, -inf }
 0x49c   : > { %v4998_v21 = vpop.eup %4997  ;;  %2250 = vmax.xlane.f32.xlu0 %v2249_v20  ;;  %v2246_v22 = vpop.f32.mrf.mxu1 }
 0x49d   : > { %v1571_v24 = vsel %vm1518_vm6, %v4998_v21, 0.0 }
 0x49e   : > { %v4581_v23 = vpop.f32.mrf.mxu1 }
 0x4a0   : > { %1572 = vadd.xlane.f32.xlu0 %v1571_v24  ;;  %v2358_v25 = vpop.f32.mrf.mxu1 }
 0x4a1   : > { %v2359_v26 = vadd.f32 %v2358_v25, %v1248_v37 }
 0x4a2   : > { %v4592_v27 = vpop.f32.mrf.mxu1 }
 0x4a3   : > { %v2364_v28 = vsel %vm1518_vm6, %v2359_v26, -inf }
 0x4a4   : > { %2365 = vmax.xlane.f32.xlu1 %v2364_v28  ;;  %v2361_v29 = vpop.f32.mrf.mxu1 }
 0x4a5   : > { %v2041_v29 = vsel %vm1580_vm7, %v6077_v54, 0 }
 0x4a6   : > { %v4593_v30 = vpop.f32.mrf.mxu1 }
 0x4b5   : > { %1690 = vrot.lane.b32.xlu1 %v5990_v12, %s5587_s16 }
 0x4b6   : > { %1806 = vrot.lane.b32.xlu0 %v5990_v12, %s6421_s18 }
 0x4fd   : > { %v1679_v31 = vpop.xlane.xlu1 %1678 }
 0x4fe   : > { %v1680_v32 = vsub.f32 %v1672_v45, %v1679_v31 }
 0x500   : > { %v1681_v33 = vmul.f32 1.442695, %v1680_v32 }
 0x502   : > { %4999 = vpow2.f32 %v1681_v33 }
 0x505   : > { %v1796_v34 = vpop.xlane.xlu0 %1795 }
 0x506   : > { %v1797_v35 = vsub.f32 %v1789_v51, %v1796_v34 }
 0x508   : > { %v1798_v36 = vmul.f32 1.442695, %v1797_v35 }
 0x50a   : > { %5001 = vpow2.f32 %v1798_v36 }
 0x50d   : > { %v1912_v37 = vpop.xlane.xlu0 %1911 }
 0x50e   : > { %v1913_v38 = vsub.f32 %v1905_v57, %v1912_v37 }
 0x50f   : > { %v5000_v39 = vpop.eup %4999 }
 0x510   : > { %v1914_v40 = vmul.f32 1.442695, %v1913_v38  ;;  %v1683_v41 = vsel %vm1518_vm6, %v5000_v39, 0.0 }
 0x511   : > { %1684 = vadd.xlane.f32.xlu1 %v1683_v41 }
 0x512   : > { %5003 = vpow2.f32 %v1914_v40 }
 0x515   : > { %v2026_v42 = vpop.xlane.xlu0 %2025 }
 0x516   : > { %v2027_v43 = vsub.f32 %v2019_v63, %v2026_v42 }
 0x517   : > { %v6064_v44 = vpop.eup %5001 }
 0x518   : > { %v2028_v46 = vmul.f32 1.442695, %v2027_v43  ;;  %v1800_v45 = vsel %vm1518_vm6, %v6064_v44, 0.0 }
 0x519   : > { %1801 = vadd.xlane.f32.xlu0 %v1800_v45 }
 0x51a   : > { %5005 = vpow2.f32 %v2028_v46 }
 0x51d   : > { %v2136_v53 = vpop.xlane.xlu1 %2135 }
 0x51e   : > { %v2137_v63 = vsub.f32 %v6049_v10, %v2136_v53 }
 0x51f   : > { %v6068_v47 = vpop.eup %5003 }
 0x520   : > { %v1916_v48 = vsel %vm1518_vm6, %v6068_v47, 0.0  ;;  %v2138_v1 = vmul.f32 1.442695, %v2137_v63 }
 0x521   : > { %1917 = vadd.xlane.f32.xlu1 %v1916_v48 }
 0x525   : > { %v2251_v49 = vpop.xlane.xlu0 %2250 }
 0x526   : > { %v2252_v60 = vsub.f32 %v6053_v18, %v2251_v49 }
 0x527   : > { %v6072_v50 = vpop.eup %5005 }
 0x528   : > { %v2030_v51 = vsel %vm1518_vm6, %v6072_v50, 0.0  ;;  %v2253_v62 = vmul.f32 1.442695, %v2252_v60 }
 0x529   : > { %v1573_v52 = vpop.xlane.xlu0 %1572  ;;  %2031 = vadd.xlane.f32.xlu0 %v2030_v51 }
 0x52a   : > { %5007 = vrcp.f32 %v1573_v52 }
 0x52b   : > { %5009 = vpow2.f32 %v2253_v62 }
 0x52c   : > { %5011 = vpow2.f32 %v2138_v1 }
 0x52d   : > { %v2366_v55 = vpop.xlane.xlu1 %2365  ;;  %v1807_v11 = vpop.permute.xlu0 %1806 }
 0x52e   : > { %v2367_v3 = vsub.f32 %v2359_v26, %v2366_v55  ;;  %v1812_v19 = vsel %vm1580_vm7, %v1807_v11, 0  ;;  %v4971_v11 = vld [vmem:[%s6451_s2 + $0x8] sm:$0xff]  }
 0x52f   : > { %4601 = vmatpush3.bf16.msra.mxu1 %v4971_v11  ;;  %v4329_v11 = vld [vmem:[#allocation13] ss:$0 sm:$0xff] }
 0x530   : > { %v2368_v4 = vmul.f32 1.442695, %v2367_v3  ;;  %4602 = vmatprep.subr.bf16.mxu1 %v5585_v16 }
 0x531   : > { %v1691_v58 = vpop.permute.xlu1 %1690 }
 0x532   : > { %2146 = vrot.lane.b32.xlu1 %v6077_v54, %s5587_s16  ;;  %v1696_v61 = vsel %vm1580_vm7, %v1691_v58, 0  ;;  %5013 = vpow2.f32 %v2368_v4 }
 0x537   : > { %v5008_v56 = vpop.eup %5007 }
 0x538   : > { %v1575_v57 = vmul.f32 %v5008_v56, %v4998_v21  ;;  %v6090_v5 = vpop.eup %5009 }
 0x539   : > { %v2255_v6 = vsel %vm1518_vm6, %v6090_v5, 0.0  ;;  %v5012_v7 = vpop.eup %5011 }
 0x53a   : > { %v1576_v59 = vpack.c.bf16 %v1575_v57, %v1575_v57 }
 0x53c   : > { %4513 = vmatmul.mubr.msk.bf16.vlgmr.msra.gmra.mxu0 %vm1518_vm6, %v1576_v59 }
 0x53d   : > { %4523 = vmatpush3.bf16.msra.mxu0 %v1696_v61  ;;  %4524 = vmatprep.mubr.msk.bf16.mxu0 %vm5586_vm1, %v5585_v16 }
 0x53e   : > { %4534 = vmatprep.subr.bf16.mxu0 %v5585_v16 }
 0x53f   : > { %1922 = vrot.lane.b32.xlu0 %v5990_v12, %s6419_s26  ;;  %v2140_v12 = vsel %vm1518_vm6, %v5012_v7, 0.0  ;;  %v6095_v8 = vpop.eup %5013 }
 0x540   : > { %v2370_v9 = vsel %vm1518_vm6, %v6095_v8, 0.0 }
 0x556   : > { %2256 = vadd.xlane.f32.xlu1 %v2255_v6 }
 0x55e   : > { %2141 = vadd.xlane.f32.xlu0 %v2140_v12 }
 0x562   : > { %2371 = vadd.xlane.f32.xlu0 %v2370_v9 }
 0x567   : > { %2376 = vrot.lane.b32.xlu1 %v6077_v54, %s6419_s26 }
 0x578   : > { %2261 = vrot.lane.b32.xlu0 %v6077_v54, %s6421_s18 }
 0x59a   : > { %v1685_v10 = vpop.xlane.xlu1 %1684 }
 0x59b   : > { %5015 = vrcp.f32 %v1685_v10 }
 0x5a2   : > { %v1802_v13 = vpop.xlane.xlu0 %1801 }
 0x5a3   : > { %5017 = vrcp.f32 %v1802_v13 }
 0x5a8   : > { %v5016_v14 = vpop.eup %5015 }
 0x5a9   : > { %v1687_v15 = vmul.f32 %v5016_v14, %v5000_v39  ;;  %v4972_v14 = vld [vmem:[%s6451_s2] sm:$0xff]  }
 0x5aa   : > { %v1918_v17 = vpop.xlane.xlu1 %1917  ;;  %4603 = vmatpush3.bf16.msra.mxu1 %v4972_v14 }
 0x5ab   : > { %5019 = vrcp.f32 %v1918_v17  ;;  %v1688_v18 = vpack.c.bf16 %v1687_v15, %v1687_v15 }
 0x5ad   : > { %4525 = vmatmul.mubr.msk.bf16.vlgmr.msra.gmra.mxu0 %vm1518_vm6, %v1688_v18 }
 0x5ae   : > { %4535 = vmatpush3.bf16.msra.mxu0 %v1812_v19  ;;  %4536 = vmatprep.mubr.msk.bf16.mxu0 %vm5586_vm1, %v5585_v16  ;;  %v2147_v32 = vpop.permute.xlu1 %2146 }
 0x5af   : > { %4546 = vmatprep.subr.bf16.mxu0 %v5585_v16  ;;  %v2152_v34 = vsel %vm1580_vm7, %v2147_v32, 0 }
 0x5b0   : > { %v5018_v20 = vpop.eup %5017 }
 0x5b1   : > { %v1804_v21 = vmul.f32 %v5018_v20, %v6064_v44 }
 0x5b2   : > { %v2032_v22 = vpop.xlane.xlu0 %2031 }
 0x5b3   : > { %5021 = vrcp.f32 %v2032_v22  ;;  %v1805_v23 = vpack.c.bf16 %v1804_v21, %v1804_v21 }
 0x5b5   : > { %4537 = vmatmul.mubr.msk.bf16.vlgmr.msra.gmra.mxu0 %vm1518_vm6, %v1805_v23 }
 0x5b6   : > { %v1923_v24 = vpop.permute.xlu0 %1922  ;;  %4548 = vmatprep.mubr.msk.bf16.mxu0 %vm5586_vm1, %v5585_v16 }
 0x5b7   : > { %v1928_v25 = vsel %vm1580_vm7, %v1923_v24, 0 }
 0x5b8   : > { %v5020_v26 = vpop.eup %5019  ;;  %4547 = vmatpush3.bf16.msra.mxu0 %v1928_v25 }
 0x5b9   : > { %4558 = vmatprep.subr.bf16.mxu0 %v5585_v16  ;;  %v1920_v27 = vmul.f32 %v5020_v26, %v6068_v47 }
 0x5bb   : > { %v1921_v28 = vpack.c.bf16 %v1920_v27, %v1920_v27 }
 0x5bd   : > { %4549 = vmatmul.mubr.msk.bf16.vlgmr.msra.gmra.mxu0 %vm1518_vm6, %v1921_v28 }
 0x5be   : > { %4559 = vmatpush3.bf16.msra.mxu0 %v2041_v29  ;;  %4560 = vmatprep.mubr.msk.bf16.mxu0 %vm5586_vm1, %v5585_v16 }
 0x5bf   : > { %4570 = vmatprep.subr.bf16.mxu0 %v5585_v16 }
 0x5c0   : > { %v5022_v30 = vpop.eup %5021 }
 0x5c1   : > { %v2034_v31 = vmul.f32 %v5022_v30, %v6072_v50 }
 0x5c3   : > { %v2035_v33 = vpack.c.bf16 %v2034_v31, %v2034_v31 }
 0x5c5   : > { %4561 = vmatmul.mubr.msk.bf16.vlgmr.msra.gmra.mxu0 %vm1518_vm6, %v2035_v33  ;;  %v4325_v33 = vld [vmem:[#allocation11] ss:$0 sm:$0xff] }
 0x5c6   : > { %4571 = vmatpush3.bf16.msra.mxu0 %v2152_v34  ;;  %4572 = vmatprep.mubr.msk.bf16.mxu0 %vm5586_vm1, %v5585_v16 }
 0x5c7   : > { %4582 = vmatprep.subr.bf16.mxu0 %v5585_v16 }
 0x5df   : > { %v2257_v36 = vpop.xlane.xlu1 %2256 }
 0x5e3   : > { %v2377_v45 = vpop.permute.xlu1 %2376 }
 0x5e4   : > { %v2382_v51 = vsel %vm1580_vm7, %v2377_v45, 0 }
 0x5e7   : > { %v2142_v35 = vpop.xlane.xlu0 %2141 }
 0x5e8   : > { %5023 = vrcp.f32 %v2142_v35 }
 0x5e9   : > { %5025 = vrcp.f32 %v2257_v36 }
 0x5eb   : > { %v2372_v37 = vpop.xlane.xlu0 %2371 }
 0x5ec   : > { %5027 = vrcp.f32 %v2372_v37 }
 0x5ef   : > { %v2262_v40 = vpop.permute.xlu0 %2261 }
 0x5f0   : > { %v2267_v43 = vsel %vm1580_vm7, %v2262_v40, 0 }
 0x5f5   : > { %v5024_v38 = vpop.eup %5023 }
 0x5f6   : > { %v2144_v39 = vmul.f32 %v5024_v38, %v5012_v7  ;;  %v5026_v42 = vpop.eup %5025 }
 0x5f7   : > { %v2259_v44 = vmul.f32 %v5026_v42, %v6090_v5 }
 0x5f8   : > { %v2145_v41 = vpack.c.bf16 %v2144_v39, %v2144_v39 }
 0x5f9   : > { %v2260_v48 = vpack.c.bf16 %v2259_v44, %v2259_v44  ;;  %v5028_v49 = vpop.eup %5027 }
 0x5fa   : > { %4573 = vmatmul.mubr.msk.bf16.vlgmr.msra.gmra.mxu0 %vm1518_vm6, %v2145_v41  ;;  %v2374_v53 = vmul.f32 %v5028_v49, %v6095_v8 }
 0x5fb   : > { %4583 = vmatpush3.bf16.msra.mxu0 %v2267_v43  ;;  %4584 = vmatprep.mubr.msk.bf16.mxu0 %vm5586_vm1, %v5585_v16 }
 0x5fc   : > { %4594 = vmatprep.subr.bf16.mxu0 %v5585_v16  ;;  %v1618_v46 = vpop.f32.mrf.mxu0  ;;  %v2375_v54 = vpack.c.bf16 %v2374_v53, %v2374_v53 }
 0x5fd   : > { %1624 = vst.msk [vmem:[#allocation2] sm:$0xff] %vm1518_vm6, %v1618_v46 }
 0x5fe   : > { %v4514_v47 = vpop.f32.mrf.mxu0 }
 0x600   : > { %v1621_v50 = vpop.f32.mrf.mxu0 }
 0x602   : > { %4585 = vmatmul.mubr.msk.bf16.vlgmr.msra.gmra.mxu0 %vm1518_vm6, %v2260_v48  ;;  %v4515_v52 = vpop.f32.mrf.mxu0 }
 0x603   : > { %4595 = vmatpush3.bf16.msra.mxu0 %v2382_v51  ;;  %4596 = vmatprep.mubr.msk.bf16.mxu0 %vm5586_vm1, %v5585_v16 }
 0x604   : > { %4608 = vmatprep.subr.bf16.mxu0 %v5585_v16 }
 0x60a   : > { %4597 = vmatmul.mubr.msk.bf16.vlgmr.msra.gmra.mxu0 %vm1518_vm6, %v2375_v54  ;;  %v6177_v54 = vld [vmem:[%s5952_s11 + $0x8] sm:$0xff]  }
 0x60b   : > { %4612 = vmatprep.mubr.msk.bf16.mxu0 %vm5586_vm1, %v5585_v16 }
 0x66d   : > { %v1732_v55 = vpop.f32.mrf.mxu0 }
 0x66e   : > { %1739 = vrot.lane.b32.xlu1 %v1732_v55, %s6417_s7  ;;  %v4975_v55 = vld [vmem:[%s5952_s11] sm:$0xff]   ;;  %s6454_s11 = sld [smem:[#allocation47_spill]] }
 0x66f   : > { %v4526_v56 = vpop.f32.mrf.mxu0 }
 0x671   : > { %v1735_v57 = vpop.f32.mrf.mxu0 }
 0x673   : > { %v4527_v58 = vpop.f32.mrf.mxu0 }
 0x675   : > { %v1848_v59 = vpop.f32.mrf.mxu0 }
 0x676   : > { %1855 = vrot.lane.b32.xlu1 %v1848_v59, %s6415_s0 }
 0x677   : > { %v4538_v60 = vpop.f32.mrf.mxu0 }
 0x679   : > { %v1851_v61 = vpop.f32.mrf.mxu0 }
 0x67b   : > { %v4539_v62 = vpop.f32.mrf.mxu0 }
 0x67d   : > { %v1964_v63 = vpop.f32.mrf.mxu0 }
 0x67e   : > { %1971 = vrot.lane.b32.xlu0 %v1964_v63, %s6413_s23 }
 0x67f   : > { %v4550_v1 = vpop.f32.mrf.mxu0 }
 0x681   : > { %v1967_v3 = vpop.f32.mrf.mxu0 }
 0x683   : > { %v4551_v4 = vpop.f32.mrf.mxu0 }
 0x685   : > { %v2077_v5 = vpop.f32.mrf.mxu0 }
 0x686   : > { %2083 = vst.msk [vmem:[#allocation2 + $0x8] sm:$0xff] %vm1518_vm6, %v2077_v5 }
 0x687   : > { %v4562_v6 = vpop.f32.mrf.mxu0 }
 0x689   : > { %v2080_v7 = vpop.f32.mrf.mxu0 }
 0x68b   : > { %v4563_v12 = vpop.f32.mrf.mxu0 }
 0x6ba   : > { %v2188_v8 = vpop.f32.mrf.mxu0 }
 0x6bb   : > { %2195 = vrot.lane.b32.xlu1 %v2188_v8, %s6417_s7  ;;  %s6455_s7 = sld [smem:[#allocation49_spill]] }
 0x6bc   : > { %v4574_v9 = vpop.f32.mrf.mxu0 }
 0x6be   : > { %v2191_v10 = vpop.f32.mrf.mxu0 }
 0x6c0   : > { %v4575_v13 = vpop.f32.mrf.mxu0 }
 0x6c2   : > { %v2303_v15 = vpop.f32.mrf.mxu0 }
 0x6c3   : > { %2310 = vrot.lane.b32.xlu1 %v2303_v15, %s6415_s0  ;;  %s6453_s0 = sld [smem:[#allocation46_spill]] }
 0x6c4   : > { %v4586_v17 = vpop.f32.mrf.mxu0 }
 0x6c6   : > { %v2306_v18 = vpop.f32.mrf.mxu0 }
 0x6c8   : > { %v4587_v19 = vpop.f32.mrf.mxu0 }
 0x6c9   : > { %v4976_v56 = vld [vmem:[%s6453_s0 + $0x8] sm:$0xff]   ;;  %v4977_v57 = vld [vmem:[%s6453_s0] sm:$0xff]   ;;  %v4330_v19 = vld [vmem:[#allocation14] ss:$0 sm:$0xff] }
 0x6ca   : > { %v2418_v20 = vpop.f32.mrf.mxu0  ;;  %4609 = vmatpush3.bf16.msra.mxu0 %v4976_v56 }
 0x6cb   : > { %2425 = vrot.lane.b32.xlu1 %v2418_v20, %s6413_s23  ;;  %s6452_s23 = sld [smem:[#allocation48_spill]]  ;;  %4610 = vmatprep.subr.bf16.mxu0 %v5585_v16 }
 0x6cc   : > { %v4598_v21 = vpop.f32.mrf.mxu0 }
 0x6ce   : > { %v2421_v22 = vpop.f32.mrf.mxu0  ;;  %4611 = vmatpush3.bf16.msra.mxu0 %v4977_v57 }
 0x6d0   : > { %v4599_v23 = vpop.f32.mrf.mxu0 }
 0x6d1   : > { %v4973_v52 = vld [vmem:[%s6452_s23 + $0x8] sm:$0xff]   ;;  %v4974_v53 = vld [vmem:[%s6452_s23] sm:$0xff]  }
 0x6d2   : > { %4616 = vmatprep.subr.bf16.mxu1 %v4973_v52 }
 0x6e0   : > { %v1740_v24 = vpop.permute.xlu1 %1739 }
 0x6e1   : > { %1743 = vst.msk [vmem:[#allocation2] sm:$0xff] %vm1742_vm9, %v1740_v24 }
 0x6e8   : > { %v1856_v25 = vpop.permute.xlu1 %1855 }
 0x6e9   : > { %1859 = vst.msk [vmem:[#allocation2] sm:$0xff] %vm1858_vm10, %v1856_v25  ;;  %v4335_v25 = vld [vmem:[#allocation16] ss:$0 sm:$0xff] }
 0x6f0   : > { %v1972_v26 = vpop.permute.xlu0 %1971 }
 0x6f1   : > { %1975 = vst.msk [vmem:[#allocation2] sm:$0xff] %vm1974_vm11, %v1972_v26 }
 0x6f8   : > { %v2429_v30 = vld [vmem:[#allocation2] sm:$0xff] }
 0x72d   : > { %v2196_v27 = vpop.permute.xlu1 %2195 }
 0x72e   : > { %2198 = vst.msk [vmem:[#allocation2 + $0x8] sm:$0xff] %vm1742_vm9, %v2196_v27 }
 0x735   : > { %v2311_v28 = vpop.permute.xlu1 %2310 }
 0x736   : > { %2313 = vst.msk [vmem:[#allocation2 + $0x8] sm:$0xff] %vm1858_vm10, %v2311_v28 }
 0x73d   : > { %v2426_v29 = vpop.permute.xlu1 %2425 }
 0x73e   : > { %2428 = vst.msk [vmem:[#allocation2 + $0x8] sm:$0xff] %vm1974_vm11, %v2426_v29 }
 0x745   : > { %v2430_v31 = vld [vmem:[#allocation2 + $0x8] sm:$0xff] }
 0x746   : > { %v2431_v32 = vpack.c.bf16 %v2430_v31, %v2429_v30 }
 0x748   : > { %4605 = vmatmul.mubr.msk.bf16.vlgmr.msra.gmra.mxu1 %vm1257_vm0, %v2431_v32 }
 0x749   : > { %4617 = vmatpush3.bf16.msra.mxu1 %v4973_v52  ;;  %4620 = vmatprep.mubr.msk.bf16.mxu1 %vm1257_vm0, %v4975_v55 }
 0x74a   : > { %4618 = vmatprep.subr.bf16.mxu1 %v4974_v53 }
 0x74d   : > { %4619 = vmatpush3.bf16.msra.mxu1 %v4974_v53 }
 0x74e   : > { %4632 = vmatprep.subr.bf16.mxu1 %v5585_v16 }
 0x750   : > { %4621 = vmatmul.mubr.msk.bf16.vlgmr.msra.gmra.mxu1 %vm1257_vm0, %v6177_v54 }
 0x751   : > { %4634 = vmatprep.mubr.msk.bf16.mxu1 %vm5586_vm1, %v5585_v16 }
 0x808   : > { %v2492_v34 = vpop.f32.mrf.mxu1 }
 0x809   : > { %v2493_v35 = vadd.f32 %v4325_v33, %v2492_v34 }
 0x80a   : > { %v4606_v36 = vpop.f32.mrf.mxu1 }
 0x80b   : > { %v6161_v37 = vadd.f32 %v2493_v35, %v5942_v0  ;;  %v4331_v36 = vld [vmem:[%s6454_s11] ss:$0 sm:$0xff]  ;;  %s6456_s11 = sld [smem:[#allocation40_spill]] }
 0x80c   : > { %v2495_v38 = vpop.f32.mrf.mxu1 }
 0x80d   : > { %v2496_v39 = vadd.f32 %v4325_v33, %v2495_v38  ;;  %v2503_v40 = vsel %vm1257_vm0, %v6161_v37, 0.0 }
 0x80e   : > { %2504 = vadd.xlane.f32.xlu0 %v2503_v40  ;;  %v4607_v41 = vpop.f32.mrf.mxu1 }
 0x80f   : > { %v6166_v42 = vadd.f32 %v2496_v39, %v5946_v2 }
 0x810   : > { %v4622_v24 = vpop.f32.mrf.mxu1 }
 0x811   : > { %v2506_v43 = vsel %vm1257_vm0, %v6166_v42, 0.0  ;;  %v2714_v32 = vadd.f32 %v4622_v24, %v4335_v25 }
 0x812   : > { %2507 = vadd.xlane.f32.xlu1 %v2506_v43  ;;  %v2705_v26 = vpop.f32.mrf.mxu1 }
 0x813   : > { %v2706_v28 = vadd.f32 %v4335_v25, %v2705_v26 }
 0x814   : > { %v4623_v27 = vpop.f32.mrf.mxu1 }
 0x815   : > { %v2717_v33 = vadd.f32 %v4623_v27, %v4335_v25 }
 0x816   : > { %v2708_v29 = vpop.f32.mrf.mxu1 }
 0x817   : > { %v2709_v30 = vadd.f32 %v4335_v25, %v2708_v29  ;;  %v2721_v34 = vpack.c.bf16 %v2717_v33, %v2714_v32 }
 0x819   : > { %v2720_v31 = vpack.c.bf16 %v2709_v30, %v2706_v28 }
 0x81b   : > { %v2806_v35 = vsel %vm1518_vm6, %v2720_v31, 0 }
 0x81c   : > { %4633 = vmatpush3.bf16.xpose.msra.mxu1 %v2806_v35 }
 0x81d   : > { %4644 = vmatprep.subr.bf16.mxu1 %v5585_v16 }
 0x897   : > { %v2505_v44 = vpop.xlane.xlu0 %2504 }
 0x898   : > { %v2509_v0 = vmul.f32 0.03125, %v2505_v44 }
 0x89a   : > { %v2511_v46 = vsub.f32 %v6161_v37, %v2509_v0 }
 0x89b   : > { %v2508_v45 = vpop.xlane.xlu1 %2507 }
 0x89c   : > { %v2510_v47 = vmul.f32 0.03125, %v2508_v45  ;;  %v2513_v48 = vmul.f32 %v2511_v46, %v2511_v46 }
 0x89e   : > { %v2512_v49 = vsub.f32 %v6166_v42, %v2510_v47  ;;  %v2515_v50 = vsel %vm1257_vm0, %v2513_v48, 0.0 }
 0x89f   : > { %2516 = vadd.xlane.f32.xlu0 %v2515_v50  ;;  %v4978_v50 = vld [vmem:[%s6455_s7 + $0x8] sm:$0xff]  }
 0x8a0   : > { %v2514_v2 = vmul.f32 %v2512_v49, %v2512_v49  ;;  %4624 = vmatprep.subr.bf16.mxu0 %v4978_v50 }
 0x8a2   : > { %v2518_v51 = vsel %vm1257_vm0, %v2514_v2, 0.0  ;;  %v4979_v2 = vld [vmem:[%s6455_s7] sm:$0xff]  }
 0x8a3   : > { %2519 = vadd.xlane.f32.xlu0 %v2518_v51 }
 0x8b9   : > { %2909 = vrot.lane.b32.xlu0 %v2720_v31, %s5587_s16 }
 0x8bd   : > { %3136 = vrot.lane.b32.xlu0 %v2720_v31, %s6419_s26 }
 0x8c1   : > { %3359 = vrot.lane.b32.xlu0 %v2721_v34, %s5587_s16 }
 0x8c5   : > { %3473 = vrot.lane.b32.xlu0 %v2721_v34, %s6421_s18 }
 0x8c9   : > { %3586 = vrot.lane.b32.xlu0 %v2721_v34, %s6419_s26 }
 0x928   : > { %v2517_v58 = vpop.xlane.xlu0 %2516 }
 0x929   : > { %v2521_v59 = vmul.f32 0.032258064, %v2517_v58  ;;  %v3258_v58 = vsel %vm1518_vm6, %v2721_v34, 0 }
 0x92b   : > { %5029 = vrsqrt.f32 %v2521_v59  ;;  %vm2525_vm12 = vcmp.eq.f32.partialorder %v2521_v59, inf  ;;  %v2528_v1 = vand.u32 2147483648, %v2521_v59  ;;  %vm2527_vm13 = vcmp.eq.f32.partialorder %v2521_v59, 0.0 }
 0x92c   : > { %v2520_v60 = vpop.xlane.xlu0 %2519 }
 0x92d   : > { %v2522_v61 = vmul.f32 0.032258064, %v2520_v60 }
 0x92f   : > { %5031 = vrsqrt.f32 %v2522_v61  ;;  %vm2532_vm14 = vcmp.eq.f32.partialorder %v2522_v61, inf  ;;  %v2535_v12 = vand.u32 2147483648, %v2522_v61  ;;  %vm2534_vm15 = vcmp.eq.f32.partialorder %v2522_v61, 0.0 }
 0x930   : > { %v2910_v45 = vpop.permute.xlu0 %2909 }
 0x931   : > { %v2915_v48 = vsel %vm1518_vm6, %v2910_v45, 0 }
 0x938   : > { %v5030_v62 = vpop.eup %5029 }
 0x939   : > { %v2524_v63 = vmul.f32 %v5030_v62, %v2521_v59 }
 0x93b   : > { %v2526_v3 = vsel %vm2525_vm12, %v2521_v59, %v2524_v63 }
 0x93c   : > { %v5032_v4 = vpop.eup %5031  ;;  %v2529_v5 = vsel %vm2527_vm13, %v2528_v1, %v2526_v3 }
 0x93d   : > { %v2537_v6 = vadd.f32 1e-06, %v2529_v5  ;;  %v2531_v7 = vmul.f32 %v5032_v4, %v2522_v61 }
 0x93f   : > { %5033 = vrcp.f32 %v2537_v6  ;;  %v2533_v8 = vsel %vm2532_vm14, %v2522_v61, %v2531_v7  ;;  %v2797_v6 = vlaneseq }
 0x940   : > { %v2536_v9 = vsel %vm2534_vm15, %v2535_v12, %v2533_v8 }
 0x941   : > { %v2538_v10 = vadd.f32 1e-06, %v2536_v9  ;;  %v2798_v12 = vshrl.u32 %v2797_v6, 7 }
 0x943   : > { %5035 = vrcp.f32 %v2538_v10  ;;  %v2799_v8 = vsub.s32 0, %v2798_v12 }
 0x94c   : > { %v5034_v13 = vpop.eup %5033 }
 0x94d   : > { %v2549_v14 = vmul.f32 %v5034_v13, %v4329_v11 }
 0x94f   : > { %v2551_v18 = vmul.f32 %v2549_v14, %v2511_v46 }
 0x950   : > { %v5036_v15 = vpop.eup %5035 }
 0x951   : > { %v2550_v17 = vmul.f32 %v5036_v15, %v4329_v11  ;;  %v2559_v21 = vadd.f32 %v4330_v19, %v2551_v18 }
 0x953   : > { %v2552_v20 = vmul.f32 %v2550_v17, %v2512_v49 }
 0x955   : > { %v2560_v22 = vadd.f32 %v4330_v19, %v2552_v20 }
 0x957   : > { %v2561_v23 = vpack.c.bf16 %v2560_v22, %v2559_v21 }
 0x959   : > { %4613 = vmatmul.mubr.msk.bf16.vlgmr.msra.gmra.mxu0 %vm1257_vm0, %v2561_v23 }
 0x95a   : > { %4628 = vmatprep.mubr.msk.bf16.mxu0 %vm1257_vm0, %v4975_v55  ;;  %4625 = vmatpush3.bf16.msra.mxu0 %v4978_v50  ;;  %v3137_v55 = vpop.permute.xlu0 %3136 }
 0x95b   : > { %4626 = vmatprep.subr.bf16.mxu0 %v4979_v2  ;;  %v3142_v57 = vsel %vm1518_vm6, %v3137_v55, 0 }
 0x95e   : > { %4627 = vmatpush3.bf16.msra.mxu0 %v4979_v2  ;;  %v3360_v59 = vpop.permute.xlu0 %3359 }
 0x95f   : > { %4638 = vmatprep.subr.bf16.mxu0 %v5585_v16  ;;  %v3365_v60 = vsel %vm1518_vm6, %v3360_v59, 0 }
 0x961   : > { %4629 = vmatmul.mubr.msk.bf16.vlgmr.msra.gmra.mxu0 %vm1257_vm0, %v6177_v54 }
 0x962   : > { %4640 = vmatprep.mubr.msk.bf16.mxu0 %vm5586_vm1, %v5585_v16  ;;  %v3474_v61 = vpop.permute.xlu0 %3473 }
 0x963   : > { %v3479_v63 = vsel %vm1518_vm6, %v3474_v61, 0 }
 0x966   : > { %v3587_v1 = vpop.permute.xlu0 %3586 }
 0x967   : > { %v3592_v4 = vsel %vm1518_vm6, %v3587_v1, 0 }
 0xa19   : > { %v2622_v38 = vpop.f32.mrf.mxu0 }
 0xa1a   : > { %v2623_v40 = vadd.f32 %v4331_v36, %v2622_v38 }
 0xa1b   : > { %v4614_v39 = vpop.f32.mrf.mxu0 }
 0xa1c   : > { %v2629_v0 = vmul.f32 0.35355338, %v2623_v40 }
 0xa1d   : > { %v2625_v41 = vpop.f32.mrf.mxu0 }
 0xa1e   : > { %v2626_v43 = vadd.f32 %v4331_v36, %v2625_v41 }
 0xa1f   : > { %v4615_v44 = vpop.f32.mrf.mxu0 }
 0xa20   : > { %v2630_v46 = vmul.f32 0.35355338, %v2626_v43 }
 0xa21   : > { %v4630_v19 = vpop.f32.mrf.mxu0 }
 0xa22   : > { %v2631_v47 = vpack.c.bf16 %v2630_v46, %v2629_v0 }
 0xa23   : > { %v2779_v22 = vpop.f32.mrf.mxu0 }
 0xa24   : > { %2906 = vrot.lane.b32.xlu1 %v2631_v47, %s5587_s16  ;;  %4635 = vmatmul.mubr.msk.bf16.vlgmr.msra.gmra.mxu1 %vm1518_vm6, %v2631_v47  ;;  %v3253_v49 = vrot.slane %v2631_v47, 4 }
 0xa25   : > { %4645 = vmatpush3.bf16.xpose.msra.mxu1 %v2915_v48  ;;  %4646 = vmatprep.mubr.msk.bf16.mxu1 %vm5586_vm1, %v5585_v16  ;;  %v4631_v23 = vpop.f32.mrf.mxu0 }
 0xa26   : > { %4656 = vmatprep.subr.bf16.mxu1 %v5585_v16 }
 0xa27   : > { %v2782_v26 = vpop.f32.mrf.mxu0 }
 0xa28   : > { %3023 = vrot.lane.b32.xlu1 %v2720_v31, %s6421_s18 }
 0xa2c   : > { %3021 = vrot.lane.b32.xlu1 %v2631_v47, %s6421_s18 }
 0xa30   : > { %3134 = vrot.lane.b32.xlu1 %v2631_v47, %s6419_s26 }
 0xa34   : > { %3356 = vrot.lane.b32.xlu1 %v3253_v49, %s5587_s16 }
 0xa38   : > { %3471 = vrot.lane.b32.xlu1 %v3253_v49, %s6421_s18  ;;  %s6457_s18 = sld [smem:[#allocation50_spill]] }
 0xa3c   : > { %3584 = vrot.lane.b32.xlu1 %v3253_v49, %s6419_s26  ;;  %s6253_s26 = scalar_lea.vmem %s6456_s11, %s6464_s1  ;;  %s6458_s1 = smov 112  }
 0xa3d   : > { %v1249_v7 = vld [vmem:[%s6253_s26] sm:$0x1]  ;;  %v1250_v41 = vld [vmem:[%s6253_s26 + $0x1] sm:$0x1]  ;;  %s6459_s26 = smov 104   ;;  %s6462_s11 = smov 24  }
 0xa3e   : > { %vm1251_vm2 = vcmp.eq.f32.partialorder %v1249_v7, 0.0  ;;  %v4342_v20 = vld [vmem:[%s6457_s18] ss:$0 sm:$0xff]  ;;  %vm1252_vm4 = vcmp.eq.f32.partialorder %v1250_v41, 0.0  ;;  %s6461_s18 = smov 16  }
 0xa3f   : > { %v1253_v9 = vsel %vm1251_vm2, -1e+09, %v5585_v16  ;;  %v2788_v21 = vadd.f32 %v4630_v19, %v4342_v20  ;;  %v2780_v24 = vadd.f32 %v4342_v20, %v2779_v22  ;;  %v2791_v25 = vadd.f32 %v4631_v23, %v4342_v20 }
 0xa40   : > { %v2800_v10 = vrot.slane %v1253_v9, %v2799_v8  ;;  %v2783_v28 = vadd.f32 %v4342_v20, %v2782_v26  ;;  %v1254_v47 = vsel %vm1252_vm4, -1e+09, %v5585_v16 }
 0xa41   : > { %v6259_v27 = vpack.c.bf16 %v2791_v25, %v2788_v21  ;;  %v3251_v50 = vrot.slane %v1254_v47, %v2799_v8 }
 0xa42   : > { %v6261_v29 = vpack.c.bf16 %v2783_v28, %v2780_v24 }
 0xa44   : > { %4639 = vmatpush3.bf16.msra.mxu0 %v6261_v29 }
 0xa45   : > { %4650 = vmatprep.subr.bf16.mxu0 %v5585_v16 }
 0xa96   : > { %v2907_v51 = vpop.permute.xlu1 %2906 }
 0xa97   : > { %4647 = vmatmul.mubr.msk.bf16.vlgmr.msra.gmra.mxu1 %vm1518_vm6, %v2907_v51 }
 0xa98   : > { %4658 = vmatprep.mubr.msk.bf16.mxu1 %vm5586_vm1, %v5585_v16 }
 0xa9a   : > { %v3024_v52 = vpop.permute.xlu1 %3023 }
 0xa9b   : > { %v3029_v53 = vsel %vm1518_vm6, %v3024_v52, 0 }
 0xa9c   : > { %4657 = vmatpush3.bf16.xpose.msra.mxu1 %v3029_v53 }
 0xa9d   : > { %4668 = vmatprep.subr.bf16.mxu1 %v5585_v16 }
 0xa9e   : > { %v3022_v56 = vpop.permute.xlu1 %3021 }
 0xaa2   : > { %v3135_v54 = vpop.permute.xlu1 %3134 }
 0xaa3   : > { %4659 = vmatmul.mubr.msk.bf16.vlgmr.msra.gmra.mxu1 %vm1518_vm6, %v3022_v56 }
 0xaa4   : > { %4669 = vmatpush3.bf16.xpose.msra.mxu1 %v3142_v57  ;;  %4670 = vmatprep.mubr.msk.bf16.mxu1 %vm5586_vm1, %v5585_v16 }
 0xaa5   : > { %4680 = vmatprep.subr.bf16.mxu1 %v5585_v16 }
 0xaa6   : > { %v3357_v62 = vpop.permute.xlu1 %3356 }
 0xaaa   : > { %v3472_v3 = vpop.permute.xlu1 %3471 }
 0xaab   : > { %4671 = vmatmul.mubr.msk.bf16.vlgmr.msra.gmra.mxu1 %vm1518_vm6, %v3135_v54 }
 0xaac   : > { %4681 = vmatpush3.bf16.xpose.msra.mxu1 %v3258_v58  ;;  %4682 = vmatprep.mubr.msk.bf16.mxu1 %vm5586_vm1, %v5585_v16 }
 0xaad   : > { %4692 = vmatprep.subr.bf16.mxu1 %v5585_v16 }
 0xaae   : > { %v3585_v5 = vpop.permute.xlu1 %3584 }
 0xab3   : > { %4683 = vmatmul.mubr.msk.bf16.vlgmr.msra.gmra.mxu1 %vm1518_vm6, %v3253_v49 }
 0xab4   : > { %4693 = vmatpush3.bf16.xpose.msra.mxu1 %v3365_v60  ;;  %4694 = vmatprep.mubr.msk.bf16.mxu1 %vm5586_vm1, %v5585_v16 }
 0xab5   : > { %4704 = vmatprep.subr.bf16.mxu1 %v5585_v16 }
 0xabb   : > { %4695 = vmatmul.mubr.msk.bf16.vlgmr.msra.gmra.mxu1 %vm1518_vm6, %v3357_v62 }
 0xabc   : > { %4705 = vmatpush3.bf16.xpose.msra.mxu1 %v3479_v63  ;;  %4706 = vmatprep.mubr.msk.bf16.mxu1 %vm5586_vm1, %v5585_v16 }
 0xabd   : > { %4716 = vmatprep.subr.bf16.mxu1 %v5585_v16 }
 0xac3   : > { %4707 = vmatmul.mubr.msk.bf16.vlgmr.msra.gmra.mxu1 %vm1518_vm6, %v3472_v3 }
 0xac4   : > { %4717 = vmatpush3.bf16.xpose.msra.mxu1 %v3592_v4  ;;  %4718 = vmatprep.mubr.msk.bf16.mxu1 %vm5586_vm1, %v5585_v16 }
 0xac5   : > { %4728 = vmatprep.subr.bf16.mxu1 %v5585_v16 }
 0xacb   : > { %4719 = vmatmul.mubr.msk.bf16.vlgmr.msra.gmra.mxu1 %vm1518_vm6, %v3585_v5 }
 0xacc   : > { %4732 = vmatprep.mubr.msk.bf16.mxu1 %vm5586_vm1, %v5585_v16 }
 0xae4   : > { %v2842_v11 = vpop.f32.mrf.mxu1 }
 0xae5   : > { %v2843_v13 = vadd.f32 %v2842_v11, %v2800_v10 }
 0xae6   : > { %v4636_v14 = vpop.f32.mrf.mxu1 }
 0xae7   : > { %v2849_v15 = vsel %vm2848_vm3, %v2843_v13, -inf }
 0xae8   : > { %2850 = vmax.xlane.f32.xlu0 %v2849_v15  ;;  %v2845_v17 = vpop.f32.mrf.mxu1 }
 0xaea   : > { %v4637_v18 = vpop.f32.mrf.mxu1 }
 0xb57   : > { %v2951_v30 = vpop.f32.mrf.mxu1 }
 0xb58   : > { %v6265_v31 = vadd.f32 %v2951_v30, %v2800_v10 }
 0xb59   : > { %v4648_v32 = vpop.f32.mrf.mxu1 }
 0xb5a   : > { %v2957_v33 = vsel %vm2848_vm3, %v6265_v31, -inf }
 0xb5b   : > { %2958 = vmax.xlane.f32.xlu1 %v2957_v33  ;;  %v2954_v34 = vpop.f32.mrf.mxu1 }
 0xb5d   : > { %v4649_v35 = vpop.f32.mrf.mxu1 }
 0xb63   : > { %v3065_v36 = vpop.f32.mrf.mxu1 }
 0xb64   : > { %v3066_v38 = vadd.f32 %v3065_v36, %v2800_v10 }
 0xb65   : > { %v4660_v39 = vpop.f32.mrf.mxu1 }
 0xb66   : > { %v3071_v40 = vsel %vm2848_vm3, %v3066_v38, -inf }
 0xb67   : > { %3072 = vmax.xlane.f32.xlu0 %v3071_v40  ;;  %v3068_v43 = vpop.f32.mrf.mxu1 }
 0xb69   : > { %v4661_v44 = vpop.f32.mrf.mxu1 }
 0xb6b   : > { %v3178_v0 = vpop.f32.mrf.mxu1 }
 0xb6c   : > { %v3179_v46 = vadd.f32 %v3178_v0, %v2800_v10 }
 0xb6d   : > { %v4672_v45 = vpop.f32.mrf.mxu1 }
 0xb6e   : > { %v3184_v48 = vsel %vm2848_vm3, %v3179_v46, -inf }
 0xb6f   : > { %3185 = vmax.xlane.f32.xlu0 %v3184_v48  ;;  %v3181_v49 = vpop.f32.mrf.mxu1 }
 0xb71   : > { %v2851_v2 = vpop.xlane.xlu0 %2850  ;;  %v4673_v51 = vpop.f32.mrf.mxu1 }
 0xb72   : > { %v2852_v52 = vsub.f32 %v2843_v13, %v2851_v2 }
 0xb73   : > { %v3294_v53 = vpop.f32.mrf.mxu1 }
 0xb74   : > { %v3295_v55 = vadd.f32 %v3294_v53, %v3251_v50  ;;  %v2853_v57 = vmul.f32 1.442695, %v2852_v52 }
 0xb75   : > { %v4684_v56 = vpop.f32.mrf.mxu1 }
 0xb76   : > { %v3300_v54 = vsel %vm2848_vm3, %v3295_v55, -inf  ;;  %5037 = vpow2.f32 %v2853_v57 }
 0xb77   : > { %3301 = vmax.xlane.f32.xlu0 %v3300_v54  ;;  %v3297_v58 = vpop.f32.mrf.mxu1 }
 0xb79   : > { %v4685_v59 = vpop.f32.mrf.mxu1 }
 0xb7b   : > { %v3401_v60 = vpop.f32.mrf.mxu1 }
 0xb7c   : > { %v6274_v61 = vadd.f32 %v3401_v60, %v3251_v50 }
 0xb7d   : > { %v4696_v62 = vpop.f32.mrf.mxu1 }
 0xb7e   : > { %v3407_v63 = vsel %vm2848_vm3, %v6274_v61, -inf }
 0xb7f   : > { %3408 = vmax.xlane.f32.xlu1 %v3407_v63  ;;  %v3404_v1 = vpop.f32.mrf.mxu1 }
 0xb81   : > { %v4697_v3 = vpop.f32.mrf.mxu1 }
 0xb83   : > { %v3515_v4 = vpop.f32.mrf.mxu1  ;;  %v5038_v12 = vpop.eup %5037 }
 0xb84   : > { %v3516_v5 = vadd.f32 %v3515_v4, %v3251_v50  ;;  %v2855_v10 = vsel %vm2848_vm3, %v5038_v12, 0.0 }
 0xb85   : > { %v4708_v6 = vpop.f32.mrf.mxu1 }
 0xb86   : > { %v3521_v7 = vsel %vm2848_vm3, %v3516_v5, -inf }
 0xb87   : > { %3522 = vmax.xlane.f32.xlu0 %v3521_v7  ;;  %v3518_v8 = vpop.f32.mrf.mxu1 }
 0xb89   : > { %v4709_v9 = vpop.f32.mrf.mxu1 }
 0xb8b   : > { %2856 = vadd.xlane.f32.xlu0 %v2855_v10  ;;  %v3628_v11 = vpop.f32.mrf.mxu1 }
 0xb8c   : > { %v3629_v13 = vadd.f32 %v3628_v11, %v3251_v50 }
 0xb8d   : > { %v4720_v14 = vpop.f32.mrf.mxu1 }
 0xb8e   : > { %v3634_v15 = vsel %vm2848_vm3, %v3629_v13, -inf }
 0xb8f   : > { %3635 = vmax.xlane.f32.xlu1 %v3634_v15  ;;  %v3631_v17 = vpop.f32.mrf.mxu1 }
 0xb91   : > { %v4721_v18 = vpop.f32.mrf.mxu1 }
 0xba0   : > { %2970 = vrot.lane.b32.xlu1 %v6261_v29, %s5587_s16 }
 0xba1   : > { %3083 = vrot.lane.b32.xlu0 %v6261_v29, %s6458_s1 }
 0xbe4   : > { %v2959_v19 = vpop.xlane.xlu1 %2958 }
 0xbe5   : > { %v2960_v20 = vsub.f32 %v6265_v31, %v2959_v19 }
 0xbe7   : > { %v2961_v21 = vmul.f32 1.442695, %v2960_v20 }
 0xbe9   : > { %5039 = vpow2.f32 %v2961_v21 }
 0xbf0   : > { %v3073_v22 = vpop.xlane.xlu0 %3072 }
 0xbf1   : > { %v3074_v23 = vsub.f32 %v3066_v38, %v3073_v22 }
 0xbf3   : > { %v3075_v24 = vmul.f32 1.442695, %v3074_v23 }
 0xbf5   : > { %5041 = vpow2.f32 %v3075_v24 }
 0xbf6   : > { %v5040_v25 = vpop.eup %5039 }
 0xbf7   : > { %v2963_v26 = vsel %vm2848_vm3, %v5040_v25, 0.0 }
 0xbf8   : > { %v3186_v28 = vpop.xlane.xlu0 %3185  ;;  %2964 = vadd.xlane.f32.xlu1 %v2963_v26 }
 0xbf9   : > { %v3187_v30 = vsub.f32 %v3179_v46, %v3186_v28 }
 0xbfb   : > { %v3188_v32 = vmul.f32 1.442695, %v3187_v30 }
 0xbfd   : > { %5043 = vpow2.f32 %v3188_v32 }
 0xc00   : > { %v3302_v33 = vpop.xlane.xlu0 %3301 }
 0xc01   : > { %v3303_v34 = vsub.f32 %v3295_v55, %v3302_v33 }
 0xc02   : > { %v5042_v35 = vpop.eup %5041 }
 0xc03   : > { %v3304_v36 = vmul.f32 1.442695, %v3303_v34  ;;  %v3077_v31 = vsel %vm2848_vm3, %v5042_v35, 0.0 }
 0xc04   : > { %3078 = vadd.xlane.f32.xlu0 %v3077_v31 }
 0xc05   : > { %5045 = vpow2.f32 %v3304_v36 }
 0xc08   : > { %v3409_v0 = vpop.xlane.xlu1 %3408 }
 0xc09   : > { %v3410_v51 = vsub.f32 %v6274_v61, %v3409_v0 }
 0xc0a   : > { %v6288_v39 = vpop.eup %5043 }
 0xc0b   : > { %v3190_v38 = vsel %vm2848_vm3, %v6288_v39, 0.0  ;;  %v3411_v52 = vmul.f32 1.442695, %v3410_v51 }
 0xc0c   : > { %3191 = vadd.xlane.f32.xlu1 %v3190_v38 }
 0xc10   : > { %v3523_v40 = vpop.xlane.xlu0 %3522 }
 0xc11   : > { %v3524_v50 = vsub.f32 %v3516_v5, %v3523_v40 }
 0xc12   : > { %v6292_v41 = vpop.eup %5045 }
 0xc13   : > { %v3306_v43 = vsel %vm2848_vm3, %v6292_v41, 0.0  ;;  %v3525_v2 = vmul.f32 1.442695, %v3524_v50 }
 0xc14   : > { %v2857_v44 = vpop.xlane.xlu0 %2856  ;;  %3307 = vadd.xlane.f32.xlu0 %v3306_v43 }
 0xc15   : > { %5047 = vrcp.f32 %v2857_v44 }
 0xc16   : > { %5049 = vpow2.f32 %v3525_v2 }
 0xc17   : > { %5051 = vpow2.f32 %v3411_v52 }
 0xc18   : > { %v3636_v46 = vpop.xlane.xlu1 %3635  ;;  %v3084_v61 = vpop.permute.xlu0 %3083 }
 0xc19   : > { %v3637_v53 = vsub.f32 %v3629_v13, %v3636_v46 }
 0xc1b   : > { %v3638_v55 = vmul.f32 1.442695, %v3637_v53 }
 0xc1c   : > { %v2971_v49 = vpop.permute.xlu1 %2970 }
 0xc1d   : > { %3420 = vrot.lane.b32.xlu1 %v6259_v27, %s5587_s16  ;;  %5053 = vpow2.f32 %v3638_v55  ;;  %s6460_s16 = smov 8  }
 0xc22   : > { %v5048_v45 = vpop.eup %5047 }
 0xc23   : > { %v2859_v47 = vmul.f32 %v5048_v45, %v5038_v12  ;;  %v6305_v56 = vpop.eup %5049 }
 0xc24   : > { %v3527_v57 = vsel %vm2848_vm3, %v6305_v56, 0.0  ;;  %v5052_v54 = vpop.eup %5051 }
 0xc25   : > { %v2860_v48 = vpack.c.bf16 %v2859_v47, %v2859_v47 }
 0xc27   : > { %4641 = vmatmul.mubr.msk.bf16.vlgmr.msra.gmra.mxu0 %vm2848_vm3, %v2860_v48 }
 0xc28   : > { %4651 = vmatpush3.bf16.msra.mxu0 %v2971_v49  ;;  %4652 = vmatprep.mubr.msk.bf16.mxu0 %vm5586_vm1, %v5585_v16 }
 0xc29   : > { %4662 = vmatprep.subr.bf16.mxu0 %v5585_v16 }
 0xc2a   : > { %3196 = vrot.lane.b32.xlu0 %v6261_v29, %s6459_s26  ;;  %v3413_v29 = vsel %vm2848_vm3, %v5052_v54, 0.0  ;;  %v6310_v58 = vpop.eup %5053 }
 0xc2b   : > { %v3640_v59 = vsel %vm2848_vm3, %v6310_v58, 0.0 }
 0xc41   : > { %3528 = vadd.xlane.f32.xlu1 %v3527_v57  ;;  %v4980_v57 = vld [vmem:[#allocation17 + $0x8] sm:$0xff]  }
 0xc42   : > { %4729 = vmatpush3.bf16.msra.mxu1 %v4980_v57 }
 0xc43   : > { %4730 = vmatprep.subr.bf16.mxu1 %v5585_v16 }
 0xc49   : > { %3414 = vadd.xlane.f32.xlu0 %v3413_v29  ;;  %v4981_v29 = vld [vmem:[#allocation17] sm:$0xff]  }
 0xc4a   : > { %4731 = vmatpush3.bf16.msra.mxu1 %v4981_v29 }
 0xc4b   : > { %4744 = vmatprep.subr.bf16.mxu1 %v5585_v16 }
 0xc4d   : > { %3641 = vadd.xlane.f32.xlu0 %v3640_v59 }
 0xc52   : > { %3646 = vrot.lane.b32.xlu1 %v6259_v27, %s6459_s26 }
 0xc63   : > { %3533 = vrot.lane.b32.xlu0 %v6259_v27, %s6458_s1  ;;  %s1237_s1 = scalar_lea.vmem %s5751_s5, %s5938_s10 }
 0xc81   : > { %v2965_v60 = vpop.xlane.xlu1 %2964 }
 0xc82   : > { %5055 = vrcp.f32 %v2965_v60 }
 0xc8d   : > { %v3079_v62 = vpop.xlane.xlu0 %3078 }
 0xc8e   : > { %5057 = vrcp.f32 %v3079_v62 }
 0xc8f   : > { %v5056_v63 = vpop.eup %5055 }
 0xc90   : > { %v2967_v1 = vmul.f32 %v5056_v63, %v5040_v25 }
 0xc92   : > { %v2968_v3 = vpack.c.bf16 %v2967_v1, %v2967_v1 }
 0xc94   : > { %4653 = vmatmul.mubr.msk.bf16.vlgmr.msra.gmra.mxu0 %vm2848_vm3, %v2968_v3 }
 0xc95   : > { %4663 = vmatpush3.bf16.msra.mxu0 %v3084_v61  ;;  %v3192_v4 = vpop.xlane.xlu1 %3191  ;;  %4664 = vmatprep.mubr.msk.bf16.mxu0 %vm5586_vm1, %v5585_v16 }
 0xc96   : > { %5059 = vrcp.f32 %v3192_v4  ;;  %4674 = vmatprep.subr.bf16.mxu0 %v5585_v16 }
 0xc99   : > { %v3421_v17 = vpop.permute.xlu1 %3420 }
 0xc9b   : > { %v5058_v5 = vpop.eup %5057 }
 0xc9c   : > { %v3081_v6 = vmul.f32 %v5058_v5, %v5042_v35 }
 0xc9d   : > { %v3308_v7 = vpop.xlane.xlu0 %3307 }
 0xc9e   : > { %5061 = vrcp.f32 %v3308_v7  ;;  %v3082_v12 = vpack.c.bf16 %v3081_v6, %v3081_v6 }
 0xca0   : > { %4665 = vmatmul.mubr.msk.bf16.vlgmr.msra.gmra.mxu0 %vm2848_vm3, %v3082_v12 }
 0xca1   : > { %v3197_v8 = vpop.permute.xlu0 %3196  ;;  %4676 = vmatprep.mubr.msk.bf16.mxu0 %vm5586_vm1, %v5585_v16 }
 0xca2   : > { %4675 = vmatpush3.bf16.msra.mxu0 %v3197_v8 }
 0xca3   : > { %v5060_v9 = vpop.eup %5059  ;;  %4686 = vmatprep.subr.bf16.mxu0 %v5585_v16 }
 0xca4   : > { %v3194_v10 = vmul.f32 %v5060_v9, %v6288_v39 }
 0xca6   : > { %v3195_v11 = vpack.c.bf16 %v3194_v10, %v3194_v10 }
 0xca8   : > { %4677 = vmatmul.mubr.msk.bf16.vlgmr.msra.gmra.mxu0 %vm2848_vm3, %v3195_v11 }
 0xca9   : > { %4687 = vmatpush3.bf16.msra.mxu0 %v6259_v27  ;;  %4688 = vmatprep.mubr.msk.bf16.mxu0 %vm5586_vm1, %v5585_v16 }
 0xcaa   : > { %4698 = vmatprep.subr.bf16.mxu0 %v5585_v16 }
 0xcab   : > { %v5062_v13 = vpop.eup %5061 }
 0xcac   : > { %v3310_v14 = vmul.f32 %v5062_v13, %v6292_v41  ;;  %v4363_v13 = vld [vmem:[#allocation19] ss:$0 sm:$0xff] }
 0xcae   : > { %v3311_v15 = vpack.c.bf16 %v3310_v14, %v3310_v14 }
 0xcb0   : > { %4689 = vmatmul.mubr.msk.bf16.vlgmr.msra.gmra.mxu0 %vm2848_vm3, %v3311_v15 }
 0xcb1   : > { %4699 = vmatpush3.bf16.msra.mxu0 %v3421_v17  ;;  %4700 = vmatprep.mubr.msk.bf16.mxu0 %vm5586_vm1, %v5585_v16 }
 0xcb2   : > { %4710 = vmatprep.subr.bf16.mxu0 %v5585_v16 }
 0xcca   : > { %v3529_v27 = vpop.xlane.xlu1 %3528 }
 0xcce   : > { %v3647_v34 = vpop.permute.xlu1 %3646 }
 0xcd2   : > { %v3415_v18 = vpop.xlane.xlu0 %3414 }
 0xcd3   : > { %5063 = vrcp.f32 %v3415_v18 }
 0xcd4   : > { %5065 = vrcp.f32 %v3529_v27 }
 0xcd6   : > { %v3642_v19 = vpop.xlane.xlu0 %3641 }
 0xcd7   : > { %5067 = vrcp.f32 %v3642_v19 }
 0xcda   : > { %v3534_v24 = vpop.permute.xlu0 %3533 }
 0xce0   : > { %v5064_v20 = vpop.eup %5063 }
 0xce1   : > { %v3417_v21 = vmul.f32 %v5064_v20, %v5052_v54  ;;  %v5066_v23 = vpop.eup %5065 }
 0xce2   : > { %v3531_v25 = vmul.f32 %v5066_v23, %v6305_v56 }
 0xce3   : > { %v3418_v22 = vpack.c.bf16 %v3417_v21, %v3417_v21 }
 0xce4   : > { %v3532_v30 = vpack.c.bf16 %v3531_v25, %v3531_v25  ;;  %v5068_v32 = vpop.eup %5067 }
 0xce5   : > { %4701 = vmatmul.mubr.msk.bf16.vlgmr.msra.gmra.mxu0 %vm2848_vm3, %v3418_v22  ;;  %v3644_v36 = vmul.f32 %v5068_v32, %v6310_v58 }
 0xce6   : > { %4711 = vmatpush3.bf16.msra.mxu0 %v3534_v24  ;;  %4712 = vmatprep.mubr.msk.bf16.mxu0 %vm5586_vm1, %v5585_v16 }
 0xce7   : > { %4722 = vmatprep.subr.bf16.mxu0 %v5585_v16  ;;  %v2898_v26 = vpop.f32.mrf.mxu0  ;;  %v3645_v31 = vpack.c.bf16 %v3644_v36, %v3644_v36  ;;  %v4983_v36 = vld [vmem:[#allocation23] sm:$0xff]  }
 0xce8   : > { %2904 = vst.msk [vmem:[#allocation2] sm:$0xff] %vm1518_vm6, %v2898_v26 }
 0xce9   : > { %v4642_v28 = vpop.f32.mrf.mxu0 }
 0xceb   : > { %v2901_v33 = vpop.f32.mrf.mxu0 }
 0xced   : > { %4713 = vmatmul.mubr.msk.bf16.vlgmr.msra.gmra.mxu0 %vm2848_vm3, %v3532_v30  ;;  %v4643_v35 = vpop.f32.mrf.mxu0 }
 0xcee   : > { %4723 = vmatpush3.bf16.msra.mxu0 %v3647_v34  ;;  %4724 = vmatprep.mubr.msk.bf16.mxu0 %vm5586_vm1, %v5585_v16  ;;  %v4982_v35 = vld [vmem:[#allocation23 + $0x8] sm:$0xff]  }
 0xcef   : > { %4736 = vmatprep.subr.bf16.mxu0 %v5585_v16 }
 0xcf5   : > { %4725 = vmatmul.mubr.msk.bf16.vlgmr.msra.gmra.mxu0 %vm2848_vm3, %v3645_v31  ;;  %v4984_v31 = vld [vmem:[%s5741_s29 + $0x18] sm:$0xff]  }
 0xcf6   : > { %4740 = vmatprep.mubr.msk.bf16.mxu0 %vm5586_vm1, %v5585_v16  ;;  %4737 = vmatpush3.bf16.msra.mxu0 %v4982_v35 }
 0xcf7   : > { %4738 = vmatprep.subr.bf16.mxu0 %v5585_v16 }
 0xcfa   : > { %4739 = vmatpush3.bf16.msra.mxu0 %v4983_v36 }
 0xd54   : > { %v3010_v39 = vpop.f32.mrf.mxu0 }
 0xd55   : > { %3017 = vrot.lane.b32.xlu1 %v3010_v39, %s6460_s16 }
 0xd56   : > { %v4654_v38 = vpop.f32.mrf.mxu0 }
 0xd58   : > { %v3013_v40 = vpop.f32.mrf.mxu0 }
 0xd5a   : > { %v4655_v41 = vpop.f32.mrf.mxu0 }
 0xd60   : > { %v3123_v43 = vpop.f32.mrf.mxu0 }
 0xd61   : > { %3130 = vrot.lane.b32.xlu1 %v3123_v43, %s6461_s18 }
 0xd62   : > { %v4666_v44 = vpop.f32.mrf.mxu0 }
 0xd64   : > { %v3126_v0 = vpop.f32.mrf.mxu0 }
 0xd66   : > { %v4667_v46 = vpop.f32.mrf.mxu0 }
 0xd68   : > { %v3236_v45 = vpop.f32.mrf.mxu0 }
 0xd69   : > { %3243 = vrot.lane.b32.xlu0 %v3236_v45, %s6462_s11 }
 0xd6a   : > { %v4678_v47 = vpop.f32.mrf.mxu0 }
 0xd6c   : > { %v3239_v48 = vpop.f32.mrf.mxu0 }
 0xd6e   : > { %v4679_v49 = vpop.f32.mrf.mxu0 }
 0xd70   : > { %v3349_v50 = vpop.f32.mrf.mxu0 }
 0xd71   : > { %3355 = vst.msk [vmem:[#allocation2 + $0x8] sm:$0xff] %vm1518_vm6, %v3349_v50 }
 0xd72   : > { %v4690_v2 = vpop.f32.mrf.mxu0 }
 0xd74   : > { %v3352_v51 = vpop.f32.mrf.mxu0 }
 0xd76   : > { %v4691_v52 = vpop.f32.mrf.mxu0 }
 0xda5   : > { %v3460_v53 = vpop.f32.mrf.mxu0 }
 0xda6   : > { %3467 = vrot.lane.b32.xlu1 %v3460_v53, %s6460_s16  ;;  %v4367_v53 = vld [vmem:[#allocation20] ss:$0 sm:$0xff] }
 0xda7   : > { %v4702_v55 = vpop.f32.mrf.mxu0 }
 0xda9   : > { %v3463_v56 = vpop.f32.mrf.mxu0 }
 0xdab   : > { %v4703_v54 = vpop.f32.mrf.mxu0 }
 0xdad   : > { %v3573_v58 = vpop.f32.mrf.mxu0 }
 0xdae   : > { %3580 = vrot.lane.b32.xlu1 %v3573_v58, %s6461_s18  ;;  %v4368_v58 = vld [vmem:[#allocation22] ss:$0 sm:$0xff] }
 0xdaf   : > { %v4714_v59 = vpop.f32.mrf.mxu0 }
 0xdb1   : > { %v3576_v60 = vpop.f32.mrf.mxu0 }
 0xdb3   : > { %v4715_v61 = vpop.f32.mrf.mxu0 }
 0xdb5   : > { %v3686_v62 = vpop.f32.mrf.mxu0 }
 0xdb6   : > { %3693 = vrot.lane.b32.xlu1 %v3686_v62, %s6462_s11 }
 0xdb7   : > { %v4726_v63 = vpop.f32.mrf.mxu0 }
 0xdb8   : > { %v4985_v63 = vld [vmem:[%s5741_s29 + $0x10] sm:$0xff]  }
 0xdb9   : > { %v3689_v1 = vpop.f32.mrf.mxu0 }
 0xdba   : > { %v4986_v1 = vld [vmem:[%s5741_s29 + $0x8] sm:$0xff]  }
 0xdbb   : > { %v4727_v3 = vpop.f32.mrf.mxu0 }
 0xdbc   : > { %v4987_v3 = vld [vmem:[%s5741_s29] sm:$0xff]  }
 0xdc7   : > { %v3018_v4 = vpop.permute.xlu1 %3017 }
 0xdc8   : > { %3020 = vst.msk [vmem:[#allocation2] sm:$0xff] %vm1742_vm9, %v3018_v4  ;;  %v4369_v4 = vld [vmem:[#allocation25] ss:$0 sm:$0xff] }
 0xdd3   : > { %v3131_v5 = vpop.permute.xlu1 %3130 }
 0xdd4   : > { %3133 = vst.msk [vmem:[#allocation2] sm:$0xff] %vm1858_vm10, %v3131_v5 }
 0xddb   : > { %v3244_v6 = vpop.permute.xlu0 %3243 }
 0xddc   : > { %3246 = vst.msk [vmem:[#allocation2] sm:$0xff] %vm1974_vm11, %v3244_v6 }
 0xde3   : > { %v3697_v9 = vld [vmem:[#allocation2] sm:$0xff] }
 0xe18   : > { %v3468_v7 = vpop.permute.xlu1 %3467 }
 0xe19   : > { %3470 = vst.msk [vmem:[#allocation2 + $0x8] sm:$0xff] %vm1742_vm9, %v3468_v7 }
 0xe20   : > { %v3581_v12 = vpop.permute.xlu1 %3580 }
 0xe21   : > { %3583 = vst.msk [vmem:[#allocation2 + $0x8] sm:$0xff] %vm1858_vm10, %v3581_v12 }
 0xe28   : > { %v3694_v8 = vpop.permute.xlu1 %3693 }
 0xe29   : > { %3696 = vst.msk [vmem:[#allocation2 + $0x8] sm:$0xff] %vm1974_vm11, %v3694_v8 }
 0xe30   : > { %v3698_v10 = vld [vmem:[#allocation2 + $0x8] sm:$0xff] }
 0xe31   : > { %v3699_v11 = vpack.c.bf16 %v3698_v10, %v3697_v9 }
 0xe33   : > { %4733 = vmatmul.mubr.msk.bf16.vlgmr.msra.gmra.mxu1 %vm1257_vm0, %v3699_v11 }
 0xe34   : > { %4752 = vmatprep.mubr.msk.bf16.mxu1 %vm5586_vm1, %v5585_v16  ;;  %4745 = vmatpush3.bf16.msra.mxu1 %v4984_v31 }
 0xe35   : > { %4746 = vmatprep.subr.bf16.mxu1 %v5585_v16 }
 0xe38   : > { %4747 = vmatpush3.bf16.msra.mxu1 %v4985_v63 }
 0xe39   : > { %4748 = vmatprep.subr.bf16.mxu1 %v5585_v16 }
 0xe3c   : > { %4749 = vmatpush3.bf16.msra.mxu1 %v4986_v1 }
 0xe3d   : > { %4750 = vmatprep.subr.bf16.mxu1 %v5585_v16 }
 0xe40   : > { %4751 = vmatpush3.bf16.msra.mxu1 %v4987_v3 }
 0xef3   : > { %v3760_v14 = vpop.f32.mrf.mxu1 }
 0xef4   : > { %v3761_v15 = vadd.f32 %v4363_v13, %v3760_v14  ;;  %v4373_v14 = vld [vmem:[#allocation26] ss:$0 sm:$0xff] }
 0xef5   : > { %v4734_v17 = vpop.f32.mrf.mxu1 }
 0xef6   : > { %v6370_v18 = vadd.f32 %v3761_v15, %v6161_v37 }
 0xef7   : > { %v3763_v27 = vpop.f32.mrf.mxu1 }
 0xef8   : > { %v3764_v19 = vadd.f32 %v4363_v13, %v3763_v27  ;;  %v3771_v20 = vsel %vm1257_vm0, %v6370_v18, 0.0 }
 0xef9   : > { %3772 = vadd.xlane.f32.xlu0 %v3771_v20  ;;  %v4735_v21 = vpop.f32.mrf.mxu1 }
 0xefa   : > { %v6375_v22 = vadd.f32 %v3764_v19, %v6166_v42 }
 0xefc   : > { %v3774_v23 = vsel %vm1257_vm0, %v6375_v22, 0.0 }
 0xefd   : > { %3775 = vadd.xlane.f32.xlu1 %v3774_v23 }
 0xf82   : > { %v3773_v24 = vpop.xlane.xlu0 %3772 }
 0xf83   : > { %v3777_v25 = vmul.f32 0.03125, %v3773_v24 }
 0xf85   : > { %v3779_v37 = vsub.f32 %v6370_v18, %v3777_v25 }
 0xf86   : > { %v3776_v26 = vpop.xlane.xlu1 %3775 }
 0xf87   : > { %v3778_v28 = vmul.f32 0.03125, %v3776_v26  ;;  %v3781_v30 = vmul.f32 %v3779_v37, %v3779_v37 }
 0xf89   : > { %v3780_v32 = vsub.f32 %v6375_v22, %v3778_v28  ;;  %v3783_v33 = vsel %vm1257_vm0, %v3781_v30, 0.0 }
 0xf8a   : > { %3784 = vadd.xlane.f32.xlu0 %v3783_v33 }
 0xf8b   : > { %v3782_v34 = vmul.f32 %v3780_v32, %v3780_v32 }
 0xf8d   : > { %v3786_v42 = vsel %vm1257_vm0, %v3782_v34, 0.0 }
 0xf8e   : > { %3787 = vadd.xlane.f32.xlu0 %v3786_v42 }
0x1013   : > { %v3785_v39 = vpop.xlane.xlu0 %3784 }
0x1014   : > { %v3789_v38 = vmul.f32 0.032258064, %v3785_v39 }
0x1016   : > { %5069 = vrsqrt.f32 %v3789_v38  ;;  %vm3793_vm1 = vcmp.eq.f32.partialorder %v3789_v38, inf  ;;  %v3796_v0 = vand.u32 2147483648, %v3789_v38  ;;  %vm3795_vm5 = vcmp.eq.f32.partialorder %v3789_v38, 0.0 }
0x1017   : > { %v3788_v40 = vpop.xlane.xlu0 %3787 }
0x1018   : > { %v3790_v41 = vmul.f32 0.032258064, %v3788_v40 }
0x101a   : > { %5071 = vrsqrt.f32 %v3790_v41  ;;  %vm3800_vm6 = vcmp.eq.f32.partialorder %v3790_v41, inf  ;;  %v3803_v50 = vand.u32 2147483648, %v3790_v41  ;;  %vm3802_vm7 = vcmp.eq.f32.partialorder %v3790_v41, 0.0 }
0x1023   : > { %v5070_v43 = vpop.eup %5069 }
0x1024   : > { %v3792_v44 = vmul.f32 %v5070_v43, %v3789_v38 }
0x1026   : > { %v3794_v46 = vsel %vm3793_vm1, %v3789_v38, %v3792_v44 }
0x1027   : > { %v5072_v45 = vpop.eup %5071  ;;  %v3797_v47 = vsel %vm3795_vm5, %v3796_v0, %v3794_v46 }
0x1028   : > { %v3805_v48 = vadd.f32 1e-06, %v3797_v47  ;;  %v3799_v49 = vmul.f32 %v5072_v45, %v3790_v41 }
0x102a   : > { %5073 = vrcp.f32 %v3805_v48  ;;  %v3801_v2 = vsel %vm3800_vm6, %v3790_v41, %v3799_v49 }
0x102b   : > { %v3804_v51 = vsel %vm3802_vm7, %v3803_v50, %v3801_v2 }
0x102c   : > { %v3806_v52 = vadd.f32 1e-06, %v3804_v51 }
0x102e   : > { %5075 = vrcp.f32 %v3806_v52 }
0x1037   : > { %v5074_v55 = vpop.eup %5073 }
0x1038   : > { %v3817_v56 = vmul.f32 %v5074_v55, %v4367_v53 }
0x103a   : > { %v3819_v29 = vmul.f32 %v3817_v56, %v3779_v37 }
0x103b   : > { %v5076_v57 = vpop.eup %5075 }
0x103c   : > { %v3818_v54 = vmul.f32 %v5076_v57, %v4367_v53  ;;  %v3827_v60 = vadd.f32 %v4368_v58, %v3819_v29 }
0x103e   : > { %v3820_v59 = vmul.f32 %v3818_v54, %v3780_v32 }
0x1040   : > { %v3828_v61 = vadd.f32 %v4368_v58, %v3820_v59 }
0x1042   : > { %v3829_v62 = vpack.c.bf16 %v3828_v61, %v3827_v60 }
0x1044   : > { %4741 = vmatmul.mubr.msk.bf16.vlgmr.msra.gmra.mxu0 %vm1257_vm0, %v3829_v62 }
0x1104   : > { %v3890_v5 = vpop.f32.mrf.mxu0 }
0x1105   : > { %v3891_v7 = vadd.f32 %v4369_v4, %v3890_v5 }
0x1106   : > { %v4742_v6 = vpop.f32.mrf.mxu0 }
0x1107   : > { %v3897_v10 = vmax.f32 %v3891_v7, 0.0 }
0x1108   : > { %v3893_v12 = vpop.f32.mrf.mxu0 }
0x1109   : > { %v3894_v8 = vadd.f32 %v4369_v4, %v3893_v12 }
0x110a   : > { %v4743_v9 = vpop.f32.mrf.mxu0 }
0x110b   : > { %v3898_v11 = vmax.f32 %v3894_v8, 0.0 }
0x110d   : > { %v3899_v13 = vpack.c.bf16 %v3898_v11, %v3897_v10 }
0x110f   : > { %4753 = vmatmul.mubr.msk.bf16.vlgmr.msra.gmra.mxu1 %vm3939_vm8, %v3899_v13 }
0x11cf   : > { %v3977_v15 = vpop.f32.mrf.mxu1 }
0x11d0   : > { %v3978_v17 = vadd.f32 %v4373_v14, %v3977_v15 }
0x11d1   : > { %v4754_v16 = vpop.f32.mrf.mxu1 }
0x11d2   : > { %v3984_v27 = vadd.f32 %v3978_v17, %v6370_v18 }
0x11d3   : > { %v3980_v19 = vpop.f32.mrf.mxu1 }
0x11d4   : > { %3986 = vst.msk [vmem:[%s1237_s1] sm:$0xff] %vm1257_vm0, %v3984_v27  ;;  %v3981_v20 = vadd.f32 %v4373_v14, %v3980_v19 }
0x11d5   : > { %v4755_v21 = vpop.f32.mrf.mxu1 }
0x11d6   : > { %v3985_v23 = vadd.f32 %v3981_v20, %v6375_v22 }
0x11d8   : > { %3987 = vst.msk [vmem:[%s1237_s1 + $0x8] sm:$0xff] %vm1257_vm0, %v3985_v23 }
0x11d9 PF: > { %s84_s15 = sadd.s32 1, %s5535_s15  }
0x11da   : > { %p81_p6 = scmp.ge.s32.totalorder %s84_s15, 4  }
0x11dc   :  { %83 = sbr.rel (!%p81_p6) target bundleno = 55 (0x37), region = 281 }
0x11e1   :  { %4010 = vsyncpa [#allocation4], 1 }
0x11e2   :  { %4012 = vsyncpa [#allocation4 + $0x1], 1 }
0x11e3   :  { %4013 = vsyncpa [#allocation6], 1 }
0x11e4   :  { %4014 = vsyncpa [#allocation9], 1 }
0x11e5   :  { %4015 = vsyncpa [#allocation12], 1 }
0x11e6   :  { %4016 = vsyncpa [#allocation15], 1 }
0x11e7   :  { %4017 = vsyncpa [#allocation18], 1 }
0x11e8   :  { %4018 = vsyncpa [#allocation21], 1 }
0x11e9   :  { %4019 = vsyncpa [#allocation24], 1 }
0x11ea   :  { %4020 = vsyncpa [#allocation27], 1 }

// kernel: decoder_forward.3
= control target key start
LH: loop header
LB: loop body
LE: loop exit
PB: predicated region body
PF: predicated region fallthrough
CT: control target
= control target key end

     0   :  { %s4778_s6 = smov 1   ;;  %s4779_s10 = smov 2   ;;  %s5580_s0 = inlined_call_operand.smem [shape: u32[33], index: -1, kind: input, shape index: {}] }
   0x1   :  { %s4829_s5 = sld [smem:[%s5580_s0]]   ;;  %s4780_s14 = smov 3  }
   0x2   :  { %s4834_s9 = sld [smem:[%s5580_s0 + %s4778_s6]]   ;;  %s4781_s18 = smov 4  }
   0x3   :  { %s4839_s13 = sld [smem:[%s5580_s0 + %s4779_s10]]   ;;  %s4782_s22 = smov 5  }
   0x4   :  { %s4844_s17 = sld [smem:[%s5580_s0 + %s4780_s14]]   ;;  %s4783_s26 = smov 6  }
   0x5   :  { %s4849_s21 = sld [smem:[%s5580_s0 + %s4781_s18]]   ;;  %s4784_s30 = smov 7  }
   0x6   :  { %s4854_s25 = sld [smem:[%s5580_s0 + %s4782_s22]]   ;;  %s4785_s4 = smov 8  }
   0x7   :  { %5602 = sst [smem:[#allocation9_spill]] %s4829_s5  ;;  %s4786_s10 = smov 9  }
   0x8   :  { %5603 = sst [smem:[#allocation10_spill]] %s4834_s9  ;;  %s4787_s15 = smov 10  }
   0x9   :  { %s4859_s29 = sld [smem:[%s5580_s0 + %s4783_s26]]   ;;  %s4788_s20 = smov 11  }
   0xa   :  { %5604 = sst [smem:[#allocation11_spill]] %s4844_s17  ;;  %s4789_s26 = smov 12  }
   0xb   :  { %s4864_s3 = sld [smem:[%s5580_s0 + %s4784_s30]]   ;;  %s4790_s1 = smov 13  }
   0xc   :  { %s4869_s8 = sld [smem:[%s5580_s0 + %s4785_s4]]   ;;  %s4791_s7 = smov 14  }
   0xd   :  { %s4874_s14 = sld [smem:[%s5580_s0 + %s4786_s10]]   ;;  %s4793_s22 = smov 16  }
   0xe   :  { %s4879_s19 = sld [smem:[%s5580_s0 + %s4787_s15]]   ;;  %s4792_s15 = smov 15  }
   0xf   :  { %s4884_s24 = sld [smem:[%s5580_s0 + %s4788_s20]]   ;;  %s4794_s28 = smov 17  }
  0x10   :  { %s4889_s30 = sld [smem:[%s5580_s0 + %s4789_s26]]  }
  0x11   :  { %5605 = sst [smem:[#allocation12_spill]] %s4864_s3 }
  0x12   :  { %5606 = sst [smem:[#allocation13_spill]] %s4869_s8 }
  0x13   :  { %s4894_s6 = sld [smem:[%s5580_s0 + %s4790_s1]]  }
  0x14   :  { %s4899_s12 = sld [smem:[%s5580_s0 + %s4791_s7]]   ;;  %s4795_s7 = smov 18  }
  0x15   :  { %s4904_s20 = sld [smem:[%s5580_s0 + %s4792_s15]]   ;;  %s4796_s15 = smov 19  }
  0x16   :  { %s4909_s27 = sld [smem:[%s5580_s0 + %s4793_s22]]   ;;  %s4797_s22 = smov 20  }
  0x17   :  { %s4914_s4 = sld [smem:[%s5580_s0 + %s4794_s28]]   ;;  %s4798_s28 = smov 21  }
  0x18   :  { %s4919_s17 = sld [smem:[%s5580_s0 + %s4795_s7]]   ;;  %s4799_s7 = smov 22  }
  0x19   :  { %5607 = sst [smem:[#allocation14_spill]] %s4894_s6 }
  0x1a   :  { %5608 = sst [smem:[#allocation15_spill]] %s4899_s12 }
  0x1b   :  { %5609 = sst [smem:[#allocation16_spill]] %s4904_s20 }
  0x1c   :  { %5610 = sst [smem:[#allocation17_spill]] %s4909_s27 }
  0x1d   :  { %5611 = sst [smem:[#allocation18_spill]] %s4914_s4 }
  0x1e   :  { %s4924_s20 = sld [smem:[%s5580_s0 + %s4796_s15]]   ;;  %s4800_s15 = smov 23  }
  0x1f   :  { %s4929_s12 = sld [smem:[%s5580_s0 + %s4797_s22]]   ;;  %s4801_s22 = smov 24  }
  0x20   :  { %s4934_s4 = sld [smem:[%s5580_s0 + %s4798_s28]]   ;;  %s4802_s28 = smov 25  }
  0x21   :  { %s4939_s27 = sld [smem:[%s5580_s0 + %s4799_s7]]   ;;  %s4803_s7 = smov 26  }
  0x24   :  { %5612 = sst [smem:[#allocation19_spill]] %s4924_s20 }
  0x25   :  { %5613 = sst [smem:[#allocation20_spill]] %s4929_s12 }
  0x26   :  { %5614 = sst [smem:[#allocation21_spill]] %s4934_s4 }
  0x27   :  { %5615 = sst [smem:[#allocation22_spill]] %s4939_s27 }
  0x28   :  { %s4944_s20 = sld [smem:[%s5580_s0 + %s4800_s15]]   ;;  %s4804_s15 = smov 27  }
  0x29   :  { %s4949_s12 = sld [smem:[%s5580_s0 + %s4801_s22]]   ;;  %s4805_s22 = smov 28  }
  0x2a   :  { %s4954_s4 = sld [smem:[%s5580_s0 + %s4802_s28]]   ;;  %s4806_s28 = smov 29  }
  0x2b   :  { %s4959_s27 = sld [smem:[%s5580_s0 + %s4803_s7]]   ;;  %s4807_s7 = smov 30  }
  0x2e   :  { %5616 = sst [smem:[#allocation23_spill]] %s4944_s20 }
  0x2f   :  { %5617 = sst [smem:[#allocation24_spill]] %s4949_s12 }
  0x30   :  { %5618 = sst [smem:[#allocation25_spill]] %s4954_s4 }
  0x31   :  { %5619 = sst [smem:[#allocation26_spill]] %s4959_s27 }
  0x32   :  { %s4964_s20 = sld [smem:[%s5580_s0 + %s4804_s15]]   ;;  %s4808_s15 = smov 31  }
  0x33   :  { %s4969_s12 = sld [smem:[%s5580_s0 + %s4805_s22]]   ;;  %s4809_s22 = smov 32  }
  0x34   :  { %s4974_s4 = sld [smem:[%s5580_s0 + %s4806_s28]]  }
  0x35   :  { %s4979_s27 = sld [smem:[%s5580_s0 + %s4807_s7]]  }
  0x38   :  { %5620 = sst [smem:[#allocation27_spill]] %s4964_s20 }
  0x39   :  { %5621 = sst [smem:[#allocation28_spill]] %s4969_s12 }
  0x3a   :  { %5622 = sst [smem:[#allocation29_spill]] %s4974_s4 }
  0x3b   :  { %s4984_s20 = sld [smem:[%s5580_s0 + %s4808_s15]]  }
  0x3c   :  { %s4989_s12 = sld [smem:[%s5580_s0 + %s4809_s22]]  }
  0x3d   :  { %70 = vsyncpa [#allocation4], 0 }
  0x3e   :  { %71 = vsyncpa [#allocation5], 0 }
  0x3f   :  { %73 = vsyncpa [#allocation5 + $0x1], 0  ;;  %s4991_s28 = smov 0   ;;  %s4993_s1 = smov 0  }
  0x40   :  { %s4995_s2 = smov 0   ;;  %s4997_s7 = smov 0  }
  0x41 LB: > { %s5623_s8 = sld [smem:[#allocation13_spill]]  ;;  %s5012_s0 = sadd.s32 4294967295, %s4776_s7   ;;  %s4764_s28 = sphi %s4991_s28, %s5655_s28   ;;  %s4776_s7 = sphi %s4997_s7, %s5658_s7   ;;  %s4772_s2 = sphi %s4995_s2, %s5657_s2   ;;  %s4768_s1 = sphi %s4993_s1, %s5656_s1  }
  0x42   : > { %s3995_s10 = sadd.s32 4294967294, %s4776_s7   ;;  %s5016_s11 = sadd.s32 1, %s4776_s7  }
  0x43   : > { %s773_s15 = sadd.s32 1, %s4772_s2  ;;  %s770_s16 = ssub.s32 %s4776_s7, %s5016_s11 }
  0x44   : > { %p783_p0 = scmp.ne.s32.totalorder %s4772_s2, %s4768_s1  ;;  %p771_p1 = scmp.eq.s32.totalorder %s770_s16, 0 }
  0x45   : > { %p784_p2 = scmp.eq.s32.totalorder %s5012_s0, 1  ;;  %p789_p3 = scmp.ne.s32.totalorder %s4768_s1, %s4764_s28 }
  0x46   : > { %p790_p4 = scmp.eq.s32.totalorder %s3995_s10, 1  ;;  %p3996_p7 = scmp.ge.s32.totalorder %s4776_s7, 1 }
  0x47   : > { %s5027_s18 = scalar_select %p771_p1, %s4772_s2, %s773_s15  }
  0x48   : > { %p5029_p5 = por %p784_p2, %p783_p0  ;;  %p5033_p6 = por %p790_p4, %p789_p3 }
  0x49   : > { %5624 = sst [smem:[#allocation30_spill]] %s5027_s18  ;;  %p797_p8 = scmp.lt.s32.totalorder %s4776_s7, 3 }
  0x4a   : > { %p4489_p9 = scmp.eq.s32.totalorder %s5012_s0, 0  ;;  %s4810_s16 = smov [#allocation3]  }
  0x4b   : > { %p5040_p10 = pnand %p3996_p7, %p797_p8  ;;  %s888_s10 = sshll.u32 %s4810_s16, 4  ;;  %s889_s10 = int_to_ptr.vmem [resolvable:$true] %s888_s10 }
  0x4c   : > { %s4697_s15 = scalar_lea.vmem %s889_s10, 16  ;;  %s4704_s18 = scalar_lea.vmem %s889_s10, 32 }
  0x4d   : > { %p4481_p11 = pneg %p5040_p10  ;;  %p4698_p0 = scmp.ne.s32.totalorder %s889_s10, %s4697_s15 }
  0x4e   : > { %p4705_p3 = scmp.lt.s32.totalorder %s889_s10, %s889_s10  ;;  %p4706_p4 = scmp.lt.s32.totalorder %s4704_s18, %s4697_s15 }
  0x4f   : > { %p4482_p12 = pnand %p4489_p9, %p4481_p11 }
  0x50   : > { %p4707_p7 = por %p4706_p4, %p4705_p3 }
  0x51   : > { %p4688_p13 = pneg %p4482_p12 }
  0x53   : > { %p4700_p1 = pnand %p4698_p0, %p4688_p13 }
  0x55   : > { %p4701_p2 = pneg %p4700_p1 }
  0x57   : > { %p4708_p8 = pnand %p4707_p7, %p4701_p2 }
  0x59   : > { %4711 = shalt.err (!%p4708_p8)
}
  0x5a   : > { %s5628_s4 = sld [smem:[#allocation29_spill]] }
  0x5c   : > { %934 = sbr.rel (%p5040_p10) target bundleno = 4726 (0x1276), region = 148 }
  0x60   : > { %4484 = dma.hbm_to_vmem [thread:$0]  (!%p4482_p12), %s5628_s4, 16, %s889_s10, [#allocation4]  }
  0x61   : > { %4755 = dma.done.wait (%p4489_p9), [#allocation4], 16  }
  0x62   : > { %4757 = vsyncadd (%p4489_p9), [#allocation4], 4294967280  ;;  %s5629_s5 = sld [smem:[#allocation9_spill]]  ;;  %s4002_s16 = sshll.u32 %s5012_s0, 1  ;;  %vm1063_vm0 = vcmask 261120   ;;  %v4567_v14 = vld [vmem:[%s4859_s29 + $0x8] sm:$0xff]  }
  0x63   : > { %s5630_s9 = sld [smem:[#allocation10_spill]]  ;;  %p1027_p11 = scmp.lt.s32.totalorder %s4002_s16, 3  ;;  %v4568_v15 = vld [vmem:[%s5623_s8 + $0x8] sm:$0xff]   ;;  %v4811_v16 = vmov 0.0   ;;  %v4569_v17 = vld [vmem:[%s4859_s29] sm:$0xff]   ;;  %vm4812_vm1 = vmmov 0  }
  0x64   : > { %4199 = vmatprep.subr.bf16.mxu0 %v4811_v16  ;;  %4207 = vmatprep.subr.bf16.mxu1 %v4811_v16  ;;  %v4570_v18 = vld [vmem:[%s5623_s8] sm:$0xff]   ;;  %s5631_s3 = sld [smem:[#allocation12_spill]]  ;;  %v4571_v45 = vld [vmem:[%s4879_s19 + $0x8] sm:$0xff]   ;;  %vm1324_vm6 = vcmask 64512   ;;  %s5590_s26 = smov 120   ;;  %vm1386_vm7 = vcmask 1043456  }
  0x65   : > { %s5660_s16 = smov (!%p1027_p11, %s4002_s16), 3  ;;  %4200 = vmatpush3.bf16.msra.mxu0 %v4567_v14  ;;  %4208 = vmatpush3.bf16.msra.mxu1 %v4568_v15  ;;  %v4008_v35 = vld [vmem:[%s4849_s21] ss:$0 sm:$0xff]  ;;  %vm1548_vm9 = vcmask 130112   ;;  %vm1664_vm10 = vcmask 195712   ;;  %s5632_s6 = sld [smem:[#allocation14_spill]] }
  0x66   : > { %s4003_s18 = sshll.u32 %s5660_s16, 3  ;;  %4201 = vmatprep.subr.bf16.mxu0 %v4811_v16  ;;  %4209 = vmatprep.subr.bf16.mxu1 %v4811_v16  ;;  %v4009_v41 = vld [vmem:[%s4854_s25] ss:$0 sm:$0xff]  ;;  %vm1780_vm11 = vcmask 261312   ;;  %s5640_s4 = smov 112  }
  0x67   : > { %4203 = vmatprep.mubr.msk.bf16.mxu0 %vm4812_vm1, %v4811_v16  ;;  %4211 = vmatprep.mubr.msk.bf16.mxu1 %vm4812_vm1, %v4811_v16  ;;  %v4572_v47 = vld [vmem:[%s4879_s19] sm:$0xff]  }
  0x68   : > { %s1030_s10 = scalar_lea.vmem %s5629_s5, %s4003_s18  ;;  %v4014_v51 = vld [vmem:[%s4874_s14] ss:$0 sm:$0xff] }
  0x69   : > { %s5061_s15 = scalar_lea.vmem %s5630_s9, %s4003_s18  ;;  %v5063_v0 = vld [vmem:[%s1030_s10] sm:$0xff]  ;;  %v5067_v2 = vld [vmem:[%s1030_s10 + $0x8] sm:$0xff]  ;;  %4202 = vmatpush3.bf16.msra.mxu0 %v4569_v17  ;;  %4210 = vmatpush3.bf16.msra.mxu1 %v4570_v18  ;;  %s5588_s18 = smov 104  }
  0x6a   : > { %v1064_v1 = vsel %vm1063_vm0, %v5063_v0, 0.0  ;;  %v1067_v3 = vsel %vm1063_vm0, %v5067_v2, 0.0  ;;  %4215 = vmatprep.subr.bf16.mxu0 %v4811_v16  ;;  %4223 = vmatprep.subr.bf16.mxu1 %v4811_v16  ;;  %v4010_v48 = vld [vmem:[%s5631_s3] ss:$0 sm:$0xff]  ;;  %s5586_s10 = smov 112   ;;  %s5637_s3 = sld [smem:[#allocation18_spill]] }
  0x6b   : > { %1065 = vadd.xlane.f32.xlu0 %v1064_v1 }
  0x6f   : > { %1068 = vadd.xlane.f32.xlu0 %v1067_v3 }
  0xf4   : > { %v1066_v4 = vpop.xlane.xlu0 %1065 }
  0xf5   : > { %v1071_v5 = vmul.f32 0.03125, %v1066_v4 }
  0xf7   : > { %v1073_v6 = vsub.f32 %v5063_v0, %v1071_v5 }
  0xf8   : > { %v1069_v7 = vpop.xlane.xlu0 %1068 }
  0xf9   : > { %v1072_v8 = vmul.f32 0.03125, %v1069_v7  ;;  %v1075_v9 = vmul.f32 %v1073_v6, %v1073_v6 }
  0xfb   : > { %v1074_v10 = vsub.f32 %v5067_v2, %v1072_v8  ;;  %v1077_v11 = vsel %vm1063_vm0, %v1075_v9, 0.0 }
  0xfc   : > { %1078 = vadd.xlane.f32.xlu1 %v1077_v11 }
  0xfd   : > { %v1076_v12 = vmul.f32 %v1074_v10, %v1074_v10 }
  0xff   : > { %v1080_v13 = vsel %vm1063_vm0, %v1076_v12, 0.0 }
 0x100   : > { %1081 = vadd.xlane.f32.xlu1 %v1080_v13 }
 0x185   : > { %v1079_v19 = vpop.xlane.xlu1 %1078 }
 0x186   : > { %v1083_v20 = vmul.f32 0.032258064, %v1079_v19 }
 0x188   : > { %4590 = vrsqrt.f32 %v1083_v20  ;;  %vm1087_vm2 = vcmp.eq.f32.partialorder %v1083_v20, inf  ;;  %v1090_v25 = vand.u32 2147483648, %v1083_v20  ;;  %vm1089_vm3 = vcmp.eq.f32.partialorder %v1083_v20, 0.0 }
 0x189   : > { %v1082_v21 = vpop.xlane.xlu1 %1081 }
 0x18a   : > { %v1084_v22 = vmul.f32 0.032258064, %v1082_v21 }
 0x18c   : > { %4592 = vrsqrt.f32 %v1084_v22  ;;  %vm1094_vm4 = vcmp.eq.f32.partialorder %v1084_v22, inf  ;;  %v1097_v31 = vand.u32 2147483648, %v1084_v22  ;;  %vm1096_vm5 = vcmp.eq.f32.partialorder %v1084_v22, 0.0 }
 0x195   : > { %v4591_v23 = vpop.eup %4590 }
 0x196   : > { %v1086_v24 = vmul.f32 %v4591_v23, %v1083_v20 }
 0x198   : > { %v1088_v26 = vsel %vm1087_vm2, %v1083_v20, %v1086_v24 }
 0x199   : > { %v4593_v27 = vpop.eup %4592  ;;  %v1091_v28 = vsel %vm1089_vm3, %v1090_v25, %v1088_v26  ;;  %vm2654_vm3 = vcmask 130048  }
 0x19a   : > { %v1099_v29 = vadd.f32 1e-06, %v1091_v28  ;;  %v1093_v30 = vmul.f32 %v4593_v27, %v1084_v22 }
 0x19c   : > { %4594 = vrcp.f32 %v1099_v29  ;;  %v1095_v32 = vsel %vm1094_vm4, %v1084_v22, %v1093_v30 }
 0x19d   : > { %v1098_v33 = vsel %vm1096_vm5, %v1097_v31, %v1095_v32 }
 0x19e   : > { %v1100_v34 = vadd.f32 1e-06, %v1098_v33 }
 0x1a0   : > { %4596 = vrcp.f32 %v1100_v34 }
 0x1a9   : > { %v4595_v36 = vpop.eup %4594 }
 0x1aa   : > { %v1111_v37 = vmul.f32 %v4595_v36, %v4008_v35  ;;  %v1052_v36 = vld [vmem:[%s4839_s13] sm:$0xff] }
 0x1ab   : > { %vm1053_vm8 = vcmp.eq.f32.partialorder %v1052_v36, 0.0 }
 0x1ac   : > { %v1113_v40 = vmul.f32 %v1111_v37, %v1073_v6  ;;  %v4018_v6 = vld [vmem:[%s4884_s24] ss:$0 sm:$0xff]  ;;  %v1054_v37 = vsel %vm1053_vm8, -1e+09, %v4811_v16  ;;  %vm3745_vm8 = vcmask 523264  }
 0x1ad   : > { %v4597_v38 = vpop.eup %4596 }
 0x1ae   : > { %v1112_v39 = vmul.f32 %v4597_v38, %v4008_v35  ;;  %v1121_v43 = vadd.f32 %v4009_v41, %v1113_v40 }
 0x1b0   : > { %v1114_v42 = vmul.f32 %v1112_v39, %v1074_v10 }
 0x1b2   : > { %v1122_v44 = vadd.f32 %v4009_v41, %v1114_v42 }
 0x1b4   : > { %v1123_v46 = vpack.c.bf16 %v1122_v44, %v1121_v43 }
 0x1b6   : > { %4204 = vmatmul.mubr.msk.bf16.vlgmr.msra.gmra.mxu0 %vm1063_vm0, %v1123_v46  ;;  %4212 = vmatmul.mubr.msk.bf16.vlgmr.msra.gmra.mxu1 %vm1063_vm0, %v1123_v46 }
 0x1b7   : > { %4216 = vmatpush3.bf16.msra.mxu0 %v4571_v45  ;;  %4219 = vmatprep.mubr.msk.bf16.mxu0 %vm4812_vm1, %v4811_v16 }
 0x1b8   : > { %4217 = vmatprep.subr.bf16.mxu0 %v4811_v16  ;;  %4225 = vmatprep.mubr.msk.bf16.mxu1 %vm4812_vm1, %v4811_v16 }
 0x1bb   : > { %4218 = vmatpush3.bf16.msra.mxu0 %v4572_v47 }
 0x1bc   : > { %4229 = vmatprep.subr.bf16.mxu0 %v4811_v16 }
 0x1be   : > { %4220 = vmatmul.mubr.msk.bf16.vlgmr.msra.gmra.mxu0 %vm1063_vm0, %v1123_v46 }
 0x1bf   : > { %4231 = vmatprep.mubr.msk.bf16.mxu0 %vm4812_vm1, %v4811_v16 }
 0x276   : > { %v1184_v49 = vpop.f32.mrf.mxu0  ;;  %v1251_v50 = vpop.f32.mrf.mxu1 }
 0x277   : > { %v1185_v54 = vadd.f32 %v4010_v48, %v1184_v49  ;;  %v1252_v57 = vadd.f32 %v4014_v51, %v1251_v50 }
 0x278   : > { %v4205_v52 = vpop.f32.mrf.mxu0  ;;  %v4213_v53 = vpop.f32.mrf.mxu1 }
 0x279   : > { %v1191_v62 = vmul.f32 0.35355338, %v1185_v54 }
 0x27a   : > { %v1187_v55 = vpop.f32.mrf.mxu0  ;;  %v1254_v56 = vpop.f32.mrf.mxu1 }
 0x27b   : > { %v1188_v58 = vadd.f32 %v4010_v48, %v1187_v55  ;;  %v1255_v59 = vadd.f32 %v4014_v51, %v1254_v56 }
 0x27c   : > { %v4206_v60 = vpop.f32.mrf.mxu0  ;;  %v4214_v61 = vpop.f32.mrf.mxu1 }
 0x27d   : > { %v1192_v63 = vmul.f32 0.35355338, %v1188_v58  ;;  %v1258_v1 = vpack.c.bf16 %v1255_v59, %v1252_v57 }
 0x27e   : > { %v1316_v3 = vpop.f32.mrf.mxu0 }
 0x27f   : > { %v1193_v4 = vpack.c.bf16 %v1192_v63, %v1191_v62  ;;  %1435 = vrot.lane.b32.xlu0 %v1258_v1, %s5590_s26  ;;  %v1329_v5 = vsel %vm1324_vm6, %v1258_v1, 0  ;;  %v1317_v9 = vadd.f32 %v4018_v6, %v1316_v3  ;;  %v1783_v13 = vrot.slane %v1258_v1, 4 }
 0x280   : > { %v4221_v7 = vpop.f32.mrf.mxu0  ;;  %4224 = vmatpush3.bf16.xpose.msra.mxu1 %v1329_v5 }
 0x281   : > { %1432 = vrot.lane.b32.xlu1 %v1193_v4, %s5590_s26  ;;  %4235 = vmatprep.subr.bf16.mxu1 %v4811_v16  ;;  %v1782_v15 = vrot.slane %v1193_v4, 4  ;;  %v1788_v26 = vsel %vm1324_vm6, %v1783_v13, 0 }
 0x282   : > { %v1319_v8 = vpop.f32.mrf.mxu0 }
 0x283   : > { %v1320_v10 = vadd.f32 %v4018_v6, %v1319_v8  ;;  %1668 = vrot.lane.b32.xlu0 %v1258_v1, %s5588_s18 }
 0x284   : > { %v4222_v11 = vpop.f32.mrf.mxu0 }
 0x285   : > { %v5112_v12 = vpack.c.bf16 %v1320_v10, %v1317_v9  ;;  %1552 = vrot.lane.b32.xlu1 %v1258_v1, %s5586_s10 }
 0x287   : > { %1892 = vrot.lane.b32.xlu0 %v1783_v13, %s5590_s26  ;;  %4226 = vmatmul.mubr.msk.bf16.vlgmr.msra.gmra.mxu1 %vm1324_vm6, %v1193_v4  ;;  %v1388_v14 = vsel %vm1386_vm7, %v5112_v12, 0 }
 0x288   : > { %4230 = vmatpush3.bf16.msra.mxu0 %v1388_v14  ;;  %4237 = vmatprep.mubr.msk.bf16.mxu1 %vm4812_vm1, %v4811_v16 }
 0x289   : > { %1550 = vrot.lane.b32.xlu1 %v1193_v4, %s5586_s10  ;;  %4241 = vmatprep.subr.bf16.mxu0 %v4811_v16 }
 0x28b   : > { %2007 = vrot.lane.b32.xlu0 %v1783_v13, %s5586_s10 }
 0x28d   : > { %1666 = vrot.lane.b32.xlu1 %v1193_v4, %s5588_s18 }
 0x28f   : > { %2122 = vrot.lane.b32.xlu0 %v1783_v13, %s5588_s18 }
 0x291   : > { %1890 = vrot.lane.b32.xlu1 %v1782_v15, %s5590_s26 }
 0x295   : > { %2005 = vrot.lane.b32.xlu1 %v1782_v15, %s5586_s10 }
 0x299   : > { %2120 = vrot.lane.b32.xlu1 %v1782_v15, %s5588_s18 }
 0x2f1   : > { %v1436_v17 = vpop.permute.xlu0 %1435 }
 0x2f2   : > { %v1441_v18 = vsel %vm1324_vm6, %v1436_v17, 0 }
 0x2f3   : > { %v1433_v19 = vpop.permute.xlu1 %1432  ;;  %4236 = vmatpush3.bf16.xpose.msra.mxu1 %v1441_v18 }
 0x2f4   : > { %4247 = vmatprep.subr.bf16.mxu1 %v4811_v16 }
 0x2f5   : > { %v1669_v22 = vpop.permute.xlu0 %1668 }
 0x2f6   : > { %v1674_v24 = vsel %vm1324_vm6, %v1669_v22, 0 }
 0x2f7   : > { %v1553_v20 = vpop.permute.xlu1 %1552 }
 0x2f8   : > { %v1558_v21 = vsel %vm1324_vm6, %v1553_v20, 0 }
 0x2f9   : > { %v1893_v27 = vpop.permute.xlu0 %1892 }
 0x2fa   : > { %4238 = vmatmul.mubr.msk.bf16.vlgmr.msra.gmra.mxu1 %vm1324_vm6, %v1433_v19  ;;  %v1898_v28 = vsel %vm1324_vm6, %v1893_v27, 0 }
 0x2fb   : > { %4248 = vmatpush3.bf16.xpose.msra.mxu1 %v1558_v21  ;;  %4249 = vmatprep.mubr.msk.bf16.mxu1 %vm4812_vm1, %v4811_v16  ;;  %v1551_v23 = vpop.permute.xlu1 %1550 }
 0x2fc   : > { %4259 = vmatprep.subr.bf16.mxu1 %v4811_v16 }
 0x2fd   : > { %v2008_v29 = vpop.permute.xlu0 %2007 }
 0x2fe   : > { %v2013_v31 = vsel %vm1324_vm6, %v2008_v29, 0 }
 0x2ff   : > { %v1667_v25 = vpop.permute.xlu1 %1666 }
 0x301   : > { %v2123_v32 = vpop.permute.xlu0 %2122 }
 0x302   : > { %4250 = vmatmul.mubr.msk.bf16.vlgmr.msra.gmra.mxu1 %vm1324_vm6, %v1551_v23  ;;  %v2128_v34 = vsel %vm1324_vm6, %v2123_v32, 0 }
 0x303   : > { %4260 = vmatpush3.bf16.xpose.msra.mxu1 %v1674_v24  ;;  %4261 = vmatprep.mubr.msk.bf16.mxu1 %vm4812_vm1, %v4811_v16  ;;  %v1891_v30 = vpop.permute.xlu1 %1890 }
 0x304   : > { %4271 = vmatprep.subr.bf16.mxu1 %v4811_v16 }
 0x307   : > { %v2006_v33 = vpop.permute.xlu1 %2005 }
 0x30a   : > { %4262 = vmatmul.mubr.msk.bf16.vlgmr.msra.gmra.mxu1 %vm1324_vm6, %v1667_v25 }
 0x30b   : > { %4272 = vmatpush3.bf16.xpose.msra.mxu1 %v1788_v26  ;;  %4273 = vmatprep.mubr.msk.bf16.mxu1 %vm4812_vm1, %v4811_v16  ;;  %v2121_v35 = vpop.permute.xlu1 %2120 }
 0x30c   : > { %4283 = vmatprep.subr.bf16.mxu1 %v4811_v16 }
 0x312   : > { %4274 = vmatmul.mubr.msk.bf16.vlgmr.msra.gmra.mxu1 %vm1324_vm6, %v1782_v15 }
 0x313   : > { %4284 = vmatpush3.bf16.xpose.msra.mxu1 %v1898_v28  ;;  %4285 = vmatprep.mubr.msk.bf16.mxu1 %vm4812_vm1, %v4811_v16 }
 0x314   : > { %4295 = vmatprep.subr.bf16.mxu1 %v4811_v16 }
 0x31a   : > { %4286 = vmatmul.mubr.msk.bf16.vlgmr.msra.gmra.mxu1 %vm1324_vm6, %v1891_v30 }
 0x31b   : > { %4296 = vmatpush3.bf16.xpose.msra.mxu1 %v2013_v31  ;;  %4297 = vmatprep.mubr.msk.bf16.mxu1 %vm4812_vm1, %v4811_v16 }
 0x31c   : > { %4307 = vmatprep.subr.bf16.mxu1 %v4811_v16 }
 0x322   : > { %4298 = vmatmul.mubr.msk.bf16.vlgmr.msra.gmra.mxu1 %vm1324_vm6, %v2006_v33 }
 0x323   : > { %4308 = vmatpush3.bf16.xpose.msra.mxu1 %v2128_v34  ;;  %4309 = vmatprep.mubr.msk.bf16.mxu1 %vm4812_vm1, %v4811_v16 }
 0x324   : > { %4319 = vmatprep.subr.bf16.mxu1 %v4811_v16 }
 0x32a   : > { %4310 = vmatmul.mubr.msk.bf16.vlgmr.msra.gmra.mxu1 %vm1324_vm6, %v2121_v35 }
 0x32b   : > { %4323 = vmatprep.mubr.msk.bf16.mxu1 %vm4812_vm1, %v4811_v16 }
 0x347   : > { %v1365_v38 = vpop.f32.mrf.mxu1 }
 0x348   : > { %v1366_v39 = vadd.f32 %v1365_v38, %v1054_v37 }
 0x349   : > { %v4227_v40 = vpop.f32.mrf.mxu1 }
 0x34a   : > { %v1371_v41 = vsel %vm1324_vm6, %v1366_v39, -inf }
 0x34b   : > { %1372 = vmax.xlane.f32.xlu0 %v1371_v41  ;;  %v1368_v42 = vpop.f32.mrf.mxu1 }
 0x34d   : > { %v4228_v43 = vpop.f32.mrf.mxu1 }
 0x3ba   : > { %v1477_v44 = vpop.f32.mrf.mxu1 }
 0x3bb   : > { %v1478_v45 = vadd.f32 %v1477_v44, %v1054_v37 }
 0x3bc   : > { %v4239_v46 = vpop.f32.mrf.mxu1 }
 0x3bd   : > { %v1483_v47 = vsel %vm1324_vm6, %v1478_v45, -inf }
 0x3be   : > { %1484 = vmax.xlane.f32.xlu1 %v1483_v47  ;;  %v1480_v48 = vpop.f32.mrf.mxu1 }
 0x3c0   : > { %v4240_v49 = vpop.f32.mrf.mxu1 }
 0x3c2   : > { %v1594_v50 = vpop.f32.mrf.mxu1 }
 0x3c3   : > { %v1595_v51 = vadd.f32 %v1594_v50, %v1054_v37 }
 0x3c4   : > { %v4251_v52 = vpop.f32.mrf.mxu1 }
 0x3c5   : > { %v1600_v53 = vsel %vm1324_vm6, %v1595_v51, -inf }
 0x3c6   : > { %1601 = vmax.xlane.f32.xlu0 %v1600_v53  ;;  %v1597_v54 = vpop.f32.mrf.mxu1 }
 0x3c7   : > { %v5199_v54 = vrot.slane %v5112_v12, 4 }
 0x3c8   : > { %v4252_v55 = vpop.f32.mrf.mxu1 }
 0x3ca   : > { %v1710_v56 = vpop.f32.mrf.mxu1 }
 0x3cb   : > { %v1711_v57 = vadd.f32 %v1710_v56, %v1054_v37 }
 0x3cc   : > { %v4263_v58 = vpop.f32.mrf.mxu1 }
 0x3cd   : > { %v1716_v59 = vsel %vm1324_vm6, %v1711_v57, -inf }
 0x3ce   : > { %1717 = vmax.xlane.f32.xlu0 %v1716_v59  ;;  %v1713_v60 = vpop.f32.mrf.mxu1 }
 0x3d0   : > { %v4264_v61 = vpop.f32.mrf.mxu1 }
 0x3d2   : > { %v1824_v62 = vpop.f32.mrf.mxu1 }
 0x3d3   : > { %v1825_v63 = vadd.f32 %v1824_v62, %v1054_v37 }
 0x3d4   : > { %v1373_v1 = vpop.xlane.xlu0 %1372  ;;  %v4275_v3 = vpop.f32.mrf.mxu1 }
 0x3d5   : > { %v1374_v4 = vsub.f32 %v1366_v39, %v1373_v1  ;;  %v1830_v5 = vsel %vm1324_vm6, %v1825_v63, -inf }
 0x3d6   : > { %1831 = vmax.xlane.f32.xlu0 %v1830_v5  ;;  %v1827_v6 = vpop.f32.mrf.mxu1 }
 0x3d7   : > { %v1375_v7 = vmul.f32 1.442695, %v1374_v4 }
 0x3d8   : > { %v4276_v8 = vpop.f32.mrf.mxu1 }
 0x3d9   : > { %4598 = vpow2.f32 %v1375_v7 }
 0x3da   : > { %v1934_v9 = vpop.f32.mrf.mxu1 }
 0x3db   : > { %v5171_v10 = vadd.f32 %v1934_v9, %v1054_v37 }
 0x3dc   : > { %v4287_v11 = vpop.f32.mrf.mxu1 }
 0x3dd   : > { %v1940_v13 = vsel %vm1324_vm6, %v5171_v10, -inf }
 0x3de   : > { %1941 = vmax.xlane.f32.xlu1 %v1940_v13  ;;  %v1937_v14 = vpop.f32.mrf.mxu1 }
 0x3e0   : > { %v4288_v15 = vpop.f32.mrf.mxu1 }
 0x3e2   : > { %v2049_v17 = vpop.f32.mrf.mxu1 }
 0x3e3   : > { %v5175_v18 = vadd.f32 %v2049_v17, %v1054_v37 }
 0x3e4   : > { %v4299_v19 = vpop.f32.mrf.mxu1 }
 0x3e5   : > { %v2055_v20 = vsel %vm1324_vm6, %v5175_v18, -inf }
 0x3e6   : > { %v4599_v21 = vpop.eup %4598  ;;  %2056 = vmax.xlane.f32.xlu0 %v2055_v20  ;;  %v2052_v22 = vpop.f32.mrf.mxu1 }
 0x3e7   : > { %v1377_v24 = vsel %vm1324_vm6, %v4599_v21, 0.0 }
 0x3e8   : > { %v4300_v23 = vpop.f32.mrf.mxu1 }
 0x3ea   : > { %1378 = vadd.xlane.f32.xlu0 %v1377_v24  ;;  %v2164_v25 = vpop.f32.mrf.mxu1 }
 0x3eb   : > { %v2165_v26 = vadd.f32 %v2164_v25, %v1054_v37 }
 0x3ec   : > { %v4311_v27 = vpop.f32.mrf.mxu1 }
 0x3ed   : > { %v2170_v28 = vsel %vm1324_vm6, %v2165_v26, -inf }
 0x3ee   : > { %2171 = vmax.xlane.f32.xlu1 %v2170_v28  ;;  %v2167_v29 = vpop.f32.mrf.mxu1 }
 0x3ef   : > { %v1847_v29 = vsel %vm1386_vm7, %v5199_v54, 0 }
 0x3f0   : > { %v4312_v30 = vpop.f32.mrf.mxu1 }
 0x3ff   : > { %1496 = vrot.lane.b32.xlu1 %v5112_v12, %s5590_s26 }
 0x400   : > { %1612 = vrot.lane.b32.xlu0 %v5112_v12, %s5586_s10 }
 0x447   : > { %v1485_v31 = vpop.xlane.xlu1 %1484 }
 0x448   : > { %v1486_v32 = vsub.f32 %v1478_v45, %v1485_v31 }
 0x44a   : > { %v1487_v33 = vmul.f32 1.442695, %v1486_v32 }
 0x44c   : > { %4600 = vpow2.f32 %v1487_v33 }
 0x44f   : > { %v1602_v34 = vpop.xlane.xlu0 %1601 }
 0x450   : > { %v1603_v35 = vsub.f32 %v1595_v51, %v1602_v34 }
 0x452   : > { %v1604_v36 = vmul.f32 1.442695, %v1603_v35 }
 0x454   : > { %4602 = vpow2.f32 %v1604_v36 }
 0x457   : > { %v1718_v37 = vpop.xlane.xlu0 %1717 }
 0x458   : > { %v1719_v38 = vsub.f32 %v1711_v57, %v1718_v37 }
 0x459   : > { %v4601_v39 = vpop.eup %4600 }
 0x45a   : > { %v1720_v40 = vmul.f32 1.442695, %v1719_v38  ;;  %v1489_v41 = vsel %vm1324_vm6, %v4601_v39, 0.0 }
 0x45b   : > { %1490 = vadd.xlane.f32.xlu1 %v1489_v41 }
 0x45c   : > { %4604 = vpow2.f32 %v1720_v40 }
 0x45f   : > { %v1832_v42 = vpop.xlane.xlu0 %1831 }
 0x460   : > { %v1833_v43 = vsub.f32 %v1825_v63, %v1832_v42 }
 0x461   : > { %v5186_v44 = vpop.eup %4602 }
 0x462   : > { %v1834_v46 = vmul.f32 1.442695, %v1833_v43  ;;  %v1606_v45 = vsel %vm1324_vm6, %v5186_v44, 0.0 }
 0x463   : > { %1607 = vadd.xlane.f32.xlu0 %v1606_v45 }
 0x464   : > { %4606 = vpow2.f32 %v1834_v46 }
 0x467   : > { %v1942_v53 = vpop.xlane.xlu1 %1941 }
 0x468   : > { %v1943_v63 = vsub.f32 %v5171_v10, %v1942_v53 }
 0x469   : > { %v5190_v47 = vpop.eup %4604 }
 0x46a   : > { %v1722_v48 = vsel %vm1324_vm6, %v5190_v47, 0.0  ;;  %v1944_v1 = vmul.f32 1.442695, %v1943_v63 }
 0x46b   : > { %1723 = vadd.xlane.f32.xlu1 %v1722_v48 }
 0x46f   : > { %v2057_v49 = vpop.xlane.xlu0 %2056 }
 0x470   : > { %v2058_v60 = vsub.f32 %v5175_v18, %v2057_v49 }
 0x471   : > { %v5194_v50 = vpop.eup %4606 }
 0x472   : > { %v1836_v51 = vsel %vm1324_vm6, %v5194_v50, 0.0  ;;  %v2059_v62 = vmul.f32 1.442695, %v2058_v60 }
 0x473   : > { %v1379_v52 = vpop.xlane.xlu0 %1378  ;;  %1837 = vadd.xlane.f32.xlu0 %v1836_v51 }
 0x474   : > { %4608 = vrcp.f32 %v1379_v52 }
 0x475   : > { %4610 = vpow2.f32 %v2059_v62 }
 0x476   : > { %4612 = vpow2.f32 %v1944_v1 }
 0x477   : > { %v2172_v55 = vpop.xlane.xlu1 %2171  ;;  %v1613_v11 = vpop.permute.xlu0 %1612 }
 0x478   : > { %v2173_v3 = vsub.f32 %v2165_v26, %v2172_v55  ;;  %v1618_v19 = vsel %vm1386_vm7, %v1613_v11, 0  ;;  %v4573_v11 = vld [vmem:[%s4889_s30 + $0x8] sm:$0xff]  }
 0x479   : > { %4320 = vmatpush3.bf16.msra.mxu1 %v4573_v11 }
 0x47a   : > { %v2174_v4 = vmul.f32 1.442695, %v2173_v3  ;;  %4321 = vmatprep.subr.bf16.mxu1 %v4811_v16 }
 0x47b   : > { %v1497_v58 = vpop.permute.xlu1 %1496 }
 0x47c   : > { %1952 = vrot.lane.b32.xlu1 %v5199_v54, %s5590_s26  ;;  %v1502_v61 = vsel %vm1386_vm7, %v1497_v58, 0  ;;  %4614 = vpow2.f32 %v2174_v4  ;;  %s5592_s26 = smov 24  }
 0x481   : > { %v4609_v56 = vpop.eup %4608 }
 0x482   : > { %v1381_v57 = vmul.f32 %v4609_v56, %v4599_v21  ;;  %v5212_v5 = vpop.eup %4610 }
 0x483   : > { %v2061_v6 = vsel %vm1324_vm6, %v5212_v5, 0.0  ;;  %v4613_v7 = vpop.eup %4612 }
 0x484   : > { %v1382_v59 = vpack.c.bf16 %v1381_v57, %v1381_v57 }
 0x486   : > { %4232 = vmatmul.mubr.msk.bf16.vlgmr.msra.gmra.mxu0 %vm1324_vm6, %v1382_v59 }
 0x487   : > { %4242 = vmatpush3.bf16.msra.mxu0 %v1502_v61  ;;  %4243 = vmatprep.mubr.msk.bf16.mxu0 %vm4812_vm1, %v4811_v16 }
 0x488   : > { %4253 = vmatprep.subr.bf16.mxu0 %v4811_v16 }
 0x489   : > { %1728 = vrot.lane.b32.xlu0 %v5112_v12, %s5588_s18  ;;  %v1946_v12 = vsel %vm1324_vm6, %v4613_v7, 0.0  ;;  %v5217_v8 = vpop.eup %4614 }
 0x48a   : > { %v2176_v9 = vsel %vm1324_vm6, %v5217_v8, 0.0 }
 0x4a0   : > { %2062 = vadd.xlane.f32.xlu1 %v2061_v6 }
 0x4a8   : > { %1947 = vadd.xlane.f32.xlu0 %v1946_v12 }
 0x4ac   : > { %2177 = vadd.xlane.f32.xlu0 %v2176_v9 }
 0x4b1   : > { %2182 = vrot.lane.b32.xlu1 %v5199_v54, %s5588_s18  ;;  %s5594_s18 = smov 16  }
 0x4c2   : > { %2067 = vrot.lane.b32.xlu0 %v5199_v54, %s5586_s10  ;;  %s5596_s10 = smov 8  }
 0x4e4   : > { %v1491_v10 = vpop.xlane.xlu1 %1490 }
 0x4e5   : > { %4616 = vrcp.f32 %v1491_v10 }
 0x4ec   : > { %v1608_v13 = vpop.xlane.xlu0 %1607 }
 0x4ed   : > { %4618 = vrcp.f32 %v1608_v13 }
 0x4f2   : > { %v4617_v14 = vpop.eup %4616 }
 0x4f3   : > { %v1493_v15 = vmul.f32 %v4617_v14, %v4601_v39  ;;  %v4574_v14 = vld [vmem:[%s4889_s30] sm:$0xff]  }
 0x4f4   : > { %v1724_v17 = vpop.xlane.xlu1 %1723  ;;  %4322 = vmatpush3.bf16.msra.mxu1 %v4574_v14 }
 0x4f5   : > { %4620 = vrcp.f32 %v1724_v17  ;;  %v1494_v18 = vpack.c.bf16 %v1493_v15, %v1493_v15 }
 0x4f7   : > { %4244 = vmatmul.mubr.msk.bf16.vlgmr.msra.gmra.mxu0 %vm1324_vm6, %v1494_v18 }
 0x4f8   : > { %4254 = vmatpush3.bf16.msra.mxu0 %v1618_v19  ;;  %4255 = vmatprep.mubr.msk.bf16.mxu0 %vm4812_vm1, %v4811_v16  ;;  %v1953_v32 = vpop.permute.xlu1 %1952 }
 0x4f9   : > { %4265 = vmatprep.subr.bf16.mxu0 %v4811_v16  ;;  %v1958_v34 = vsel %vm1386_vm7, %v1953_v32, 0 }
 0x4fa   : > { %v4619_v20 = vpop.eup %4618 }
 0x4fb   : > { %v1610_v21 = vmul.f32 %v4619_v20, %v5186_v44 }
 0x4fc   : > { %v1838_v22 = vpop.xlane.xlu0 %1837 }
 0x4fd   : > { %4622 = vrcp.f32 %v1838_v22  ;;  %v1611_v23 = vpack.c.bf16 %v1610_v21, %v1610_v21 }
 0x4ff   : > { %4256 = vmatmul.mubr.msk.bf16.vlgmr.msra.gmra.mxu0 %vm1324_vm6, %v1611_v23 }
 0x500   : > { %v1729_v24 = vpop.permute.xlu0 %1728  ;;  %4267 = vmatprep.mubr.msk.bf16.mxu0 %vm4812_vm1, %v4811_v16 }
 0x501   : > { %v1734_v25 = vsel %vm1386_vm7, %v1729_v24, 0 }
 0x502   : > { %v4621_v26 = vpop.eup %4620  ;;  %4266 = vmatpush3.bf16.msra.mxu0 %v1734_v25 }
 0x503   : > { %4277 = vmatprep.subr.bf16.mxu0 %v4811_v16  ;;  %v1726_v27 = vmul.f32 %v4621_v26, %v5190_v47 }
 0x505   : > { %v1727_v28 = vpack.c.bf16 %v1726_v27, %v1726_v27 }
 0x507   : > { %4268 = vmatmul.mubr.msk.bf16.vlgmr.msra.gmra.mxu0 %vm1324_vm6, %v1727_v28 }
 0x508   : > { %4278 = vmatpush3.bf16.msra.mxu0 %v1847_v29  ;;  %4279 = vmatprep.mubr.msk.bf16.mxu0 %vm4812_vm1, %v4811_v16 }
 0x509   : > { %4289 = vmatprep.subr.bf16.mxu0 %v4811_v16 }
 0x50a   : > { %v4623_v30 = vpop.eup %4622 }
 0x50b   : > { %v1840_v31 = vmul.f32 %v4623_v30, %v5194_v50 }
 0x50d   : > { %v1841_v33 = vpack.c.bf16 %v1840_v31, %v1840_v31 }
 0x50f   : > { %4280 = vmatmul.mubr.msk.bf16.vlgmr.msra.gmra.mxu0 %vm1324_vm6, %v1841_v33  ;;  %v4038_v33 = vld [vmem:[%s5632_s6] ss:$0 sm:$0xff]  ;;  %s5643_s6 = sld [smem:[#allocation21_spill]] }
 0x510   : > { %4290 = vmatpush3.bf16.msra.mxu0 %v1958_v34  ;;  %4291 = vmatprep.mubr.msk.bf16.mxu0 %vm4812_vm1, %v4811_v16 }
 0x511   : > { %4301 = vmatprep.subr.bf16.mxu0 %v4811_v16 }
 0x529   : > { %v2063_v36 = vpop.xlane.xlu1 %2062 }
 0x52d   : > { %v2183_v45 = vpop.permute.xlu1 %2182 }
 0x52e   : > { %v2188_v51 = vsel %vm1386_vm7, %v2183_v45, 0 }
 0x531   : > { %v1948_v35 = vpop.xlane.xlu0 %1947 }
 0x532   : > { %4624 = vrcp.f32 %v1948_v35 }
 0x533   : > { %4626 = vrcp.f32 %v2063_v36 }
 0x535   : > { %v2178_v37 = vpop.xlane.xlu0 %2177 }
 0x536   : > { %4628 = vrcp.f32 %v2178_v37 }
 0x539   : > { %v2068_v40 = vpop.permute.xlu0 %2067 }
 0x53a   : > { %v2073_v43 = vsel %vm1386_vm7, %v2068_v40, 0 }
 0x53f   : > { %v4625_v38 = vpop.eup %4624 }
 0x540   : > { %v1950_v39 = vmul.f32 %v4625_v38, %v4613_v7  ;;  %v4627_v42 = vpop.eup %4626 }
 0x541   : > { %v2065_v44 = vmul.f32 %v4627_v42, %v5212_v5 }
 0x542   : > { %v1951_v41 = vpack.c.bf16 %v1950_v39, %v1950_v39 }
 0x543   : > { %v2066_v48 = vpack.c.bf16 %v2065_v44, %v2065_v44  ;;  %v4629_v49 = vpop.eup %4628 }
 0x544   : > { %4292 = vmatmul.mubr.msk.bf16.vlgmr.msra.gmra.mxu0 %vm1324_vm6, %v1951_v41  ;;  %v2180_v53 = vmul.f32 %v4629_v49, %v5217_v8 }
 0x545   : > { %4302 = vmatpush3.bf16.msra.mxu0 %v2073_v43  ;;  %4303 = vmatprep.mubr.msk.bf16.mxu0 %vm4812_vm1, %v4811_v16 }
 0x546   : > { %4313 = vmatprep.subr.bf16.mxu0 %v4811_v16  ;;  %v1424_v46 = vpop.f32.mrf.mxu0  ;;  %v2181_v54 = vpack.c.bf16 %v2180_v53, %v2180_v53  ;;  %v4576_v53 = vld [vmem:[%s4919_s17] sm:$0xff]  }
 0x547   : > { %1430 = vst.msk [vmem:[#allocation2] sm:$0xff] %vm1324_vm6, %v1424_v46 }
 0x548   : > { %v4233_v47 = vpop.f32.mrf.mxu0 }
 0x54a   : > { %v1427_v50 = vpop.f32.mrf.mxu0 }
 0x54c   : > { %4304 = vmatmul.mubr.msk.bf16.vlgmr.msra.gmra.mxu0 %vm1324_vm6, %v2066_v48  ;;  %v4234_v52 = vpop.f32.mrf.mxu0 }
 0x54d   : > { %4314 = vmatpush3.bf16.msra.mxu0 %v2188_v51  ;;  %4315 = vmatprep.mubr.msk.bf16.mxu0 %vm4812_vm1, %v4811_v16  ;;  %v4575_v52 = vld [vmem:[%s4919_s17 + $0x8] sm:$0xff]  }
 0x54e   : > { %4327 = vmatprep.subr.bf16.mxu0 %v4811_v16  ;;  %4335 = vmatprep.subr.bf16.mxu1 %v4575_v52 }
 0x554   : > { %4316 = vmatmul.mubr.msk.bf16.vlgmr.msra.gmra.mxu0 %vm1324_vm6, %v2181_v54  ;;  %v5300_v54 = vld [vmem:[%s5061_s15 + $0x8] sm:$0xff]  }
 0x555   : > { %4331 = vmatprep.mubr.msk.bf16.mxu0 %vm4812_vm1, %v4811_v16 }
 0x5b7   : > { %v1538_v55 = vpop.f32.mrf.mxu0 }
 0x5b8   : > { %1545 = vrot.lane.b32.xlu1 %v1538_v55, %s5596_s10  ;;  %v4577_v55 = vld [vmem:[%s5061_s15] sm:$0xff]   ;;  %s5634_s15 = sld [smem:[#allocation15_spill]] }
 0x5b9   : > { %v4245_v56 = vpop.f32.mrf.mxu0 }
 0x5bb   : > { %v1541_v57 = vpop.f32.mrf.mxu0 }
 0x5bd   : > { %v4246_v58 = vpop.f32.mrf.mxu0 }
 0x5be   : > { %v4042_v11 = vld [vmem:[%s5634_s15] ss:$0 sm:$0xff]  ;;  %s5639_s15 = smov 104  }
 0x5bf   : > { %v1654_v59 = vpop.f32.mrf.mxu0 }
 0x5c0   : > { %1661 = vrot.lane.b32.xlu1 %v1654_v59, %s5594_s18 }
 0x5c1   : > { %v4257_v60 = vpop.f32.mrf.mxu0 }
 0x5c3   : > { %v1657_v61 = vpop.f32.mrf.mxu0 }
 0x5c5   : > { %v4258_v62 = vpop.f32.mrf.mxu0 }
 0x5c7   : > { %v1770_v63 = vpop.f32.mrf.mxu0 }
 0x5c8   : > { %1777 = vrot.lane.b32.xlu0 %v1770_v63, %s5592_s26 }
 0x5c9   : > { %v4269_v1 = vpop.f32.mrf.mxu0 }
 0x5cb   : > { %v1773_v3 = vpop.f32.mrf.mxu0 }
 0x5cd   : > { %v4270_v4 = vpop.f32.mrf.mxu0 }
 0x5cf   : > { %v1883_v5 = vpop.f32.mrf.mxu0 }
 0x5d0   : > { %1889 = vst.msk [vmem:[#allocation2 + $0x8] sm:$0xff] %vm1324_vm6, %v1883_v5 }
 0x5d1   : > { %v4281_v6 = vpop.f32.mrf.mxu0 }
 0x5d3   : > { %v1886_v7 = vpop.f32.mrf.mxu0 }
 0x5d5   : > { %v4282_v12 = vpop.f32.mrf.mxu0 }
 0x604   : > { %v1994_v8 = vpop.f32.mrf.mxu0 }
 0x605   : > { %2001 = vrot.lane.b32.xlu1 %v1994_v8, %s5596_s10  ;;  %s5636_s10 = sld [smem:[#allocation19_spill]] }
 0x606   : > { %v4293_v9 = vpop.f32.mrf.mxu0 }
 0x608   : > { %v1997_v10 = vpop.f32.mrf.mxu0 }
 0x60a   : > { %v4294_v13 = vpop.f32.mrf.mxu0 }
 0x60c   : > { %v2109_v15 = vpop.f32.mrf.mxu0 }
 0x60d   : > { %2116 = vrot.lane.b32.xlu1 %v2109_v15, %s5594_s18  ;;  %s5635_s18 = sld [smem:[#allocation16_spill]] }
 0x60e   : > { %v4305_v17 = vpop.f32.mrf.mxu0 }
 0x610   : > { %v2112_v18 = vpop.f32.mrf.mxu0 }
 0x612   : > { %v4306_v19 = vpop.f32.mrf.mxu0 }
 0x613   : > { %v4043_v19 = vld [vmem:[%s5635_s18] ss:$0 sm:$0xff]  ;;  %s5638_s18 = smov 120  }
 0x614   : > { %v2224_v20 = vpop.f32.mrf.mxu0 }
 0x615   : > { %2231 = vrot.lane.b32.xlu1 %v2224_v20, %s5592_s26  ;;  %s5633_s26 = sld [smem:[#allocation17_spill]] }
 0x616   : > { %v4317_v21 = vpop.f32.mrf.mxu0 }
 0x618   : > { %v2227_v22 = vpop.f32.mrf.mxu0 }
 0x61a   : > { %v4318_v23 = vpop.f32.mrf.mxu0 }
 0x61b   : > { %v4578_v56 = vld [vmem:[%s5633_s26 + $0x8] sm:$0xff]   ;;  %v4579_v57 = vld [vmem:[%s5633_s26] sm:$0xff]  }
 0x61c   : > { %4328 = vmatpush3.bf16.msra.mxu0 %v4578_v56 }
 0x61d   : > { %4329 = vmatprep.subr.bf16.mxu0 %v4811_v16 }
 0x620   : > { %4330 = vmatpush3.bf16.msra.mxu0 %v4579_v57 }
 0x62a   : > { %v1546_v24 = vpop.permute.xlu1 %1545 }
 0x62b   : > { %1549 = vst.msk [vmem:[#allocation2] sm:$0xff] %vm1548_vm9, %v1546_v24 }
 0x632   : > { %v1662_v25 = vpop.permute.xlu1 %1661 }
 0x633   : > { %1665 = vst.msk [vmem:[#allocation2] sm:$0xff] %vm1664_vm10, %v1662_v25  ;;  %v4048_v25 = vld [vmem:[%s5636_s10] ss:$0 sm:$0xff]  ;;  %s5641_s10 = sld [smem:[#allocation20_spill]] }
 0x63a   : > { %v1778_v26 = vpop.permute.xlu0 %1777 }
 0x63b   : > { %1781 = vst.msk [vmem:[#allocation2] sm:$0xff] %vm1780_vm11, %v1778_v26 }
 0x642   : > { %v2235_v30 = vld [vmem:[#allocation2] sm:$0xff] }
 0x677   : > { %v2002_v27 = vpop.permute.xlu1 %2001 }
 0x678   : > { %2004 = vst.msk [vmem:[#allocation2 + $0x8] sm:$0xff] %vm1548_vm9, %v2002_v27 }
 0x67f   : > { %v2117_v28 = vpop.permute.xlu1 %2116 }
 0x680   : > { %2119 = vst.msk [vmem:[#allocation2 + $0x8] sm:$0xff] %vm1664_vm10, %v2117_v28 }
 0x687   : > { %v2232_v29 = vpop.permute.xlu1 %2231 }
 0x688   : > { %2234 = vst.msk [vmem:[#allocation2 + $0x8] sm:$0xff] %vm1780_vm11, %v2232_v29 }
 0x68f   : > { %v2236_v31 = vld [vmem:[#allocation2 + $0x8] sm:$0xff] }
 0x690   : > { %v2237_v32 = vpack.c.bf16 %v2236_v31, %v2235_v30 }
 0x692   : > { %4324 = vmatmul.mubr.msk.bf16.vlgmr.msra.gmra.mxu1 %vm1063_vm0, %v2237_v32 }
 0x693   : > { %4336 = vmatpush3.bf16.msra.mxu1 %v4575_v52  ;;  %4339 = vmatprep.mubr.msk.bf16.mxu1 %vm1063_vm0, %v4577_v55 }
 0x694   : > { %4337 = vmatprep.subr.bf16.mxu1 %v4576_v53 }
 0x697   : > { %4338 = vmatpush3.bf16.msra.mxu1 %v4576_v53 }
 0x698   : > { %4351 = vmatprep.subr.bf16.mxu1 %v4811_v16 }
 0x69a   : > { %4340 = vmatmul.mubr.msk.bf16.vlgmr.msra.gmra.mxu1 %vm1063_vm0, %v5300_v54 }
 0x69b   : > { %4353 = vmatprep.mubr.msk.bf16.mxu1 %vm4812_vm1, %v4811_v16 }
 0x752   : > { %v2298_v34 = vpop.f32.mrf.mxu1 }
 0x753   : > { %v2299_v35 = vadd.f32 %v4038_v33, %v2298_v34 }
 0x754   : > { %v4325_v36 = vpop.f32.mrf.mxu1 }
 0x755   : > { %v5284_v37 = vadd.f32 %v2299_v35, %v5063_v0  ;;  %v4044_v36 = vld [vmem:[%s5637_s3] ss:$0 sm:$0xff]  ;;  %s5642_s3 = sld [smem:[#allocation11_spill]] }
 0x756   : > { %v2301_v38 = vpop.f32.mrf.mxu1 }
 0x757   : > { %v2302_v39 = vadd.f32 %v4038_v33, %v2301_v38  ;;  %v2309_v40 = vsel %vm1063_vm0, %v5284_v37, 0.0 }
 0x758   : > { %2310 = vadd.xlane.f32.xlu0 %v2309_v40  ;;  %v4326_v41 = vpop.f32.mrf.mxu1 }
 0x759   : > { %v5289_v42 = vadd.f32 %v2302_v39, %v5067_v2 }
 0x75a   : > { %v4341_v24 = vpop.f32.mrf.mxu1 }
 0x75b   : > { %v2312_v43 = vsel %vm1063_vm0, %v5289_v42, 0.0  ;;  %v2520_v32 = vadd.f32 %v4341_v24, %v4048_v25  ;;  %s5379_s5 = scalar_lea.vmem %s5642_s3, %s5660_s16  ;;  %s5647_s16 = smov 24  }
 0x75c   : > { %2313 = vadd.xlane.f32.xlu1 %v2312_v43  ;;  %v2511_v26 = vpop.f32.mrf.mxu1  ;;  %s5650_s3 = sld [smem:[#allocation28_spill]] }
 0x75d   : > { %v2512_v28 = vadd.f32 %v4048_v25, %v2511_v26 }
 0x75e   : > { %v4342_v27 = vpop.f32.mrf.mxu1 }
 0x75f   : > { %v2523_v33 = vadd.f32 %v4342_v27, %v4048_v25 }
 0x760   : > { %v2514_v29 = vpop.f32.mrf.mxu1 }
 0x761   : > { %v2515_v30 = vadd.f32 %v4048_v25, %v2514_v29  ;;  %v2527_v34 = vpack.c.bf16 %v2523_v33, %v2520_v32 }
 0x763   : > { %v2526_v31 = vpack.c.bf16 %v2515_v30, %v2512_v28 }
 0x765   : > { %v2612_v35 = vsel %vm1324_vm6, %v2526_v31, 0 }
 0x766   : > { %4352 = vmatpush3.bf16.xpose.msra.mxu1 %v2612_v35 }
 0x767   : > { %4363 = vmatprep.subr.bf16.mxu1 %v4811_v16 }
 0x7e1   : > { %v2311_v44 = vpop.xlane.xlu0 %2310 }
 0x7e2   : > { %v2315_v0 = vmul.f32 0.03125, %v2311_v44 }
 0x7e4   : > { %v2317_v46 = vsub.f32 %v5284_v37, %v2315_v0 }
 0x7e5   : > { %v2314_v45 = vpop.xlane.xlu1 %2313 }
 0x7e6   : > { %v2316_v47 = vmul.f32 0.03125, %v2314_v45  ;;  %v2319_v48 = vmul.f32 %v2317_v46, %v2317_v46 }
 0x7e8   : > { %v2318_v49 = vsub.f32 %v5289_v42, %v2316_v47  ;;  %v2321_v50 = vsel %vm1063_vm0, %v2319_v48, 0.0 }
 0x7e9   : > { %2322 = vadd.xlane.f32.xlu0 %v2321_v50  ;;  %v4580_v50 = vld [vmem:[%s5641_s10 + $0x8] sm:$0xff]  }
 0x7ea   : > { %v2320_v2 = vmul.f32 %v2318_v49, %v2318_v49  ;;  %4343 = vmatprep.subr.bf16.mxu0 %v4580_v50 }
 0x7ec   : > { %v2324_v51 = vsel %vm1063_vm0, %v2320_v2, 0.0  ;;  %v4581_v2 = vld [vmem:[%s5641_s10] sm:$0xff]  }
 0x7ed   : > { %2325 = vadd.xlane.f32.xlu0 %v2324_v51 }
 0x803   : > { %2715 = vrot.lane.b32.xlu0 %v2526_v31, %s5638_s18 }
 0x807   : > { %2942 = vrot.lane.b32.xlu0 %v2526_v31, %s5639_s15 }
 0x80b   : > { %3165 = vrot.lane.b32.xlu0 %v2527_v34, %s5638_s18 }
 0x80f   : > { %3279 = vrot.lane.b32.xlu0 %v2527_v34, %s5640_s4 }
 0x813   : > { %3392 = vrot.lane.b32.xlu0 %v2527_v34, %s5639_s15 }
 0x872   : > { %v2323_v58 = vpop.xlane.xlu0 %2322 }
 0x873   : > { %v2327_v59 = vmul.f32 0.032258064, %v2323_v58  ;;  %v3064_v58 = vsel %vm1324_vm6, %v2527_v34, 0 }
 0x875   : > { %4630 = vrsqrt.f32 %v2327_v59  ;;  %vm2331_vm12 = vcmp.eq.f32.partialorder %v2327_v59, inf  ;;  %v2334_v1 = vand.u32 2147483648, %v2327_v59  ;;  %vm2333_vm13 = vcmp.eq.f32.partialorder %v2327_v59, 0.0 }
 0x876   : > { %v2326_v60 = vpop.xlane.xlu0 %2325 }
 0x877   : > { %v2328_v61 = vmul.f32 0.032258064, %v2326_v60 }
 0x879   : > { %4632 = vrsqrt.f32 %v2328_v61  ;;  %vm2338_vm14 = vcmp.eq.f32.partialorder %v2328_v61, inf  ;;  %v2341_v12 = vand.u32 2147483648, %v2328_v61  ;;  %vm2340_vm15 = vcmp.eq.f32.partialorder %v2328_v61, 0.0 }
 0x87a   : > { %v2716_v45 = vpop.permute.xlu0 %2715 }
 0x87b   : > { %v2721_v48 = vsel %vm1324_vm6, %v2716_v45, 0 }
 0x882   : > { %v4631_v62 = vpop.eup %4630 }
 0x883   : > { %v2330_v63 = vmul.f32 %v4631_v62, %v2327_v59 }
 0x885   : > { %v2332_v3 = vsel %vm2331_vm12, %v2327_v59, %v2330_v63 }
 0x886   : > { %v4633_v4 = vpop.eup %4632  ;;  %v2335_v5 = vsel %vm2333_vm13, %v2334_v1, %v2332_v3 }
 0x887   : > { %v2343_v6 = vadd.f32 1e-06, %v2335_v5  ;;  %v2337_v7 = vmul.f32 %v4633_v4, %v2328_v61 }
 0x889   : > { %4634 = vrcp.f32 %v2343_v6  ;;  %v2339_v8 = vsel %vm2338_vm14, %v2328_v61, %v2337_v7  ;;  %v2603_v6 = vlaneseq  ;;  %v1055_v7 = vld [vmem:[%s5379_s5] sm:$0x1] }
 0x88a   : > { %v2342_v9 = vsel %vm2340_vm15, %v2341_v12, %v2339_v8  ;;  %vm1057_vm2 = vcmp.eq.f32.partialorder %v1055_v7, 0.0 }
 0x88b   : > { %v2344_v10 = vadd.f32 1e-06, %v2342_v9  ;;  %v2604_v12 = vshrl.u32 %v2603_v6, 7  ;;  %v1059_v9 = vsel %vm1057_vm2, -1e+09, %v4811_v16 }
 0x88d   : > { %4636 = vrcp.f32 %v2344_v10  ;;  %v2605_v8 = vsub.s32 0, %v2604_v12 }
 0x88f   : > { %v2606_v10 = vrot.slane %v1059_v9, %v2605_v8 }
 0x896   : > { %v4635_v13 = vpop.eup %4634 }
 0x897   : > { %v2355_v14 = vmul.f32 %v4635_v13, %v4042_v11 }
 0x899   : > { %v2357_v18 = vmul.f32 %v2355_v14, %v2317_v46 }
 0x89a   : > { %v4637_v15 = vpop.eup %4636 }
 0x89b   : > { %v2356_v17 = vmul.f32 %v4637_v15, %v4042_v11  ;;  %v2365_v21 = vadd.f32 %v4043_v19, %v2357_v18 }
 0x89d   : > { %v2358_v20 = vmul.f32 %v2356_v17, %v2318_v49 }
 0x89f   : > { %v2366_v22 = vadd.f32 %v4043_v19, %v2358_v20  ;;  %v4055_v20 = vld [vmem:[%s5643_s6] ss:$0 sm:$0xff]  ;;  %s5645_s6 = smov 16  }
 0x8a1   : > { %v2367_v23 = vpack.c.bf16 %v2366_v22, %v2365_v21 }
 0x8a3   : > { %4332 = vmatmul.mubr.msk.bf16.vlgmr.msra.gmra.mxu0 %vm1063_vm0, %v2367_v23 }
 0x8a4   : > { %4347 = vmatprep.mubr.msk.bf16.mxu0 %vm1063_vm0, %v4577_v55  ;;  %4344 = vmatpush3.bf16.msra.mxu0 %v4580_v50  ;;  %v2943_v55 = vpop.permute.xlu0 %2942 }
 0x8a5   : > { %4345 = vmatprep.subr.bf16.mxu0 %v4581_v2  ;;  %v2948_v57 = vsel %vm1324_vm6, %v2943_v55, 0 }
 0x8a8   : > { %4346 = vmatpush3.bf16.msra.mxu0 %v4581_v2  ;;  %v3166_v59 = vpop.permute.xlu0 %3165 }
 0x8a9   : > { %4357 = vmatprep.subr.bf16.mxu0 %v4811_v16  ;;  %v3171_v60 = vsel %vm1324_vm6, %v3166_v59, 0 }
 0x8ab   : > { %4348 = vmatmul.mubr.msk.bf16.vlgmr.msra.gmra.mxu0 %vm1063_vm0, %v5300_v54 }
 0x8ac   : > { %4359 = vmatprep.mubr.msk.bf16.mxu0 %vm4812_vm1, %v4811_v16  ;;  %v3280_v61 = vpop.permute.xlu0 %3279 }
 0x8ad   : > { %v3285_v63 = vsel %vm1324_vm6, %v3280_v61, 0 }
 0x8b0   : > { %v3393_v1 = vpop.permute.xlu0 %3392 }
 0x8b1   : > { %v3398_v4 = vsel %vm1324_vm6, %v3393_v1, 0 }
 0x963   : > { %v2428_v38 = vpop.f32.mrf.mxu0 }
 0x964   : > { %v2429_v40 = vadd.f32 %v4044_v36, %v2428_v38 }
 0x965   : > { %v4333_v39 = vpop.f32.mrf.mxu0 }
 0x966   : > { %v2435_v0 = vmul.f32 0.35355338, %v2429_v40 }
 0x967   : > { %v2431_v41 = vpop.f32.mrf.mxu0 }
 0x968   : > { %v2432_v43 = vadd.f32 %v4044_v36, %v2431_v41  ;;  %v1056_v41 = vld [vmem:[%s5379_s5 + $0x1] sm:$0x1]  ;;  %s5644_s5 = smov 8  }
 0x969   : > { %v4334_v44 = vpop.f32.mrf.mxu0  ;;  %vm1058_vm4 = vcmp.eq.f32.partialorder %v1056_v41, 0.0 }
 0x96a   : > { %v2436_v46 = vmul.f32 0.35355338, %v2432_v43 }
 0x96b   : > { %v4349_v19 = vpop.f32.mrf.mxu0 }
 0x96c   : > { %v2437_v47 = vpack.c.bf16 %v2436_v46, %v2435_v0  ;;  %v2594_v21 = vadd.f32 %v4349_v19, %v4055_v20 }
 0x96d   : > { %v2585_v22 = vpop.f32.mrf.mxu0 }
 0x96e   : > { %2712 = vrot.lane.b32.xlu1 %v2437_v47, %s5638_s18  ;;  %4354 = vmatmul.mubr.msk.bf16.vlgmr.msra.gmra.mxu1 %vm1324_vm6, %v2437_v47  ;;  %v3059_v49 = vrot.slane %v2437_v47, 4  ;;  %v2586_v24 = vadd.f32 %v4055_v20, %v2585_v22 }
 0x96f   : > { %4364 = vmatpush3.bf16.xpose.msra.mxu1 %v2721_v48  ;;  %4365 = vmatprep.mubr.msk.bf16.mxu1 %vm4812_vm1, %v4811_v16  ;;  %v4350_v23 = vpop.f32.mrf.mxu0 }
 0x970   : > { %4375 = vmatprep.subr.bf16.mxu1 %v4811_v16  ;;  %v2597_v25 = vadd.f32 %v4350_v23, %v4055_v20 }
 0x971   : > { %v2588_v26 = vpop.f32.mrf.mxu0 }
 0x972   : > { %2829 = vrot.lane.b32.xlu1 %v2526_v31, %s5640_s4  ;;  %v5385_v27 = vpack.c.bf16 %v2597_v25, %v2594_v21  ;;  %v2589_v28 = vadd.f32 %v4055_v20, %v2588_v26 }
 0x974   : > { %v5387_v29 = vpack.c.bf16 %v2589_v28, %v2586_v24 }
 0x976   : > { %2827 = vrot.lane.b32.xlu1 %v2437_v47, %s5640_s4  ;;  %4358 = vmatpush3.bf16.msra.mxu0 %v5387_v29 }
 0x977   : > { %4369 = vmatprep.subr.bf16.mxu0 %v4811_v16 }
 0x97a   : > { %2940 = vrot.lane.b32.xlu1 %v2437_v47, %s5639_s15  ;;  %v1060_v47 = vsel %vm1058_vm4, -1e+09, %v4811_v16 }
 0x97b   : > { %v3057_v50 = vrot.slane %v1060_v47, %v2605_v8 }
 0x97e   : > { %3162 = vrot.lane.b32.xlu1 %v3059_v49, %s5638_s18 }
 0x982   : > { %3277 = vrot.lane.b32.xlu1 %v3059_v49, %s5640_s4 }
 0x986   : > { %3390 = vrot.lane.b32.xlu1 %v3059_v49, %s5639_s15 }
 0x9e0   : > { %v2713_v51 = vpop.permute.xlu1 %2712 }
 0x9e1   : > { %4366 = vmatmul.mubr.msk.bf16.vlgmr.msra.gmra.mxu1 %vm1324_vm6, %v2713_v51 }
 0x9e2   : > { %4377 = vmatprep.mubr.msk.bf16.mxu1 %vm4812_vm1, %v4811_v16 }
 0x9e4   : > { %v2830_v52 = vpop.permute.xlu1 %2829 }
 0x9e5   : > { %v2835_v53 = vsel %vm1324_vm6, %v2830_v52, 0 }
 0x9e6   : > { %4376 = vmatpush3.bf16.xpose.msra.mxu1 %v2835_v53 }
 0x9e7   : > { %4387 = vmatprep.subr.bf16.mxu1 %v4811_v16 }
 0x9e8   : > { %v2828_v56 = vpop.permute.xlu1 %2827 }
 0x9ec   : > { %v2941_v54 = vpop.permute.xlu1 %2940 }
 0x9ed   : > { %4378 = vmatmul.mubr.msk.bf16.vlgmr.msra.gmra.mxu1 %vm1324_vm6, %v2828_v56 }
 0x9ee   : > { %4388 = vmatpush3.bf16.xpose.msra.mxu1 %v2948_v57  ;;  %4389 = vmatprep.mubr.msk.bf16.mxu1 %vm4812_vm1, %v4811_v16 }
 0x9ef   : > { %4399 = vmatprep.subr.bf16.mxu1 %v4811_v16 }
 0x9f0   : > { %v3163_v62 = vpop.permute.xlu1 %3162 }
 0x9f4   : > { %v3278_v3 = vpop.permute.xlu1 %3277 }
 0x9f5   : > { %4390 = vmatmul.mubr.msk.bf16.vlgmr.msra.gmra.mxu1 %vm1324_vm6, %v2941_v54 }
 0x9f6   : > { %4400 = vmatpush3.bf16.xpose.msra.mxu1 %v3064_v58  ;;  %4401 = vmatprep.mubr.msk.bf16.mxu1 %vm4812_vm1, %v4811_v16 }
 0x9f7   : > { %4411 = vmatprep.subr.bf16.mxu1 %v4811_v16 }
 0x9f8   : > { %v3391_v5 = vpop.permute.xlu1 %3390 }
 0x9fd   : > { %4402 = vmatmul.mubr.msk.bf16.vlgmr.msra.gmra.mxu1 %vm1324_vm6, %v3059_v49 }
 0x9fe   : > { %4412 = vmatpush3.bf16.xpose.msra.mxu1 %v3171_v60  ;;  %4413 = vmatprep.mubr.msk.bf16.mxu1 %vm4812_vm1, %v4811_v16 }
 0x9ff   : > { %4423 = vmatprep.subr.bf16.mxu1 %v4811_v16 }
 0xa05   : > { %4414 = vmatmul.mubr.msk.bf16.vlgmr.msra.gmra.mxu1 %vm1324_vm6, %v3163_v62 }
 0xa06   : > { %4424 = vmatpush3.bf16.xpose.msra.mxu1 %v3285_v63  ;;  %4425 = vmatprep.mubr.msk.bf16.mxu1 %vm4812_vm1, %v4811_v16 }
 0xa07   : > { %4435 = vmatprep.subr.bf16.mxu1 %v4811_v16 }
 0xa0d   : > { %4426 = vmatmul.mubr.msk.bf16.vlgmr.msra.gmra.mxu1 %vm1324_vm6, %v3278_v3 }
 0xa0e   : > { %4436 = vmatpush3.bf16.xpose.msra.mxu1 %v3398_v4  ;;  %4437 = vmatprep.mubr.msk.bf16.mxu1 %vm4812_vm1, %v4811_v16 }
 0xa0f   : > { %4447 = vmatprep.subr.bf16.mxu1 %v4811_v16 }
 0xa15   : > { %4438 = vmatmul.mubr.msk.bf16.vlgmr.msra.gmra.mxu1 %vm1324_vm6, %v3391_v5 }
 0xa16   : > { %4451 = vmatprep.mubr.msk.bf16.mxu1 %vm4812_vm1, %v4811_v16 }
 0xa2e   : > { %v2648_v11 = vpop.f32.mrf.mxu1 }
 0xa2f   : > { %v2649_v13 = vadd.f32 %v2648_v11, %v2606_v10 }
 0xa30   : > { %v4355_v14 = vpop.f32.mrf.mxu1 }
 0xa31   : > { %v2655_v15 = vsel %vm2654_vm3, %v2649_v13, -inf }
 0xa32   : > { %2656 = vmax.xlane.f32.xlu0 %v2655_v15  ;;  %v2651_v17 = vpop.f32.mrf.mxu1 }
 0xa34   : > { %v4356_v18 = vpop.f32.mrf.mxu1 }
 0xaa1   : > { %v2757_v30 = vpop.f32.mrf.mxu1 }
 0xaa2   : > { %v5391_v31 = vadd.f32 %v2757_v30, %v2606_v10 }
 0xaa3   : > { %v4367_v32 = vpop.f32.mrf.mxu1 }
 0xaa4   : > { %v2763_v33 = vsel %vm2654_vm3, %v5391_v31, -inf }
 0xaa5   : > { %2764 = vmax.xlane.f32.xlu1 %v2763_v33  ;;  %v2760_v34 = vpop.f32.mrf.mxu1 }
 0xaa7   : > { %v4368_v35 = vpop.f32.mrf.mxu1 }
 0xaad   : > { %v2871_v36 = vpop.f32.mrf.mxu1 }
 0xaae   : > { %v2872_v38 = vadd.f32 %v2871_v36, %v2606_v10 }
 0xaaf   : > { %v4379_v39 = vpop.f32.mrf.mxu1 }
 0xab0   : > { %v2877_v40 = vsel %vm2654_vm3, %v2872_v38, -inf }
 0xab1   : > { %2878 = vmax.xlane.f32.xlu0 %v2877_v40  ;;  %v2874_v43 = vpop.f32.mrf.mxu1 }
 0xab3   : > { %v4380_v44 = vpop.f32.mrf.mxu1 }
 0xab5   : > { %v2984_v0 = vpop.f32.mrf.mxu1 }
 0xab6   : > { %v2985_v46 = vadd.f32 %v2984_v0, %v2606_v10 }
 0xab7   : > { %v4391_v45 = vpop.f32.mrf.mxu1 }
 0xab8   : > { %v2990_v48 = vsel %vm2654_vm3, %v2985_v46, -inf }
 0xab9   : > { %2991 = vmax.xlane.f32.xlu0 %v2990_v48  ;;  %v2987_v49 = vpop.f32.mrf.mxu1 }
 0xabb   : > { %v2657_v2 = vpop.xlane.xlu0 %2656  ;;  %v4392_v51 = vpop.f32.mrf.mxu1 }
 0xabc   : > { %v2658_v52 = vsub.f32 %v2649_v13, %v2657_v2 }
 0xabd   : > { %v3100_v53 = vpop.f32.mrf.mxu1 }
 0xabe   : > { %v3101_v55 = vadd.f32 %v3100_v53, %v3057_v50  ;;  %v2659_v57 = vmul.f32 1.442695, %v2658_v52 }
 0xabf   : > { %v4403_v56 = vpop.f32.mrf.mxu1 }
 0xac0   : > { %v3106_v54 = vsel %vm2654_vm3, %v3101_v55, -inf  ;;  %4638 = vpow2.f32 %v2659_v57 }
 0xac1   : > { %3107 = vmax.xlane.f32.xlu0 %v3106_v54  ;;  %v3103_v58 = vpop.f32.mrf.mxu1 }
 0xac3   : > { %v4404_v59 = vpop.f32.mrf.mxu1 }
 0xac5   : > { %v3207_v60 = vpop.f32.mrf.mxu1 }
 0xac6   : > { %v5400_v61 = vadd.f32 %v3207_v60, %v3057_v50 }
 0xac7   : > { %v4415_v62 = vpop.f32.mrf.mxu1 }
 0xac8   : > { %v3213_v63 = vsel %vm2654_vm3, %v5400_v61, -inf }
 0xac9   : > { %3214 = vmax.xlane.f32.xlu1 %v3213_v63  ;;  %v3210_v1 = vpop.f32.mrf.mxu1 }
 0xacb   : > { %v4416_v3 = vpop.f32.mrf.mxu1 }
 0xacd   : > { %v3321_v4 = vpop.f32.mrf.mxu1  ;;  %v4639_v12 = vpop.eup %4638 }
 0xace   : > { %v3322_v5 = vadd.f32 %v3321_v4, %v3057_v50  ;;  %v2661_v10 = vsel %vm2654_vm3, %v4639_v12, 0.0 }
 0xacf   : > { %v4427_v6 = vpop.f32.mrf.mxu1 }
 0xad0   : > { %v3327_v7 = vsel %vm2654_vm3, %v3322_v5, -inf }
 0xad1   : > { %3328 = vmax.xlane.f32.xlu0 %v3327_v7  ;;  %v3324_v8 = vpop.f32.mrf.mxu1 }
 0xad3   : > { %v4428_v9 = vpop.f32.mrf.mxu1 }
 0xad5   : > { %2662 = vadd.xlane.f32.xlu0 %v2661_v10  ;;  %v3434_v11 = vpop.f32.mrf.mxu1 }
 0xad6   : > { %v3435_v13 = vadd.f32 %v3434_v11, %v3057_v50 }
 0xad7   : > { %v4439_v14 = vpop.f32.mrf.mxu1 }
 0xad8   : > { %v3440_v15 = vsel %vm2654_vm3, %v3435_v13, -inf }
 0xad9   : > { %3441 = vmax.xlane.f32.xlu1 %v3440_v15  ;;  %v3437_v17 = vpop.f32.mrf.mxu1 }
 0xadb   : > { %v4440_v18 = vpop.f32.mrf.mxu1 }
 0xaea   : > { %2776 = vrot.lane.b32.xlu1 %v5387_v29, %s5638_s18 }
 0xaeb   : > { %2889 = vrot.lane.b32.xlu0 %v5387_v29, %s5640_s4 }
 0xb2e   : > { %v2765_v19 = vpop.xlane.xlu1 %2764 }
 0xb2f   : > { %v2766_v20 = vsub.f32 %v5391_v31, %v2765_v19 }
 0xb31   : > { %v2767_v21 = vmul.f32 1.442695, %v2766_v20 }
 0xb33   : > { %4640 = vpow2.f32 %v2767_v21 }
 0xb3a   : > { %v2879_v22 = vpop.xlane.xlu0 %2878 }
 0xb3b   : > { %v2880_v23 = vsub.f32 %v2872_v38, %v2879_v22 }
 0xb3d   : > { %v2881_v24 = vmul.f32 1.442695, %v2880_v23 }
 0xb3f   : > { %4642 = vpow2.f32 %v2881_v24 }
 0xb40   : > { %v4641_v25 = vpop.eup %4640 }
 0xb41   : > { %v2769_v26 = vsel %vm2654_vm3, %v4641_v25, 0.0 }
 0xb42   : > { %v2992_v28 = vpop.xlane.xlu0 %2991  ;;  %2770 = vadd.xlane.f32.xlu1 %v2769_v26 }
 0xb43   : > { %v2993_v30 = vsub.f32 %v2985_v46, %v2992_v28 }
 0xb45   : > { %v2994_v32 = vmul.f32 1.442695, %v2993_v30 }
 0xb47   : > { %4644 = vpow2.f32 %v2994_v32 }
 0xb4a   : > { %v3108_v33 = vpop.xlane.xlu0 %3107 }
 0xb4b   : > { %v3109_v34 = vsub.f32 %v3101_v55, %v3108_v33 }
 0xb4c   : > { %v4643_v35 = vpop.eup %4642 }
 0xb4d   : > { %v3110_v36 = vmul.f32 1.442695, %v3109_v34  ;;  %v2883_v31 = vsel %vm2654_vm3, %v4643_v35, 0.0 }
 0xb4e   : > { %2884 = vadd.xlane.f32.xlu0 %v2883_v31 }
 0xb4f   : > { %4646 = vpow2.f32 %v3110_v36 }
 0xb52   : > { %v3215_v0 = vpop.xlane.xlu1 %3214 }
 0xb53   : > { %v3216_v51 = vsub.f32 %v5400_v61, %v3215_v0 }
 0xb54   : > { %v5414_v39 = vpop.eup %4644 }
 0xb55   : > { %v2996_v38 = vsel %vm2654_vm3, %v5414_v39, 0.0  ;;  %v3217_v52 = vmul.f32 1.442695, %v3216_v51 }
 0xb56   : > { %2997 = vadd.xlane.f32.xlu1 %v2996_v38 }
 0xb5a   : > { %v3329_v40 = vpop.xlane.xlu0 %3328 }
 0xb5b   : > { %v3330_v50 = vsub.f32 %v3322_v5, %v3329_v40 }
 0xb5c   : > { %v5418_v41 = vpop.eup %4646 }
 0xb5d   : > { %v3112_v43 = vsel %vm2654_vm3, %v5418_v41, 0.0  ;;  %v3331_v2 = vmul.f32 1.442695, %v3330_v50 }
 0xb5e   : > { %v2663_v44 = vpop.xlane.xlu0 %2662  ;;  %3113 = vadd.xlane.f32.xlu0 %v3112_v43 }
 0xb5f   : > { %4648 = vrcp.f32 %v2663_v44 }
 0xb60   : > { %4650 = vpow2.f32 %v3331_v2 }
 0xb61   : > { %4652 = vpow2.f32 %v3217_v52 }
 0xb62   : > { %v3442_v46 = vpop.xlane.xlu1 %3441  ;;  %v2890_v61 = vpop.permute.xlu0 %2889 }
 0xb63   : > { %v3443_v53 = vsub.f32 %v3435_v13, %v3442_v46 }
 0xb65   : > { %v3444_v55 = vmul.f32 1.442695, %v3443_v53 }
 0xb66   : > { %v2777_v49 = vpop.permute.xlu1 %2776 }
 0xb67   : > { %3226 = vrot.lane.b32.xlu1 %v5385_v27, %s5638_s18  ;;  %4654 = vpow2.f32 %v3444_v55  ;;  %s5648_s18 = sld [smem:[#allocation23_spill]] }
 0xb6c   : > { %v4649_v45 = vpop.eup %4648 }
 0xb6d   : > { %v2665_v47 = vmul.f32 %v4649_v45, %v4639_v12  ;;  %v5431_v56 = vpop.eup %4650 }
 0xb6e   : > { %v3333_v57 = vsel %vm2654_vm3, %v5431_v56, 0.0  ;;  %v4653_v54 = vpop.eup %4652 }
 0xb6f   : > { %v2666_v48 = vpack.c.bf16 %v2665_v47, %v2665_v47 }
 0xb71   : > { %4360 = vmatmul.mubr.msk.bf16.vlgmr.msra.gmra.mxu0 %vm2654_vm3, %v2666_v48 }
 0xb72   : > { %4370 = vmatpush3.bf16.msra.mxu0 %v2777_v49  ;;  %4371 = vmatprep.mubr.msk.bf16.mxu0 %vm4812_vm1, %v4811_v16 }
 0xb73   : > { %4381 = vmatprep.subr.bf16.mxu0 %v4811_v16 }
 0xb74   : > { %3002 = vrot.lane.b32.xlu0 %v5387_v29, %s5639_s15  ;;  %v3219_v29 = vsel %vm2654_vm3, %v4653_v54, 0.0  ;;  %v5436_v58 = vpop.eup %4654 }
 0xb75   : > { %v3446_v59 = vsel %vm2654_vm3, %v5436_v58, 0.0 }
 0xb8b   : > { %3334 = vadd.xlane.f32.xlu1 %v3333_v57 }
 0xb93   : > { %3220 = vadd.xlane.f32.xlu0 %v3219_v29 }
 0xb97   : > { %3447 = vadd.xlane.f32.xlu0 %v3446_v59 }
 0xb9c   : > { %3452 = vrot.lane.b32.xlu1 %v5385_v27, %s5639_s15  ;;  %s5649_s15 = sld [smem:[#allocation26_spill]] }
 0xbad   : > { %3339 = vrot.lane.b32.xlu0 %v5385_v27, %s5640_s4  ;;  %s5646_s4 = sld [smem:[#allocation22_spill]] }
 0xbb3   : > { %v4582_v57 = vld [vmem:[%s5646_s4 + $0x8] sm:$0xff]   ;;  %v4583_v29 = vld [vmem:[%s5646_s4] sm:$0xff]  }
 0xbb4   : > { %4448 = vmatpush3.bf16.msra.mxu1 %v4582_v57 }
 0xbb5   : > { %4449 = vmatprep.subr.bf16.mxu1 %v4811_v16 }
 0xbb8   : > { %4450 = vmatpush3.bf16.msra.mxu1 %v4583_v29 }
 0xbb9   : > { %4463 = vmatprep.subr.bf16.mxu1 %v4811_v16 }
 0xbcb   : > { %v2771_v60 = vpop.xlane.xlu1 %2770 }
 0xbcc   : > { %4656 = vrcp.f32 %v2771_v60 }
 0xbd7   : > { %v2885_v62 = vpop.xlane.xlu0 %2884 }
 0xbd8   : > { %4658 = vrcp.f32 %v2885_v62 }
 0xbd9   : > { %v4657_v63 = vpop.eup %4656 }
 0xbda   : > { %v2773_v1 = vmul.f32 %v4657_v63, %v4641_v25 }
 0xbdc   : > { %v2774_v3 = vpack.c.bf16 %v2773_v1, %v2773_v1 }
 0xbde   : > { %4372 = vmatmul.mubr.msk.bf16.vlgmr.msra.gmra.mxu0 %vm2654_vm3, %v2774_v3 }
 0xbdf   : > { %4382 = vmatpush3.bf16.msra.mxu0 %v2890_v61  ;;  %v2998_v4 = vpop.xlane.xlu1 %2997  ;;  %4383 = vmatprep.mubr.msk.bf16.mxu0 %vm4812_vm1, %v4811_v16 }
 0xbe0   : > { %4660 = vrcp.f32 %v2998_v4  ;;  %4393 = vmatprep.subr.bf16.mxu0 %v4811_v16 }
 0xbe3   : > { %v3227_v17 = vpop.permute.xlu1 %3226 }
 0xbe5   : > { %v4659_v5 = vpop.eup %4658 }
 0xbe6   : > { %v2887_v6 = vmul.f32 %v4659_v5, %v4643_v35 }
 0xbe7   : > { %v3114_v7 = vpop.xlane.xlu0 %3113 }
 0xbe8   : > { %4662 = vrcp.f32 %v3114_v7  ;;  %v2888_v12 = vpack.c.bf16 %v2887_v6, %v2887_v6 }
 0xbea   : > { %4384 = vmatmul.mubr.msk.bf16.vlgmr.msra.gmra.mxu0 %vm2654_vm3, %v2888_v12 }
 0xbeb   : > { %v3003_v8 = vpop.permute.xlu0 %3002  ;;  %4395 = vmatprep.mubr.msk.bf16.mxu0 %vm4812_vm1, %v4811_v16 }
 0xbec   : > { %4394 = vmatpush3.bf16.msra.mxu0 %v3003_v8 }
 0xbed   : > { %v4661_v9 = vpop.eup %4660  ;;  %4405 = vmatprep.subr.bf16.mxu0 %v4811_v16 }
 0xbee   : > { %v3000_v10 = vmul.f32 %v4661_v9, %v5414_v39 }
 0xbf0   : > { %v3001_v11 = vpack.c.bf16 %v3000_v10, %v3000_v10 }
 0xbf2   : > { %4396 = vmatmul.mubr.msk.bf16.vlgmr.msra.gmra.mxu0 %vm2654_vm3, %v3001_v11 }
 0xbf3   : > { %4406 = vmatpush3.bf16.msra.mxu0 %v5385_v27  ;;  %4407 = vmatprep.mubr.msk.bf16.mxu0 %vm4812_vm1, %v4811_v16 }
 0xbf4   : > { %4417 = vmatprep.subr.bf16.mxu0 %v4811_v16 }
 0xbf5   : > { %v4663_v13 = vpop.eup %4662 }
 0xbf6   : > { %v3116_v14 = vmul.f32 %v4663_v13, %v5418_v41  ;;  %v4076_v13 = vld [vmem:[%s5648_s18] ss:$0 sm:$0xff]  ;;  %s5653_s18 = sld [smem:[#allocation27_spill]] }
 0xbf8   : > { %v3117_v15 = vpack.c.bf16 %v3116_v14, %v3116_v14 }
 0xbfa   : > { %4408 = vmatmul.mubr.msk.bf16.vlgmr.msra.gmra.mxu0 %vm2654_vm3, %v3117_v15 }
 0xbfb   : > { %4418 = vmatpush3.bf16.msra.mxu0 %v3227_v17  ;;  %4419 = vmatprep.mubr.msk.bf16.mxu0 %vm4812_vm1, %v4811_v16 }
 0xbfc   : > { %4429 = vmatprep.subr.bf16.mxu0 %v4811_v16 }
 0xc14   : > { %v3335_v27 = vpop.xlane.xlu1 %3334 }
 0xc18   : > { %v3453_v34 = vpop.permute.xlu1 %3452 }
 0xc1c   : > { %v3221_v18 = vpop.xlane.xlu0 %3220 }
 0xc1d   : > { %4664 = vrcp.f32 %v3221_v18 }
 0xc1e   : > { %4666 = vrcp.f32 %v3335_v27 }
 0xc20   : > { %v3448_v19 = vpop.xlane.xlu0 %3447 }
 0xc21   : > { %4668 = vrcp.f32 %v3448_v19 }
 0xc24   : > { %v3340_v24 = vpop.permute.xlu0 %3339 }
 0xc2a   : > { %v4665_v20 = vpop.eup %4664 }
 0xc2b   : > { %v3223_v21 = vmul.f32 %v4665_v20, %v4653_v54  ;;  %v4667_v23 = vpop.eup %4666 }
 0xc2c   : > { %v3337_v25 = vmul.f32 %v4667_v23, %v5431_v56 }
 0xc2d   : > { %v3224_v22 = vpack.c.bf16 %v3223_v21, %v3223_v21 }
 0xc2e   : > { %v3338_v30 = vpack.c.bf16 %v3337_v25, %v3337_v25  ;;  %v4669_v32 = vpop.eup %4668 }
 0xc2f   : > { %4420 = vmatmul.mubr.msk.bf16.vlgmr.msra.gmra.mxu0 %vm2654_vm3, %v3224_v22  ;;  %v3450_v36 = vmul.f32 %v4669_v32, %v5436_v58 }
 0xc30   : > { %4430 = vmatpush3.bf16.msra.mxu0 %v3340_v24  ;;  %4431 = vmatprep.mubr.msk.bf16.mxu0 %vm4812_vm1, %v4811_v16 }
 0xc31   : > { %4441 = vmatprep.subr.bf16.mxu0 %v4811_v16  ;;  %v2704_v26 = vpop.f32.mrf.mxu0  ;;  %v3451_v31 = vpack.c.bf16 %v3450_v36, %v3450_v36  ;;  %v4585_v36 = vld [vmem:[%s5649_s15] sm:$0xff]  }
 0xc32   : > { %2710 = vst.msk [vmem:[#allocation2] sm:$0xff] %vm1324_vm6, %v2704_v26 }
 0xc33   : > { %v4361_v28 = vpop.f32.mrf.mxu0 }
 0xc35   : > { %v2707_v33 = vpop.f32.mrf.mxu0 }
 0xc37   : > { %4432 = vmatmul.mubr.msk.bf16.vlgmr.msra.gmra.mxu0 %vm2654_vm3, %v3338_v30  ;;  %v4362_v35 = vpop.f32.mrf.mxu0 }
 0xc38   : > { %4442 = vmatpush3.bf16.msra.mxu0 %v3453_v34  ;;  %4443 = vmatprep.mubr.msk.bf16.mxu0 %vm4812_vm1, %v4811_v16  ;;  %v4584_v35 = vld [vmem:[%s5649_s15 + $0x8] sm:$0xff]  }
 0xc39   : > { %4455 = vmatprep.subr.bf16.mxu0 %v4811_v16 }
 0xc3f   : > { %4444 = vmatmul.mubr.msk.bf16.vlgmr.msra.gmra.mxu0 %vm2654_vm3, %v3451_v31  ;;  %v4586_v31 = vld [vmem:[%s5650_s3 + $0x18] sm:$0xff]  }
 0xc40   : > { %4459 = vmatprep.mubr.msk.bf16.mxu0 %vm4812_vm1, %v4811_v16  ;;  %4456 = vmatpush3.bf16.msra.mxu0 %v4584_v35 }
 0xc41   : > { %4457 = vmatprep.subr.bf16.mxu0 %v4811_v16 }
 0xc44   : > { %4458 = vmatpush3.bf16.msra.mxu0 %v4585_v36 }
 0xc9e   : > { %v2816_v39 = vpop.f32.mrf.mxu0 }
 0xc9f   : > { %2823 = vrot.lane.b32.xlu1 %v2816_v39, %s5644_s5 }
 0xca0   : > { %v4373_v38 = vpop.f32.mrf.mxu0 }
 0xca2   : > { %v2819_v40 = vpop.f32.mrf.mxu0 }
 0xca4   : > { %v4374_v41 = vpop.f32.mrf.mxu0 }
 0xcaa   : > { %v2929_v43 = vpop.f32.mrf.mxu0 }
 0xcab   : > { %2936 = vrot.lane.b32.xlu1 %v2929_v43, %s5645_s6 }
 0xcac   : > { %v4385_v44 = vpop.f32.mrf.mxu0 }
 0xcae   : > { %v2932_v0 = vpop.f32.mrf.mxu0 }
 0xcb0   : > { %v4386_v46 = vpop.f32.mrf.mxu0 }
 0xcb2   : > { %v3042_v45 = vpop.f32.mrf.mxu0 }
 0xcb3   : > { %3049 = vrot.lane.b32.xlu0 %v3042_v45, %s5647_s16 }
 0xcb4   : > { %v4397_v47 = vpop.f32.mrf.mxu0 }
 0xcb6   : > { %v3045_v48 = vpop.f32.mrf.mxu0 }
 0xcb8   : > { %v4398_v49 = vpop.f32.mrf.mxu0 }
 0xcba   : > { %v3155_v50 = vpop.f32.mrf.mxu0 }
 0xcbb   : > { %3161 = vst.msk [vmem:[#allocation2 + $0x8] sm:$0xff] %vm1324_vm6, %v3155_v50 }
 0xcbc   : > { %v4409_v2 = vpop.f32.mrf.mxu0 }
 0xcbe   : > { %v3158_v51 = vpop.f32.mrf.mxu0 }
 0xcc0   : > { %v4410_v52 = vpop.f32.mrf.mxu0 }
 0xcef   : > { %v3266_v53 = vpop.f32.mrf.mxu0 }
 0xcf0   : > { %3273 = vrot.lane.b32.xlu1 %v3266_v53, %s5644_s5 }
 0xcf1   : > { %v4421_v55 = vpop.f32.mrf.mxu0 }
 0xcf3   : > { %v3269_v56 = vpop.f32.mrf.mxu0 }
 0xcf5   : > { %v4422_v54 = vpop.f32.mrf.mxu0 }
 0xcf7   : > { %v3379_v58 = vpop.f32.mrf.mxu0 }
 0xcf8   : > { %3386 = vrot.lane.b32.xlu1 %v3379_v58, %s5645_s6  ;;  %s5651_s6 = sld [smem:[#allocation24_spill]] }
 0xcf9   : > { %v4433_v59 = vpop.f32.mrf.mxu0 }
 0xcfb   : > { %v3382_v60 = vpop.f32.mrf.mxu0 }
 0xcfd   : > { %v4434_v61 = vpop.f32.mrf.mxu0 }
 0xcfe   : > { %v4080_v53 = vld [vmem:[%s5651_s6] ss:$0 sm:$0xff]  ;;  %s1023_s6 = sand.u32 1, %s4768_s1  }
 0xcff   : > { %v3492_v62 = vpop.f32.mrf.mxu0  ;;  %s5543_s9 = scalar_lea.sflag [#allocation5], %s1023_s6 }
 0xd00   : > { %3499 = vrot.lane.b32.xlu1 %v3492_v62, %s5647_s16  ;;  %s5652_s16 = sld [smem:[#allocation25_spill]] }
 0xd01   : > { %v4445_v63 = vpop.f32.mrf.mxu0 }
 0xd02   : > { %v4587_v63 = vld [vmem:[%s5650_s3 + $0x10] sm:$0xff]  }
 0xd03   : > { %v3495_v1 = vpop.f32.mrf.mxu0 }
 0xd04   : > { %v4588_v1 = vld [vmem:[%s5650_s3 + $0x8] sm:$0xff]  }
 0xd05   : > { %v4446_v3 = vpop.f32.mrf.mxu0 }
 0xd06   : > { %v4081_v58 = vld [vmem:[%s5652_s16] ss:$0 sm:$0xff]  ;;  %s4001_s16 = sshll.u32 %s1023_s6, 4 }
 0xd07   : > { %v4589_v3 = vld [vmem:[%s5650_s3] sm:$0xff]   ;;  %s1025_s3 = scalar_lea.vmem [#allocation6], %s4001_s16 }
 0xd08   : > { %s3868_s4 = sshll.u32 %s1025_s3, 4  ;;  %s5540_s4 = int_to_ptr.vmem [resolvable:$true] %s3868_s4 }
 0xd09   : > { %s4712_s10 = scalar_lea.vmem %s5540_s4, 256 }
 0xd0a   : > { %p4713_p9 = scmp.ne.s32.totalorder %s5540_s4, %s4712_s10 }
 0xd0c   : > { %p4714_p10 = pnand %p4713_p9, %p5029_p5 }
 0xd0e   : > { %p4715_p12 = pneg %p4714_p10 }
 0xd11   : > { %v2824_v4 = vpop.permute.xlu1 %2823 }
 0xd12   : > { %2826 = vst.msk [vmem:[#allocation2] sm:$0xff] %vm1548_vm9, %v2824_v4  ;;  %v4082_v4 = vld [vmem:[%s5653_s18] ss:$0 sm:$0xff]  ;;  %s4100_s18 = sshll.u32 %s5012_s0, 8  ;;  %s4819_s0 = smov [#allocation6]  }
 0xd13   : > { %s5538_s8 = scalar_lea.hbm %s4989_s12, %s4100_s18  ;;  %s4716_s16 = sshll.u32 %s4819_s0, 4  ;;  %s4717_s16 = int_to_ptr.vmem [resolvable:$false] %s4716_s16 }
 0xd14   : > { %s4718_s18 = scalar_lea.vmem %s4717_s16, 512  ;;  %p4719_p13 = scmp.lt.s32.totalorder %s5540_s4, %s4717_s16 }
 0xd15   : > { %p4720_p0 = scmp.lt.s32.totalorder %s4718_s18, %s4712_s10 }
 0xd17   : > { %p4721_p1 = por %p4720_p0, %p4719_p13 }
 0xd19   : > { %p4722_p2 = pnand %p4721_p1, %p4715_p12 }
 0xd1d   : > { %v2937_v5 = vpop.permute.xlu1 %2936 }
 0xd1e   : > { %2939 = vst.msk [vmem:[#allocation2] sm:$0xff] %vm1664_vm10, %v2937_v5 }
 0xd25   : > { %v3050_v6 = vpop.permute.xlu0 %3049 }
 0xd26   : > { %3052 = vst.msk [vmem:[#allocation2] sm:$0xff] %vm1780_vm11, %v3050_v6 }
 0xd2d   : > { %v3503_v9 = vld [vmem:[#allocation2] sm:$0xff] }
 0xd62   : > { %v3274_v7 = vpop.permute.xlu1 %3273 }
 0xd63   : > { %3276 = vst.msk [vmem:[#allocation2 + $0x8] sm:$0xff] %vm1548_vm9, %v3274_v7 }
 0xd6a   : > { %v3387_v12 = vpop.permute.xlu1 %3386 }
 0xd6b   : > { %3389 = vst.msk [vmem:[#allocation2 + $0x8] sm:$0xff] %vm1664_vm10, %v3387_v12 }
 0xd72   : > { %v3500_v8 = vpop.permute.xlu1 %3499 }
 0xd73   : > { %3502 = vst.msk [vmem:[#allocation2 + $0x8] sm:$0xff] %vm1780_vm11, %v3500_v8 }
 0xd7a   : > { %v3504_v10 = vld [vmem:[#allocation2 + $0x8] sm:$0xff] }
 0xd7b   : > { %v3505_v11 = vpack.c.bf16 %v3504_v10, %v3503_v9 }
 0xd7d   : > { %4452 = vmatmul.mubr.msk.bf16.vlgmr.msra.gmra.mxu1 %vm1063_vm0, %v3505_v11 }
 0xd7e   : > { %4471 = vmatprep.mubr.msk.bf16.mxu1 %vm4812_vm1, %v4811_v16  ;;  %4464 = vmatpush3.bf16.msra.mxu1 %v4586_v31 }
 0xd7f   : > { %4465 = vmatprep.subr.bf16.mxu1 %v4811_v16 }
 0xd82   : > { %4466 = vmatpush3.bf16.msra.mxu1 %v4587_v63 }
 0xd83   : > { %4467 = vmatprep.subr.bf16.mxu1 %v4811_v16 }
 0xd86   : > { %4468 = vmatpush3.bf16.msra.mxu1 %v4588_v1 }
 0xd87   : > { %4469 = vmatprep.subr.bf16.mxu1 %v4811_v16 }
 0xd8a   : > { %4470 = vmatpush3.bf16.msra.mxu1 %v4589_v3 }
 0xe3d   : > { %v3566_v14 = vpop.f32.mrf.mxu1 }
 0xe3e   : > { %v3567_v15 = vadd.f32 %v4076_v13, %v3566_v14  ;;  %v4086_v14 = vld [vmem:[#allocation3] ss:$0 sm:$0xff] }
 0xe3f   : > { %v4453_v17 = vpop.f32.mrf.mxu1 }
 0xe40   : > { %v5499_v18 = vadd.f32 %v3567_v15, %v5284_v37 }
 0xe41   : > { %v3569_v27 = vpop.f32.mrf.mxu1 }
 0xe42   : > { %v3570_v19 = vadd.f32 %v4076_v13, %v3569_v27  ;;  %v3577_v20 = vsel %vm1063_vm0, %v5499_v18, 0.0 }
 0xe43   : > { %3578 = vadd.xlane.f32.xlu0 %v3577_v20  ;;  %v4454_v21 = vpop.f32.mrf.mxu1 }
 0xe44   : > { %v5504_v22 = vadd.f32 %v3570_v19, %v5289_v42 }
 0xe46   : > { %v3580_v23 = vsel %vm1063_vm0, %v5504_v22, 0.0 }
 0xe47   : > { %3581 = vadd.xlane.f32.xlu1 %v3580_v23 }
 0xecc   : > { %v3579_v24 = vpop.xlane.xlu0 %3578 }
 0xecd   : > { %v3583_v25 = vmul.f32 0.03125, %v3579_v24 }
 0xecf   : > { %v3585_v37 = vsub.f32 %v5499_v18, %v3583_v25 }
 0xed0   : > { %v3582_v26 = vpop.xlane.xlu1 %3581 }
 0xed1   : > { %v3584_v28 = vmul.f32 0.03125, %v3582_v26  ;;  %v3587_v30 = vmul.f32 %v3585_v37, %v3585_v37 }
 0xed3   : > { %v3586_v32 = vsub.f32 %v5504_v22, %v3584_v28  ;;  %v3589_v33 = vsel %vm1063_vm0, %v3587_v30, 0.0 }
 0xed4   : > { %3590 = vadd.xlane.f32.xlu0 %v3589_v33 }
 0xed5   : > { %v3588_v42 = vmul.f32 %v3586_v32, %v3586_v32 }
 0xed7   : > { %v3592_v34 = vsel %vm1063_vm0, %v3588_v42, 0.0 }
 0xed8   : > { %3593 = vadd.xlane.f32.xlu0 %v3592_v34 }
 0xf5d   : > { %v3591_v39 = vpop.xlane.xlu0 %3590 }
 0xf5e   : > { %v3595_v38 = vmul.f32 0.032258064, %v3591_v39 }
 0xf60   : > { %4670 = vrsqrt.f32 %v3595_v38  ;;  %vm3599_vm1 = vcmp.eq.f32.partialorder %v3595_v38, inf  ;;  %v3602_v0 = vand.u32 2147483648, %v3595_v38  ;;  %vm3601_vm5 = vcmp.eq.f32.partialorder %v3595_v38, 0.0 }
 0xf61   : > { %v3594_v40 = vpop.xlane.xlu0 %3593 }
 0xf62   : > { %v3596_v41 = vmul.f32 0.032258064, %v3594_v40 }
 0xf64   : > { %4672 = vrsqrt.f32 %v3596_v41  ;;  %vm3606_vm6 = vcmp.eq.f32.partialorder %v3596_v41, inf  ;;  %v3609_v50 = vand.u32 2147483648, %v3596_v41  ;;  %vm3608_vm7 = vcmp.eq.f32.partialorder %v3596_v41, 0.0 }
 0xf6d   : > { %v4671_v43 = vpop.eup %4670 }
 0xf6e   : > { %v3598_v44 = vmul.f32 %v4671_v43, %v3595_v38 }
 0xf70   : > { %v3600_v46 = vsel %vm3599_vm1, %v3595_v38, %v3598_v44 }
 0xf71   : > { %v4673_v45 = vpop.eup %4672  ;;  %v3603_v47 = vsel %vm3601_vm5, %v3602_v0, %v3600_v46 }
 0xf72   : > { %v3611_v48 = vadd.f32 1e-06, %v3603_v47  ;;  %v3605_v49 = vmul.f32 %v4673_v45, %v3596_v41 }
 0xf74   : > { %4674 = vrcp.f32 %v3611_v48  ;;  %v3607_v2 = vsel %vm3606_vm6, %v3596_v41, %v3605_v49 }
 0xf75   : > { %v3610_v51 = vsel %vm3608_vm7, %v3609_v50, %v3607_v2  ;;  %v4092_v2 = vld [vmem:[%s4979_s27] ss:$0 sm:$0xff] }
 0xf76   : > { %v3612_v52 = vadd.f32 1e-06, %v3610_v51 }
 0xf78   : > { %4676 = vrcp.f32 %v3612_v52 }
 0xf81   : > { %v4675_v55 = vpop.eup %4674 }
 0xf82   : > { %v3623_v56 = vmul.f32 %v4675_v55, %v4080_v53 }
 0xf84   : > { %v3625_v29 = vmul.f32 %v3623_v56, %v3585_v37 }
 0xf85   : > { %v4677_v57 = vpop.eup %4676 }
 0xf86   : > { %v3624_v54 = vmul.f32 %v4677_v57, %v4080_v53  ;;  %v3633_v60 = vadd.f32 %v4081_v58, %v3625_v29  ;;  %v4093_v53 = vld [vmem:[%s4984_s20] ss:$0 sm:$0xff] }
 0xf88   : > { %v3626_v59 = vmul.f32 %v3624_v54, %v3586_v32 }
 0xf8a   : > { %v3634_v61 = vadd.f32 %v4081_v58, %v3626_v59 }
 0xf8c   : > { %v3635_v62 = vpack.c.bf16 %v3634_v61, %v3633_v60 }
 0xf8e   : > { %4460 = vmatmul.mubr.msk.bf16.vlgmr.msra.gmra.mxu0 %vm1063_vm0, %v3635_v62 }
0x104e   : > { %v3696_v5 = vpop.f32.mrf.mxu0 }
0x104f   : > { %v3697_v7 = vadd.f32 %v4082_v4, %v3696_v5 }
0x1050   : > { %v4461_v6 = vpop.f32.mrf.mxu0 }
0x1051   : > { %v3703_v10 = vmax.f32 %v3697_v7, 0.0 }
0x1052   : > { %v3699_v12 = vpop.f32.mrf.mxu0 }
0x1053   : > { %v3700_v8 = vadd.f32 %v4082_v4, %v3699_v12 }
0x1054   : > { %v4462_v9 = vpop.f32.mrf.mxu0 }
0x1055   : > { %v3704_v11 = vmax.f32 %v3700_v8, 0.0 }
0x1057   : > { %v3705_v13 = vpack.c.bf16 %v3704_v11, %v3703_v10 }
0x1059   : > { %4472 = vmatmul.mubr.msk.bf16.vlgmr.msra.gmra.mxu1 %vm3745_vm8, %v3705_v13 }
0x1119   : > { %v3783_v15 = vpop.f32.mrf.mxu1 }
0x111a   : > { %v3784_v17 = vadd.f32 %v4086_v14, %v3783_v15 }
0x111b   : > { %v4473_v27 = vpop.f32.mrf.mxu1 }
0x111c   : > { %v3790_v16 = vadd.f32 %v3784_v17, %v5499_v18 }
0x111d   : > { %v3786_v19 = vpop.f32.mrf.mxu1 }
0x111e   : > { %v3787_v20 = vadd.f32 %v4086_v14, %v3786_v19  ;;  %v3794_v21 = vsel %vm1063_vm0, %v3790_v16, 0.0 }
0x111f   : > { %3795 = vadd.xlane.f32.xlu0 %v3794_v21  ;;  %v4474_v23 = vpop.f32.mrf.mxu1 }
0x1120   : > { %v3791_v24 = vadd.f32 %v3787_v20, %v5504_v22 }
0x1122   : > { %v3797_v25 = vsel %vm1063_vm0, %v3791_v24, 0.0 }
0x1123   : > { %3798 = vadd.xlane.f32.xlu1 %v3797_v25 }
0x11a8   : > { %v3796_v37 = vpop.xlane.xlu0 %3795 }
0x11a9   : > { %v3800_v26 = vmul.f32 0.03125, %v3796_v37 }
0x11ab   : > { %v3802_v28 = vsub.f32 %v3790_v16, %v3800_v26 }
0x11ac   : > { %v3799_v30 = vpop.xlane.xlu1 %3798 }
0x11ad   : > { %v3801_v32 = vmul.f32 0.03125, %v3799_v30  ;;  %v3804_v33 = vmul.f32 %v3802_v28, %v3802_v28 }
0x11af   : > { %v3803_v42 = vsub.f32 %v3791_v24, %v3801_v32  ;;  %v3806_v18 = vsel %vm1063_vm0, %v3804_v33, 0.0 }
0x11b0   : > { %3807 = vadd.xlane.f32.xlu0 %v3806_v18 }
0x11b1   : > { %v3805_v34 = vmul.f32 %v3803_v42, %v3803_v42 }
0x11b3   : > { %v3809_v35 = vsel %vm1063_vm0, %v3805_v34, 0.0 }
0x11b4   : > { %3810 = vadd.xlane.f32.xlu1 %v3809_v35 }
0x1239   : > { %v3808_v36 = vpop.xlane.xlu0 %3807 }
0x123a   : > { %v3812_v31 = vmul.f32 0.032258064, %v3808_v36 }
0x123c   : > { %4678 = vrsqrt.f32 %v3812_v31  ;;  %vm3816_vm9 = vcmp.eq.f32.partialorder %v3812_v31, inf  ;;  %v3819_v41 = vand.u32 2147483648, %v3812_v31  ;;  %vm3818_vm10 = vcmp.eq.f32.partialorder %v3812_v31, 0.0 }
0x123d   : > { %v3811_v22 = vpop.xlane.xlu1 %3810 }
0x123e   : > { %v3813_v39 = vmul.f32 0.032258064, %v3811_v22 }
0x1240   : > { %4680 = vrsqrt.f32 %v3813_v39  ;;  %vm3823_vm11 = vcmp.eq.f32.partialorder %v3813_v39, inf  ;;  %v3826_v47 = vand.u32 2147483648, %v3813_v39  ;;  %vm3825_vm12 = vcmp.eq.f32.partialorder %v3813_v39, 0.0 }
0x1249   : > { %v4679_v38 = vpop.eup %4678 }
0x124a   : > { %v3815_v40 = vmul.f32 %v4679_v38, %v3812_v31 }
0x124c   : > { %v3817_v43 = vsel %vm3816_vm9, %v3812_v31, %v3815_v40 }
0x124d   : > { %v4681_v44 = vpop.eup %4680  ;;  %v3820_v0 = vsel %vm3818_vm10, %v3819_v41, %v3817_v43 }
0x124e   : > { %v3828_v46 = vadd.f32 1e-06, %v3820_v0  ;;  %v3822_v45 = vmul.f32 %v4681_v44, %v3813_v39 }
0x1250   : > { %4682 = vrcp.f32 %v3828_v46  ;;  %v3824_v48 = vsel %vm3823_vm11, %v3813_v39, %v3822_v45 }
0x1251   : > { %v3827_v49 = vsel %vm3825_vm12, %v3826_v47, %v3824_v48 }
0x1252   : > { %v3829_v50 = vadd.f32 1e-06, %v3827_v49 }
0x1254   : > { %4684 = vrcp.f32 %v3829_v50 }
0x125d   : > { %v4683_v51 = vpop.eup %4682 }
0x125e   : > { %v3840_v52 = vmul.f32 %v4683_v51, %v4092_v2 }
0x1260   : > { %v3842_v55 = vmul.f32 %v3840_v52, %v3802_v28 }
0x1261   : > { %v4685_v56 = vpop.eup %4684 }
0x1262   : > { %v3841_v57 = vmul.f32 %v4685_v56, %v4092_v2  ;;  %v3850_v54 = vadd.f32 %v4093_v53, %v3842_v55 }
0x1264   : > { %v3843_v29 = vmul.f32 %v3841_v57, %v3803_v42  ;;  %3852 = vst.msk [vmem:[%s1025_s3] sm:$0xff] %vm1063_vm0, %v3850_v54 }
0x1266   : > { %v3851_v58 = vadd.f32 %v4093_v53, %v3843_v29 }
0x1268   : > { %3853 = vst.msk [vmem:[%s1025_s3 + $0x8] sm:$0xff] %vm1063_vm0, %v3851_v58 }
0x1269   : > { %4725 = shalt.err (!%p4722_p2)
}
0x126a   : > { %s4726_s3 = scalar_lea.hbm %s5538_s8, 256  ;;  %s4730_s6 = scalar_lea.hbm %s4989_s12, 512 }
0x126b   : > { %p4727_p3 = scmp.ne.s32.totalorder %s5538_s8, %s4726_s3  ;;  %p4731_p8 = scmp.lt.s32.totalorder %s5538_s8, %s4989_s12 }
0x126c   : > { %p4732_p11 = scmp.lt.s32.totalorder %s4730_s6, %s4726_s3 }
0x126d   : > { %p4728_p4 = pnand %p4727_p3, %p5029_p5 }
0x126e   : > { %p4733_p9 = por %p4732_p11, %p4731_p8 }
0x126f   : > { %p4729_p7 = pneg %p4728_p4 }
0x1271   : > { %p4734_p10 = pnand %p4733_p9, %p4729_p7 }
0x1273   : > { %4737 = shalt.err (!%p4734_p10)
}
0x1274   : > { %s4820_s10 = smov 128  }
0x1275   : > { %4479 = dma.vmem_to_hbm [thread:$0]  (%p5029_p5), %s5540_s4, 256, %s5538_s8, %s5543_s9, %s4820_s10, %s4820_s10, %s5644_s5  }
0x1276 PF: > { %p4491_p12 = scmp.ge.s32.totalorder %s4776_s7, 2  ;;  %s3883_s0 = sand.u32 1, %s4764_s28  }
0x1277   : > { %s3884_s16 = scalar_lea.sflag [#allocation5], %s3883_s0 }
0x1278   : > { %p4486_p13 = pnand %p4491_p12, %p5033_p6 }
0x127a   : > { %p4487_p0 = pneg %p4486_p13 }
0x127c   : > { %4759 = dma.done.wait (%p4487_p0), %s3884_s16, 256  }
0x127d   : > { %4761 = vsyncadd (%p4487_p0), %s3884_s16, 4294967040  ;;  %s5654_s22 = sld [smem:[#allocation30_spill]]  ;;  %p76_p1 = scmp.ge.s32.totalorder %s5016_s11, 4  }
0x127e   : > { %s5655_s28 = smov %s4768_s1  ;;  %s5656_s1 = smov %s4772_s2 }
0x127f   : > { %s5658_s7 = smov %s5016_s11  ;;  %78 = sbr.rel (!%p76_p1) target bundleno = 65 (0x41), region = 226 }
0x1283   : > { %s5657_s2 = smov %s5654_s22 }
0x1284   :  { %3889 = vsyncpa [#allocation4], 1 }
0x1285   :  { %3891 = vsyncpa [#allocation4 + $0x1], 1 }
0x1286   :  { %3892 = vsyncpa [#allocation5], 1 }
0x1287   :  { %3894 = vsyncpa [#allocation5 + $0x1], 1 }

</bundles_post_ra>
